<compile_context>
chip_gen: v7x
topology: tpu7x:2x2x1
jax: 0.10.0
libtpu: 0.0.40
codegen_flags: <defaults>
</compile_context>

<pallas_src>
import functools

import jax
import jax.numpy as jnp
from jax.experimental import pallas as pl
from jax.experimental.pallas import tpu as pltpu

EPS = 1e-5       # nn.BatchNorm2d default
LANE = 128


def _round_up(x, m):
    return (x + m - 1) // m * m


@functools.lru_cache(maxsize=None)
def _vmem_limit_bytes():
    # ~70% of physical VMEM (~90 MiB on v5e/v6e, ~45 MiB on v7x); fallback is
    # safe everywhere since actual usage at these tile sizes is small.
    try:
        return int(pltpu.get_tpu_info().vmem_capacity_bytes * 0.7)
    except Exception:
        return 48 * 1024 * 1024


def _pick_row_tile(h, w, max_rows=1024):
    """Largest divisor th of H with th*W <= max_rows.

    th | H keeps the tiling exact: no padded M rows, so BatchNorm statistics
    divide by the true element count.  Prefer tiles whose row count is a
    sublane multiple.
    """
    divs = [d for d in range(1, h + 1) if h % d == 0 and d * w <= max_rows]
    if not divs:
        return 1
    aligned = [d for d in divs if (d * w) % 8 == 0 or d == h]
    return max(aligned) if aligned else max(divs)


def _pick_flat_tile(m, cap_rows=2048):
    """Largest divisor of M <= cap_rows for the streaming BN-ReLU pass."""
    cap = min(m, cap_rows)
    best = None
    for d in range(cap, 0, -1):
        if m % d == 0:
            if d == m or d % 8 == 0:
                return d
            if best is None:
                best = d
    return best if best is not None else m


# ---------------------------------------------------------------------------
# Pass A: 3x3 "same" conv with in-kernel im2col + per-tile BN partial stats
# ---------------------------------------------------------------------------
def _conv3x3_stats_kernel(xp_ref, w_ref, y_ref, st_ref):
    """One (image n, row-tile i) grid step.

    xp_ref: (H+2, W+2, C)  bf16  zero-padded input image, resident per n
    w_ref : (9, C, Cp)     bf16  tap-major (ky, kx) weight slabs
    y_ref : (th*W, Cp)     bf16  raw (pre-BN) conv output rows of this tile
    st_ref: (8, Cp)        f32   row 0 = sum(conv), row 1 = sum(conv^2)
    """
    th_w, cp = y_ref.shape
    _, wp, c = xp_ref.shape
    w_out = wp - 2
    th = th_w // w_out
    r0 = pl.program_id(1) * th          # first padded input row of this tile

    # In-kernel im2col: 9 shifted VMEM windows -> (th*W, C) patch slabs.
    taps = []
    for ky in range(3):
        for kx in range(3):
            win = xp_ref[pl.ds(r0 + ky, th), pl.ds(kx, w_out), :]
            taps.append(win.reshape(th_w, c))

    if c % LANE == 0:
        # Lane-aligned channels: build full-K patch rows and issue one matmul
        # (K = 9*C keeps the 2x256^2 MXUs on v6e/v7x full).
        patch = jnp.concatenate(taps, axis=-1)                     # (th*W, 9C)
        w_full = w_ref[...].reshape(9 * c, cp)
        acc = jnp.dot(patch, w_full, preferred_element_type=jnp.float32)
    else:
        # Tiny / unaligned C (first layer): 9 accumulated short-K matmuls,
        # avoiding unaligned lane concatenation of narrow slabs.
        acc = jnp.dot(taps[0], w_ref[0], preferred_element_type=jnp.float32)
        for t in range(1, 9):
            acc = acc + jnp.dot(taps[t], w_ref[t],
                                preferred_element_type=jnp.float32)

    y_ref[...] = acc.astype(y_ref.dtype)     # bf16 writeback (halves traffic)

    # Per-tile, per-channel partial BatchNorm statistics from the f32 acc.
    # TODO(synk): if a bundle dump shows this square+reduce binding VALU/XLU
    # after the memory fixes, fold it into extra MXU columns instead.
    st_ref[...] = jnp.zeros_like(st_ref)
    st_ref[0:1, :] = jnp.sum(acc, axis=0, keepdims=True)
    st_ref[1:2, :] = jnp.sum(acc * acc, axis=0, keepdims=True)


def _conv_stats_pass(xp, w_taps, th):
    n, hp, wp, c = xp.shape
    h, w = hp - 2, wp - 2
    _, _, cp = w_taps.shape
    num_i = h // th

    return pl.pallas_call(
        _conv3x3_stats_kernel,
        out_shape=(
            jax.ShapeDtypeStruct((n, h * w, cp), jnp.bfloat16),
            jax.ShapeDtypeStruct((n, num_i, 8, cp), jnp.float32),
        ),
        grid=(n, num_i),
        in_specs=[
            # Whole padded image, resident across the row-tile axis (index_map
            # ignores i -> DMA'd once per image).
            # TODO(synk): for very large H*W switch to haloed row blocks via
            # manual double-buffered DMA instead of a full resident image.
            pl.BlockSpec((None, hp, wp, c), lambda ni, i: (ni, 0, 0, 0)),
            # Weights: constant index -> fetched once, stays resident.
            # TODO(synk): for very large Cout, tile Cp (or single-buffer with
            # pl.Buffered(1)) to reclaim the idle second weight buffer.
            pl.BlockSpec((9, c, cp), lambda ni, i: (0, 0, 0)),
        ],
        out_specs=(
            pl.BlockSpec((None, th * w, cp), lambda ni, i: (ni, i, 0)),
            pl.BlockSpec((None, None, 8, cp), lambda ni, i: (ni, i, 0, 0)),
        ),
        compiler_params=pltpu.CompilerParams(
            # Per-tile partial stats -> no resident accumulator -> every grid
            # axis is parallel (v7x dual-TC on the heavy pass).
            dimension_semantics=("parallel", "parallel"),
            vmem_limit_bytes=_vmem_limit_bytes()),
        cost_estimate=pl.CostEstimate(
            flops=2 * n * h * w * 9 * c * cp,
            transcendentals=0,
            bytes_accessed=(n * hp * wp * c * 2 + 9 * c * cp * 2
                            + n * h * w * cp * 2 + n * num_i * 8 * cp * 4)),
    )(xp, w_taps)


# ---------------------------------------------------------------------------
# Pass B: y = relu(x * scale + shift), streaming, lane-dense tiles
# ---------------------------------------------------------------------------
def _bn_relu_kernel(x_ref, sc_ref, sh_ref, o_ref):
    x = x_ref[...].astype(jnp.float32)          # f32 math (v5e: no bf16 VPU)
    y = x * sc_ref[...] + sh_ref[...]
    o_ref[...] = jnp.maximum(y, 0.0).astype(o_ref.dtype)


def _bn_relu_pass(x_flat, scale, shift, out_dtype, tm):
    m, cp = x_flat.shape
    return pl.pallas_call(
        _bn_relu_kernel,
        out_shape=jax.ShapeDtypeStruct((m, cp), out_dtype),
        grid=(m // tm,),
        in_specs=[
            pl.BlockSpec((tm, cp), lambda i: (i, 0)),
            pl.BlockSpec((1, cp), lambda i: (0, 0)),
            pl.BlockSpec((1, cp), lambda i: (0, 0)),
        ],
        out_specs=pl.BlockSpec((tm, cp), lambda i: (i, 0)),
        compiler_params=pltpu.CompilerParams(
            dimension_semantics=("parallel",),
            vmem_limit_bytes=_vmem_limit_bytes()),
    )(x_flat, scale, shift)


# ---------------------------------------------------------------------------
# One stage: Conv3x3 (pad=1, no bias) + BatchNorm2d (training stats) + ReLU
# ---------------------------------------------------------------------------
def _conv_bn_relu_stage(x_nhwc, w_oihw, gamma, beta, out_dtype):
    """x_nhwc: (N, H, W, Ct) bf16; channels beyond the real Cin are zeros.

    Returns (N, H, W, Cp) with Cp = round_up(Cout, 128); extra channels are 0.
    """
    n, h, w, ct = x_nhwc.shape
    cout, cin = w_oihw.shape[0], w_oihw.shape[1]
    cp = _round_up(cout, LANE)

    # Single spatial zero-pad copy of the bf16 activation (the 9x im2col
    # expansion now happens in VMEM inside the kernel).
    xp = jnp.pad(x_nhwc, ((0, 0), (1, 1), (1, 1), (0, 0)))

    # (Cout, Cin, 3, 3) -> (9, Ct, Cp) tap-major; zero rows/cols for padded
    # input / output channels.
    w_taps = jnp.zeros((3, 3, ct, cp), jnp.float32)
    w_taps = w_taps.at[:, :, :cin, :cout].set(
        jnp.transpose(w_oihw, (2, 3, 1, 0)))
    w_taps = w_taps.reshape(9, ct, cp).astype(jnp.bfloat16)

    th = _pick_row_tile(h, w)
    conv_raw, stats = _conv_stats_pass(xp, w_taps, th)

    # Fold global batch statistics + affine params into one per-channel
    # scale/shift (tiny (1, Cp) f32 arrays, computed once outside the tiles).
    m = n * h * w
    ch_sum = jnp.sum(stats[:, :, 0, :], axis=(0, 1))
    ch_ssq = jnp.sum(stats[:, :, 1, :], axis=(0, 1))
    mean = ch_sum / m
    var = jnp.maximum(ch_ssq / m - mean * mean, 0.0)    # biased (training) var
    # TODO(synk): E[x^2]-E[x]^2 can cancel when |mean| >> std at very large M;
    # switch to mean-shifted per-tile accumulation if that regime matters.
    g = jnp.zeros((cp,), jnp.float32).at[:cout].set(gamma)
    b = jnp.zeros((cp,), jnp.float32).at[:cout].set(beta)
    scale = g * jax.lax.rsqrt(var + EPS)
    shift = b - mean * scale

    tm = _pick_flat_tile(m)
    y = _bn_relu_pass(conv_raw.reshape(m, cp), scale.reshape(1, cp),
                      shift.reshape(1, cp), out_dtype, tm)
    return y.reshape(n, h, w, cp)


@jax.jit
def double_conv(x_nchw, params):
    w1, g1, b1, w2, g2, b2 = params
    cout = w1.shape[0]

    x = jnp.transpose(x_nchw, (0, 2, 3, 1)).astype(jnp.bfloat16)   # NCHW->NHWC

    # Stage 1 (bf16 activation, lane-padded channels handed straight to 2).
    a1 = _conv_bn_relu_stage(x, w1, g1, b1, jnp.bfloat16)
    # TODO(synk): fusing stage-1's scale/shift+ReLU into stage-2's patch build
    # would save one (M, Cp) bf16 round trip, but needs per-core-safe scratch
    # init under megacore "parallel" splitting; kept as a streaming pass.
    y = _conv_bn_relu_stage(a1, w2, g2, b2, jnp.float32)

    return jnp.transpose(y[:, :, :, :cout], (0, 3, 1, 2))          # -> NCHW


# ---------------------------------------------------------------------------
# Pure-JAX reference (same math via lax.conv) for a correctness check
# ---------------------------------------------------------------------------
def _reference(x, params):
    w1, g1, b1, w2, g2, b2 = params

    def conv(x, w):
        return jax.lax.conv_general_dilated(
            x, w, (1, 1), ((1, 1), (1, 1)),
            dimension_numbers=("NCHW", "OIHW", "NCHW"),
            precision=jax.lax.Precision.HIGHEST)

    def bn(x, g, b):
        mean = jnp.mean(x, axis=(0, 2, 3), keepdims=True)
        var = jnp.mean((x - mean) ** 2, axis=(0, 2, 3), keepdims=True)
        xn = (x - mean) * jax.lax.rsqrt(var + EPS)
        return xn * g.reshape(1, -1, 1, 1) + b.reshape(1, -1, 1, 1)

    h = jax.nn.relu(bn(conv(x, w1), g1, b1))
    return jax.nn.relu(bn(conv(h, w2), g2, b2))


if __name__ == "__main__":
    N, Cin, Cout, H, W = 2, 4, 8, 16, 16

    key = jax.random.PRNGKey(0)
    kx_, kw1, kw2 = jax.random.split(key, 3)
    x = jax.random.normal(kx_, (N, Cin, H, W), jnp.float32)

    # Deterministic synthetic parameters (shapes as nn.Conv2d / nn.BatchNorm2d)
    w1 = 0.1 * jax.random.normal(kw1, (Cout, Cin, 3, 3), jnp.float32)
    w2 = 0.1 * jax.random.normal(kw2, (Cout, Cout, 3, 3), jnp.float32)
    g1 = jnp.ones((Cout,), jnp.float32)    # BatchNorm gamma init
    b1 = jnp.zeros((Cout,), jnp.float32)   # BatchNorm beta init
    g2 = jnp.ones((Cout,), jnp.float32)
    b2 = jnp.zeros((Cout,), jnp.float32)
    params = (w1, g1, b1, w2, g2, b2)

    out = jax.block_until_ready(double_conv(x, params))
    ref = jax.block_until_ready(_reference(x, params))

    assert out.shape == (N, Cout, H, W), out.shape
    max_err = float(jnp.max(jnp.abs(out - ref)))
    assert jnp.allclose(out, ref, atol=3e-2, rtol=3e-2), max_err
    print("KERNEL_OK")
</pallas_src>

<mosaic_0001>
module attributes {stable_mosaic.version = 11 : i64} {
  func.func @_conv3x3_stats_kernel(%arg0: i32, %arg1: i32, %arg2: memref<1x18x18x4xbf16, #tpu.memory_space<vmem>>, %arg3: memref<9x4x128xbf16, #tpu.memory_space<vmem>>, %arg4: memref<1x256x128xbf16, #tpu.memory_space<vmem>>, %arg5: memref<1x1x8x128xf32, #tpu.memory_space<vmem>>) attributes {dimension_semantics = [#tpu.dimension_semantics<parallel>, #tpu.dimension_semantics<parallel>], iteration_bounds = array<i64: 2, 1>, scalar_prefetch = 0 : i64, scratch_operands = 0 : i64, tpu.core_type = #tpu.core_type<tc>, window_params = [{transform_indices = @transform_0, window_bounds = array<i64: 1, 18, 18, 4>}, {pipeline_mode = #tpu.pipeline_mode<synchronous>, transform_indices = @transform_1, window_bounds = array<i64: 9, 4, 128>}, {transform_indices = @transform_2, window_bounds = array<i64: 1, 256, 128>}, {transform_indices = @transform_3, window_bounds = array<i64: 1, 1, 8, 128>}]} {
    %c16_i32 = arith.constant 16 : i32
    %0 = arith.muli %arg1, %c16_i32 : i32
    %c0_i32 = arith.constant 0 : i32
    %1 = arith.addi %0, %c0_i32 : i32
    %c0 = arith.constant 0 : index
    %2 = arith.index_cast %1 : i32 to index
    %c0_0 = arith.constant 0 : index
    %c0_1 = arith.constant 0 : index
    %3 = vector.load %arg2[%c0, %2, %c0_0, %c0_1] : memref<1x18x18x4xbf16, #tpu.memory_space<vmem>>, vector<1x16x16x4xbf16>
    %4 = vector.shape_cast %3 : vector<1x16x16x4xbf16> to vector<16x16x4xbf16>
    %5 = vector.shape_cast %4 : vector<16x16x4xbf16> to vector<256x4xbf16>
    %c0_i32_2 = arith.constant 0 : i32
    %6 = arith.addi %0, %c0_i32_2 : i32
    %c0_3 = arith.constant 0 : index
    %7 = arith.index_cast %6 : i32 to index
    %c1 = arith.constant 1 : index
    %c0_4 = arith.constant 0 : index
    %8 = vector.load %arg2[%c0_3, %7, %c1, %c0_4] : memref<1x18x18x4xbf16, #tpu.memory_space<vmem>>, vector<1x16x16x4xbf16>
    %9 = vector.shape_cast %8 : vector<1x16x16x4xbf16> to vector<16x16x4xbf16>
    %10 = vector.shape_cast %9 : vector<16x16x4xbf16> to vector<256x4xbf16>
    %c0_i32_5 = arith.constant 0 : i32
    %11 = arith.addi %0, %c0_i32_5 : i32
    %c0_6 = arith.constant 0 : index
    %12 = arith.index_cast %11 : i32 to index
    %c2 = arith.constant 2 : index
    %c0_7 = arith.constant 0 : index
    %13 = vector.load %arg2[%c0_6, %12, %c2, %c0_7] : memref<1x18x18x4xbf16, #tpu.memory_space<vmem>>, vector<1x16x16x4xbf16>
    %14 = vector.shape_cast %13 : vector<1x16x16x4xbf16> to vector<16x16x4xbf16>
    %15 = vector.shape_cast %14 : vector<16x16x4xbf16> to vector<256x4xbf16>
    %c1_i32 = arith.constant 1 : i32
    %16 = arith.addi %0, %c1_i32 : i32
    %c0_8 = arith.constant 0 : index
    %17 = arith.index_cast %16 : i32 to index
    %c0_9 = arith.constant 0 : index
    %c0_10 = arith.constant 0 : index
    %18 = vector.load %arg2[%c0_8, %17, %c0_9, %c0_10] : memref<1x18x18x4xbf16, #tpu.memory_space<vmem>>, vector<1x16x16x4xbf16>
    %19 = vector.shape_cast %18 : vector<1x16x16x4xbf16> to vector<16x16x4xbf16>
    %20 = vector.shape_cast %19 : vector<16x16x4xbf16> to vector<256x4xbf16>
    %c1_i32_11 = arith.constant 1 : i32
    %21 = arith.addi %0, %c1_i32_11 : i32
    %c0_12 = arith.constant 0 : index
    %22 = arith.index_cast %21 : i32 to index
    %c1_13 = arith.constant 1 : index
    %c0_14 = arith.constant 0 : index
    %23 = vector.load %arg2[%c0_12, %22, %c1_13, %c0_14] : memref<1x18x18x4xbf16, #tpu.memory_space<vmem>>, vector<1x16x16x4xbf16>
    %24 = vector.shape_cast %23 : vector<1x16x16x4xbf16> to vector<16x16x4xbf16>
    %25 = vector.shape_cast %24 : vector<16x16x4xbf16> to vector<256x4xbf16>
    %c1_i32_15 = arith.constant 1 : i32
    %26 = arith.addi %0, %c1_i32_15 : i32
    %c0_16 = arith.constant 0 : index
    %27 = arith.index_cast %26 : i32 to index
    %c2_17 = arith.constant 2 : index
    %c0_18 = arith.constant 0 : index
    %28 = vector.load %arg2[%c0_16, %27, %c2_17, %c0_18] : memref<1x18x18x4xbf16, #tpu.memory_space<vmem>>, vector<1x16x16x4xbf16>
    %29 = vector.shape_cast %28 : vector<1x16x16x4xbf16> to vector<16x16x4xbf16>
    %30 = vector.shape_cast %29 : vector<16x16x4xbf16> to vector<256x4xbf16>
    %c2_i32 = arith.constant 2 : i32
    %31 = arith.addi %0, %c2_i32 : i32
    %c0_19 = arith.constant 0 : index
    %32 = arith.index_cast %31 : i32 to index
    %c0_20 = arith.constant 0 : index
    %c0_21 = arith.constant 0 : index
    %33 = vector.load %arg2[%c0_19, %32, %c0_20, %c0_21] : memref<1x18x18x4xbf16, #tpu.memory_space<vmem>>, vector<1x16x16x4xbf16>
    %34 = vector.shape_cast %33 : vector<1x16x16x4xbf16> to vector<16x16x4xbf16>
    %35 = vector.shape_cast %34 : vector<16x16x4xbf16> to vector<256x4xbf16>
    %c2_i32_22 = arith.constant 2 : i32
    %36 = arith.addi %0, %c2_i32_22 : i32
    %c0_23 = arith.constant 0 : index
    %37 = arith.index_cast %36 : i32 to index
    %c1_24 = arith.constant 1 : index
    %c0_25 = arith.constant 0 : index
    %38 = vector.load %arg2[%c0_23, %37, %c1_24, %c0_25] : memref<1x18x18x4xbf16, #tpu.memory_space<vmem>>, vector<1x16x16x4xbf16>
    %39 = vector.shape_cast %38 : vector<1x16x16x4xbf16> to vector<16x16x4xbf16>
    %40 = vector.shape_cast %39 : vector<16x16x4xbf16> to vector<256x4xbf16>
    %c2_i32_26 = arith.constant 2 : i32
    %41 = arith.addi %0, %c2_i32_26 : i32
    %c0_27 = arith.constant 0 : index
    %42 = arith.index_cast %41 : i32 to index
    %c2_28 = arith.constant 2 : index
    %c0_29 = arith.constant 0 : index
    %43 = vector.load %arg2[%c0_27, %42, %c2_28, %c0_29] : memref<1x18x18x4xbf16, #tpu.memory_space<vmem>>, vector<1x16x16x4xbf16>
    %44 = vector.shape_cast %43 : vector<1x16x16x4xbf16> to vector<16x16x4xbf16>
    %45 = vector.shape_cast %44 : vector<16x16x4xbf16> to vector<256x4xbf16>
    %c0_30 = arith.constant 0 : index
    %c0_31 = arith.constant 0 : index
    %c0_32 = arith.constant 0 : index
    %46 = vector.load %arg3[%c0_30, %c0_31, %c0_32] : memref<9x4x128xbf16, #tpu.memory_space<vmem>>, vector<1x4x128xbf16>
    %47 = vector.shape_cast %46 : vector<1x4x128xbf16> to vector<4x128xbf16>
    %cst = arith.constant dense<0.000000e+00> : vector<256x128xf32>
    %48 = tpu.matmul %5, %47, %cst {dimension_numbers = #tpu.dot_dimension_numbers<[1], [0], [0], [1], [0, 0, 1, 1], [], []>} : vector<256x4xbf16>, vector<4x128xbf16>, vector<256x128xf32> -> vector<256x128xf32>
    %c1_33 = arith.constant 1 : index
    %c0_34 = arith.constant 0 : index
    %c0_35 = arith.constant 0 : index
    %49 = vector.load %arg3[%c1_33, %c0_34, %c0_35] : memref<9x4x128xbf16, #tpu.memory_space<vmem>>, vector<1x4x128xbf16>
    %50 = vector.shape_cast %49 : vector<1x4x128xbf16> to vector<4x128xbf16>
    %cst_36 = arith.constant dense<0.000000e+00> : vector<256x128xf32>
    %51 = tpu.matmul %10, %50, %cst_36 {dimension_numbers = #tpu.dot_dimension_numbers<[1], [0], [0], [1], [0, 0, 1, 1], [], []>} : vector<256x4xbf16>, vector<4x128xbf16>, vector<256x128xf32> -> vector<256x128xf32>
    %52 = arith.addf %48, %51 : vector<256x128xf32>
    %c2_37 = arith.constant 2 : index
    %c0_38 = arith.constant 0 : index
    %c0_39 = arith.constant 0 : index
    %53 = vector.load %arg3[%c2_37, %c0_38, %c0_39] : memref<9x4x128xbf16, #tpu.memory_space<vmem>>, vector<1x4x128xbf16>
    %54 = vector.shape_cast %53 : vector<1x4x128xbf16> to vector<4x128xbf16>
    %cst_40 = arith.constant dense<0.000000e+00> : vector<256x128xf32>
    %55 = tpu.matmul %15, %54, %cst_40 {dimension_numbers = #tpu.dot_dimension_numbers<[1], [0], [0], [1], [0, 0, 1, 1], [], []>} : vector<256x4xbf16>, vector<4x128xbf16>, vector<256x128xf32> -> vector<256x128xf32>
    %56 = arith.addf %52, %55 : vector<256x128xf32>
    %c3 = arith.constant 3 : index
    %c0_41 = arith.constant 0 : index
    %c0_42 = arith.constant 0 : index
    %57 = vector.load %arg3[%c3, %c0_41, %c0_42] : memref<9x4x128xbf16, #tpu.memory_space<vmem>>, vector<1x4x128xbf16>
    %58 = vector.shape_cast %57 : vector<1x4x128xbf16> to vector<4x128xbf16>
    %cst_43 = arith.constant dense<0.000000e+00> : vector<256x128xf32>
    %59 = tpu.matmul %20, %58, %cst_43 {dimension_numbers = #tpu.dot_dimension_numbers<[1], [0], [0], [1], [0, 0, 1, 1], [], []>} : vector<256x4xbf16>, vector<4x128xbf16>, vector<256x128xf32> -> vector<256x128xf32>
    %60 = arith.addf %56, %59 : vector<256x128xf32>
    %c4 = arith.constant 4 : index
    %c0_44 = arith.constant 0 : index
    %c0_45 = arith.constant 0 : index
    %61 = vector.load %arg3[%c4, %c0_44, %c0_45] : memref<9x4x128xbf16, #tpu.memory_space<vmem>>, vector<1x4x128xbf16>
    %62 = vector.shape_cast %61 : vector<1x4x128xbf16> to vector<4x128xbf16>
    %cst_46 = arith.constant dense<0.000000e+00> : vector<256x128xf32>
    %63 = tpu.matmul %25, %62, %cst_46 {dimension_numbers = #tpu.dot_dimension_numbers<[1], [0], [0], [1], [0, 0, 1, 1], [], []>} : vector<256x4xbf16>, vector<4x128xbf16>, vector<256x128xf32> -> vector<256x128xf32>
    %64 = arith.addf %60, %63 : vector<256x128xf32>
    %c5 = arith.constant 5 : index
    %c0_47 = arith.constant 0 : index
    %c0_48 = arith.constant 0 : index
    %65 = vector.load %arg3[%c5, %c0_47, %c0_48] : memref<9x4x128xbf16, #tpu.memory_space<vmem>>, vector<1x4x128xbf16>
    %66 = vector.shape_cast %65 : vector<1x4x128xbf16> to vector<4x128xbf16>
    %cst_49 = arith.constant dense<0.000000e+00> : vector<256x128xf32>
    %67 = tpu.matmul %30, %66, %cst_49 {dimension_numbers = #tpu.dot_dimension_numbers<[1], [0], [0], [1], [0, 0, 1, 1], [], []>} : vector<256x4xbf16>, vector<4x128xbf16>, vector<256x128xf32> -> vector<256x128xf32>
    %68 = arith.addf %64, %67 : vector<256x128xf32>
    %c6 = arith.constant 6 : index
    %c0_50 = arith.constant 0 : index
    %c0_51 = arith.constant 0 : index
    %69 = vector.load %arg3[%c6, %c0_50, %c0_51] : memref<9x4x128xbf16, #tpu.memory_space<vmem>>, vector<1x4x128xbf16>
    %70 = vector.shape_cast %69 : vector<1x4x128xbf16> to vector<4x128xbf16>
    %cst_52 = arith.constant dense<0.000000e+00> : vector<256x128xf32>
    %71 = tpu.matmul %35, %70, %cst_52 {dimension_numbers = #tpu.dot_dimension_numbers<[1], [0], [0], [1], [0, 0, 1, 1], [], []>} : vector<256x4xbf16>, vector<4x128xbf16>, vector<256x128xf32> -> vector<256x128xf32>
    %72 = arith.addf %68, %71 : vector<256x128xf32>
    %c7 = arith.constant 7 : index
    %c0_53 = arith.constant 0 : index
    %c0_54 = arith.constant 0 : index
    %73 = vector.load %arg3[%c7, %c0_53, %c0_54] : memref<9x4x128xbf16, #tpu.memory_space<vmem>>, vector<1x4x128xbf16>
    %74 = vector.shape_cast %73 : vector<1x4x128xbf16> to vector<4x128xbf16>
    %cst_55 = arith.constant dense<0.000000e+00> : vector<256x128xf32>
    %75 = tpu.matmul %40, %74, %cst_55 {dimension_numbers = #tpu.dot_dimension_numbers<[1], [0], [0], [1], [0, 0, 1, 1], [], []>} : vector<256x4xbf16>, vector<4x128xbf16>, vector<256x128xf32> -> vector<256x128xf32>
    %76 = arith.addf %72, %75 : vector<256x128xf32>
    %c8 = arith.constant 8 : index
    %c0_56 = arith.constant 0 : index
    %c0_57 = arith.constant 0 : index
    %77 = vector.load %arg3[%c8, %c0_56, %c0_57] : memref<9x4x128xbf16, #tpu.memory_space<vmem>>, vector<1x4x128xbf16>
    %78 = vector.shape_cast %77 : vector<1x4x128xbf16> to vector<4x128xbf16>
    %cst_58 = arith.constant dense<0.000000e+00> : vector<256x128xf32>
    %79 = tpu.matmul %45, %78, %cst_58 {dimension_numbers = #tpu.dot_dimension_numbers<[1], [0], [0], [1], [0, 0, 1, 1], [], []>} : vector<256x4xbf16>, vector<4x128xbf16>, vector<256x128xf32> -> vector<256x128xf32>
    %80 = arith.addf %76, %79 : vector<256x128xf32>
    %81 = arith.truncf %80 : vector<256x128xf32> to vector<256x128xbf16>
    %c0_59 = arith.constant 0 : index
    %c0_60 = arith.constant 0 : index
    %c0_61 = arith.constant 0 : index
    %82 = vector.load %arg4[%c0_59, %c0_60, %c0_61] : memref<1x256x128xbf16, #tpu.memory_space<vmem>>, vector<1x256x128xbf16>
    %83 = vector.shape_cast %82 : vector<1x256x128xbf16> to vector<256x128xbf16>
    %84 = vector.shape_cast %81 : vector<256x128xbf16> to vector<1x256x128xbf16>
    tpu.vector_store %arg4[%c0_59, %c0_60, %c0_61], %84 {strides = array<i32>} : memref<1x256x128xbf16, #tpu.memory_space<vmem>>, vector<1x256x128xbf16>,
    %cst_62 = arith.constant 0.000000e+00 : f32
    %85 = vector.broadcast %cst_62 : f32 to vector<8x128xf32>
    %c0_63 = arith.constant 0 : index
    %c0_64 = arith.constant 0 : index
    %c0_65 = arith.constant 0 : index
    %c0_66 = arith.constant 0 : index
    %86 = vector.load %arg5[%c0_63, %c0_64, %c0_65, %c0_66] : memref<1x1x8x128xf32, #tpu.memory_space<vmem>>, vector<1x1x8x128xf32>
    %87 = vector.shape_cast %86 : vector<1x1x8x128xf32> to vector<8x128xf32>
    %88 = vector.shape_cast %85 : vector<8x128xf32> to vector<1x1x8x128xf32>
    tpu.vector_store %arg5[%c0_63, %c0_64, %c0_65, %c0_66], %88 {strides = array<i32>} : memref<1x1x8x128xf32, #tpu.memory_space<vmem>>, vector<1x1x8x128xf32>,
    %cst_67 = arith.constant dense<0.000000e+00> : vector<128xf32>
    %89 = vector.multi_reduction <add>, %80, %cst_67 [0] : vector<256x128xf32> to vector<128xf32>
    %90 = vector.shape_cast %89 : vector<128xf32> to vector<1x128xf32>
    %c0_68 = arith.constant 0 : index
    %c0_69 = arith.constant 0 : index
    %c0_70 = arith.constant 0 : index
    %c0_71 = arith.constant 0 : index
    %91 = vector.load %arg5[%c0_68, %c0_69, %c0_70, %c0_71] : memref<1x1x8x128xf32, #tpu.memory_space<vmem>>, vector<1x1x1x128xf32>
    %92 = vector.shape_cast %91 : vector<1x1x1x128xf32> to vector<1x128xf32>
    %93 = vector.shape_cast %90 : vector<1x128xf32> to vector<1x1x1x128xf32>
    tpu.vector_store %arg5[%c0_68, %c0_69, %c0_70, %c0_71], %93 {strides = array<i32>} : memref<1x1x8x128xf32, #tpu.memory_space<vmem>>, vector<1x1x1x128xf32>,
    %94 = arith.mulf %80, %80 : vector<256x128xf32>
    %cst_72 = arith.constant dense<0.000000e+00> : vector<128xf32>
    %95 = vector.multi_reduction <add>, %94, %cst_72 [0] : vector<256x128xf32> to vector<128xf32>
    %96 = vector.shape_cast %95 : vector<128xf32> to vector<1x128xf32>
    %c0_73 = arith.constant 0 : index
    %c0_74 = arith.constant 0 : index
    %c1_75 = arith.constant 1 : index
    %c0_76 = arith.constant 0 : index
    %97 = vector.load %arg5[%c0_73, %c0_74, %c1_75, %c0_76] : memref<1x1x8x128xf32, #tpu.memory_space<vmem>>, vector<1x1x1x128xf32>
    %98 = vector.shape_cast %97 : vector<1x1x1x128xf32> to vector<1x128xf32>
    %99 = vector.shape_cast %96 : vector<1x128xf32> to vector<1x1x1x128xf32>
    tpu.vector_store %arg5[%c0_73, %c0_74, %c1_75, %c0_76], %99 {strides = array<i32>} : memref<1x1x8x128xf32, #tpu.memory_space<vmem>>, vector<1x1x1x128xf32>,
    return
  }
  func.func @transform_0(%arg0: i32, %arg1: i32) -> (i32, i32, i32, i32) {
    %c0_i32 = arith.constant 0 : i32
    %c0_i32_0 = arith.constant 0 : i32
    %c0_i32_1 = arith.constant 0 : i32
    %c0_i32_2 = arith.constant 0 : i32
    return %arg0, %c0_i32, %c0_i32_0, %c0_i32_1 : i32, i32, i32, i32
  }
  func.func @transform_1(%arg0: i32, %arg1: i32) -> (i32, i32, i32) {
    %c0_i32 = arith.constant 0 : i32
    %c0_i32_0 = arith.constant 0 : i32
    %c0_i32_1 = arith.constant 0 : i32
    %c0_i32_2 = arith.constant 0 : i32
    return %c0_i32, %c0_i32_0, %c0_i32_1 : i32, i32, i32
  }
  func.func @transform_2(%arg0: i32, %arg1: i32) -> (i32, i32, i32) {
    %c0_i32 = arith.constant 0 : i32
    %c0_i32_0 = arith.constant 0 : i32
    return %arg0, %arg1, %c0_i32 : i32, i32, i32
  }
  func.func @transform_3(%arg0: i32, %arg1: i32) -> (i32, i32, i32, i32) {
    %c0_i32 = arith.constant 0 : i32
    %c0_i32_0 = arith.constant 0 : i32
    %c0_i32_1 = arith.constant 0 : i32
    return %arg0, %arg1, %c0_i32, %c0_i32_0 : i32, i32, i32, i32
  }
}

module attributes {stable_mosaic.version = 11 : i64} {
  func.func @_bn_relu_kernel(%arg0: i32, %arg1: memref<512x128xbf16, #tpu.memory_space<vmem>>, %arg2: memref<1x128xf32, #tpu.memory_space<vmem>>, %arg3: memref<1x128xf32, #tpu.memory_space<vmem>>, %arg4: memref<512x128xbf16, #tpu.memory_space<vmem>>) attributes {dimension_semantics = [#tpu.dimension_semantics<parallel>], iteration_bounds = array<i64: 1>, scalar_prefetch = 0 : i64, scratch_operands = 0 : i64, tpu.core_type = #tpu.core_type<tc>, window_params = [{transform_indices = @transform_0, window_bounds = array<i64: 512, 128>}, {pipeline_mode = #tpu.pipeline_mode<synchronous>, transform_indices = @transform_1, window_bounds = array<i64: 1, 128>}, {pipeline_mode = #tpu.pipeline_mode<synchronous>, transform_indices = @transform_2, window_bounds = array<i64: 1, 128>}, {transform_indices = @transform_3, window_bounds = array<i64: 512, 128>}]} {
    %c0 = arith.constant 0 : index
    %c0_0 = arith.constant 0 : index
    %0 = vector.load %arg1[%c0, %c0_0] : memref<512x128xbf16, #tpu.memory_space<vmem>>, vector<512x128xbf16>
    %1 = arith.extf %0 : vector<512x128xbf16> to vector<512x128xf32>
    %c0_1 = arith.constant 0 : index
    %c0_2 = arith.constant 0 : index
    %2 = vector.load %arg2[%c0_1, %c0_2] : memref<1x128xf32, #tpu.memory_space<vmem>>, vector<1x128xf32>
    %3 = vector.broadcast %2 : vector<1x128xf32> to vector<512x128xf32>
    %4 = arith.mulf %1, %3 : vector<512x128xf32>
    %c0_3 = arith.constant 0 : index
    %c0_4 = arith.constant 0 : index
    %5 = vector.load %arg3[%c0_3, %c0_4] : memref<1x128xf32, #tpu.memory_space<vmem>>, vector<1x128xf32>
    %6 = vector.broadcast %5 : vector<1x128xf32> to vector<512x128xf32>
    %7 = arith.addf %4, %6 : vector<512x128xf32>
    %cst = arith.constant 0.000000e+00 : f32
    %8 = vector.broadcast %cst : f32 to vector<512x128xf32>
    %9 = arith.maximumf %7, %8 : vector<512x128xf32>
    %10 = arith.truncf %9 : vector<512x128xf32> to vector<512x128xbf16>
    %c0_5 = arith.constant 0 : index
    %c0_6 = arith.constant 0 : index
    %11 = vector.load %arg4[%c0_5, %c0_6] : memref<512x128xbf16, #tpu.memory_space<vmem>>, vector<512x128xbf16>
    tpu.vector_store %arg4[%c0_5, %c0_6], %10 {strides = array<i32>} : memref<512x128xbf16, #tpu.memory_space<vmem>>, vector<512x128xbf16>,
    return
  }
  func.func @transform_0(%arg0: i32) -> (i32, i32) {
    %c0_i32 = arith.constant 0 : i32
    %c0_i32_0 = arith.constant 0 : i32
    return %arg0, %c0_i32 : i32, i32
  }
  func.func @transform_1(%arg0: i32) -> (i32, i32) {
    %c0_i32 = arith.constant 0 : i32
    %c0_i32_0 = arith.constant 0 : i32
    %c0_i32_1 = arith.constant 0 : i32
    return %c0_i32, %c0_i32_0 : i32, i32
  }
  func.func @transform_2(%arg0: i32) -> (i32, i32) {
    %c0_i32 = arith.constant 0 : i32
    %c0_i32_0 = arith.constant 0 : i32
    %c0_i32_1 = arith.constant 0 : i32
    return %c0_i32, %c0_i32_0 : i32, i32
  }
  func.func @transform_3(%arg0: i32) -> (i32, i32) {
    %c0_i32 = arith.constant 0 : i32
    %c0_i32_0 = arith.constant 0 : i32
    return %arg0, %c0_i32 : i32, i32
  }
}

module attributes {stable_mosaic.version = 11 : i64} {
  func.func @_bn_relu_kernel(%arg0: i32, %arg1: memref<512x128xbf16, #tpu.memory_space<vmem>>, %arg2: memref<1x128xf32, #tpu.memory_space<vmem>>, %arg3: memref<1x128xf32, #tpu.memory_space<vmem>>, %arg4: memref<512x128xf32, #tpu.memory_space<vmem>>) attributes {dimension_semantics = [#tpu.dimension_semantics<parallel>], iteration_bounds = array<i64: 1>, scalar_prefetch = 0 : i64, scratch_operands = 0 : i64, tpu.core_type = #tpu.core_type<tc>, window_params = [{transform_indices = @transform_0, window_bounds = array<i64: 512, 128>}, {pipeline_mode = #tpu.pipeline_mode<synchronous>, transform_indices = @transform_1, window_bounds = array<i64: 1, 128>}, {pipeline_mode = #tpu.pipeline_mode<synchronous>, transform_indices = @transform_2, window_bounds = array<i64: 1, 128>}, {transform_indices = @transform_3, window_bounds = array<i64: 512, 128>}]} {
    %c0 = arith.constant 0 : index
    %c0_0 = arith.constant 0 : index
    %0 = vector.load %arg1[%c0, %c0_0] : memref<512x128xbf16, #tpu.memory_space<vmem>>, vector<512x128xbf16>
    %1 = arith.extf %0 : vector<512x128xbf16> to vector<512x128xf32>
    %c0_1 = arith.constant 0 : index
    %c0_2 = arith.constant 0 : index
    %2 = vector.load %arg2[%c0_1, %c0_2] : memref<1x128xf32, #tpu.memory_space<vmem>>, vector<1x128xf32>
    %3 = vector.broadcast %2 : vector<1x128xf32> to vector<512x128xf32>
    %4 = arith.mulf %1, %3 : vector<512x128xf32>
    %c0_3 = arith.constant 0 : index
    %c0_4 = arith.constant 0 : index
    %5 = vector.load %arg3[%c0_3, %c0_4] : memref<1x128xf32, #tpu.memory_space<vmem>>, vector<1x128xf32>
    %6 = vector.broadcast %5 : vector<1x128xf32> to vector<512x128xf32>
    %7 = arith.addf %4, %6 : vector<512x128xf32>
    %cst = arith.constant 0.000000e+00 : f32
    %8 = vector.broadcast %cst : f32 to vector<512x128xf32>
    %9 = arith.maximumf %7, %8 : vector<512x128xf32>
    %c0_5 = arith.constant 0 : index
    %c0_6 = arith.constant 0 : index
    %10 = vector.load %arg4[%c0_5, %c0_6] : memref<512x128xf32, #tpu.memory_space<vmem>>, vector<512x128xf32>
    tpu.vector_store %arg4[%c0_5, %c0_6], %9 {strides = array<i32>} : memref<512x128xf32, #tpu.memory_space<vmem>>, vector<512x128xf32>,
    return
  }
  func.func @transform_0(%arg0: i32) -> (i32, i32) {
    %c0_i32 = arith.constant 0 : i32
    %c0_i32_0 = arith.constant 0 : i32
    return %arg0, %c0_i32 : i32, i32
  }
  func.func @transform_1(%arg0: i32) -> (i32, i32) {
    %c0_i32 = arith.constant 0 : i32
    %c0_i32_0 = arith.constant 0 : i32
    %c0_i32_1 = arith.constant 0 : i32
    return %c0_i32, %c0_i32_0 : i32, i32
  }
  func.func @transform_2(%arg0: i32) -> (i32, i32) {
    %c0_i32 = arith.constant 0 : i32
    %c0_i32_0 = arith.constant 0 : i32
    %c0_i32_1 = arith.constant 0 : i32
    return %c0_i32, %c0_i32_0 : i32, i32
  }
  func.func @transform_3(%arg0: i32) -> (i32, i32) {
    %c0_i32 = arith.constant 0 : i32
    %c0_i32_0 = arith.constant 0 : i32
    return %arg0, %c0_i32 : i32, i32
  }
}

module attributes {stable_mosaic.version = 11 : i64} {
  func.func @_conv3x3_stats_kernel(%arg0: i32, %arg1: i32, %arg2: memref<1x18x18x128xbf16, #tpu.memory_space<vmem>>, %arg3: memref<9x128x128xbf16, #tpu.memory_space<vmem>>, %arg4: memref<1x256x128xbf16, #tpu.memory_space<vmem>>, %arg5: memref<1x1x8x128xf32, #tpu.memory_space<vmem>>) attributes {dimension_semantics = [#tpu.dimension_semantics<parallel>, #tpu.dimension_semantics<parallel>], iteration_bounds = array<i64: 2, 1>, scalar_prefetch = 0 : i64, scratch_operands = 0 : i64, tpu.core_type = #tpu.core_type<tc>, window_params = [{transform_indices = @transform_0, window_bounds = array<i64: 1, 18, 18, 128>}, {pipeline_mode = #tpu.pipeline_mode<synchronous>, transform_indices = @transform_1, window_bounds = array<i64: 9, 128, 128>}, {transform_indices = @transform_2, window_bounds = array<i64: 1, 256, 128>}, {transform_indices = @transform_3, window_bounds = array<i64: 1, 1, 8, 128>}]} {
    %c16_i32 = arith.constant 16 : i32
    %0 = arith.muli %arg1, %c16_i32 : i32
    %c0_i32 = arith.constant 0 : i32
    %1 = arith.addi %0, %c0_i32 : i32
    %c0 = arith.constant 0 : index
    %2 = arith.index_cast %1 : i32 to index
    %c0_0 = arith.constant 0 : index
    %c0_1 = arith.constant 0 : index
    %3 = vector.load %arg2[%c0, %2, %c0_0, %c0_1] : memref<1x18x18x128xbf16, #tpu.memory_space<vmem>>, vector<1x16x16x128xbf16>
    %4 = vector.shape_cast %3 : vector<1x16x16x128xbf16> to vector<16x16x128xbf16>
    %5 = vector.shape_cast %4 : vector<16x16x128xbf16> to vector<256x128xbf16>
    %c0_i32_2 = arith.constant 0 : i32
    %6 = arith.addi %0, %c0_i32_2 : i32
    %c0_3 = arith.constant 0 : index
    %7 = arith.index_cast %6 : i32 to index
    %c1 = arith.constant 1 : index
    %c0_4 = arith.constant 0 : index
    %8 = vector.load %arg2[%c0_3, %7, %c1, %c0_4] : memref<1x18x18x128xbf16, #tpu.memory_space<vmem>>, vector<1x16x16x128xbf16>
    %9 = vector.shape_cast %8 : vector<1x16x16x128xbf16> to vector<16x16x128xbf16>
    %10 = vector.shape_cast %9 : vector<16x16x128xbf16> to vector<256x128xbf16>
    %c0_i32_5 = arith.constant 0 : i32
    %11 = arith.addi %0, %c0_i32_5 : i32
    %c0_6 = arith.constant 0 : index
    %12 = arith.index_cast %11 : i32 to index
    %c2 = arith.constant 2 : index
    %c0_7 = arith.constant 0 : index
    %13 = vector.load %arg2[%c0_6, %12, %c2, %c0_7] : memref<1x18x18x128xbf16, #tpu.memory_space<vmem>>, vector<1x16x16x128xbf16>
    %14 = vector.shape_cast %13 : vector<1x16x16x128xbf16> to vector<16x16x128xbf16>
    %15 = vector.shape_cast %14 : vector<16x16x128xbf16> to vector<256x128xbf16>
    %c1_i32 = arith.constant 1 : i32
    %16 = arith.addi %0, %c1_i32 : i32
    %c0_8 = arith.constant 0 : index
    %17 = arith.index_cast %16 : i32 to index
    %c0_9 = arith.constant 0 : index
    %c0_10 = arith.constant 0 : index
    %18 = vector.load %arg2[%c0_8, %17, %c0_9, %c0_10] : memref<1x18x18x128xbf16, #tpu.memory_space<vmem>>, vector<1x16x16x128xbf16>
    %19 = vector.shape_cast %18 : vector<1x16x16x128xbf16> to vector<16x16x128xbf16>
    %20 = vector.shape_cast %19 : vector<16x16x128xbf16> to vector<256x128xbf16>
    %c1_i32_11 = arith.constant 1 : i32
    %21 = arith.addi %0, %c1_i32_11 : i32
    %c0_12 = arith.constant 0 : index
    %22 = arith.index_cast %21 : i32 to index
    %c1_13 = arith.constant 1 : index
    %c0_14 = arith.constant 0 : index
    %23 = vector.load %arg2[%c0_12, %22, %c1_13, %c0_14] : memref<1x18x18x128xbf16, #tpu.memory_space<vmem>>, vector<1x16x16x128xbf16>
    %24 = vector.shape_cast %23 : vector<1x16x16x128xbf16> to vector<16x16x128xbf16>
    %25 = vector.shape_cast %24 : vector<16x16x128xbf16> to vector<256x128xbf16>
    %c1_i32_15 = arith.constant 1 : i32
    %26 = arith.addi %0, %c1_i32_15 : i32
    %c0_16 = arith.constant 0 : index
    %27 = arith.index_cast %26 : i32 to index
    %c2_17 = arith.constant 2 : index
    %c0_18 = arith.constant 0 : index
    %28 = vector.load %arg2[%c0_16, %27, %c2_17, %c0_18] : memref<1x18x18x128xbf16, #tpu.memory_space<vmem>>, vector<1x16x16x128xbf16>
    %29 = vector.shape_cast %28 : vector<1x16x16x128xbf16> to vector<16x16x128xbf16>
    %30 = vector.shape_cast %29 : vector<16x16x128xbf16> to vector<256x128xbf16>
    %c2_i32 = arith.constant 2 : i32
    %31 = arith.addi %0, %c2_i32 : i32
    %c0_19 = arith.constant 0 : index
    %32 = arith.index_cast %31 : i32 to index
    %c0_20 = arith.constant 0 : index
    %c0_21 = arith.constant 0 : index
    %33 = vector.load %arg2[%c0_19, %32, %c0_20, %c0_21] : memref<1x18x18x128xbf16, #tpu.memory_space<vmem>>, vector<1x16x16x128xbf16>
    %34 = vector.shape_cast %33 : vector<1x16x16x128xbf16> to vector<16x16x128xbf16>
    %35 = vector.shape_cast %34 : vector<16x16x128xbf16> to vector<256x128xbf16>
    %c2_i32_22 = arith.constant 2 : i32
    %36 = arith.addi %0, %c2_i32_22 : i32
    %c0_23 = arith.constant 0 : index
    %37 = arith.index_cast %36 : i32 to index
    %c1_24 = arith.constant 1 : index
    %c0_25 = arith.constant 0 : index
    %38 = vector.load %arg2[%c0_23, %37, %c1_24, %c0_25] : memref<1x18x18x128xbf16, #tpu.memory_space<vmem>>, vector<1x16x16x128xbf16>
    %39 = vector.shape_cast %38 : vector<1x16x16x128xbf16> to vector<16x16x128xbf16>
    %40 = vector.shape_cast %39 : vector<16x16x128xbf16> to vector<256x128xbf16>
    %c2_i32_26 = arith.constant 2 : i32
    %41 = arith.addi %0, %c2_i32_26 : i32
    %c0_27 = arith.constant 0 : index
    %42 = arith.index_cast %41 : i32 to index
    %c2_28 = arith.constant 2 : index
    %c0_29 = arith.constant 0 : index
    %43 = vector.load %arg2[%c0_27, %42, %c2_28, %c0_29] : memref<1x18x18x128xbf16, #tpu.memory_space<vmem>>, vector<1x16x16x128xbf16>
    %44 = vector.shape_cast %43 : vector<1x16x16x128xbf16> to vector<16x16x128xbf16>
    %45 = vector.shape_cast %44 : vector<16x16x128xbf16> to vector<256x128xbf16>
    %46 = tpu.concatenate %5, %10, %15, %20, %25, %30, %35, %40, %45 in 1 : vector<256x128xbf16>, vector<256x128xbf16>, vector<256x128xbf16>, vector<256x128xbf16>, vector<256x128xbf16>, vector<256x128xbf16>, vector<256x128xbf16>, vector<256x128xbf16>, vector<256x128xbf16> -> vector<256x1152xbf16>
    %c0_30 = arith.constant 0 : index
    %c0_31 = arith.constant 0 : index
    %c0_32 = arith.constant 0 : index
    %47 = vector.load %arg3[%c0_30, %c0_31, %c0_32] : memref<9x128x128xbf16, #tpu.memory_space<vmem>>, vector<9x128x128xbf16>
    %48 = vector.shape_cast %47 : vector<9x128x128xbf16> to vector<1152x128xbf16>
    %cst = arith.constant dense<0.000000e+00> : vector<256x128xf32>
    %49 = tpu.matmul %46, %48, %cst {dimension_numbers = #tpu.dot_dimension_numbers<[1], [0], [0], [1], [0, 0, 1, 1], [], []>} : vector<256x1152xbf16>, vector<1152x128xbf16>, vector<256x128xf32> -> vector<256x128xf32>
    %50 = arith.truncf %49 : vector<256x128xf32> to vector<256x128xbf16>
    %c0_33 = arith.constant 0 : index
    %c0_34 = arith.constant 0 : index
    %c0_35 = arith.constant 0 : index
    %51 = vector.load %arg4[%c0_33, %c0_34, %c0_35] : memref<1x256x128xbf16, #tpu.memory_space<vmem>>, vector<1x256x128xbf16>
    %52 = vector.shape_cast %51 : vector<1x256x128xbf16> to vector<256x128xbf16>
    %53 = vector.shape_cast %50 : vector<256x128xbf16> to vector<1x256x128xbf16>
    tpu.vector_store %arg4[%c0_33, %c0_34, %c0_35], %53 {strides = array<i32>} : memref<1x256x128xbf16, #tpu.memory_space<vmem>>, vector<1x256x128xbf16>,
    %cst_36 = arith.constant 0.000000e+00 : f32
    %54 = vector.broadcast %cst_36 : f32 to vector<8x128xf32>
    %c0_37 = arith.constant 0 : index
    %c0_38 = arith.constant 0 : index
    %c0_39 = arith.constant 0 : index
    %c0_40 = arith.constant 0 : index
    %55 = vector.load %arg5[%c0_37, %c0_38, %c0_39, %c0_40] : memref<1x1x8x128xf32, #tpu.memory_space<vmem>>, vector<1x1x8x128xf32>
    %56 = vector.shape_cast %55 : vector<1x1x8x128xf32> to vector<8x128xf32>
    %57 = vector.shape_cast %54 : vector<8x128xf32> to vector<1x1x8x128xf32>
    tpu.vector_store %arg5[%c0_37, %c0_38, %c0_39, %c0_40], %57 {strides = array<i32>} : memref<1x1x8x128xf32, #tpu.memory_space<vmem>>, vector<1x1x8x128xf32>,
    %cst_41 = arith.constant dense<0.000000e+00> : vector<128xf32>
    %58 = vector.multi_reduction <add>, %49, %cst_41 [0] : vector<256x128xf32> to vector<128xf32>
    %59 = vector.shape_cast %58 : vector<128xf32> to vector<1x128xf32>
    %c0_42 = arith.constant 0 : index
    %c0_43 = arith.constant 0 : index
    %c0_44 = arith.constant 0 : index
    %c0_45 = arith.constant 0 : index
    %60 = vector.load %arg5[%c0_42, %c0_43, %c0_44, %c0_45] : memref<1x1x8x128xf32, #tpu.memory_space<vmem>>, vector<1x1x1x128xf32>
    %61 = vector.shape_cast %60 : vector<1x1x1x128xf32> to vector<1x128xf32>
    %62 = vector.shape_cast %59 : vector<1x128xf32> to vector<1x1x1x128xf32>
    tpu.vector_store %arg5[%c0_42, %c0_43, %c0_44, %c0_45], %62 {strides = array<i32>} : memref<1x1x8x128xf32, #tpu.memory_space<vmem>>, vector<1x1x1x128xf32>,
    %63 = arith.mulf %49, %49 : vector<256x128xf32>
    %cst_46 = arith.constant dense<0.000000e+00> : vector<128xf32>
    %64 = vector.multi_reduction <add>, %63, %cst_46 [0] : vector<256x128xf32> to vector<128xf32>
    %65 = vector.shape_cast %64 : vector<128xf32> to vector<1x128xf32>
    %c0_47 = arith.constant 0 : index
    %c0_48 = arith.constant 0 : index
    %c1_49 = arith.constant 1 : index
    %c0_50 = arith.constant 0 : index
    %66 = vector.load %arg5[%c0_47, %c0_48, %c1_49, %c0_50] : memref<1x1x8x128xf32, #tpu.memory_space<vmem>>, vector<1x1x1x128xf32>
    %67 = vector.shape_cast %66 : vector<1x1x1x128xf32> to vector<1x128xf32>
    %68 = vector.shape_cast %65 : vector<1x128xf32> to vector<1x1x1x128xf32>
    tpu.vector_store %arg5[%c0_47, %c0_48, %c1_49, %c0_50], %68 {strides = array<i32>} : memref<1x1x8x128xf32, #tpu.memory_space<vmem>>, vector<1x1x1x128xf32>,
    return
  }
  func.func @transform_0(%arg0: i32, %arg1: i32) -> (i32, i32, i32, i32) {
    %c0_i32 = arith.constant 0 : i32
    %c0_i32_0 = arith.constant 0 : i32
    %c0_i32_1 = arith.constant 0 : i32
    %c0_i32_2 = arith.constant 0 : i32
    return %arg0, %c0_i32, %c0_i32_0, %c0_i32_1 : i32, i32, i32, i32
  }
  func.func @transform_1(%arg0: i32, %arg1: i32) -> (i32, i32, i32) {
    %c0_i32 = arith.constant 0 : i32
    %c0_i32_0 = arith.constant 0 : i32
    %c0_i32_1 = arith.constant 0 : i32
    %c0_i32_2 = arith.constant 0 : i32
    return %c0_i32, %c0_i32_0, %c0_i32_1 : i32, i32, i32
  }
  func.func @transform_2(%arg0: i32, %arg1: i32) -> (i32, i32, i32) {
    %c0_i32 = arith.constant 0 : i32
    %c0_i32_0 = arith.constant 0 : i32
    return %arg0, %arg1, %c0_i32 : i32, i32, i32
  }
  func.func @transform_3(%arg0: i32, %arg1: i32) -> (i32, i32, i32, i32) {
    %c0_i32 = arith.constant 0 : i32
    %c0_i32_0 = arith.constant 0 : i32
    %c0_i32_1 = arith.constant 0 : i32
    return %arg0, %arg1, %c0_i32, %c0_i32_0 : i32, i32, i32, i32
  }
}

</mosaic_0001>

<bundles_post_ra>
// kernel: double_conv.5
= control target key start
LH: loop header
LB: loop body
LE: loop exit
PB: predicated region body
PF: predicated region fallthrough
CT: control target
= control target key end

     0   :  { %s1502_s0 = inlined_call_operand.vmem [shape: bf16[512,128], index: 0, kind: input, shape index: {}]   ;;  %s1503_s1 = inlined_call_operand.vmem [shape: f32[1,128], index: 1, kind: input, shape index: {}]   ;;  %s1504_s2 = inlined_call_operand.vmem [shape: f32[1,128], index: 2, kind: input, shape index: {}]   ;;  %s1505_s3 = inlined_call_operand.vmem [shape: bf16[512,128], index: 3, kind: output, shape index: {}]  }
   0x1   :  { %v803_v0 = vld [vmem:[%s1502_s0] sm:$0xff]   ;;  %v1090_v4 = vld [vmem:[%s1502_s0 + $0x8] sm:$0xff]   ;;  %v1091_v5 = vld [vmem:[%s1502_s0 + $0x10] sm:$0xff]  }
   0x2   :  { %v1178_v1 = vld [vmem:[%s1503_s1] ss:$0 sm:$0xff]  ;;  %v804_v2 = vunpack.c.l.bf16 %v803_v0  ;;  %v805_v3 = vunpack.c.h.bf16 %v803_v0  ;;  %v1092_v6 = vld [vmem:[%s1502_s0 + $0x18] sm:$0xff]   ;;  %v808_v8 = vunpack.c.l.bf16 %v1090_v4  ;;  %v809_v9 = vunpack.c.h.bf16 %v1090_v4  ;;  %v1094_v33 = vld [vmem:[%s1502_s0 + $0x28] sm:$0xff]  }
   0x3   :  { %v1192_v7 = vld [vmem:[%s1504_s2] ss:$0 sm:$0xff]  ;;  %v812_v10 = vunpack.c.l.bf16 %v1091_v5  ;;  %v813_v11 = vunpack.c.h.bf16 %v1091_v5  ;;  %v816_v14 = vunpack.c.l.bf16 %v1092_v6  ;;  %v817_v15 = vunpack.c.h.bf16 %v1092_v6  ;;  %v1095_v38 = vld [vmem:[%s1502_s0 + $0x30] sm:$0xff]   ;;  %v1096_v43 = vld [vmem:[%s1502_s0 + $0x38] sm:$0xff]  }
   0x4   :  { %v149_v12 = vmul.f32 %v804_v2, %v1178_v1  ;;  %v150_v13 = vmul.f32 %v805_v3, %v1178_v1  ;;  %v151_v16 = vmul.f32 %v808_v8, %v1178_v1  ;;  %v152_v17 = vmul.f32 %v809_v9, %v1178_v1  ;;  %v1093_v28 = vld [vmem:[%s1502_s0 + $0x20] sm:$0xff]  }
   0x5   :  { %v153_v18 = vmul.f32 %v812_v10, %v1178_v1  ;;  %v154_v19 = vmul.f32 %v813_v11, %v1178_v1  ;;  %v155_v22 = vmul.f32 %v816_v14, %v1178_v1  ;;  %v156_v23 = vmul.f32 %v817_v15, %v1178_v1  ;;  %v1097_v0 = vld [vmem:[%s1502_s0 + $0x40] sm:$0xff]   ;;  %v1098_v11 = vld [vmem:[%s1502_s0 + $0x48] sm:$0xff]  }
   0x6   :  { %v220_v20 = vadd.f32 %v1192_v7, %v149_v12  ;;  %v221_v21 = vadd.f32 %v1192_v7, %v150_v13  ;;  %v222_v24 = vadd.f32 %v1192_v7, %v151_v16  ;;  %v223_v25 = vadd.f32 %v1192_v7, %v152_v17  ;;  %v1099_v16 = vld [vmem:[%s1502_s0 + $0x50] sm:$0xff]  }
   0x7   :  { %v224_v26 = vadd.f32 %v1192_v7, %v153_v18  ;;  %v225_v27 = vadd.f32 %v1192_v7, %v154_v19  ;;  %v226_v31 = vadd.f32 %v1192_v7, %v155_v22  ;;  %v227_v32 = vadd.f32 %v1192_v7, %v156_v23 }
   0x8   :  { %v284_v29 = vmax.f32 %v220_v20, 0.0  ;;  %v285_v30 = vmax.f32 %v221_v21, 0.0  ;;  %v286_v34 = vmax.f32 %v222_v24, 0.0  ;;  %v287_v35 = vmax.f32 %v223_v25, 0.0  ;;  %v1100_v25 = vld [vmem:[%s1502_s0 + $0x58] sm:$0xff]  }
   0x9   :  { %v288_v36 = vmax.f32 %v224_v26, 0.0  ;;  %v289_v37 = vmax.f32 %v225_v27, 0.0  ;;  %v290_v40 = vmax.f32 %v226_v31, 0.0  ;;  %v291_v41 = vmax.f32 %v227_v32, 0.0 }
   0xa   :  { %v933_v39 = vpack.c.bf16 %v285_v30, %v284_v29  ;;  %v820_v42 = vunpack.c.l.bf16 %v1093_v28  ;;  %v938_v44 = vpack.c.bf16 %v287_v35, %v286_v34  ;;  %v821_v46 = vunpack.c.h.bf16 %v1093_v28 }
   0xb   :  { %v943_v45 = vpack.c.bf16 %v289_v37, %v288_v36  ;;  %v824_v47 = vunpack.c.l.bf16 %v1094_v33  ;;  %v948_v48 = vpack.c.bf16 %v291_v41, %v290_v40  ;;  %v825_v50 = vunpack.c.h.bf16 %v1094_v33 }
   0xc   :  { %934 = vst [vmem:[%s1505_s3] sm:$0xff] %v933_v39   ;;  %v157_v49 = vmul.f32 %v820_v42, %v1178_v1  ;;  %v828_v51 = vunpack.c.l.bf16 %v1095_v38  ;;  %1121 = vst [vmem:[%s1505_s3 + $0x8] sm:$0xff] %v938_v44   ;;  %v158_v52 = vmul.f32 %v821_v46, %v1178_v1  ;;  %v829_v54 = vunpack.c.h.bf16 %v1095_v38  ;;  %v1101_v38 = vld [vmem:[%s1502_s0 + $0x60] sm:$0xff]  }
   0xd   :  { %1122 = vst [vmem:[%s1505_s3 + $0x10] sm:$0xff] %v943_v45   ;;  %v159_v53 = vmul.f32 %v824_v47, %v1178_v1  ;;  %v832_v55 = vunpack.c.l.bf16 %v1096_v43  ;;  %1123 = vst [vmem:[%s1505_s3 + $0x18] sm:$0xff] %v948_v48   ;;  %v160_v57 = vmul.f32 %v825_v50, %v1178_v1  ;;  %v833_v59 = vunpack.c.h.bf16 %v1096_v43 }
   0xe   :  { %v228_v56 = vadd.f32 %v1192_v7, %v157_v49  ;;  %v161_v58 = vmul.f32 %v828_v51, %v1178_v1  ;;  %v229_v60 = vadd.f32 %v1192_v7, %v158_v52  ;;  %v162_v62 = vmul.f32 %v829_v54, %v1178_v1  ;;  %v1102_v51 = vld [vmem:[%s1502_s0 + $0x68] sm:$0xff]  }
   0xf   :  { %v230_v61 = vadd.f32 %v1192_v7, %v159_v53  ;;  %v163_v63 = vmul.f32 %v832_v55, %v1178_v1  ;;  %v231_v3 = vadd.f32 %v1192_v7, %v160_v57  ;;  %v164_v5 = vmul.f32 %v833_v59, %v1178_v1 }
  0x10   :  { %v292_v2 = vmax.f32 %v228_v56, 0.0  ;;  %v232_v4 = vadd.f32 %v1192_v7, %v161_v58  ;;  %v293_v6 = vmax.f32 %v229_v60, 0.0  ;;  %v233_v9 = vadd.f32 %v1192_v7, %v162_v62  ;;  %v1103_v60 = vld [vmem:[%s1502_s0 + $0x70] sm:$0xff]  }
  0x11   :  { %v294_v8 = vmax.f32 %v230_v61, 0.0  ;;  %v234_v10 = vadd.f32 %v1192_v7, %v163_v63  ;;  %v295_v12 = vmax.f32 %v231_v3, 0.0  ;;  %v235_v14 = vadd.f32 %v1192_v7, %v164_v5 }
  0x12   :  { %v296_v13 = vmax.f32 %v232_v4, 0.0  ;;  %v836_v15 = vunpack.c.l.bf16 %v1097_v0  ;;  %v953_v17 = vpack.c.bf16 %v293_v6, %v292_v2  ;;  %v297_v18 = vmax.f32 %v233_v9, 0.0  ;;  %v1104_v2 = vld [vmem:[%s1502_s0 + $0x78] sm:$0xff]  }
  0x13   :  { %v298_v19 = vmax.f32 %v234_v10, 0.0  ;;  %v837_v20 = vunpack.c.h.bf16 %v1097_v0  ;;  %v958_v21 = vpack.c.bf16 %v295_v12, %v294_v8  ;;  %v299_v22 = vmax.f32 %v235_v14, 0.0  ;;  %v1105_v12 = vld [vmem:[%s1502_s0 + $0x80] sm:$0xff]  }
  0x14   :  { %v165_v23 = vmul.f32 %v836_v15, %v1178_v1  ;;  %v840_v24 = vunpack.c.l.bf16 %v1098_v11  ;;  %1124 = vst [vmem:[%s1505_s3 + $0x20] sm:$0xff] %v953_v17   ;;  %v963_v26 = vpack.c.bf16 %v297_v18, %v296_v13  ;;  %v841_v28 = vunpack.c.h.bf16 %v1098_v11 }
  0x15   :  { %v166_v27 = vmul.f32 %v837_v20, %v1178_v1  ;;  %v844_v29 = vunpack.c.l.bf16 %v1099_v16  ;;  %1125 = vst [vmem:[%s1505_s3 + $0x28] sm:$0xff] %v958_v21   ;;  %v968_v30 = vpack.c.bf16 %v299_v22, %v298_v19  ;;  %v845_v33 = vunpack.c.h.bf16 %v1099_v16 }
  0x16   :  { %v236_v31 = vadd.f32 %v1192_v7, %v165_v23  ;;  %v167_v32 = vmul.f32 %v840_v24, %v1178_v1  ;;  %1126 = vst [vmem:[%s1505_s3 + $0x30] sm:$0xff] %v963_v26   ;;  %v168_v35 = vmul.f32 %v841_v28, %v1178_v1  ;;  %v848_v37 = vunpack.c.l.bf16 %v1100_v25 }
  0x17   :  { %v237_v34 = vadd.f32 %v1192_v7, %v166_v27  ;;  %v169_v36 = vmul.f32 %v844_v29, %v1178_v1  ;;  %1127 = vst [vmem:[%s1505_s3 + $0x38] sm:$0xff] %v968_v30   ;;  %v170_v41 = vmul.f32 %v845_v33, %v1178_v1  ;;  %v849_v42 = vunpack.c.h.bf16 %v1100_v25  ;;  %v1106_v29 = vld [vmem:[%s1502_s0 + $0x88] sm:$0xff]  }
  0x18   :  { %v300_v39 = vmax.f32 %v236_v31, 0.0  ;;  %v238_v40 = vadd.f32 %v1192_v7, %v167_v32  ;;  %v239_v44 = vadd.f32 %v1192_v7, %v168_v35  ;;  %v171_v46 = vmul.f32 %v848_v37, %v1178_v1 }
  0x19   :  { %v301_v43 = vmax.f32 %v237_v34, 0.0  ;;  %v240_v45 = vadd.f32 %v1192_v7, %v169_v36  ;;  %v241_v48 = vadd.f32 %v1192_v7, %v170_v41  ;;  %v172_v49 = vmul.f32 %v849_v42, %v1178_v1  ;;  %v1107_v34 = vld [vmem:[%s1502_s0 + $0x90] sm:$0xff]  }
  0x1a   :  { %v302_v47 = vmax.f32 %v238_v40, 0.0  ;;  %v852_v50 = vunpack.c.l.bf16 %v1101_v38  ;;  %v303_v53 = vmax.f32 %v239_v44, 0.0  ;;  %v242_v55 = vadd.f32 %v1192_v7, %v171_v46 }
  0x1b   :  { %v973_v52 = vpack.c.bf16 %v301_v43, %v300_v39  ;;  %v304_v54 = vmax.f32 %v240_v45, 0.0  ;;  %v305_v56 = vmax.f32 %v241_v48, 0.0  ;;  %v243_v57 = vadd.f32 %v1192_v7, %v172_v49  ;;  %v1108_v43 = vld [vmem:[%s1502_s0 + $0x98] sm:$0xff]  }
  0x1c   :  { %v853_v58 = vunpack.c.h.bf16 %v1101_v38  ;;  %v173_v59 = vmul.f32 %v852_v50, %v1178_v1  ;;  %v978_v61 = vpack.c.bf16 %v303_v53, %v302_v47  ;;  %v306_v62 = vmax.f32 %v242_v55, 0.0 }
  0x1d   :  { %1128 = vst [vmem:[%s1505_s3 + $0x40] sm:$0xff] %v973_v52   ;;  %v856_v63 = vunpack.c.l.bf16 %v1102_v51  ;;  %v857_v0 = vunpack.c.h.bf16 %v1102_v51  ;;  %v983_v3 = vpack.c.bf16 %v305_v56, %v304_v54  ;;  %v307_v4 = vmax.f32 %v243_v57, 0.0  ;;  %v1109_v56 = vld [vmem:[%s1502_s0 + $0xa0] sm:$0xff]  }
  0x1e   :  { %v174_v5 = vmul.f32 %v853_v58, %v1178_v1  ;;  %v244_v6 = vadd.f32 %v1192_v7, %v173_v59  ;;  %1129 = vst [vmem:[%s1505_s3 + $0x48] sm:$0xff] %v978_v61   ;;  %v860_v10 = vunpack.c.l.bf16 %v1103_v60  ;;  %v861_v11 = vunpack.c.h.bf16 %v1103_v60 }
  0x1f   :  { %v175_v8 = vmul.f32 %v856_v63, %v1178_v1  ;;  %v176_v9 = vmul.f32 %v857_v0, %v1178_v1  ;;  %1130 = vst [vmem:[%s1505_s3 + $0x50] sm:$0xff] %v983_v3   ;;  %v988_v13 = vpack.c.bf16 %v307_v4, %v306_v62  ;;  %v864_v16 = vunpack.c.l.bf16 %v1104_v2 }
  0x20   :  { %v245_v14 = vadd.f32 %v1192_v7, %v174_v5  ;;  %v308_v15 = vmax.f32 %v244_v6, 0.0  ;;  %v177_v19 = vmul.f32 %v860_v10, %v1178_v1  ;;  %v178_v20 = vmul.f32 %v861_v11, %v1178_v1 }
  0x21   :  { %v246_v17 = vadd.f32 %v1192_v7, %v175_v8  ;;  %v247_v18 = vadd.f32 %v1192_v7, %v176_v9  ;;  %1131 = vst [vmem:[%s1505_s3 + $0x58] sm:$0xff] %v988_v13   ;;  %v865_v22 = vunpack.c.h.bf16 %v1104_v2  ;;  %v179_v23 = vmul.f32 %v864_v16, %v1178_v1  ;;  %v1110_v2 = vld [vmem:[%s1502_s0 + $0xa8] sm:$0xff]   ;;  %v1111_v16 = vld [vmem:[%s1502_s0 + $0xb0] sm:$0xff]  }
  0x22   :  { %v309_v21 = vmax.f32 %v245_v14, 0.0  ;;  %v868_v24 = vunpack.c.l.bf16 %v1105_v12  ;;  %v248_v27 = vadd.f32 %v1192_v7, %v177_v19  ;;  %v249_v28 = vadd.f32 %v1192_v7, %v178_v20 }
  0x23   :  { %v310_v25 = vmax.f32 %v246_v17, 0.0  ;;  %v311_v26 = vmax.f32 %v247_v18, 0.0  ;;  %v180_v31 = vmul.f32 %v865_v22, %v1178_v1  ;;  %v250_v32 = vadd.f32 %v1192_v7, %v179_v23 }
  0x24   :  { %v993_v30 = vpack.c.bf16 %v309_v21, %v308_v15  ;;  %v869_v33 = vunpack.c.h.bf16 %v1105_v12  ;;  %v312_v36 = vmax.f32 %v248_v27, 0.0  ;;  %v313_v37 = vmax.f32 %v249_v28, 0.0  ;;  %v1112_v21 = vld [vmem:[%s1502_s0 + $0xb8] sm:$0xff]  }
  0x25   :  { %v998_v35 = vpack.c.bf16 %v311_v26, %v310_v25  ;;  %v181_v38 = vmul.f32 %v868_v24, %v1178_v1  ;;  %v251_v39 = vadd.f32 %v1192_v7, %v180_v31  ;;  %v314_v40 = vmax.f32 %v250_v32, 0.0 }
  0x26   :  { %1132 = vst [vmem:[%s1505_s3 + $0x60] sm:$0xff] %v993_v30   ;;  %v182_v41 = vmul.f32 %v869_v33, %v1178_v1  ;;  %v872_v42 = vunpack.c.l.bf16 %v1106_v29  ;;  %v1003_v44 = vpack.c.bf16 %v313_v37, %v312_v36  ;;  %v873_v46 = vunpack.c.h.bf16 %v1106_v29 }
  0x27   :  { %1133 = vst [vmem:[%s1505_s3 + $0x68] sm:$0xff] %v998_v35   ;;  %v252_v45 = vadd.f32 %v1192_v7, %v181_v38  ;;  %v876_v47 = vunpack.c.l.bf16 %v1107_v34  ;;  %v315_v48 = vmax.f32 %v251_v39, 0.0  ;;  %v877_v51 = vunpack.c.h.bf16 %v1107_v34  ;;  %v1113_v34 = vld [vmem:[%s1502_s0 + $0xc0] sm:$0xff]  }
  0x28   :  { %v253_v49 = vadd.f32 %v1192_v7, %v182_v41  ;;  %v183_v50 = vmul.f32 %v872_v42, %v1178_v1  ;;  %1134 = vst [vmem:[%s1505_s3 + $0x70] sm:$0xff] %v1003_v44   ;;  %v184_v53 = vmul.f32 %v873_v46, %v1178_v1  ;;  %v880_v55 = vunpack.c.l.bf16 %v1108_v43 }
  0x29   :  { %v316_v52 = vmax.f32 %v252_v45, 0.0  ;;  %v185_v54 = vmul.f32 %v876_v47, %v1178_v1  ;;  %v1008_v57 = vpack.c.bf16 %v315_v48, %v314_v40  ;;  %v186_v60 = vmul.f32 %v877_v51, %v1178_v1  ;;  %v1114_v47 = vld [vmem:[%s1502_s0 + $0xc8] sm:$0xff]  }
  0x2a   :  { %v317_v58 = vmax.f32 %v253_v49, 0.0  ;;  %v254_v59 = vadd.f32 %v1192_v7, %v183_v50  ;;  %v255_v61 = vadd.f32 %v1192_v7, %v184_v53  ;;  %v881_v63 = vunpack.c.h.bf16 %v1108_v43 }
  0x2b   :  { %v256_v62 = vadd.f32 %v1192_v7, %v185_v54  ;;  %v187_v0 = vmul.f32 %v880_v55, %v1178_v1  ;;  %1135 = vst [vmem:[%s1505_s3 + $0x78] sm:$0xff] %v1008_v57   ;;  %v257_v5 = vadd.f32 %v1192_v7, %v186_v60  ;;  %v884_v6 = vunpack.c.l.bf16 %v1109_v56 }
  0x2c   :  { %v1013_v3 = vpack.c.bf16 %v317_v58, %v316_v52  ;;  %v318_v4 = vmax.f32 %v254_v59, 0.0  ;;  %v319_v8 = vmax.f32 %v255_v61, 0.0  ;;  %v188_v10 = vmul.f32 %v881_v63, %v1178_v1  ;;  %v1115_v52 = vld [vmem:[%s1502_s0 + $0xd0] sm:$0xff]   ;;  %v1116_v61 = vld [vmem:[%s1502_s0 + $0xd8] sm:$0xff]  }
  0x2d   :  { %v320_v9 = vmax.f32 %v256_v62, 0.0  ;;  %v258_v11 = vadd.f32 %v1192_v7, %v187_v0  ;;  %v321_v12 = vmax.f32 %v257_v5, 0.0  ;;  %v885_v13 = vunpack.c.h.bf16 %v1109_v56 }
  0x2e   :  { %1136 = vst [vmem:[%s1505_s3 + $0x80] sm:$0xff] %v1013_v3   ;;  %v189_v14 = vmul.f32 %v884_v6, %v1178_v1  ;;  %v888_v15 = vunpack.c.l.bf16 %v1110_v2  ;;  %v1018_v17 = vpack.c.bf16 %v319_v8, %v318_v4  ;;  %v259_v18 = vadd.f32 %v1192_v7, %v188_v10 }
  0x2f   :  { %v322_v19 = vmax.f32 %v258_v11, 0.0  ;;  %v889_v20 = vunpack.c.h.bf16 %v1110_v2  ;;  %v1023_v22 = vpack.c.bf16 %v321_v12, %v320_v9  ;;  %v190_v23 = vmul.f32 %v885_v13, %v1178_v1  ;;  %v1117_v12 = vld [vmem:[%s1502_s0 + $0xe0] sm:$0xff]  }
  0x30   :  { %v260_v24 = vadd.f32 %v1192_v7, %v189_v14  ;;  %v191_v25 = vmul.f32 %v888_v15, %v1178_v1  ;;  %1137 = vst [vmem:[%s1505_s3 + $0x88] sm:$0xff] %v1018_v17   ;;  %v323_v26 = vmax.f32 %v259_v18, 0.0  ;;  %v892_v28 = vunpack.c.l.bf16 %v1111_v16 }
  0x31   :  { %v192_v27 = vmul.f32 %v889_v20, %v1178_v1  ;;  %v893_v29 = vunpack.c.h.bf16 %v1111_v16  ;;  %1138 = vst [vmem:[%s1505_s3 + $0x90] sm:$0xff] %v1023_v22   ;;  %v261_v30 = vadd.f32 %v1192_v7, %v190_v23  ;;  %v896_v33 = vunpack.c.l.bf16 %v1112_v21 }
  0x32   :  { %v324_v31 = vmax.f32 %v260_v24, 0.0  ;;  %v262_v32 = vadd.f32 %v1192_v7, %v191_v25  ;;  %v1028_v35 = vpack.c.bf16 %v323_v26, %v322_v19  ;;  %v193_v37 = vmul.f32 %v892_v28, %v1178_v1 }
  0x33   :  { %v263_v36 = vadd.f32 %v1192_v7, %v192_v27  ;;  %v194_v38 = vmul.f32 %v893_v29, %v1178_v1  ;;  %v325_v39 = vmax.f32 %v261_v30, 0.0  ;;  %v897_v41 = vunpack.c.h.bf16 %v1112_v21  ;;  %v1118_v21 = vld [vmem:[%s1502_s0 + $0xe8] sm:$0xff]  }
  0x34   :  { %v326_v40 = vmax.f32 %v262_v32, 0.0  ;;  %v195_v42 = vmul.f32 %v896_v33, %v1178_v1  ;;  %1139 = vst [vmem:[%s1505_s3 + $0x98] sm:$0xff] %v1028_v35   ;;  %v264_v44 = vadd.f32 %v1192_v7, %v193_v37  ;;  %v900_v46 = vunpack.c.l.bf16 %v1113_v34 }
  0x35   :  { %v327_v43 = vmax.f32 %v263_v36, 0.0  ;;  %v265_v45 = vadd.f32 %v1192_v7, %v194_v38  ;;  %v1033_v48 = vpack.c.bf16 %v325_v39, %v324_v31  ;;  %v196_v49 = vmul.f32 %v897_v41, %v1178_v1  ;;  %v1120_v39 = vld [vmem:[%s1502_s0 + $0xf8] sm:$0xff]  }
  0x36   :  { %v266_v50 = vadd.f32 %v1192_v7, %v195_v42  ;;  %v901_v51 = vunpack.c.h.bf16 %v1113_v34  ;;  %v328_v54 = vmax.f32 %v264_v44, 0.0  ;;  %v197_v56 = vmul.f32 %v900_v46, %v1178_v1  ;;  %v1119_v34 = vld [vmem:[%s1502_s0 + $0xf0] sm:$0xff]  }
  0x37   :  { %v1038_v53 = vpack.c.bf16 %v327_v43, %v326_v40  ;;  %v329_v55 = vmax.f32 %v265_v45, 0.0  ;;  %1140 = vst [vmem:[%s1505_s3 + $0xa0] sm:$0xff] %v1033_v48   ;;  %v267_v57 = vadd.f32 %v1192_v7, %v196_v49  ;;  %v904_v60 = vunpack.c.l.bf16 %v1114_v47 }
  0x38   :  { %v330_v58 = vmax.f32 %v266_v50, 0.0  ;;  %v198_v59 = vmul.f32 %v901_v51, %v1178_v1  ;;  %v268_v63 = vadd.f32 %v1192_v7, %v197_v56  ;;  %v905_v0 = vunpack.c.h.bf16 %v1114_v47 }
  0x39   :  { %1141 = vst [vmem:[%s1505_s3 + $0xa8] sm:$0xff] %v1038_v53   ;;  %v1043_v62 = vpack.c.bf16 %v329_v55, %v328_v54  ;;  %v908_v2 = vunpack.c.l.bf16 %v1115_v52  ;;  %v331_v3 = vmax.f32 %v267_v57, 0.0  ;;  %v199_v5 = vmul.f32 %v904_v60, %v1178_v1 }
  0x3a   :  { %v269_v4 = vadd.f32 %v1192_v7, %v198_v59  ;;  %v909_v6 = vunpack.c.h.bf16 %v1115_v52  ;;  %v332_v8 = vmax.f32 %v268_v63, 0.0  ;;  %v200_v9 = vmul.f32 %v905_v0, %v1178_v1 }
  0x3b   :  { %1142 = vst [vmem:[%s1505_s3 + $0xb0] sm:$0xff] %v1043_v62   ;;  %v201_v10 = vmul.f32 %v908_v2, %v1178_v1  ;;  %v912_v11 = vunpack.c.l.bf16 %v1116_v61  ;;  %v1048_v13 = vpack.c.bf16 %v331_v3, %v330_v58  ;;  %v270_v15 = vadd.f32 %v1192_v7, %v199_v5 }
  0x3c   :  { %v333_v14 = vmax.f32 %v269_v4, 0.0  ;;  %v202_v16 = vmul.f32 %v909_v6, %v1178_v1  ;;  %v271_v17 = vadd.f32 %v1192_v7, %v200_v9  ;;  %v913_v19 = vunpack.c.h.bf16 %v1116_v61 }
  0x3d   :  { %v272_v18 = vadd.f32 %v1192_v7, %v201_v10  ;;  %v203_v20 = vmul.f32 %v912_v11, %v1178_v1  ;;  %1143 = vst [vmem:[%s1505_s3 + $0xb8] sm:$0xff] %v1048_v13   ;;  %v334_v23 = vmax.f32 %v270_v15, 0.0  ;;  %v916_v25 = vunpack.c.l.bf16 %v1117_v12 }
  0x3e   :  { %v1053_v22 = vpack.c.bf16 %v333_v14, %v332_v8  ;;  %v273_v24 = vadd.f32 %v1192_v7, %v202_v16  ;;  %v335_v26 = vmax.f32 %v271_v17, 0.0  ;;  %v204_v28 = vmul.f32 %v913_v19, %v1178_v1 }
  0x3f   :  { %v336_v27 = vmax.f32 %v272_v18, 0.0  ;;  %v274_v29 = vadd.f32 %v1192_v7, %v203_v20  ;;  %v917_v31 = vunpack.c.h.bf16 %v1117_v12  ;;  %v205_v32 = vmul.f32 %v916_v25, %v1178_v1 }
  0x40   :  { %1144 = vst [vmem:[%s1505_s3 + $0xc0] sm:$0xff] %v1053_v22   ;;  %v337_v30 = vmax.f32 %v273_v24, 0.0  ;;  %v920_v33 = vunpack.c.l.bf16 %v1118_v21  ;;  %v1058_v35 = vpack.c.bf16 %v335_v26, %v334_v23  ;;  %v275_v36 = vadd.f32 %v1192_v7, %v204_v28 }
  0x41   :  { %v338_v37 = vmax.f32 %v274_v29, 0.0  ;;  %v921_v38 = vunpack.c.h.bf16 %v1118_v21  ;;  %v206_v41 = vmul.f32 %v917_v31, %v1178_v1  ;;  %v276_v42 = vadd.f32 %v1192_v7, %v205_v32 }
  0x42   :  { %v1063_v40 = vpack.c.bf16 %v337_v30, %v336_v27  ;;  %v207_v43 = vmul.f32 %v920_v33, %v1178_v1  ;;  %1145 = vst [vmem:[%s1505_s3 + $0xc8] sm:$0xff] %v1058_v35   ;;  %v339_v44 = vmax.f32 %v275_v36, 0.0  ;;  %v924_v46 = vunpack.c.l.bf16 %v1119_v34 }
  0x43   :  { %v208_v45 = vmul.f32 %v921_v38, %v1178_v1  ;;  %v925_v47 = vunpack.c.h.bf16 %v1119_v34  ;;  %v277_v48 = vadd.f32 %v1192_v7, %v206_v41  ;;  %v340_v49 = vmax.f32 %v276_v42, 0.0 }
  0x44   :  { %1146 = vst [vmem:[%s1505_s3 + $0xd0] sm:$0xff] %v1063_v40   ;;  %v278_v50 = vadd.f32 %v1192_v7, %v207_v43  ;;  %v928_v51 = vunpack.c.l.bf16 %v1120_v39  ;;  %v1068_v52 = vpack.c.bf16 %v339_v44, %v338_v37  ;;  %v209_v54 = vmul.f32 %v924_v46, %v1178_v1 }
  0x45   :  { %v279_v53 = vadd.f32 %v1192_v7, %v208_v45  ;;  %v210_v55 = vmul.f32 %v925_v47, %v1178_v1  ;;  %v341_v56 = vmax.f32 %v277_v48, 0.0  ;;  %v929_v58 = vunpack.c.h.bf16 %v1120_v39 }
  0x46   :  { %v342_v57 = vmax.f32 %v278_v50, 0.0  ;;  %v211_v59 = vmul.f32 %v928_v51, %v1178_v1  ;;  %1147 = vst [vmem:[%s1505_s3 + $0xd8] sm:$0xff] %v1068_v52   ;;  %v280_v61 = vadd.f32 %v1192_v7, %v209_v54 }
  0x47   :  { %v343_v60 = vmax.f32 %v279_v53, 0.0  ;;  %v281_v62 = vadd.f32 %v1192_v7, %v210_v55  ;;  %v1073_v63 = vpack.c.bf16 %v341_v56, %v340_v49  ;;  %v212_v0 = vmul.f32 %v929_v58, %v1178_v1 }
  0x48   :  { %v282_v2 = vadd.f32 %v1192_v7, %v211_v59  ;;  %v344_v4 = vmax.f32 %v280_v61, 0.0 }
  0x49   :  { %v1078_v3 = vpack.c.bf16 %v343_v60, %v342_v57  ;;  %v345_v5 = vmax.f32 %v281_v62, 0.0  ;;  %1148 = vst [vmem:[%s1505_s3 + $0xe0] sm:$0xff] %v1073_v63   ;;  %v283_v6 = vadd.f32 %v1192_v7, %v212_v0 }
  0x4a   :  { %v346_v8 = vmax.f32 %v282_v2, 0.0 }
  0x4b   :  { %1149 = vst [vmem:[%s1505_s3 + $0xe8] sm:$0xff] %v1078_v3   ;;  %v1083_v9 = vpack.c.bf16 %v345_v5, %v344_v4  ;;  %v347_v10 = vmax.f32 %v283_v6, 0.0 }
  0x4d   :  { %1150 = vst [vmem:[%s1505_s3 + $0xf0] sm:$0xff] %v1083_v9   ;;  %v1088_v1 = vpack.c.bf16 %v347_v10, %v346_v8 }
  0x4f   :  { %1151 = vst [vmem:[%s1505_s3 + $0xf8] sm:$0xff] %v1088_v1  }

// kernel: double_conv.7
= control target key start
LH: loop header
LB: loop body
LE: loop exit
PB: predicated region body
PF: predicated region fallthrough
CT: control target
= control target key end

     0   :  { %s1023_s0 = inlined_call_operand.vmem [shape: bf16[512,128], index: 0, kind: input, shape index: {}]   ;;  %s1024_s1 = inlined_call_operand.vmem [shape: f32[1,128], index: 1, kind: input, shape index: {}]   ;;  %s1025_s2 = inlined_call_operand.vmem [shape: f32[1,128], index: 2, kind: input, shape index: {}]   ;;  %s1026_s3 = inlined_call_operand.vmem [shape: f32[512,128], index: 3, kind: output, shape index: {}]  }
   0x1   :  { %v419_v0 = vld [vmem:[%s1023_s0] sm:$0xff]   ;;  %v546_v4 = vld [vmem:[%s1023_s0 + $0x8] sm:$0xff]   ;;  %v547_v5 = vld [vmem:[%s1023_s0 + $0x10] sm:$0xff]  }
   0x2   :  { %v603_v1 = vld [vmem:[%s1024_s1] ss:$0 sm:$0xff]  ;;  %v420_v2 = vunpack.c.l.bf16 %v419_v0  ;;  %v421_v3 = vunpack.c.h.bf16 %v419_v0  ;;  %v548_v6 = vld [vmem:[%s1023_s0 + $0x18] sm:$0xff]   ;;  %v424_v8 = vunpack.c.l.bf16 %v546_v4  ;;  %v425_v9 = vunpack.c.h.bf16 %v546_v4  ;;  %v550_v33 = vld [vmem:[%s1023_s0 + $0x28] sm:$0xff]  }
   0x3   :  { %v617_v7 = vld [vmem:[%s1025_s2] ss:$0 sm:$0xff]  ;;  %v428_v10 = vunpack.c.l.bf16 %v547_v5  ;;  %v429_v11 = vunpack.c.h.bf16 %v547_v5  ;;  %v432_v14 = vunpack.c.l.bf16 %v548_v6  ;;  %v433_v15 = vunpack.c.h.bf16 %v548_v6  ;;  %v551_v34 = vld [vmem:[%s1023_s0 + $0x30] sm:$0xff]   ;;  %v552_v39 = vld [vmem:[%s1023_s0 + $0x38] sm:$0xff]  }
   0x4   :  { %v149_v12 = vmul.f32 %v420_v2, %v603_v1  ;;  %v150_v13 = vmul.f32 %v421_v3, %v603_v1  ;;  %v151_v16 = vmul.f32 %v424_v8, %v603_v1  ;;  %v152_v17 = vmul.f32 %v425_v9, %v603_v1  ;;  %v549_v28 = vld [vmem:[%s1023_s0 + $0x20] sm:$0xff]   ;;  %v554_v6 = vld [vmem:[%s1023_s0 + $0x48] sm:$0xff]   ;;  %v555_v8 = vld [vmem:[%s1023_s0 + $0x50] sm:$0xff]  }
   0x5   :  { %v153_v18 = vmul.f32 %v428_v10, %v603_v1  ;;  %v154_v19 = vmul.f32 %v429_v11, %v603_v1  ;;  %v155_v22 = vmul.f32 %v432_v14, %v603_v1  ;;  %v156_v23 = vmul.f32 %v433_v15, %v603_v1  ;;  %v553_v0 = vld [vmem:[%s1023_s0 + $0x40] sm:$0xff]  }
   0x6   :  { %v220_v20 = vadd.f32 %v617_v7, %v149_v12  ;;  %v221_v21 = vadd.f32 %v617_v7, %v150_v13  ;;  %v222_v24 = vadd.f32 %v617_v7, %v151_v16  ;;  %v223_v25 = vadd.f32 %v617_v7, %v152_v17  ;;  %v556_v13 = vld [vmem:[%s1023_s0 + $0x58] sm:$0xff]  }
   0x7   :  { %v224_v26 = vadd.f32 %v617_v7, %v153_v18  ;;  %v225_v27 = vadd.f32 %v617_v7, %v154_v19  ;;  %v226_v31 = vadd.f32 %v617_v7, %v155_v22  ;;  %v227_v32 = vadd.f32 %v617_v7, %v156_v23 }
   0x8   :  { %v284_v29 = vmax.f32 %v220_v20, 0.0  ;;  %v285_v30 = vmax.f32 %v221_v21, 0.0  ;;  %v286_v35 = vmax.f32 %v222_v24, 0.0  ;;  %v287_v36 = vmax.f32 %v223_v25, 0.0 }
   0x9   :  { %v288_v37 = vmax.f32 %v224_v26, 0.0  ;;  %v289_v38 = vmax.f32 %v225_v27, 0.0  ;;  %v290_v40 = vmax.f32 %v226_v31, 0.0  ;;  %v291_v41 = vmax.f32 %v227_v32, 0.0 }
   0xa   :  { %348 = vst [vmem:[%s1026_s3] sm:$0xff] %v284_v29  ;;  %349 = vst [vmem:[%s1026_s3 + $0x8] sm:$0xff] %v285_v30  ;;  %v436_v42 = vunpack.c.l.bf16 %v549_v28  ;;  %v437_v43 = vunpack.c.h.bf16 %v549_v28  ;;  %v440_v44 = vunpack.c.l.bf16 %v550_v33  ;;  %v441_v45 = vunpack.c.h.bf16 %v550_v33 }
   0xb   :  { %350 = vst [vmem:[%s1026_s3 + $0x10] sm:$0xff] %v286_v35  ;;  %351 = vst [vmem:[%s1026_s3 + $0x18] sm:$0xff] %v287_v36  ;;  %v444_v46 = vunpack.c.l.bf16 %v551_v34  ;;  %v445_v47 = vunpack.c.h.bf16 %v551_v34  ;;  %v448_v50 = vunpack.c.l.bf16 %v552_v39  ;;  %v449_v51 = vunpack.c.h.bf16 %v552_v39 }
   0xc   :  { %352 = vst [vmem:[%s1026_s3 + $0x20] sm:$0xff] %v288_v37  ;;  %353 = vst [vmem:[%s1026_s3 + $0x28] sm:$0xff] %v289_v38  ;;  %v157_v48 = vmul.f32 %v436_v42, %v603_v1  ;;  %v158_v49 = vmul.f32 %v437_v43, %v603_v1  ;;  %v159_v52 = vmul.f32 %v440_v44, %v603_v1  ;;  %v452_v16 = vunpack.c.l.bf16 %v553_v0  ;;  %v557_v38 = vld [vmem:[%s1023_s0 + $0x60] sm:$0xff]   ;;  %v558_v43 = vld [vmem:[%s1023_s0 + $0x68] sm:$0xff]  }
   0xd   :  { %354 = vst [vmem:[%s1026_s3 + $0x30] sm:$0xff] %v290_v40  ;;  %355 = vst [vmem:[%s1026_s3 + $0x38] sm:$0xff] %v291_v41  ;;  %v160_v53 = vmul.f32 %v441_v45, %v603_v1  ;;  %v161_v54 = vmul.f32 %v444_v46, %v603_v1  ;;  %v162_v55 = vmul.f32 %v445_v47, %v603_v1  ;;  %v453_v17 = vunpack.c.h.bf16 %v553_v0  ;;  %v559_v44 = vld [vmem:[%s1023_s0 + $0x70] sm:$0xff]  }
   0xe   :  { %v228_v56 = vadd.f32 %v617_v7, %v157_v48  ;;  %v229_v57 = vadd.f32 %v617_v7, %v158_v49  ;;  %v163_v58 = vmul.f32 %v448_v50, %v603_v1  ;;  %v164_v59 = vmul.f32 %v449_v51, %v603_v1  ;;  %v560_v49 = vld [vmem:[%s1023_s0 + $0x78] sm:$0xff]  }
   0xf   :  { %v230_v60 = vadd.f32 %v617_v7, %v159_v52  ;;  %v231_v61 = vadd.f32 %v617_v7, %v160_v53  ;;  %v232_v62 = vadd.f32 %v617_v7, %v161_v54  ;;  %v233_v63 = vadd.f32 %v617_v7, %v162_v55 }
  0x10   :  { %v292_v2 = vmax.f32 %v228_v56, 0.0  ;;  %v293_v3 = vmax.f32 %v229_v57, 0.0  ;;  %v234_v4 = vadd.f32 %v617_v7, %v163_v58  ;;  %v235_v5 = vadd.f32 %v617_v7, %v164_v59 }
  0x11   :  { %v294_v9 = vmax.f32 %v230_v60, 0.0  ;;  %v295_v10 = vmax.f32 %v231_v61, 0.0  ;;  %v296_v11 = vmax.f32 %v232_v62, 0.0  ;;  %v297_v12 = vmax.f32 %v233_v63, 0.0 }
  0x12   :  { %356 = vst [vmem:[%s1026_s3 + $0x40] sm:$0xff] %v292_v2  ;;  %357 = vst [vmem:[%s1026_s3 + $0x48] sm:$0xff] %v293_v3  ;;  %v298_v14 = vmax.f32 %v234_v4, 0.0  ;;  %v299_v15 = vmax.f32 %v235_v5, 0.0  ;;  %v456_v18 = vunpack.c.l.bf16 %v554_v6  ;;  %v457_v19 = vunpack.c.h.bf16 %v554_v6 }
  0x13   :  { %358 = vst [vmem:[%s1026_s3 + $0x50] sm:$0xff] %v294_v9  ;;  %359 = vst [vmem:[%s1026_s3 + $0x58] sm:$0xff] %v295_v10  ;;  %v460_v20 = vunpack.c.l.bf16 %v555_v8  ;;  %v461_v21 = vunpack.c.h.bf16 %v555_v8  ;;  %v165_v22 = vmul.f32 %v452_v16, %v603_v1  ;;  %v166_v23 = vmul.f32 %v453_v17, %v603_v1  ;;  %v562_v17 = vld [vmem:[%s1023_s0 + $0x88] sm:$0xff]  }
  0x14   :  { %360 = vst [vmem:[%s1026_s3 + $0x60] sm:$0xff] %v296_v11  ;;  %361 = vst [vmem:[%s1026_s3 + $0x68] sm:$0xff] %v297_v12  ;;  %v464_v24 = vunpack.c.l.bf16 %v556_v13  ;;  %v465_v25 = vunpack.c.h.bf16 %v556_v13  ;;  %v167_v26 = vmul.f32 %v456_v18, %v603_v1  ;;  %v168_v27 = vmul.f32 %v457_v19, %v603_v1  ;;  %v561_v12 = vld [vmem:[%s1023_s0 + $0x80] sm:$0xff]   ;;  %v563_v18 = vld [vmem:[%s1023_s0 + $0x90] sm:$0xff]  }
  0x15   :  { %362 = vst [vmem:[%s1026_s3 + $0x70] sm:$0xff] %v298_v14  ;;  %363 = vst [vmem:[%s1026_s3 + $0x78] sm:$0xff] %v299_v15  ;;  %v169_v28 = vmul.f32 %v460_v20, %v603_v1  ;;  %v170_v29 = vmul.f32 %v461_v21, %v603_v1  ;;  %v236_v30 = vadd.f32 %v617_v7, %v165_v22  ;;  %v468_v52 = vunpack.c.l.bf16 %v557_v38 }
  0x16   :  { %v237_v31 = vadd.f32 %v617_v7, %v166_v23  ;;  %v171_v32 = vmul.f32 %v464_v24, %v603_v1  ;;  %v172_v33 = vmul.f32 %v465_v25, %v603_v1  ;;  %v238_v34 = vadd.f32 %v617_v7, %v167_v26  ;;  %v564_v23 = vld [vmem:[%s1023_s0 + $0x98] sm:$0xff]  }
  0x17   :  { %v239_v35 = vadd.f32 %v617_v7, %v168_v27  ;;  %v240_v36 = vadd.f32 %v617_v7, %v169_v28  ;;  %v241_v37 = vadd.f32 %v617_v7, %v170_v29  ;;  %v300_v39 = vmax.f32 %v236_v30, 0.0 }
  0x18   :  { %v301_v40 = vmax.f32 %v237_v31, 0.0  ;;  %v242_v41 = vadd.f32 %v617_v7, %v171_v32  ;;  %v243_v42 = vadd.f32 %v617_v7, %v172_v33  ;;  %v302_v45 = vmax.f32 %v238_v34, 0.0 }
  0x19   :  { %v303_v46 = vmax.f32 %v239_v35, 0.0  ;;  %v304_v47 = vmax.f32 %v240_v36, 0.0  ;;  %v305_v48 = vmax.f32 %v241_v37, 0.0  ;;  %364 = vst [vmem:[%s1026_s3 + $0x80] sm:$0xff] %v300_v39  ;;  %v469_v53 = vunpack.c.h.bf16 %v557_v38 }
  0x1a   :  { %365 = vst [vmem:[%s1026_s3 + $0x88] sm:$0xff] %v301_v40  ;;  %v306_v50 = vmax.f32 %v242_v41, 0.0  ;;  %v307_v51 = vmax.f32 %v243_v42, 0.0  ;;  %366 = vst [vmem:[%s1026_s3 + $0x90] sm:$0xff] %v302_v45  ;;  %v472_v54 = vunpack.c.l.bf16 %v558_v43  ;;  %v473_v55 = vunpack.c.h.bf16 %v558_v43 }
  0x1b   :  { %367 = vst [vmem:[%s1026_s3 + $0x98] sm:$0xff] %v303_v46  ;;  %368 = vst [vmem:[%s1026_s3 + $0xa0] sm:$0xff] %v304_v47  ;;  %v476_v56 = vunpack.c.l.bf16 %v559_v44  ;;  %v477_v57 = vunpack.c.h.bf16 %v559_v44  ;;  %v173_v58 = vmul.f32 %v468_v52, %v603_v1  ;;  %v174_v59 = vmul.f32 %v469_v53, %v603_v1  ;;  %v566_v53 = vld [vmem:[%s1023_s0 + $0xa8] sm:$0xff]  }
  0x1c   :  { %369 = vst [vmem:[%s1026_s3 + $0xa8] sm:$0xff] %v305_v48  ;;  %370 = vst [vmem:[%s1026_s3 + $0xb0] sm:$0xff] %v306_v50  ;;  %v480_v60 = vunpack.c.l.bf16 %v560_v49  ;;  %v481_v61 = vunpack.c.h.bf16 %v560_v49  ;;  %v175_v62 = vmul.f32 %v472_v54, %v603_v1  ;;  %v176_v63 = vmul.f32 %v473_v55, %v603_v1  ;;  %v565_v48 = vld [vmem:[%s1023_s0 + $0xa0] sm:$0xff]   ;;  %v567_v54 = vld [vmem:[%s1023_s0 + $0xb0] sm:$0xff]  }
  0x1d   :  { %371 = vst [vmem:[%s1026_s3 + $0xb8] sm:$0xff] %v307_v51  ;;  %v177_v0 = vmul.f32 %v476_v56, %v603_v1  ;;  %v178_v2 = vmul.f32 %v477_v57, %v603_v1  ;;  %v244_v3 = vadd.f32 %v617_v7, %v173_v58  ;;  %v245_v4 = vadd.f32 %v617_v7, %v174_v59  ;;  %v568_v59 = vld [vmem:[%s1023_s0 + $0xb8] sm:$0xff]  }
  0x1e   :  { %v179_v5 = vmul.f32 %v480_v60, %v603_v1  ;;  %v180_v6 = vmul.f32 %v481_v61, %v603_v1  ;;  %v246_v8 = vadd.f32 %v617_v7, %v175_v62  ;;  %v247_v9 = vadd.f32 %v617_v7, %v176_v63 }
  0x1f   :  { %v248_v10 = vadd.f32 %v617_v7, %v177_v0  ;;  %v249_v11 = vadd.f32 %v617_v7, %v178_v2  ;;  %v308_v13 = vmax.f32 %v244_v3, 0.0  ;;  %v309_v14 = vmax.f32 %v245_v4, 0.0 }
  0x20   :  { %v250_v15 = vadd.f32 %v617_v7, %v179_v5  ;;  %v251_v16 = vadd.f32 %v617_v7, %v180_v6  ;;  %v310_v19 = vmax.f32 %v246_v8, 0.0  ;;  %v311_v20 = vmax.f32 %v247_v9, 0.0 }
  0x21   :  { %v312_v21 = vmax.f32 %v248_v10, 0.0  ;;  %v313_v22 = vmax.f32 %v249_v11, 0.0  ;;  %372 = vst [vmem:[%s1026_s3 + $0xc0] sm:$0xff] %v308_v13  ;;  %373 = vst [vmem:[%s1026_s3 + $0xc8] sm:$0xff] %v309_v14  ;;  %v484_v26 = vunpack.c.l.bf16 %v561_v12  ;;  %v485_v27 = vunpack.c.h.bf16 %v561_v12 }
  0x22   :  { %v314_v24 = vmax.f32 %v250_v15, 0.0  ;;  %v315_v25 = vmax.f32 %v251_v16, 0.0  ;;  %374 = vst [vmem:[%s1026_s3 + $0xd0] sm:$0xff] %v310_v19  ;;  %375 = vst [vmem:[%s1026_s3 + $0xd8] sm:$0xff] %v311_v20  ;;  %v488_v28 = vunpack.c.l.bf16 %v562_v17  ;;  %v489_v29 = vunpack.c.h.bf16 %v562_v17 }
  0x23   :  { %376 = vst [vmem:[%s1026_s3 + $0xe0] sm:$0xff] %v312_v21  ;;  %377 = vst [vmem:[%s1026_s3 + $0xe8] sm:$0xff] %v313_v22  ;;  %v492_v30 = vunpack.c.l.bf16 %v563_v18  ;;  %v493_v31 = vunpack.c.h.bf16 %v563_v18  ;;  %v181_v32 = vmul.f32 %v484_v26, %v603_v1  ;;  %v182_v33 = vmul.f32 %v485_v27, %v603_v1  ;;  %v569_v22 = vld [vmem:[%s1023_s0 + $0xc0] sm:$0xff]   ;;  %v570_v27 = vld [vmem:[%s1023_s0 + $0xc8] sm:$0xff]  }
  0x24   :  { %378 = vst [vmem:[%s1026_s3 + $0xf0] sm:$0xff] %v314_v24  ;;  %379 = vst [vmem:[%s1026_s3 + $0xf8] sm:$0xff] %v315_v25  ;;  %v496_v34 = vunpack.c.l.bf16 %v564_v23  ;;  %v497_v35 = vunpack.c.h.bf16 %v564_v23  ;;  %v183_v36 = vmul.f32 %v488_v28, %v603_v1  ;;  %v184_v37 = vmul.f32 %v489_v29, %v603_v1  ;;  %v571_v28 = vld [vmem:[%s1023_s0 + $0xd0] sm:$0xff]  }
  0x25   :  { %v185_v38 = vmul.f32 %v492_v30, %v603_v1  ;;  %v186_v39 = vmul.f32 %v493_v31, %v603_v1  ;;  %v252_v40 = vadd.f32 %v617_v7, %v181_v32  ;;  %v253_v41 = vadd.f32 %v617_v7, %v182_v33  ;;  %v572_v33 = vld [vmem:[%s1023_s0 + $0xd8] sm:$0xff]  }
  0x26   :  { %v187_v42 = vmul.f32 %v496_v34, %v603_v1  ;;  %v188_v43 = vmul.f32 %v497_v35, %v603_v1  ;;  %v254_v44 = vadd.f32 %v617_v7, %v183_v36  ;;  %v255_v45 = vadd.f32 %v617_v7, %v184_v37 }
  0x27   :  { %v256_v46 = vadd.f32 %v617_v7, %v185_v38  ;;  %v257_v47 = vadd.f32 %v617_v7, %v186_v39  ;;  %v316_v49 = vmax.f32 %v252_v40, 0.0  ;;  %v317_v50 = vmax.f32 %v253_v41, 0.0 }
  0x28   :  { %v258_v51 = vadd.f32 %v617_v7, %v187_v42  ;;  %v259_v52 = vadd.f32 %v617_v7, %v188_v43  ;;  %v318_v55 = vmax.f32 %v254_v44, 0.0  ;;  %v319_v56 = vmax.f32 %v255_v45, 0.0 }
  0x29   :  { %v320_v57 = vmax.f32 %v256_v46, 0.0  ;;  %v321_v58 = vmax.f32 %v257_v47, 0.0  ;;  %380 = vst [vmem:[%s1026_s3 + $0x100] sm:$0xff] %v316_v49  ;;  %381 = vst [vmem:[%s1026_s3 + $0x108] sm:$0xff] %v317_v50  ;;  %v500_v62 = vunpack.c.l.bf16 %v565_v48  ;;  %v501_v63 = vunpack.c.h.bf16 %v565_v48 }
  0x2a   :  { %v322_v60 = vmax.f32 %v258_v51, 0.0  ;;  %v323_v61 = vmax.f32 %v259_v52, 0.0  ;;  %382 = vst [vmem:[%s1026_s3 + $0x110] sm:$0xff] %v318_v55  ;;  %383 = vst [vmem:[%s1026_s3 + $0x118] sm:$0xff] %v319_v56  ;;  %v504_v0 = vunpack.c.l.bf16 %v566_v53  ;;  %v505_v2 = vunpack.c.h.bf16 %v566_v53 }
  0x2b   :  { %384 = vst [vmem:[%s1026_s3 + $0x120] sm:$0xff] %v320_v57  ;;  %385 = vst [vmem:[%s1026_s3 + $0x128] sm:$0xff] %v321_v58  ;;  %v508_v3 = vunpack.c.l.bf16 %v567_v54  ;;  %v509_v4 = vunpack.c.h.bf16 %v567_v54  ;;  %v189_v5 = vmul.f32 %v500_v62, %v603_v1  ;;  %v190_v6 = vmul.f32 %v501_v63, %v603_v1  ;;  %v573_v58 = vld [vmem:[%s1023_s0 + $0xe0] sm:$0xff]   ;;  %v574_v63 = vld [vmem:[%s1023_s0 + $0xe8] sm:$0xff]  }
  0x2c   :  { %386 = vst [vmem:[%s1026_s3 + $0x130] sm:$0xff] %v322_v60  ;;  %387 = vst [vmem:[%s1026_s3 + $0x138] sm:$0xff] %v323_v61  ;;  %v512_v8 = vunpack.c.l.bf16 %v568_v59  ;;  %v513_v9 = vunpack.c.h.bf16 %v568_v59  ;;  %v191_v10 = vmul.f32 %v504_v0, %v603_v1  ;;  %v192_v11 = vmul.f32 %v505_v2, %v603_v1  ;;  %v575_v0 = vld [vmem:[%s1023_s0 + $0xf0] sm:$0xff]  }
  0x2d   :  { %v193_v12 = vmul.f32 %v508_v3, %v603_v1  ;;  %v194_v13 = vmul.f32 %v509_v4, %v603_v1  ;;  %v260_v14 = vadd.f32 %v617_v7, %v189_v5  ;;  %v261_v15 = vadd.f32 %v617_v7, %v190_v6  ;;  %v576_v6 = vld [vmem:[%s1023_s0 + $0xf8] sm:$0xff]  }
  0x2e   :  { %v195_v16 = vmul.f32 %v512_v8, %v603_v1  ;;  %v196_v17 = vmul.f32 %v513_v9, %v603_v1  ;;  %v262_v18 = vadd.f32 %v617_v7, %v191_v10  ;;  %v263_v19 = vadd.f32 %v617_v7, %v192_v11 }
  0x2f   :  { %v264_v20 = vadd.f32 %v617_v7, %v193_v12  ;;  %v265_v21 = vadd.f32 %v617_v7, %v194_v13  ;;  %v324_v23 = vmax.f32 %v260_v14, 0.0  ;;  %v325_v24 = vmax.f32 %v261_v15, 0.0 }
  0x30   :  { %v266_v25 = vadd.f32 %v617_v7, %v195_v16  ;;  %v267_v26 = vadd.f32 %v617_v7, %v196_v17  ;;  %v326_v29 = vmax.f32 %v262_v18, 0.0  ;;  %v327_v30 = vmax.f32 %v263_v19, 0.0 }
  0x31   :  { %v328_v31 = vmax.f32 %v264_v20, 0.0  ;;  %v329_v32 = vmax.f32 %v265_v21, 0.0  ;;  %388 = vst [vmem:[%s1026_s3 + $0x140] sm:$0xff] %v324_v23  ;;  %389 = vst [vmem:[%s1026_s3 + $0x148] sm:$0xff] %v325_v24  ;;  %v516_v36 = vunpack.c.l.bf16 %v569_v22  ;;  %v517_v37 = vunpack.c.h.bf16 %v569_v22 }
  0x32   :  { %v330_v34 = vmax.f32 %v266_v25, 0.0  ;;  %v331_v35 = vmax.f32 %v267_v26, 0.0  ;;  %390 = vst [vmem:[%s1026_s3 + $0x150] sm:$0xff] %v326_v29  ;;  %391 = vst [vmem:[%s1026_s3 + $0x158] sm:$0xff] %v327_v30  ;;  %v520_v38 = vunpack.c.l.bf16 %v570_v27  ;;  %v521_v39 = vunpack.c.h.bf16 %v570_v27 }
  0x33   :  { %392 = vst [vmem:[%s1026_s3 + $0x160] sm:$0xff] %v328_v31  ;;  %393 = vst [vmem:[%s1026_s3 + $0x168] sm:$0xff] %v329_v32  ;;  %v524_v40 = vunpack.c.l.bf16 %v571_v28  ;;  %v525_v41 = vunpack.c.h.bf16 %v571_v28  ;;  %v197_v42 = vmul.f32 %v516_v36, %v603_v1  ;;  %v198_v43 = vmul.f32 %v517_v37, %v603_v1 }
  0x34   :  { %394 = vst [vmem:[%s1026_s3 + $0x170] sm:$0xff] %v330_v34  ;;  %395 = vst [vmem:[%s1026_s3 + $0x178] sm:$0xff] %v331_v35  ;;  %v528_v44 = vunpack.c.l.bf16 %v572_v33  ;;  %v529_v45 = vunpack.c.h.bf16 %v572_v33  ;;  %v199_v46 = vmul.f32 %v520_v38, %v603_v1  ;;  %v200_v47 = vmul.f32 %v521_v39, %v603_v1 }
  0x35   :  { %v201_v48 = vmul.f32 %v524_v40, %v603_v1  ;;  %v202_v49 = vmul.f32 %v525_v41, %v603_v1  ;;  %v268_v50 = vadd.f32 %v617_v7, %v197_v42  ;;  %v269_v51 = vadd.f32 %v617_v7, %v198_v43 }
  0x36   :  { %v203_v52 = vmul.f32 %v528_v44, %v603_v1  ;;  %v204_v53 = vmul.f32 %v529_v45, %v603_v1  ;;  %v270_v54 = vadd.f32 %v617_v7, %v199_v46  ;;  %v271_v55 = vadd.f32 %v617_v7, %v200_v47 }
  0x37   :  { %v272_v56 = vadd.f32 %v617_v7, %v201_v48  ;;  %v273_v57 = vadd.f32 %v617_v7, %v202_v49  ;;  %v332_v59 = vmax.f32 %v268_v50, 0.0  ;;  %v333_v60 = vmax.f32 %v269_v51, 0.0 }
  0x38   :  { %v274_v61 = vadd.f32 %v617_v7, %v203_v52  ;;  %v275_v62 = vadd.f32 %v617_v7, %v204_v53  ;;  %v334_v2 = vmax.f32 %v270_v54, 0.0  ;;  %v335_v3 = vmax.f32 %v271_v55, 0.0 }
  0x39   :  { %v336_v4 = vmax.f32 %v272_v56, 0.0  ;;  %v337_v5 = vmax.f32 %v273_v57, 0.0  ;;  %396 = vst [vmem:[%s1026_s3 + $0x180] sm:$0xff] %v332_v59  ;;  %397 = vst [vmem:[%s1026_s3 + $0x188] sm:$0xff] %v333_v60  ;;  %v532_v10 = vunpack.c.l.bf16 %v573_v58  ;;  %v533_v11 = vunpack.c.h.bf16 %v573_v58 }
  0x3a   :  { %v338_v8 = vmax.f32 %v274_v61, 0.0  ;;  %v339_v9 = vmax.f32 %v275_v62, 0.0  ;;  %398 = vst [vmem:[%s1026_s3 + $0x190] sm:$0xff] %v334_v2  ;;  %399 = vst [vmem:[%s1026_s3 + $0x198] sm:$0xff] %v335_v3  ;;  %v536_v12 = vunpack.c.l.bf16 %v574_v63  ;;  %v537_v13 = vunpack.c.h.bf16 %v574_v63 }
  0x3b   :  { %400 = vst [vmem:[%s1026_s3 + $0x1a0] sm:$0xff] %v336_v4  ;;  %401 = vst [vmem:[%s1026_s3 + $0x1a8] sm:$0xff] %v337_v5  ;;  %v540_v14 = vunpack.c.l.bf16 %v575_v0  ;;  %v541_v15 = vunpack.c.h.bf16 %v575_v0  ;;  %v205_v16 = vmul.f32 %v532_v10, %v603_v1  ;;  %v206_v17 = vmul.f32 %v533_v11, %v603_v1 }
  0x3c   :  { %402 = vst [vmem:[%s1026_s3 + $0x1b0] sm:$0xff] %v338_v8  ;;  %403 = vst [vmem:[%s1026_s3 + $0x1b8] sm:$0xff] %v339_v9  ;;  %v544_v18 = vunpack.c.l.bf16 %v576_v6  ;;  %v545_v19 = vunpack.c.h.bf16 %v576_v6  ;;  %v207_v20 = vmul.f32 %v536_v12, %v603_v1  ;;  %v208_v21 = vmul.f32 %v537_v13, %v603_v1 }
  0x3d   :  { %v209_v22 = vmul.f32 %v540_v14, %v603_v1  ;;  %v210_v23 = vmul.f32 %v541_v15, %v603_v1  ;;  %v276_v24 = vadd.f32 %v617_v7, %v205_v16  ;;  %v277_v25 = vadd.f32 %v617_v7, %v206_v17 }
  0x3e   :  { %v211_v26 = vmul.f32 %v544_v18, %v603_v1  ;;  %v212_v27 = vmul.f32 %v545_v19, %v603_v1  ;;  %v278_v28 = vadd.f32 %v617_v7, %v207_v20  ;;  %v279_v29 = vadd.f32 %v617_v7, %v208_v21 }
  0x3f   :  { %v280_v30 = vadd.f32 %v617_v7, %v209_v22  ;;  %v281_v31 = vadd.f32 %v617_v7, %v210_v23  ;;  %v340_v32 = vmax.f32 %v276_v24, 0.0  ;;  %v341_v33 = vmax.f32 %v277_v25, 0.0 }
  0x40   :  { %v282_v34 = vadd.f32 %v617_v7, %v211_v26  ;;  %v283_v35 = vadd.f32 %v617_v7, %v212_v27  ;;  %v342_v36 = vmax.f32 %v278_v28, 0.0  ;;  %v343_v37 = vmax.f32 %v279_v29, 0.0 }
  0x41   :  { %v344_v38 = vmax.f32 %v280_v30, 0.0  ;;  %v345_v39 = vmax.f32 %v281_v31, 0.0  ;;  %404 = vst [vmem:[%s1026_s3 + $0x1c0] sm:$0xff] %v340_v32  ;;  %405 = vst [vmem:[%s1026_s3 + $0x1c8] sm:$0xff] %v341_v33 }
  0x42   :  { %v346_v1 = vmax.f32 %v282_v34, 0.0  ;;  %v347_v40 = vmax.f32 %v283_v35, 0.0  ;;  %406 = vst [vmem:[%s1026_s3 + $0x1d0] sm:$0xff] %v342_v36  ;;  %407 = vst [vmem:[%s1026_s3 + $0x1d8] sm:$0xff] %v343_v37 }
  0x43   :  { %408 = vst [vmem:[%s1026_s3 + $0x1e0] sm:$0xff] %v344_v38  ;;  %409 = vst [vmem:[%s1026_s3 + $0x1e8] sm:$0xff] %v345_v39 }
  0x44   :  { %410 = vst [vmem:[%s1026_s3 + $0x1f0] sm:$0xff] %v346_v1  ;;  %411 = vst [vmem:[%s1026_s3 + $0x1f8] sm:$0xff] %v347_v40 }

// kernel: double_conv.4
= control target key start
LH: loop header
LB: loop body
LE: loop exit
PB: predicated region body
PF: predicated region fallthrough
CT: control target
= control target key end

     0   :  { %s6663_s12 = smov 0   ;;  %s6665_s13 = smov 0   ;;  %s8532_s0 = inlined_call_operand.vmem [shape: bf16[2,18,18,4], index: 0, kind: input, shape index: {}]   ;;  %s8533_s1 = inlined_call_operand.vmem [shape: bf16[9,4,128], index: 1, kind: input, shape index: {}]   ;;  %s8534_s2 = inlined_call_operand.vmem [shape: bf16[2,256,128], index: 2, kind: output, shape index: {0}]   ;;  %s8535_s3 = inlined_call_operand.vmem [shape: f32[2,1,8,128], index: 3, kind: output, shape index: {1}]  }
   0x1   :  { %s6667_s14 = smov 0  }
   0x2 LB: > { %s26_s15 = sadd.s32 1, %s6636_s13  ;;  %p5092_p0 = scmp.ge.s32.totalorder %s6640_s14, 1  ;;  %s6640_s14 = sphi %s6667_s14, %s14_s14   ;;  %s6636_s13 = sphi %s6665_s13, %s8603_s13   ;;  %s6632_s12 = sphi %s6663_s12, %s8602_s12  }
   0x3   : > { %p28_p1 = scmp.ge.s32.totalorder %s26_s15, 2  ;;  %p156_p2 = scmp.lt.s32.totalorder %s6640_s14, 3 }
   0x5   : > { %s8605_s15 = smov (%p28_p1, %s26_s15), 0  ;;  %p157_p3 = pnand %p5092_p0, %p156_p2 }
   0x7   : > { %160 = sbr.rel (%p157_p3) target bundleno = 604 (0x25c), region = 28 }
   0xe   : > { %v5273_v0 = vld [vmem:[%s8533_s1 + $0x2] sm:$0x3]  ;;  %vm2156_vm0 = vcmask 1041408   ;;  %v5404_v1 = vld [vmem:[%s8533_s1 + $0x8] sm:$0x3]  ;;  %p191_p4 = scmp.lt.s32.totalorder %s6632_s12, 1 }
   0xf   : > { %6448 = vmatprep.subr.msk.bf16.mxu1 %vm2156_vm0, %v5273_v0  ;;  %6452 = vmatprep.subr.msk.bf16.mxu0 %vm2156_vm0, %v5404_v1  ;;  %v2158_v2 = vsel %vm2156_vm0, %v5273_v0, 0  ;;  %v6691_v3 = vsel %vm2156_vm0, %v5404_v1, 0  ;;  %v2056_v4 = vld [vmem:[%s8533_s1] sm:$0x3]  ;;  %v5437_v5 = vld [vmem:[%s8533_s1 + $0xa] sm:$0x3] }
  0x10   : > { %8547 = vst [vmem:[#allocation2_spill] sm:$0xff] %v6691_v3  ;;  %5885 = vmatpush3.bf16.msra.mxu1 %v2158_v2  ;;  %6021 = vmatpush3.bf16.msra.mxu0 %v6691_v3  ;;  %s8607_s12 = smov (!%p191_p4, %s6632_s12), 1  ;;  %vm266_vm1 = vsmask.f32 3328  ;;  %vm267_vm2 = vsmask.f32 7440 }
  0x11   : > { %6449 = vmatprep.subr.msk.bf16.mxu1 %vm2156_vm0, %v2056_v4  ;;  %6454 = vmatprep.subr.msk.bf16.mxu0 %vm2156_vm0, %v5437_v5  ;;  %s6458_s24 = smul.u32 216, %s8607_s12  ;;  %vm2107_vm3 = vcmask 31744   ;;  %v6721_v17 = vsel %vm2156_vm0, %v2056_v4, 0  ;;  %vm6730_vm4 = vmor %vm266_vm1, %vm267_vm2  ;;  %v6735_v36 = vsel %vm2156_vm0, %v5437_v5, 0  ;;  %v6745_v50 = vld [vmem:[%s8533_s1 + $0xc] sm:$0x3] }
  0x12   : > { %v6760_v1 = vsel %vm2156_vm0, %v6745_v50, 0  ;;  %vm717_vm5 = vcmask 1042432   ;;  %vm718_vm6 = vcmask 1046532   ;;  %s5096_s19 = sshll.u32 %s8607_s12, 3  ;;  %s5603_s23 = sshll.u32 %s8607_s12, 7 }
  0x13   : > { %s6708_s27 = scalar_lea.vmem %s8532_s0, %s6458_s24  ;;  %vm6969_vm7 = vmor %vm717_vm5, %vm718_vm6  ;;  %s8484_s22 = scalar_lea.vmem %s8535_s3, %s5096_s19 }
  0x14   : > { %v218_v6 = vld [vmem:[%s6708_s27] sm:$0xf]  ;;  %v219_v7 = vld [vmem:[%s6708_s27 + $0x4] sm:$0xf]  ;;  %v250_v8 = vld [vmem:[%s6708_s27 + $0x8] sm:$0x1]  ;;  %s8499_s26 = scalar_lea.vmem %s8534_s2, %s5603_s23 }
  0x15   : > { %v270_v9 = vshrl.u32 %v218_v6, 16  ;;  %v273_v10 = vshll.u32 %v218_v6, 16  ;;  %v279_v11 = vshll.u32 %v219_v7, 16  ;;  %v283_v12 = vshrl.u32 %v219_v7, 16  ;;  %v5113_v13 = vld [vmem:[%s6708_s27 + $0xc] sm:$0xf] }
  0x16   : > { %v289_v14 = vshll.u32 %v250_v8, 16  ;;  %v6715_v15 = vld [vmem:[%s6708_s27 + $0x10] sm:$0xf]  ;;  %v6718_v16 = vld [vmem:[%s6708_s27 + $0x14] sm:$0x1]  ;;  %v885_v23 = vshrl.u32 %v5113_v13, 16 }
  0x17   : > { %v272_v18 = vrot.slane %v270_v9, 4  ;;  %v275_v19 = vrot.slane %v273_v10, 5  ;;  %v281_v20 = vrot.slane %v279_v11, 5  ;;  %v285_v21 = vrot.slane %v283_v12, 4  ;;  %v220_v30 = vld [vmem:[%s6708_s27 + $0xc] sm:$0xf] }
  0x18   : > { %v291_v22 = vrot.slane %v289_v14, 5  ;;  %v888_v24 = vshll.u32 %v5113_v13, 16  ;;  %v894_v25 = vshll.u32 %v6715_v15, 16  ;;  %v898_v28 = vshrl.u32 %v6715_v15, 16  ;;  %v221_v31 = vld [vmem:[%s6708_s27 + $0x10] sm:$0xf] }
  0x19   : > { %v276_v26 = vor.u32 %v275_v19, %v272_v18  ;;  %v286_v27 = vor.u32 %v285_v21, %v281_v20  ;;  %v904_v29 = vshll.u32 %v6718_v16, 16  ;;  %v887_v33 = vrot.slane %v885_v23, 4  ;;  %v251_v42 = vld [vmem:[%s6708_s27 + $0x14] sm:$0x1]  ;;  %v5115_v55 = vld [vmem:[%s6708_s27 + $0x18] sm:$0xf] }
  0x1a   : > { %v890_v34 = vrot.slane %v888_v24, 5  ;;  %v896_v35 = vrot.slane %v894_v25, 5  ;;  %v900_v39 = vrot.slane %v898_v28, 4  ;;  %v294_v43 = vshrl.u32 %v220_v30, 16  ;;  %v6749_v60 = vld [vmem:[%s6708_s27 + $0x1c] sm:$0xf] }
  0x1b   : > { %v277_v37 = vrot.slane %v276_v26, 4  ;;  %v287_v38 = vrot.slane %v286_v27, 4  ;;  %v906_v40 = vrot.slane %v904_v29, 5  ;;  %v297_v44 = vshll.u32 %v220_v30, 16  ;;  %v6756_v0 = vld [vmem:[%s6708_s27 + $0x20] sm:$0x1] }
  0x1c   : > { %v891_v41 = vor.u32 %v890_v34, %v887_v33  ;;  %v303_v45 = vshll.u32 %v221_v31, 16  ;;  %v901_v48 = vor.u32 %v900_v39, %v896_v35  ;;  %v307_v49 = vshrl.u32 %v221_v31, 16  ;;  %v222_v11 = vld [vmem:[%s6708_s27 + $0x18] sm:$0xf]  ;;  %v223_v19 = vld [vmem:[%s6708_s27 + $0x1c] sm:$0xf] }
  0x1d   : > { %v282_v46 = vsel %vm6730_vm4, %v277_v37, %v281_v20  ;;  %v292_v47 = vsel %vm6730_vm4, %v287_v38, %v291_v22  ;;  %v296_v53 = vrot.slane %v294_v43, 4  ;;  %v299_v54 = vrot.slane %v297_v44, 5  ;;  %v252_v24 = vld [vmem:[%s6708_s27 + $0x20] sm:$0x1]  ;;  %v5117_v29 = vld [vmem:[%s6708_s27 + $0x24] sm:$0xf] }
  0x1e   : > { %v5274_v51 = vcombine.low %v282_v46, %v292_v47  ;;  %v892_v52 = vrot.slane %v891_v41, 4  ;;  %v902_v56 = vrot.slane %v901_v48, 4  ;;  %v305_v57 = vrot.slane %v303_v45, 5  ;;  %v6783_v44 = vld [vmem:[%s6708_s27 + $0x28] sm:$0xf] }
  0x1f   : > { %v309_v58 = vrot.slane %v307_v49, 4  ;;  %v313_v59 = vshll.u32 %v251_v42, 16  ;;  %v1337_v62 = vrot.slane %v6718_v16, 5  ;;  %v300_v63 = vor.u32 %v299_v54, %v296_v53 }
  0x20   : > { %5886 = vmatprep.mubr.msk.bf16.mxu1 %vm2107_vm3, %v5274_v51  ;;  %v897_v61 = vsel %vm6730_vm4, %v892_v52, %v896_v35  ;;  %v907_v2 = vsel %vm6730_vm4, %v902_v56, %v906_v40  ;;  %v909_v6 = vshrl.u32 %v5115_v55, 16  ;;  %v912_v9 = vshll.u32 %v5115_v55, 16  ;;  %v5338_v40 = vld [vmem:[%s8533_s1 + $0x4] sm:$0x3]  ;;  %v6787_v51 = vld [vmem:[%s6708_s27 + $0x2c] sm:$0x1] }
  0x21   : > { %v310_v4 = vor.u32 %v309_v58, %v305_v57  ;;  %v315_v5 = vrot.slane %v313_v59, 5  ;;  %v5405_v7 = vcombine.low %v897_v61, %v907_v2  ;;  %v301_v8 = vrot.slane %v300_v63, 4  ;;  %v224_v56 = vld [vmem:[%s6708_s27 + $0x24] sm:$0xf] }
  0x22   : > { %v918_v10 = vshll.u32 %v6749_v60, 16  ;;  %v911_v13 = vrot.slane %v909_v6, 4  ;;  %v922_v14 = vshrl.u32 %v6749_v60, 16  ;;  %v928_v18 = vshll.u32 %v6756_v0, 16 }
  0x23   : > { %v311_v12 = vrot.slane %v310_v4, 4  ;;  %6022 = vmatprep.mubr.msk.bf16.mxu0 %vm2107_vm3, %v5405_v7  ;;  %v306_v20 = vsel %vm6730_vm4, %v301_v8, %v305_v57  ;;  %v914_v21 = vrot.slane %v912_v9, 5  ;;  %v1341_v23 = vrot.slane %v6749_v60, 5 }
  0x24   : > { %v920_v22 = vrot.slane %v918_v10, 5  ;;  %v924_v26 = vrot.slane %v922_v14, 4  ;;  %v930_v27 = vrot.slane %v928_v18, 5  ;;  %v1344_v28 = vrot.slane %v6756_v0, 5  ;;  %v5119_v18 = vld [vmem:[%s6708_s27 + $0x30] sm:$0xf] }
  0x25   : > { %v316_v25 = vsel %vm6730_vm4, %v311_v12, %v315_v5  ;;  %v915_v31 = vor.u32 %v914_v21, %v911_v13  ;;  %v318_v33 = vshrl.u32 %v222_v11, 16  ;;  %v321_v34 = vshll.u32 %v222_v11, 16  ;;  %v225_v5 = vld [vmem:[%s6708_s27 + $0x28] sm:$0xf]  ;;  %v253_v13 = vld [vmem:[%s6708_s27 + $0x2c] sm:$0x1] }
  0x26   : > { %v5275_v30 = vcombine.low %v306_v20, %v316_v25  ;;  %v925_v35 = vor.u32 %v924_v26, %v920_v22  ;;  %v327_v37 = vshll.u32 %v223_v19, 16  ;;  %v331_v38 = vshrl.u32 %v223_v19, 16 }
  0x27   : > { %v337_v39 = vshll.u32 %v252_v24, 16  ;;  %v916_v41 = vrot.slane %v915_v31, 4  ;;  %v320_v42 = vrot.slane %v318_v33, 4  ;;  %v323_v43 = vrot.slane %v321_v34, 5 }
  0x28   : > { %5887 = vmatmul.mubr.msk.bf16.vlgmr.msra.gmra.mrb[0].mxu1 %vm2107_vm3, %v5275_v30  ;;  %v933_v45 = vshrl.u32 %v5117_v29, 16  ;;  %v926_v46 = vrot.slane %v925_v35, 4  ;;  %v329_v47 = vrot.slane %v327_v37, 5  ;;  %v333_v48 = vrot.slane %v331_v38, 4  ;;  %v6816_v38 = vld [vmem:[%s6708_s27 + $0x38] sm:$0x1] }
  0x29   : > { %5919 = vmatpush3.bf16.msra.mxu1 %v6721_v17  ;;  %v339_v49 = vrot.slane %v337_v39, 5  ;;  %v921_v52 = vsel %vm6730_vm4, %v916_v41, %v920_v22  ;;  %v324_v53 = vor.u32 %v323_v43, %v320_v42  ;;  %v936_v55 = vshll.u32 %v5117_v29, 16  ;;  %v6808_v29 = vld [vmem:[%s6708_s27 + $0x34] sm:$0xf] }
  0x2a   : > { %v935_v54 = vrot.slane %v933_v45, 4  ;;  %6450 = vmatprep.subr.msk.bf16.mxu1 %vm2156_vm0, %v5338_v40  ;;  %v931_v57 = vsel %vm6730_vm4, %v926_v46, %v930_v27  ;;  %v334_v17 = vor.u32 %v333_v48, %v329_v47  ;;  %v942_v58 = vshll.u32 %v6783_v44, 16  ;;  %v6819_v40 = vld [vmem:[%s6708_s27 + $0x30] sm:$0xf] }
  0x2b   : > { %v946_v59 = vshrl.u32 %v6783_v44, 16  ;;  %v5406_v61 = vcombine.low %v921_v52, %v931_v57  ;;  %v325_v63 = vrot.slane %v324_v53, 4  ;;  %v938_v2 = vrot.slane %v936_v55, 5 }
  0x2c   : > { %v952_v4 = vshll.u32 %v6787_v51, 16  ;;  %v335_v6 = vrot.slane %v334_v17, 4  ;;  %v944_v7 = vrot.slane %v942_v58, 5  ;;  %v342_v9 = vshrl.u32 %v224_v56, 16  ;;  %v254_v58 = vld [vmem:[%s6708_s27 + $0x38] sm:$0x1] }
  0x2d   : > { %v948_v8 = vrot.slane %v946_v59, 4  ;;  %6023 = vmatmul.mubr.msk.bf16.vlgmr.msra.gmra.mrb[0].mxu0 %vm2107_vm3, %v5406_v61  ;;  %v330_v10 = vsel %vm6730_vm4, %v325_v63, %v329_v47  ;;  %v939_v11 = vor.u32 %v938_v2, %v935_v54  ;;  %v345_v14 = vshll.u32 %v224_v56, 16 }
  0x2e   : > { %v954_v12 = vrot.slane %v952_v4, 5  ;;  %6055 = vmatpush3.bf16.msra.mxu0 %v6735_v36  ;;  %v340_v19 = vsel %vm6730_vm4, %v335_v6, %v339_v49  ;;  %v344_v21 = vrot.slane %v342_v9, 4  ;;  %v351_v22 = vshll.u32 %v225_v5, 16  ;;  %v6825_v49 = vld [vmem:[%s6708_s27 + $0x34] sm:$0xf] }
  0x2f   : > { %v949_v20 = vor.u32 %v948_v8, %v944_v7  ;;  %v5276_v24 = vcombine.low %v330_v10, %v340_v19  ;;  %v940_v25 = vrot.slane %v939_v11, 4  ;;  %v347_v26 = vrot.slane %v345_v14, 5  ;;  %6455 = vmatprep.subr.msk.bf16.mxu0 %vm2156_vm0, %v6745_v50  ;;  %v6841_v10 = vld [vmem:[%s6708_s27 + $0x40] sm:$0xf] }
  0x30   : > { %v355_v27 = vshrl.u32 %v225_v5, 16  ;;  %v353_v31 = vrot.slane %v351_v22, 5  ;;  %v361_v36 = vshll.u32 %v253_v13, 16  ;;  %v957_v33 = vshrl.u32 %v5119_v18, 16  ;;  %v5121_v5 = vld [vmem:[%s6708_s27 + $0x3c] sm:$0xf] }
  0x31   : > { %v950_v30 = vrot.slane %v949_v20, 4  ;;  %5890 = vmatprep.mubr.msk.bf16.mxu1 %vm2107_vm3, %v5276_v24  ;;  %v945_v34 = vsel %vm6730_vm4, %v940_v25, %v944_v7  ;;  %v348_v35 = vor.u32 %v347_v26, %v344_v21  ;;  %v960_v39 = vshll.u32 %v5119_v18, 16  ;;  %v6846_v21 = vld [vmem:[%s6708_s27 + $0x44] sm:$0x1] }
  0x32   : > { %v357_v37 = vrot.slane %v355_v27, 4  ;;  %v363_v41 = vrot.slane %v361_v36, 5  ;;  %v959_v42 = vrot.slane %v957_v33, 4  ;;  %v966_v43 = vshll.u32 %v6808_v29, 16 }
  0x33   : > { %v955_v50 = vsel %vm6730_vm4, %v950_v30, %v954_v12  ;;  %v349_v46 = vrot.slane %v348_v35, 4  ;;  %v962_v48 = vrot.slane %v960_v39, 5  ;;  %v970_v53 = vshrl.u32 %v6808_v29, 16 }
  0x34   : > { %v5407_v45 = vcombine.low %v945_v34, %v955_v50  ;;  %v358_v47 = vor.u32 %v357_v37, %v353_v31  ;;  %v968_v52 = vrot.slane %v966_v43, 5  ;;  %v976_v54 = vshll.u32 %v6816_v38, 16  ;;  %v6852_v34 = vld [vmem:[%s6708_s27 + $0x3c] sm:$0xf] }
  0x35   : > { %v366_v55 = vshrl.u32 %v6819_v40, 16  ;;  %v354_v56 = vsel %vm6730_vm4, %v349_v46, %v353_v31  ;;  %v963_v17 = vor.u32 %v962_v48, %v959_v42  ;;  %v369_v59 = vshll.u32 %v6819_v40, 16 }
  0x36   : > { %6026 = vmatprep.mubr.msk.bf16.mxu0 %vm2107_vm3, %v5407_v45  ;;  %v359_v57 = vrot.slane %v358_v47, 4  ;;  %v972_v61 = vrot.slane %v970_v53, 4  ;;  %v978_v63 = vrot.slane %v976_v54, 5  ;;  %v375_v4 = vshll.u32 %v6825_v49, 16 }
  0x37   : > { %v368_v2 = vrot.slane %v366_v55, 4  ;;  %v964_v7 = vrot.slane %v963_v17, 4  ;;  %v371_v8 = vrot.slane %v369_v59, 5  ;;  %v379_v9 = vshrl.u32 %v6825_v49, 16 }
  0x38   : > { %v364_v6 = vsel %vm6730_vm4, %v359_v57, %v363_v41  ;;  %v973_v12 = vor.u32 %v972_v61, %v968_v52  ;;  %v377_v13 = vrot.slane %v375_v4, 5  ;;  %v385_v14 = vshll.u32 %v254_v58, 16  ;;  %v6858_v41 = vld [vmem:[%s6708_s27 + $0x40] sm:$0xf]  ;;  %v5123_v58 = vld [vmem:[%s6708_s27 + $0x48] sm:$0xf] }
  0x39   : > { %v5277_v11 = vcombine.low %v354_v56, %v364_v6  ;;  %v969_v18 = vsel %vm6730_vm4, %v964_v7, %v968_v52  ;;  %v372_v19 = vor.u32 %v371_v8, %v368_v2  ;;  %v381_v20 = vrot.slane %v379_v9, 4  ;;  %v255_v52 = vld [vmem:[%s6708_s27 + $0x44] sm:$0x1]  ;;  %v6872_v4 = vld [vmem:[%s6708_s27 + $0x4c] sm:$0xf] }
  0x3a   : > { %v981_v22 = vshrl.u32 %v5121_v5, 16  ;;  %v974_v24 = vrot.slane %v973_v12, 4  ;;  %v387_v25 = vrot.slane %v385_v14, 5  ;;  %v984_v26 = vshll.u32 %v5121_v5, 16  ;;  %v6878_v12 = vld [vmem:[%s6708_s27 + $0x50] sm:$0x1] }
  0x3b   : > { %5891 = vmatmul.mubr.msk.bf16.gmra.mrb[4].mxu1 %vm2107_vm3, %v5277_v11  ;;  %v990_v27 = vshll.u32 %v6841_v10, 16  ;;  %v373_v30 = vrot.slane %v372_v19, 4  ;;  %v382_v31 = vor.u32 %v381_v20, %v377_v13  ;;  %v994_v33 = vshrl.u32 %v6841_v10, 16 }
  0x3c   : > { %v983_v36 = vrot.slane %v981_v22, 4  ;;  %v979_v35 = vsel %vm6730_vm4, %v974_v24, %v978_v63  ;;  %v986_v37 = vrot.slane %v984_v26, 5  ;;  %v1000_v50 = vshll.u32 %v6846_v21, 16  ;;  %v6884_v24 = vld [vmem:[%s6708_s27 + $0x48] sm:$0xf] }
  0x3d   : > { %v992_v39 = vrot.slane %v990_v27, 5  ;;  %v5408_v42 = vcombine.low %v969_v18, %v979_v35  ;;  %v378_v43 = vsel %vm6730_vm4, %v373_v30, %v377_v13  ;;  %v383_v45 = vrot.slane %v382_v31, 4  ;;  %v6887_v31 = vld [vmem:[%s6708_s27 + $0x4c] sm:$0xf] }
  0x3e   : > { %v996_v46 = vrot.slane %v994_v33, 4  ;;  %v987_v47 = vor.u32 %v986_v37, %v983_v36  ;;  %v1002_v48 = vrot.slane %v1000_v50, 5  ;;  %v390_v53 = vshrl.u32 %v6852_v34, 16 }
  0x3f   : > { %v393_v54 = vshll.u32 %v6852_v34, 16  ;;  %6027 = vmatmul.mubr.msk.bf16.gmra.mrb[4].mxu0 %vm2107_vm3, %v5408_v42  ;;  %v388_v55 = vsel %vm6730_vm4, %v383_v45, %v387_v25  ;;  %v399_v57 = vshll.u32 %v6858_v41, 16  ;;  %v403_v17 = vshrl.u32 %v6858_v41, 16  ;;  %v256_v42 = vld [vmem:[%s6708_s27 + $0x50] sm:$0x1] }
  0x40   : > { %v997_v56 = vor.u32 %v996_v46, %v992_v39  ;;  %v5278_v59 = vcombine.low %v378_v43, %v388_v55  ;;  %v988_v61 = vrot.slane %v987_v47, 4  ;;  %v392_v63 = vrot.slane %v390_v53, 4  ;;  %v5125_v53 = vld [vmem:[%s6708_s27 + $0x54] sm:$0xf] }
  0x41   : > { %v395_v2 = vrot.slane %v393_v54, 5  ;;  %v401_v6 = vrot.slane %v399_v57, 5  ;;  %v405_v7 = vrot.slane %v403_v17, 4  ;;  %v409_v8 = vshll.u32 %v255_v52, 16  ;;  %v6902_v17 = vld [vmem:[%s6708_s27 + $0x58] sm:$0xf] }
  0x42   : > { %v998_v5 = vrot.slane %v997_v56, 4  ;;  %5894 = vmatprep.mubr.msk.bf16.mxu1 %vm2107_vm3, %v5278_v59  ;;  %v993_v9 = vsel %vm6730_vm4, %v988_v61, %v992_v39  ;;  %v1005_v13 = vshrl.u32 %v5123_v58, 16  ;;  %v1008_v14 = vshll.u32 %v5123_v58, 16 }
  0x43   : > { %v396_v11 = vor.u32 %v395_v2, %v392_v63  ;;  %v406_v19 = vor.u32 %v405_v7, %v401_v6  ;;  %v411_v20 = vrot.slane %v409_v8, 5  ;;  %v1014_v22 = vshll.u32 %v6872_v4, 16 }
  0x44   : > { %v1003_v18 = vsel %vm6730_vm4, %v998_v5, %v1002_v48  ;;  %v1007_v27 = vrot.slane %v1005_v13, 4  ;;  %v1010_v30 = vrot.slane %v1008_v14, 5  ;;  %v1018_v35 = vshrl.u32 %v6872_v4, 16 }
  0x45   : > { %v5409_v25 = vcombine.low %v993_v9, %v1003_v18  ;;  %v397_v26 = vrot.slane %v396_v11, 4  ;;  %v407_v36 = vrot.slane %v406_v19, 4  ;;  %v1016_v33 = vrot.slane %v1014_v22, 5 }
  0x46   : > { %v1024_v37 = vshll.u32 %v6878_v12, 16  ;;  %v1011_v50 = vor.u32 %v1010_v30, %v1007_v27  ;;  %v414_v43 = vshrl.u32 %v6884_v24, 16  ;;  %v417_v45 = vshll.u32 %v6884_v24, 16 }
  0x47   : > { %6030 = vmatprep.mubr.msk.bf16.mxu0 %vm2107_vm3, %v5409_v25  ;;  %v402_v39 = vsel %vm6730_vm4, %v397_v26, %v401_v6  ;;  %v412_v46 = vsel %vm6730_vm4, %v407_v36, %v411_v20  ;;  %v1020_v47 = vrot.slane %v1018_v35, 4  ;;  %v423_v52 = vshll.u32 %v6887_v31, 16  ;;  %v6909_v6 = vld [vmem:[%s6708_s27 + $0x5c] sm:$0x1]  ;;  %v6914_v25 = vld [vmem:[%s6708_s27 + $0x54] sm:$0xf] }
  0x48   : > { %v1026_v48 = vrot.slane %v1024_v37, 5  ;;  %v5279_v54 = vcombine.low %v402_v39, %v412_v46  ;;  %v1012_v55 = vrot.slane %v1011_v50, 4  ;;  %v416_v56 = vrot.slane %v414_v43, 4 }
  0x49   : > { %v419_v57 = vrot.slane %v417_v45, 5  ;;  %v1021_v58 = vor.u32 %v1020_v47, %v1016_v33  ;;  %v425_v59 = vrot.slane %v423_v52, 5  ;;  %v427_v61 = vshrl.u32 %v6887_v31, 16 }
  0x4a   : > { %v433_v63 = vshll.u32 %v256_v42, 16  ;;  %5895 = vmatmul.mubr.msk.bf16.gmra.mrb[8].mxu1 %vm2107_vm3, %v5279_v54  ;;  %v1017_v2 = vsel %vm6730_vm4, %v1012_v55, %v1016_v33  ;;  %v1029_v7 = vshrl.u32 %v5125_v53, 16  ;;  %v1032_v8 = vshll.u32 %v5125_v53, 16  ;;  %v6920_v33 = vld [vmem:[%s6708_s27 + $0x58] sm:$0xf] }
  0x4b   : > { %v420_v5 = vor.u32 %v419_v57, %v416_v56  ;;  %v1022_v9 = vrot.slane %v1021_v58, 4  ;;  %v429_v11 = vrot.slane %v427_v61, 4  ;;  %v1038_v14 = vshll.u32 %v6902_v17, 16  ;;  %v257_v42 = vld [vmem:[%s6708_s27 + $0x5c] sm:$0x1] }
  0x4c   : > { %v435_v13 = vrot.slane %v433_v63, 5  ;;  %v1031_v19 = vrot.slane %v1029_v7, 4  ;;  %v1034_v20 = vrot.slane %v1032_v8, 5  ;;  %v1042_v22 = vshrl.u32 %v6902_v17, 16  ;;  %v5127_v55 = vld [vmem:[%s6708_s27 + $0x60] sm:$0xf] }
  0x4d   : > { %v421_v18 = vrot.slane %v420_v5, 4  ;;  %v1027_v26 = vsel %vm6730_vm4, %v1022_v9, %v1026_v48  ;;  %v430_v27 = vor.u32 %v429_v11, %v425_v59  ;;  %v1040_v30 = vrot.slane %v1038_v14, 5  ;;  %v6934_v61 = vld [vmem:[%s6708_s27 + $0x64] sm:$0xf]  ;;  %v6939_v14 = vld [vmem:[%s6708_s27 + $0x68] sm:$0x1] }
  0x4e   : > { %v1048_v36 = vshll.u32 %v6909_v6, 16  ;;  %v5410_v35 = vcombine.low %v1017_v2, %v1027_v26  ;;  %v1035_v39 = vor.u32 %v1034_v20, %v1031_v19  ;;  %v1044_v50 = vrot.slane %v1042_v22, 4  ;;  %v6947_v26 = vld [vmem:[%s6708_s27 + $0x60] sm:$0xf] }
  0x4f   : > { %v426_v37 = vsel %vm6730_vm4, %v421_v18, %v425_v59  ;;  %v431_v43 = vrot.slane %v430_v27, 4  ;;  %v438_v46 = vshrl.u32 %v6914_v25, 16  ;;  %v441_v47 = vshll.u32 %v6914_v25, 16 }
  0x50   : > { %v1050_v45 = vrot.slane %v1048_v36, 5  ;;  %6031 = vmatmul.mubr.msk.bf16.gmra.mrb[8].mxu0 %vm2107_vm3, %v5410_v35  ;;  %v1036_v48 = vrot.slane %v1035_v39, 4  ;;  %v1045_v52 = vor.u32 %v1044_v50, %v1040_v30  ;;  %v447_v53 = vshll.u32 %v6920_v33, 16 }
  0x51   : > { %v451_v54 = vshrl.u32 %v6920_v33, 16  ;;  %v436_v56 = vsel %vm6730_vm4, %v431_v43, %v435_v13  ;;  %v440_v57 = vrot.slane %v438_v46, 4  ;;  %v443_v58 = vrot.slane %v441_v47, 5 }
  0x52   : > { %v457_v59 = vshll.u32 %v257_v42, 16  ;;  %v5280_v63 = vcombine.low %v426_v37, %v436_v56  ;;  %v1041_v2 = vsel %vm6730_vm4, %v1036_v48, %v1040_v30  ;;  %v1046_v5 = vrot.slane %v1045_v52, 4  ;;  %v6950_v37 = vld [vmem:[%s6708_s27 + $0x64] sm:$0xf] }
  0x53   : > { %v449_v7 = vrot.slane %v447_v53, 5  ;;  %v444_v8 = vor.u32 %v443_v58, %v440_v57  ;;  %v453_v9 = vrot.slane %v451_v54, 4  ;;  %v1053_v18 = vshrl.u32 %v5127_v55, 16  ;;  %v5161_v57 = vld [vmem:[%s6708_s27 + $0xc] sm:$0xe] }
  0x54   : > { %v459_v11 = vrot.slane %v457_v59, 5  ;;  %5898 = vmatprep.mubr.msk.bf16.mxu1 %vm2107_vm3, %v5280_v63  ;;  %v1051_v13 = vsel %vm6730_vm4, %v1046_v5, %v1050_v45  ;;  %v1056_v19 = vshll.u32 %v5127_v55, 16  ;;  %v1062_v20 = vshll.u32 %v6934_v61, 16  ;;  %v258_v55 = vld [vmem:[%s6708_s27 + $0x68] sm:$0x1] }
  0x55   : > { %v1066_v22 = vshrl.u32 %v6934_v61, 16  ;;  %v5411_v27 = vcombine.low %v1041_v2, %v1051_v13  ;;  %v445_v30 = vrot.slane %v444_v8, 4  ;;  %v454_v36 = vor.u32 %v453_v9, %v449_v7  ;;  %v6965_v5 = vld [vmem:[%s6708_s27 + $0x6c] sm:$0xf] }
  0x56   : > { %v1055_v35 = vrot.slane %v1053_v18, 4  ;;  %v1058_v39 = vrot.slane %v1056_v19, 5  ;;  %v1064_v50 = vrot.slane %v1062_v20, 5  ;;  %v1072_v43 = vshll.u32 %v6939_v14, 16 }
  0x57   : > { %v1068_v42 = vrot.slane %v1066_v22, 4  ;;  %6034 = vmatprep.mubr.msk.bf16.mxu0 %vm2107_vm3, %v5411_v27  ;;  %v450_v45 = vsel %vm6730_vm4, %v445_v30, %v449_v7  ;;  %v455_v46 = vrot.slane %v454_v36, 4  ;;  %v462_v47 = vshrl.u32 %v6947_v26, 16 }
  0x58   : > { %v465_v48 = vshll.u32 %v6947_v26, 16  ;;  %v1059_v52 = vor.u32 %v1058_v39, %v1055_v35  ;;  %v1074_v54 = vrot.slane %v1072_v43, 5  ;;  %v471_v56 = vshll.u32 %v6950_v37, 16  ;;  %v6980_v35 = vld [vmem:[%s6708_s27 + $0x70] sm:$0xf] }
  0x59   : > { %v1069_v53 = vor.u32 %v1068_v42, %v1064_v50  ;;  %v460_v58 = vsel %vm6730_vm4, %v455_v46, %v459_v11  ;;  %v464_v59 = vrot.slane %v462_v47, 4  ;;  %v475_v2 = vshrl.u32 %v6950_v37, 16  ;;  %v259_v47 = vld [vmem:[%s6708_s27 + $0x74] sm:$0x1] }
  0x5a   : > { %v467_v63 = vrot.slane %v465_v48, 5  ;;  %v5281_v7 = vcombine.low %v450_v45, %v460_v58  ;;  %v1060_v8 = vrot.slane %v1059_v52, 4  ;;  %v473_v18 = vrot.slane %v471_v56, 5  ;;  %v5162_v48 = vld [vmem:[%s6708_s27 + $0x18] sm:$0xe] }
  0x5b   : > { %v1070_v9 = vrot.slane %v1069_v53, 4  ;;  %v477_v19 = vrot.slane %v475_v2, 4  ;;  %v481_v20 = vshll.u32 %v258_v55, 16  ;;  %v5177_v22 = vrot.slane %v5161_v57, 9 }
  0x5c   : > { %v468_v13 = vor.u32 %v467_v63, %v464_v59  ;;  %5899 = vmatmul.mubr.msk.bf16.gmra.mrb[12].mxu1 %vm2107_vm3, %v5281_v7  ;;  %v1065_v27 = vsel %vm6730_vm4, %v1060_v8, %v1064_v50  ;;  %v1334_v36 = vrot.slane %v6715_v15, 5  ;;  %v486_v39 = vshrl.u32 %v6965_v5, 16  ;;  %v6998_v7 = vld [vmem:[%s6708_s27 + $0x78] sm:$0xf] }
  0x5d   : > { %v1075_v30 = vsel %vm6730_vm4, %v1070_v9, %v1074_v54  ;;  %v478_v45 = vor.u32 %v477_v19, %v473_v18  ;;  %v483_v46 = vrot.slane %v481_v20, 5  ;;  %v489_v54 = vshll.u32 %v6965_v5, 16  ;;  %v7003_v19 = vld [vmem:[%s6708_s27 + $0x7c] sm:$0xf]  ;;  %v260_v20 = vld [vmem:[%s6708_s27 + $0x80] sm:$0x1] }
  0x5e   : > { %v5412_v42 = vcombine.low %v1065_v27, %v1075_v30  ;;  %v469_v43 = vrot.slane %v468_v13, 4  ;;  %v1335_v52 = vsel %vm6969_vm7, %v5177_v22, %v1334_v36  ;;  %v1336_v50 = vrot.slane %v1334_v36, 4 }
  0x5f   : > { %v488_v53 = vrot.slane %v486_v39, 4  ;;  %v479_v55 = vrot.slane %v478_v45, 4  ;;  %v495_v56 = vshll.u32 %v6980_v35, 16  ;;  %v499_v57 = vshrl.u32 %v6980_v35, 16 }
  0x60   : > { %6035 = vmatmul.mubr.msk.bf16.gmra.mrb[12].mxu0 %vm2107_vm3, %v5412_v42  ;;  %v474_v15 = vsel %vm6730_vm4, %v469_v43, %v473_v18  ;;  %v1338_v58 = vsel %vm6969_vm7, %v1336_v50, %v1337_v62  ;;  %v491_v59 = vrot.slane %v489_v54, 5  ;;  %v505_v63 = vshll.u32 %v259_v47, 16 }
  0x61   : > { %v5178_v2 = vrot.slane %v5162_v48, 9  ;;  %v484_v8 = vsel %vm6730_vm4, %v479_v55, %v483_v46  ;;  %v5438_v9 = vcombine.low %v1335_v52, %v1338_v58  ;;  %v497_v18 = vrot.slane %v495_v56, 5  ;;  %v5163_v48 = vld [vmem:[%s6708_s27 + $0x24] sm:$0xe] }
  0x62   : > { %v501_v13 = vrot.slane %v499_v57, 4  ;;  %v5282_v22 = vcombine.low %v474_v15, %v484_v8  ;;  %v492_v16 = vor.u32 %v491_v59, %v488_v53  ;;  %v507_v27 = vrot.slane %v505_v63, 5  ;;  %v7026_v56 = vld [vmem:[%s6708_s27 + $0x84] sm:$0xf]  ;;  %v7029_v57 = vld [vmem:[%s6708_s27 + $0x88] sm:$0xf] }
  0x63   : > { %v1342_v62 = vsel %vm6969_vm7, %v5178_v2, %v1341_v23  ;;  %6056 = vmatprep.mubr.msk.bf16.mxu0 %vm2107_vm3, %v5438_v9  ;;  %v1343_v36 = vrot.slane %v1341_v23, 4  ;;  %v510_v39 = vshrl.u32 %v6998_v7, 16  ;;  %v513_v42 = vshll.u32 %v6998_v7, 16 }
  0x64   : > { %v502_v30 = vor.u32 %v501_v13, %v497_v18  ;;  %5902 = vmatprep.mubr.msk.bf16.mxu1 %vm2107_vm3, %v5282_v22  ;;  %v493_v43 = vrot.slane %v492_v16, 4  ;;  %v519_v45 = vshll.u32 %v7003_v19, 16  ;;  %v523_v46 = vshrl.u32 %v7003_v19, 16 }
  0x65   : > { %v529_v47 = vshll.u32 %v260_v20, 16  ;;  %v1345_v60 = vsel %vm6969_vm7, %v1343_v36, %v1344_v28  ;;  %v512_v23 = vrot.slane %v510_v39, 4  ;;  %v515_v50 = vrot.slane %v513_v42, 5  ;;  %v7036_v28 = vld [vmem:[%s8533_s1 + $0xe] sm:$0x3] }
  0x66   : > { %v503_v52 = vrot.slane %v502_v30, 4  ;;  %v498_v53 = vsel %vm6730_vm4, %v493_v43, %v497_v18  ;;  %v5439_v54 = vcombine.low %v1342_v62, %v1345_v60  ;;  %v521_v15 = vrot.slane %v519_v45, 5  ;;  %v261_v20 = vld [vmem:[%s6708_s27 + $0x8c] sm:$0x1]  ;;  %v7063_v60 = vld [vmem:[%s6708_s27 + $0x94] sm:$0xf] }
  0x67   : > { %v525_v55 = vrot.slane %v523_v46, 4  ;;  %v516_v0 = vor.u32 %v515_v50, %v512_v23  ;;  %v531_v59 = vrot.slane %v529_v47, 5  ;;  %v5179_v63 = vrot.slane %v5163_v48, 9 }
  0x68   : > { %v508_v58 = vsel %vm6730_vm4, %v503_v52, %v507_v27  ;;  %6057 = vmatmul.mubr.msk.bf16.vlgmr.msra.gmra.mrb[0].mxu0 %vm2107_vm3, %v5439_v54  ;;  %v1348_v9 = vrot.slane %v6783_v44, 5  ;;  %v1351_v18 = vrot.slane %v6787_v51, 5  ;;  %v534_v22 = vshrl.u32 %v7026_v56, 16  ;;  %v7060_v52 = vld [vmem:[%s6708_s27 + $0x90] sm:$0xf] }
  0x69   : > { %v5283_v2 = vcombine.low %v498_v53, %v508_v58  ;;  %v526_v8 = vor.u32 %v525_v55, %v521_v15  ;;  %6089 = vmatpush3.bf16.msra.mxu0 %v6760_v1  ;;  %v517_v13 = vrot.slane %v516_v0, 4  ;;  %v537_v16 = vshll.u32 %v7026_v56, 16  ;;  %v5164_v1 = vld [vmem:[%s6708_s27 + $0x30] sm:$0xe] }
  0x6a   : > { %v543_v27 = vshll.u32 %v7029_v57, 16  ;;  %v1349_v44 = vsel %vm6969_vm7, %v5179_v63, %v1348_v9  ;;  %v1350_v30 = vrot.slane %v1348_v9, 4  ;;  %v547_v51 = vshrl.u32 %v7029_v57, 16  ;;  %6456 = vmatprep.subr.msk.bf16.mxu0 %vm2156_vm0, %v7036_v28  ;;  %v262_v63 = vld [vmem:[%s6708_s27 + $0x98] sm:$0x1] }
  0x6b   : > { %5903 = vmatmul.mubr.msk.bf16.gmra.mrb[16].mxu1 %vm2107_vm3, %v5283_v2  ;;  %v527_v62 = vrot.slane %v526_v8, 4  ;;  %v522_v36 = vsel %vm6730_vm4, %v517_v13, %v521_v15  ;;  %v536_v39 = vrot.slane %v534_v22, 4  ;;  %v539_v42 = vrot.slane %v537_v16, 5 }
  0x6c   : > { %v545_v43 = vrot.slane %v543_v27, 5  ;;  %v1352_v46 = vsel %vm6969_vm7, %v1350_v30, %v1351_v18  ;;  %v549_v47 = vrot.slane %v547_v51, 4  ;;  %v553_v48 = vshll.u32 %v261_v20, 16  ;;  %v5165_v20 = vld [vmem:[%s6708_s27 + $0x3c] sm:$0xe] }
  0x6d   : > { %v532_v45 = vsel %vm6730_vm4, %v527_v62, %v531_v59  ;;  %v5440_v50 = vcombine.low %v1349_v44, %v1352_v46  ;;  %v540_v53 = vor.u32 %v539_v42, %v536_v39  ;;  %v5180_v54 = vrot.slane %v5164_v1, 9  ;;  %v7087_v39 = vld [vmem:[%s6708_s27 + $0xa0] sm:$0xf] }
  0x6e   : > { %v5284_v23 = vcombine.low %v522_v36, %v532_v45  ;;  %v550_v15 = vor.u32 %v549_v47, %v545_v43  ;;  %v555_v55 = vrot.slane %v553_v48, 5  ;;  %v1355_v58 = vrot.slane %v6808_v29, 5  ;;  %v7084_v36 = vld [vmem:[%s6708_s27 + $0x9c] sm:$0xf] }
  0x6f   : > { %v1358_v0 = vrot.slane %v6816_v38, 5  ;;  %6060 = vmatprep.mubr.msk.bf16.mxu0 %vm2107_vm3, %v5440_v50  ;;  %v541_v59 = vrot.slane %v540_v53, 4  ;;  %v558_v2 = vshrl.u32 %v7060_v52, 16  ;;  %v561_v8 = vshll.u32 %v7060_v52, 16 }
  0x70   : > { %5906 = vmatprep.mubr.msk.bf16.mxu1 %vm2107_vm3, %v5284_v23  ;;  %v567_v9 = vshll.u32 %v7063_v60, 16  ;;  %v551_v18 = vrot.slane %v550_v15, 4  ;;  %v1356_v29 = vsel %vm6969_vm7, %v5180_v54, %v1355_v58  ;;  %v1357_v13 = vrot.slane %v1355_v58, 4  ;;  %v263_v54 = vld [vmem:[%s6708_s27 + $0xa4] sm:$0x1] }
  0x71   : > { %v571_v38 = vshrl.u32 %v7063_v60, 16  ;;  %v546_v22 = vsel %vm6730_vm4, %v541_v59, %v545_v43  ;;  %v560_v16 = vrot.slane %v558_v2, 4  ;;  %v563_v27 = vrot.slane %v561_v8, 5 }
  0x72   : > { %v569_v62 = vrot.slane %v567_v9, 5  ;;  %v556_v44 = vsel %vm6730_vm4, %v551_v18, %v555_v55  ;;  %v1359_v30 = vsel %vm6969_vm7, %v1357_v13, %v1358_v0  ;;  %v577_v1 = vshll.u32 %v262_v63, 16  ;;  %v5166_v63 = vld [vmem:[%s6708_s27 + $0x48] sm:$0xe] }
  0x73   : > { %v573_v51 = vrot.slane %v571_v38, 4  ;;  %v5285_v42 = vcombine.low %v546_v22, %v556_v44  ;;  %v5441_v45 = vcombine.low %v1356_v29, %v1359_v30  ;;  %v564_v46 = vor.u32 %v563_v27, %v560_v16  ;;  %v7108_v22 = vld [vmem:[%s6708_s27 + $0xa8] sm:$0xf]  ;;  %v7111_v16 = vld [vmem:[%s6708_s27 + $0xac] sm:$0xf] }
  0x74   : > { %v5181_v43 = vrot.slane %v5165_v20, 9  ;;  %v579_v48 = vrot.slane %v577_v1, 5  ;;  %v1362_v23 = vrot.slane %v6841_v10, 5  ;;  %v1365_v50 = vrot.slane %v6846_v21, 5 }
  0x75   : > { %v574_v47 = vor.u32 %v573_v51, %v569_v62  ;;  %5907 = vmatmul.mubr.msk.bf16.gmra.mrb[20].mxu1 %vm2107_vm3, %v5285_v42  ;;  %6061 = vmatmul.mubr.msk.bf16.gmra.mrb[4].mxu0 %vm2107_vm3, %v5441_v45  ;;  %v565_v53 = vrot.slane %v564_v46, 4  ;;  %v582_v15 = vshrl.u32 %v7084_v36, 16  ;;  %v585_v55 = vshll.u32 %v7084_v36, 16 }
  0x76   : > { %v591_v58 = vshll.u32 %v7087_v39, 16  ;;  %v1363_v10 = vsel %vm6969_vm7, %v5181_v43, %v1362_v23  ;;  %v1364_v59 = vrot.slane %v1362_v23, 4  ;;  %v595_v21 = vshrl.u32 %v7087_v39, 16  ;;  %v264_v43 = vld [vmem:[%s6708_s27 + $0xb0] sm:$0x1] }
  0x77   : > { %v575_v0 = vrot.slane %v574_v47, 4  ;;  %v570_v2 = vsel %vm6730_vm4, %v565_v53, %v569_v62  ;;  %v584_v8 = vrot.slane %v582_v15, 4  ;;  %v587_v9 = vrot.slane %v585_v55, 5 }
  0x78   : > { %v593_v18 = vrot.slane %v591_v58, 5  ;;  %v1366_v13 = vsel %vm6969_vm7, %v1364_v59, %v1365_v50  ;;  %v597_v38 = vrot.slane %v595_v21, 4  ;;  %v601_v20 = vshll.u32 %v263_v54, 16  ;;  %v5167_v54 = vld [vmem:[%s6708_s27 + $0x54] sm:$0xe] }
  0x79   : > { %v580_v29 = vsel %vm6730_vm4, %v575_v0, %v579_v48  ;;  %v5442_v44 = vcombine.low %v1363_v10, %v1366_v13  ;;  %v588_v30 = vor.u32 %v587_v9, %v584_v8  ;;  %v5182_v62 = vrot.slane %v5166_v63, 9  ;;  %v7135_v8 = vld [vmem:[%s6708_s27 + $0xb8] sm:$0xf] }
  0x7a   : > { %v5286_v27 = vcombine.low %v570_v2, %v580_v29  ;;  %v598_v51 = vor.u32 %v597_v38, %v593_v18  ;;  %v603_v1 = vrot.slane %v601_v20, 5  ;;  %v1369_v42 = vrot.slane %v6872_v4, 5  ;;  %v7132_v2 = vld [vmem:[%s6708_s27 + $0xb4] sm:$0xf] }
  0x7b   : > { %v1372_v45 = vrot.slane %v6878_v12, 5  ;;  %6064 = vmatprep.mubr.msk.bf16.mxu0 %vm2107_vm3, %v5442_v44  ;;  %v589_v46 = vrot.slane %v588_v30, 4  ;;  %v606_v47 = vshrl.u32 %v7108_v22, 16  ;;  %v609_v48 = vshll.u32 %v7108_v22, 16 }
  0x7c   : > { %5910 = vmatprep.mubr.msk.bf16.mxu1 %vm2107_vm3, %v5286_v27  ;;  %v615_v23 = vshll.u32 %v7111_v16, 16  ;;  %v599_v50 = vrot.slane %v598_v51, 4  ;;  %v1370_v4 = vsel %vm6969_vm7, %v5182_v62, %v1369_v42  ;;  %v1371_v53 = vrot.slane %v1369_v42, 4  ;;  %v265_v62 = vld [vmem:[%s6708_s27 + $0xbc] sm:$0x1] }
  0x7d   : > { %v619_v12 = vshrl.u32 %v7111_v16, 16  ;;  %v594_v15 = vsel %vm6730_vm4, %v589_v46, %v593_v18  ;;  %v608_v55 = vrot.slane %v606_v47, 4  ;;  %v611_v58 = vrot.slane %v609_v48, 5 }
  0x7e   : > { %v617_v0 = vrot.slane %v615_v23, 5  ;;  %v604_v10 = vsel %vm6730_vm4, %v599_v50, %v603_v1  ;;  %v1373_v59 = vsel %vm6969_vm7, %v1371_v53, %v1372_v45  ;;  %v625_v63 = vshll.u32 %v264_v43, 16  ;;  %v5168_v43 = vld [vmem:[%s6708_s27 + $0x60] sm:$0xe] }
  0x7f   : > { %v621_v21 = vrot.slane %v619_v12, 4  ;;  %v5287_v9 = vcombine.low %v594_v15, %v604_v10  ;;  %v5443_v29 = vcombine.low %v1370_v4, %v1373_v59  ;;  %v612_v13 = vor.u32 %v611_v58, %v608_v55  ;;  %v5130_v4 = vld [vmem:[%s6708_s27 + $0x70] sm:$0xf]  ;;  %v5153_v55 = vld [vmem:[%s6708_s27 + $0x74] sm:$0x1] }
  0x80   : > { %v5183_v18 = vrot.slane %v5167_v54, 9  ;;  %v627_v20 = vrot.slane %v625_v63, 5  ;;  %v1376_v27 = vrot.slane %v6902_v17, 5  ;;  %v1379_v44 = vrot.slane %v6909_v6, 5  ;;  %v5169_v58 = vld [vmem:[%s6708_s27 + $0x6c] sm:$0xe] }
  0x81   : > { %v622_v38 = vor.u32 %v621_v21, %v617_v0  ;;  %5911 = vmatmul.mubr.msk.bf16.gmra.mrb[24].mxu1 %vm2107_vm3, %v5287_v9  ;;  %6065 = vmatmul.mubr.msk.bf16.gmra.mrb[8].mxu0 %vm2107_vm3, %v5443_v29  ;;  %v613_v30 = vrot.slane %v612_v13, 4  ;;  %v630_v51 = vshrl.u32 %v7132_v2, 16  ;;  %v633_v1 = vshll.u32 %v7132_v2, 16 }
  0x82   : > { %v639_v42 = vshll.u32 %v7135_v8, 16  ;;  %v1377_v17 = vsel %vm6969_vm7, %v5183_v18, %v1376_v27  ;;  %v1378_v6 = vrot.slane %v1376_v27, 4  ;;  %v643_v46 = vshrl.u32 %v7135_v8, 16 }
  0x83   : > { %v623_v45 = vrot.slane %v622_v38, 4  ;;  %v618_v47 = vsel %vm6730_vm4, %v613_v30, %v617_v0  ;;  %v632_v48 = vrot.slane %v630_v51, 4  ;;  %v635_v23 = vrot.slane %v633_v1, 5  ;;  %v5170_v1 = vld [vmem:[%s6708_s27 + $0x78] sm:$0xe] }
  0x84   : > { %v641_v50 = vrot.slane %v639_v42, 5  ;;  %v1380_v12 = vsel %vm6969_vm7, %v1378_v6, %v1379_v44  ;;  %v645_v54 = vrot.slane %v643_v46, 4  ;;  %v649_v15 = vshll.u32 %v265_v62, 16  ;;  %v7175_v6 = vld [vmem:[%s6708_s27 + $0x4] sm:$0xf] }
  0x85   : > { %v628_v53 = vsel %vm6730_vm4, %v623_v45, %v627_v20  ;;  %v5444_v59 = vcombine.low %v1377_v17, %v1380_v12  ;;  %v636_v21 = vor.u32 %v635_v23, %v632_v48  ;;  %v5184_v63 = vrot.slane %v5168_v43, 9  ;;  %v6532_v17 = vld [vmem:[%s6708_s27] sm:$0xf]  ;;  %v5132_v43 = vld [vmem:[%s6708_s27 + $0x7c] sm:$0xf] }
  0x86   : > { %v5288_v10 = vcombine.low %v618_v47, %v628_v53  ;;  %v646_v9 = vor.u32 %v645_v54, %v641_v50  ;;  %v651_v0 = vrot.slane %v649_v15, 5  ;;  %v1383_v29 = vrot.slane %v6934_v61, 5  ;;  %v5154_v47 = vld [vmem:[%s6708_s27 + $0x80] sm:$0x1]  ;;  %v5155_v53 = vld [vmem:[%s6708_s27 + $0x8c] sm:$0x1] }
  0x87   : > { %v1386_v13 = vrot.slane %v6939_v14, 5  ;;  %6068 = vmatprep.mubr.msk.bf16.mxu0 %vm2107_vm3, %v5444_v59  ;;  %v637_v18 = vrot.slane %v636_v21, 4  ;;  %v5185_v38 = vrot.slane %v5169_v58, 9  ;;  %v1390_v20 = vrot.slane %v5130_v4, 5  ;;  %v5134_v4 = vld [vmem:[%s6708_s27 + $0x88] sm:$0xf] }
  0x88   : > { %5914 = vmatprep.mubr.msk.bf16.mxu1 %vm2107_vm3, %v5288_v10  ;;  %v1393_v27 = vrot.slane %v5153_v55, 5  ;;  %v647_v44 = vrot.slane %v646_v9, 4  ;;  %v1384_v30 = vsel %vm6969_vm7, %v5184_v63, %v1383_v29  ;;  %v1385_v61 = vrot.slane %v1383_v29, 4  ;;  %v5171_v12 = vld [vmem:[%s6708_s27 + $0x84] sm:$0xe] }
  0x89   : > { %v642_v14 = vsel %vm6730_vm4, %v637_v18, %v641_v50  ;;  %v1391_v62 = vsel %vm6969_vm7, %v5185_v38, %v1390_v20  ;;  %v1392_v51 = vrot.slane %v1390_v20, 4  ;;  %v5306_v46 = vcombine.low %v6532_v17, %v7175_v6  ;;  %v5136_v55 = vld [vmem:[%s6708_s27 + $0x94] sm:$0xf]  ;;  %v5156_v59 = vld [vmem:[%s6708_s27 + $0x98] sm:$0x1] }
  0x8a   : > { %v652_v42 = vsel %vm6730_vm4, %v647_v44, %v651_v0  ;;  %v1387_v45 = vsel %vm6969_vm7, %v1385_v61, %v1386_v13  ;;  %v5186_v15 = vrot.slane %v5170_v1, 9  ;;  %v1397_v58 = vrot.slane %v5132_v43, 5  ;;  %v5172_v0 = vld [vmem:[%s6708_s27 + $0x90] sm:$0xe]  ;;  %v5138_v38 = vld [vmem:[%s6708_s27 + $0xa0] sm:$0xf] }
  0x8b   : > { %v5289_v48 = vcombine.low %v642_v14, %v652_v42  ;;  %v5445_v23 = vcombine.low %v1384_v30, %v1387_v45  ;;  %v1394_v50 = vsel %vm6969_vm7, %v1392_v51, %v1393_v27  ;;  %v1400_v10 = vrot.slane %v5154_v47, 5  ;;  %v6534_v20 = vld [vmem:[%s6708_s27 + $0xc] sm:$0xf]  ;;  %v7197_v27 = vld [vmem:[%s6708_s27 + $0x10] sm:$0xf] }
  0x8c   : > { %v5446_v54 = vcombine.low %v1391_v62, %v1394_v50  ;;  %v5187_v21 = vrot.slane %v5171_v12, 9  ;;  %v1404_v63 = vrot.slane %v5134_v4, 5  ;;  %v1407_v9 = vrot.slane %v5155_v53, 5  ;;  %v5157_v14 = vld [vmem:[%s6708_s27 + $0xa4] sm:$0x1] }
  0x8d   : > { %5915 = vmatmul.mubr.msk.bf16.gmra.mrb[28].mxu1 %vm2107_vm3, %v5289_v48  ;;  %6069 = vmatmul.mubr.msk.bf16.gmra.mrb[12].mxu0 %vm2107_vm3, %v5445_v23  ;;  %v1398_v29 = vsel %vm6969_vm7, %v5186_v15, %v1397_v58  ;;  %v1399_v13 = vrot.slane %v1397_v58, 4  ;;  %v1411_v18 = vrot.slane %v5136_v55, 5  ;;  %v5307_v44 = vcombine.low %v6534_v20, %v7197_v27  ;;  %v5173_v62 = vld [vmem:[%s6708_s27 + $0x9c] sm:$0xe]  ;;  %v6536_v1 = vld [vmem:[%s6708_s27 + $0x18] sm:$0xf] }
  0x8e   : > { %5920 = vmatprep.mubr.msk.bf16.mxu1 %vm2107_vm3, %v5306_v46  ;;  %6072 = vmatprep.mubr.msk.bf16.mxu0 %vm2107_vm3, %v5446_v54  ;;  %v1405_v30 = vsel %vm6969_vm7, %v5187_v21, %v1404_v63  ;;  %v1406_v61 = vrot.slane %v1404_v63, 4  ;;  %v7208_v42 = vld [vmem:[%s6708_s27 + $0x1c] sm:$0xf]  ;;  %v5188_v17 = vrot.slane %v5172_v0, 9  ;;  %v1414_v46 = vrot.slane %v5156_v59, 5 }
  0x8f   : > { %v1401_v51 = vsel %vm6969_vm7, %v1399_v13, %v1400_v10  ;;  %v5308_v45 = vcombine.low %v6536_v1, %v7208_v42  ;;  %v1413_v48 = vrot.slane %v1411_v18, 4  ;;  %v1418_v23 = vrot.slane %v5138_v38, 5  ;;  %v6538_v50 = vld [vmem:[%s8533_s1 + $0x4] sm:$0x3]  ;;  %v5140_v15 = vld [vmem:[%s6708_s27 + $0xac] sm:$0xf] }
  0x90   : > { %v5447_v43 = vcombine.low %v1398_v29, %v1401_v51  ;;  %v1408_v47 = vsel %vm6969_vm7, %v1406_v61, %v1407_v9  ;;  %v2696_v4 = vsel %vm2156_vm0, %v6538_v50, 0  ;;  %v5189_v12 = vrot.slane %v5173_v62, 9  ;;  %v5142_v58 = vld [vmem:[%s6708_s27 + $0xb8] sm:$0xf]  ;;  %v7222_v10 = vld [vmem:[%s8533_s1 + $0x6] sm:$0x3] }
  0x91   : > { %v5448_v53 = vcombine.low %v1405_v30, %v1408_v47  ;;  %v1421_v54 = vrot.slane %v5157_v14, 5  ;;  %v1420_v55 = vrot.slane %v1418_v23, 4  ;;  %v1412_v59 = vsel %vm6969_vm7, %v5188_v17, %v1411_v18  ;;  %v5158_v29 = vld [vmem:[%s6708_s27 + $0xb0] sm:$0x1]  ;;  %v5174_v13 = vld [vmem:[%s6708_s27 + $0xa8] sm:$0xe] }
  0x92   : > { %v1415_v21 = vsel %vm6969_vm7, %v1413_v48, %v1414_v46  ;;  %v1425_v63 = vrot.slane %v5140_v15, 5  ;;  %v1419_v9 = vsel %vm6969_vm7, %v5189_v12, %v1418_v23  ;;  %v1432_v38 = vrot.slane %v5142_v58, 5  ;;  %v5159_v18 = vld [vmem:[%s6708_s27 + $0xbc] sm:$0x1]  ;;  %v5175_v20 = vld [vmem:[%s6708_s27 + $0xb4] sm:$0xe] }
  0x93   : > { %v1422_v0 = vsel %vm6969_vm7, %v1420_v55, %v1421_v54  ;;  %v7244_v30 = vld [vmem:[%s6708_s27 + $0x28] sm:$0xf]  ;;  %v5449_v14 = vcombine.low %v1412_v59, %v1415_v21  ;;  %v5310_v62 = vcombine.low %v6819_v40, %v6825_v49  ;;  %v5190_v1 = vrot.slane %v5174_v13, 9  ;;  %v5144_v48 = vld [vmem:[%s6708_s27 + $0xc4] sm:$0xf] }
  0x94   : > { %v5450_v51 = vcombine.low %v1419_v9, %v1422_v0  ;;  %v1428_v17 = vrot.slane %v5158_v29, 5  ;;  %v5191_v46 = vrot.slane %v5175_v20, 9  ;;  %v1435_v47 = vrot.slane %v5159_v18, 5  ;;  %v5176_v12 = vld [vmem:[%s6708_s27 + $0xc0] sm:$0xe] }
  0x95   : > { %5921 = vmatmul.mubr.msk.bf16.vlgmr.msra.gmra.mrb[0].mxu1 %vm2107_vm3, %v5307_v44  ;;  %6073 = vmatmul.mubr.msk.bf16.gmra.mrb[16].mxu0 %vm2107_vm3, %v5447_v43  ;;  %v6539_v44 = vld [vmem:[%s6708_s27 + $0x24] sm:$0xf]  ;;  %v1434_v43 = vrot.slane %v1432_v38, 4  ;;  %v1426_v40 = vsel %vm6969_vm7, %v5190_v1, %v1425_v63  ;;  %v1439_v23 = vrot.slane %v5144_v48, 5  ;;  %v5311_v54 = vcombine.low %v6852_v34, %v6858_v41  ;;  %v7291_v18 = vld [vmem:[%s6708_s27 + $0x28] sm:$0xf] }
  0x96   : > { %5953 = vmatpush3.bf16.msra.mxu1 %v2696_v4  ;;  %5924 = vmatprep.mubr.msk.bf16.mxu1 %vm2107_vm3, %v5308_v45  ;;  %v5309_v61 = vcombine.low %v6539_v44, %v7244_v30  ;;  %v1427_v45 = vrot.slane %v1425_v63, 4  ;;  %v1433_v50 = vsel %vm6969_vm7, %v5191_v46, %v1432_v38  ;;  %v5312_v55 = vcombine.low %v6884_v24, %v6887_v31  ;;  %v5193_v24 = vld [vmem:[%s6708_s27 + $0x18] sm:$0xf]  ;;  %v7278_v31 = vld [vmem:[%s6708_s27 + $0x1c] sm:$0xf] }
  0x97   : > { %6076 = vmatprep.mubr.msk.bf16.mxu0 %vm2107_vm3, %v5448_v53  ;;  %6451 = vmatprep.subr.msk.bf16.mxu1 %vm2156_vm0, %v7222_v10  ;;  %v1436_v4 = vsel %vm6969_vm7, %v1434_v43, %v1435_v47  ;;  %v5160_v53 = vld [vmem:[%s6708_s27 + $0xc8] sm:$0x1]  ;;  %v5192_v59 = vrot.slane %v5176_v12, 9  ;;  %v1441_v21 = vrot.slane %v1439_v23, 4  ;;  %v5313_v9 = vcombine.low %v6914_v25, %v6920_v33  ;;  %v5195_v38 = vld [vmem:[%s6708_s27 + $0x24] sm:$0xf] }
  0x98   : > { %v1429_v49 = vsel %vm6969_vm7, %v1427_v45, %v1428_v17  ;;  %v5452_v58 = vcombine.low %v1433_v50, %v1436_v4  ;;  %v1442_v63 = vrot.slane %v5160_v53, 5  ;;  %v5314_v29 = vcombine.low %v6947_v26, %v6950_v37  ;;  %v5197_v25 = vld [vmem:[%s6708_s27 + $0x30] sm:$0xf]  ;;  %v7295_v33 = vld [vmem:[%s6708_s27 + $0x34] sm:$0xf] }
  0x99   : > { %v5451_v15 = vcombine.low %v1426_v40, %v1429_v49  ;;  %v1440_v34 = vsel %vm6969_vm7, %v5192_v59, %v1439_v23  ;;  %v5471_v13 = vcombine.low %v5193_v24, %v7278_v31  ;;  %v5315_v26 = vcombine.low %v6965_v5, %v6980_v35  ;;  %v5199_v5 = vld [vmem:[%s6708_s27 + $0x3c] sm:$0xf]  ;;  %v7315_v35 = vld [vmem:[%s6708_s27 + $0x40] sm:$0xf]  ;;  %v7336_v50 = vld [vmem:[%s6708_s27 + $0x14] sm:$0x1] }
  0x9a   : > { %v1443_v41 = vsel %vm6969_vm7, %v1441_v21, %v1442_v63  ;;  %v5472_v37 = vcombine.low %v5195_v38, %v7291_v18  ;;  %v5316_v20 = vcombine.low %v6998_v7, %v7003_v19  ;;  %v4198_v44 = vsel %vm2156_vm0, %v7036_v28, 0  ;;  %v5201_v7 = vld [vmem:[%s6708_s27 + $0x48] sm:$0xf]  ;;  %v7320_v19 = vld [vmem:[%s6708_s27 + $0x4c] sm:$0xf] }
  0x9b   : > { %v5453_v0 = vcombine.low %v1440_v34, %v1443_v41  ;;  %v7325_v28 = vld [vmem:[%s6708_s27 + $0x8] sm:$0x1]  ;;  %v1500_v1 = vshll.u32 %v5193_v24, 16  ;;  %v1521_v45 = vshrl.u32 %v5195_v38, 16  ;;  %v1524_v17 = vshll.u32 %v5195_v38, 16 }
  0x9c   : > { %v5317_v46 = vcombine.low %v7026_v56, %v7029_v57  ;;  %v5474_v43 = vcombine.low %v5199_v5, %v7315_v35  ;;  %v1545_v47 = vshrl.u32 %v5197_v25, 16  ;;  %v1548_v48 = vshll.u32 %v5197_v25, 16  ;;  %v5205_v63 = vld [vmem:[%s6708_s27 + $0x60] sm:$0xf] }
  0x9d   : > { %5925 = vmatmul.mubr.msk.bf16.gmra.mrb[4].mxu1 %vm2107_vm3, %v5309_v61  ;;  %6077 = vmatmul.mubr.msk.bf16.gmra.mrb[20].mxu0 %vm2107_vm3, %v5449_v14  ;;  %v5473_v61 = vcombine.low %v5197_v25, %v7295_v33  ;;  %v7308_v14 = vld [vmem:[%s8533_s1 + $0x10] sm:$0x3]  ;;  %v5318_v40 = vcombine.low %v7060_v52, %v7063_v60  ;;  %v5475_v49 = vcombine.low %v5201_v7, %v7320_v19  ;;  %v729_v23 = vrot.slane %v7197_v27, 5  ;;  %v5203_v52 = vld [vmem:[%s6708_s27 + $0x54] sm:$0xf] }
  0x9e   : > { %5928 = vmatprep.mubr.msk.bf16.mxu1 %vm2107_vm3, %v5310_v62  ;;  %6080 = vmatprep.mubr.msk.bf16.mxu0 %vm2107_vm3, %v5450_v51  ;;  %v725_v62 = vrot.slane %v7325_v28, 5  ;;  %v1497_v51 = vshrl.u32 %v5193_v24, 16  ;;  %v732_v4 = vrot.slane %v7336_v50, 5  ;;  %v1569_v53 = vshrl.u32 %v5199_v5, 16  ;;  %v7346_v60 = vld [vmem:[%s6708_s27 + $0x58] sm:$0xf] }
  0x9f   : > { %v1572_v12 = vshll.u32 %v5199_v5, 16  ;;  %v7341_v57 = vrot.slane %v1500_v1, 5  ;;  %v1596_v21 = vshll.u32 %v5201_v7, 16  ;;  %v7356_v34 = vrot.slane %v1545_v47, 4  ;;  %v7372_v25 = vld [vmem:[%s6708_s27 + $0x6c] sm:$0xf] }
  0xa0   : > { %v7339_v56 = vrot.slane %v1497_v51, 4  ;;  %v7358_v41 = vrot.slane %v1548_v48, 5  ;;  %v1617_v38 = vshrl.u32 %v5203_v52, 16  ;;  %v653_v5 = vld [vmem:[%s6708_s27] sm:$0xe]  ;;  %v5476_v1 = vcombine.low %v5203_v52, %v7346_v60 }
  0xa1   : > { %v1665_v47 = vshrl.u32 %v7372_v25, 16  ;;  %v1668_v48 = vshll.u32 %v7372_v25, 16  ;;  %v6546_v24 = vld [vmem:[%s6708_s27 + $0x40] sm:$0xf] }
  0xa5   : > { %5929 = vmatmul.mubr.msk.bf16.gmra.mrb[8].mxu1 %vm2107_vm3, %v5311_v54  ;;  %6081 = vmatmul.mubr.msk.bf16.gmra.mrb[24].mxu0 %vm2107_vm3, %v5451_v15  ;;  %v1593_v15 = vshrl.u32 %v5201_v7, 16  ;;  %v7381_v7 = vrot.slane %v1596_v21, 5  ;;  %v5321_v21 = vcombine.low %v7132_v2, %v7135_v8  ;;  %v7420_v2 = vrot.slane %v1668_v48, 5 }
  0xa6   : > { %5932 = vmatprep.mubr.msk.bf16.mxu1 %vm2107_vm3, %v5312_v55  ;;  %6084 = vmatprep.mubr.msk.bf16.mxu0 %vm2107_vm3, %v5452_v58  ;;  %v7348_v55 = vrot.slane %v1521_v45, 4  ;;  %v7350_v58 = vrot.slane %v1524_v17, 5  ;;  %v1641_v45 = vshrl.u32 %v5205_v63, 16  ;;  %v654_v17 = vld [vmem:[%s6708_s27 + $0xc] sm:$0xe] }
  0xad   : > { %5933 = vmatmul.mubr.msk.bf16.gmra.mrb[12].mxu1 %vm2107_vm3, %v5313_v9  ;;  %6085 = vmatmul.mubr.msk.bf16.gmra.mrb[28].mxu0 %vm2107_vm3, %v5453_v0  ;;  %v7365_v0 = vld [vmem:[%s6708_s27 + $0x64] sm:$0xf]  ;;  %v658_v9 = vld [vmem:[%s6708_s27 + $0x3c] sm:$0xe] }
  0xae   : > { %5936 = vmatprep.mubr.msk.bf16.mxu1 %vm2107_vm3, %v5314_v29  ;;  %6090 = vmatprep.mubr.msk.bf16.mxu0 %vm2107_vm3, %v5471_v13  ;;  %v7367_v29 = vrot.slane %v1569_v53, 4  ;;  %v7369_v13 = vrot.slane %v1572_v12, 5  ;;  %v657_v12 = vld [vmem:[%s6708_s27 + $0x30] sm:$0xe] }
  0xb5   : > { %5937 = vmatmul.mubr.msk.bf16.gmra.mrb[16].mxu1 %vm2107_vm3, %v5315_v26  ;;  %6091 = vmatmul.mubr.msk.bf16.vlgmr.msra.gmra.mrb[0].mxu0 %vm2107_vm3, %v5472_v37  ;;  %v722_v26 = vrot.slane %v7175_v6, 5  ;;  %v7375_v37 = vrot.slane %v1593_v15, 4  ;;  %v5320_v6 = vcombine.low %v7108_v22, %v7111_v16  ;;  %v5209_v15 = vld [vmem:[%s6708_s27 + $0x78] sm:$0xf]  ;;  %v5098_v22 = vrot.slane %v654_v17, 9 }
  0xb6   : > { %6123 = vmatpush3.bf16.msra.mxu0 %v4198_v44  ;;  %5940 = vmatprep.mubr.msk.bf16.mxu1 %vm2107_vm3, %v5316_v20  ;;  %v5319_v44 = vcombine.low %v7084_v36, %v7087_v39  ;;  %v7390_v36 = vrot.slane %v1617_v38, 4  ;;  %v7393_v39 = vld [vmem:[%s6708_s27 + $0x70] sm:$0xf]  ;;  %v731_v16 = vrot.slane %v729_v23, 4  ;;  %v1692_v38 = vshll.u32 %v5209_v15, 16 }
  0xb7   : > { %6094 = vmatprep.mubr.msk.bf16.mxu0 %vm2107_vm3, %v5473_v61  ;;  %6457 = vmatprep.subr.msk.bf16.mxu0 %vm2156_vm0, %v7308_v14  ;;  %v1620_v61 = vshll.u32 %v5203_v52, 16  ;;  %v7404_v52 = vrot.slane %v1641_v45, 4  ;;  %v7418_v45 = vld [vmem:[%s6708_s27 + $0x7c] sm:$0xf]  ;;  %v5101_v20 = vrot.slane %v657_v12, 9 }
  0xb8   : > { %v7444_v28 = vsel %vm6969_vm7, %v731_v16, %v732_v4  ;;  %v7452_v48 = vrot.slane %v1692_v38, 5  ;;  %v5479_v27 = vcombine.low %v5209_v15, %v7418_v45  ;;  %v7459_v4 = vsel %vm2156_vm0, %v7222_v10, 0  ;;  %v7463_v16 = vld [vmem:[%s6708_s27 + $0x90] sm:$0xf]  ;;  %v659_v12 = vld [vmem:[%s6708_s27 + $0x48] sm:$0xe] }
  0xb9   : > { %v7396_v53 = vrot.slane %v1620_v61, 5  ;;  %v1737_v10 = vshrl.u32 %v7463_v16, 16 }
  0xba   : > { %8552 = vst [vmem:[#allocation3_spill] sm:$0xff] %v7452_v48  ;;  %v7611_v48 = vld [vmem:[%s6708_s27 + $0x2c] sm:$0x1] }
  0xbb   : > { %8568 = vst [vmem:[#allocation17_spill] sm:$0xff] %v7611_v48 }
  0xbd   : > { %5941 = vmatmul.mubr.msk.bf16.gmra.mrb[20].mxu1 %vm2107_vm3, %v5317_v46  ;;  %6095 = vmatmul.mubr.msk.bf16.gmra.mrb[4].mxu0 %vm2107_vm3, %v5474_v43  ;;  %v1644_v46 = vshll.u32 %v5205_v63, 16  ;;  %v5477_v43 = vcombine.low %v5205_v63, %v7365_v0  ;;  %v1689_v63 = vshrl.u32 %v5209_v15, 16  ;;  %v6543_v15 = vld [vmem:[%s6708_s27 + $0x20] sm:$0x1] }
  0xbe   : > { %5944 = vmatprep.mubr.msk.bf16.mxu1 %vm2107_vm3, %v5318_v40  ;;  %6098 = vmatprep.mubr.msk.bf16.mxu0 %vm2107_vm3, %v5475_v49  ;;  %v5097_v40 = vrot.slane %v653_v5, 9  ;;  %v724_v49 = vrot.slane %v722_v26, 4  ;;  %v7412_v5 = vrot.slane %v1665_v47, 4  ;;  %v7438_v47 = vsel %vm6969_vm7, %v5098_v22, %v729_v23 }
  0xbf   : > { %v7409_v61 = vrot.slane %v1644_v46, 5  ;;  %v655_v46 = vld [vmem:[%s6708_s27 + $0x18] sm:$0xe] }
  0xc0   : > { %v723_v8 = vsel %vm6969_vm7, %v5097_v40, %v722_v26  ;;  %v726_v17 = vsel %vm6969_vm7, %v724_v49, %v725_v62  ;;  %v7447_v62 = vld [vmem:[%s6708_s27 + $0x88] sm:$0xf]  ;;  %v7450_v26 = vrot.slane %v1689_v63, 4  ;;  %v656_v40 = vld [vmem:[%s6708_s27 + $0x24] sm:$0xe]  ;;  %v5099_v22 = vrot.slane %v655_v46, 9 }
  0xc1   : > { %v5339_v50 = vcombine.low %v723_v8, %v726_v17  ;;  %v5340_v63 = vcombine.low %v7438_v47, %v7444_v28  ;;  %v743_v8 = vrot.slane %v7244_v30, 5  ;;  %v1740_v46 = vshll.u32 %v7463_v16, 16 }
  0xc2   : > { %v5100_v49 = vrot.slane %v656_v40, 9 }
  0xc5   : > { %5945 = vmatmul.mubr.msk.bf16.gmra.mrb[24].mxu1 %vm2107_vm3, %v5319_v44  ;;  %6099 = vmatmul.mubr.msk.bf16.gmra.mrb[8].mxu0 %vm2107_vm3, %v5476_v1  ;;  %v5478_v1 = vcombine.low %v7372_v25, %v7393_v39  ;;  %v739_v25 = vrot.slane %v6543_v15, 5  ;;  %v7469_v44 = vld [vmem:[%s6708_s27 + $0x94] sm:$0xf] }
  0xc6   : > { %5948 = vmatprep.mubr.msk.bf16.mxu1 %vm2107_vm3, %v5320_v6  ;;  %6102 = vmatprep.mubr.msk.bf16.mxu0 %vm2107_vm3, %v5477_v43  ;;  %v7429_v6 = vld [vmem:[%s6708_s27 + $0x84] sm:$0xf]  ;;  %v736_v43 = vrot.slane %v7208_v42, 5  ;;  %8553 = vst [vmem:[#allocation4_spill] sm:$0xff] %v7469_v44  ;;  %v6544_v15 = vld [vmem:[%s6708_s27 + $0x34] sm:$0xf] }
  0xc7   : > { %v1713_v42 = vshrl.u32 %v7429_v6, 16  ;;  %v1716_v23 = vshll.u32 %v7429_v6, 16  ;;  %v5480_v28 = vcombine.low %v7429_v6, %v7447_v62  ;;  %v750_v51 = vrot.slane %v6544_v15, 5 }
  0xc8   : > { %v738_v38 = vrot.slane %v736_v43, 4  ;;  %v745_v15 = vrot.slane %v743_v8, 4 }
  0xc9   : > { %v7472_v17 = vrot.slane %v1713_v42, 4  ;;  %v7479_v47 = vrot.slane %v1716_v23, 5  ;;  %v7485_v42 = vld [vmem:[%s6708_s27 + $0x9c] sm:$0xf]  ;;  %v752_v59 = vrot.slane %v750_v51, 4 }
  0xca   : > { %v1761_v6 = vshrl.u32 %v7485_v42, 16  ;;  %v1764_v23 = vshll.u32 %v7485_v42, 16  ;;  %v740_v40 = vsel %vm6969_vm7, %v738_v38, %v739_v25  ;;  %v757_v25 = vrot.slane %v6546_v24, 5  ;;  %v7523_v24 = vld [vmem:[%s6708_s27 + $0xa8] sm:$0xf] }
  0xcb   : > { %8554 = vst [vmem:[#allocation5_spill] sm:$0xff] %v7472_v17  ;;  %8555 = vst [vmem:[#allocation6_spill] sm:$0xff] %v7479_v47  ;;  %v6549_v38 = vld [vmem:[%s6708_s27 + $0x44] sm:$0x1]  ;;  %v6555_v17 = vld [vmem:[%s6708_s27 + $0x68] sm:$0x1] }
  0xcd   : > { %5949 = vmatmul.mubr.msk.bf16.gmra.mrb[28].mxu1 %vm2107_vm3, %v5321_v21  ;;  %6103 = vmatmul.mubr.msk.bf16.gmra.mrb[12].mxu0 %vm2107_vm3, %v5478_v1  ;;  %v737_v21 = vsel %vm6969_vm7, %v5099_v22, %v736_v43  ;;  %v5481_v1 = vcombine.low %v7463_v16, %v7469_v44  ;;  %v7502_v43 = vrot.slane %v1737_v10, 4  ;;  %v7504_v22 = vrot.slane %v1740_v46, 5  ;;  %v6548_v10 = vld [vmem:[%s6708_s27 + $0x4c] sm:$0xf] }
  0xce   : > { %5954 = vmatprep.mubr.msk.bf16.mxu1 %vm2107_vm3, %v5339_v50  ;;  %6106 = vmatprep.mubr.msk.bf16.mxu0 %vm2107_vm3, %v5479_v27  ;;  %v6545_v50 = vld [vmem:[%s6708_s27 + $0x2c] sm:$0x1]  ;;  %v7500_v27 = vld [vmem:[%s6708_s27 + $0xa0] sm:$0xf]  ;;  %v7508_v16 = vsel %vm6969_vm7, %v5100_v49, %v743_v8  ;;  %v764_v3 = vrot.slane %v6548_v10, 5  ;;  %v5341_v46 = vcombine.low %v737_v21, %v740_v40  ;;  %v1785_v21 = vshrl.u32 %v7523_v24, 16 }
  0xcf   : > { %v746_v30 = vrot.slane %v6545_v50, 5  ;;  %8556 = vst [vmem:[#allocation7_spill] sm:$0xff] %v7502_v43  ;;  %8557 = vst [vmem:[#allocation8_spill] sm:$0xff] %v7504_v22  ;;  %v6547_v50 = vld [vmem:[%s6708_s27 + $0x38] sm:$0x1]  ;;  %v7516_v22 = vrot.slane %v1761_v6, 4 }
  0xd0   : > { %v753_v54 = vrot.slane %v6547_v50, 5  ;;  %v7518_v43 = vrot.slane %v1764_v23, 5  ;;  %v7531_v50 = vsel %vm6969_vm7, %v5101_v20, %v750_v51  ;;  %v1788_v6 = vshll.u32 %v7523_v24, 16  ;;  %v7536_v23 = vld [vmem:[%s6708_s27 + $0xac] sm:$0xf] }
  0xd1   : > { %8558 = vst [vmem:[#allocation9_spill] sm:$0xff] %v7516_v22  ;;  %v7527_v8 = vsel %vm6969_vm7, %v745_v15, %v746_v30  ;;  %8560 = vst [vmem:[#allocation11_spill] sm:$0xff] %v7536_v23  ;;  %v5102_v40 = vrot.slane %v658_v9, 9  ;;  %v759_v10 = vrot.slane %v757_v25, 4  ;;  %v760_v49 = vrot.slane %v6549_v38, 5 }
  0xd2   : > { %8559 = vst [vmem:[#allocation10_spill] sm:$0xff] %v7518_v43  ;;  %v5103_v43 = vrot.slane %v659_v12, 9  ;;  %v754_v20 = vsel %vm6969_vm7, %v752_v59, %v753_v54  ;;  %v766_v51 = vrot.slane %v764_v3, 4  ;;  %v6550_v30 = vld [vmem:[%s6708_s27 + $0x50] sm:$0x1]  ;;  %v5342_v9 = vcombine.low %v7508_v16, %v7527_v8 }
  0xd3   : > { %v767_v15 = vrot.slane %v6550_v30, 5  ;;  %v6551_v22 = vld [vmem:[%s6708_s27 + $0x58] sm:$0xf]  ;;  %v1506_v54 = vshll.u32 %v7278_v31, 16  ;;  %v1530_v59 = vshll.u32 %v7291_v18, 16  ;;  %v5483_v16 = vcombine.low %v7523_v24, %v7536_v23 }
  0xd4   : > { %v771_v47 = vrot.slane %v6551_v22, 5  ;;  %v7554_v22 = vrot.slane %v1785_v21, 4  ;;  %v7561_v38 = vld [vmem:[%s6708_s27 + $0xb4] sm:$0xf]  ;;  %v6552_v12 = vld [vmem:[%s6708_s27 + $0x64] sm:$0xf]  ;;  %v7571_v21 = vsel %vm6969_vm7, %v5102_v40, %v757_v25  ;;  %v7575_v24 = vsel %vm6969_vm7, %v759_v10, %v760_v49 }
  0xd5   : > { %5955 = vmatmul.mubr.msk.bf16.vlgmr.msra.gmra.mrb[0].mxu1 %vm2107_vm3, %v5340_v63  ;;  %6107 = vmatmul.mubr.msk.bf16.gmra.mrb[16].mxu0 %vm2107_vm3, %v5480_v28  ;;  %v660_v28 = vld [vmem:[%s6708_s27 + $0x54] sm:$0xe]  ;;  %v6553_v8 = vld [vmem:[%s8533_s1 + $0x8] sm:$0x3]  ;;  %v7582_v30 = vsel %vm6969_vm7, %v5103_v43, %v764_v3  ;;  %v7593_v25 = vld [vmem:[%s6708_s27 + $0xc4] sm:$0xf] }
  0xd6   : > { %5987 = vmatpush3.bf16.msra.mxu1 %v7459_v4  ;;  %5958 = vmatprep.mubr.msk.bf16.mxu1 %vm2107_vm3, %v5341_v46  ;;  %8561 = vst [vmem:[#allocation12_spill] sm:$0xff] %v7554_v22  ;;  %v7556_v4 = vrot.slane %v1788_v6, 5  ;;  %v778_v46 = vrot.slane %v6552_v12, 5  ;;  %v7578_v6 = vld [vmem:[%s6708_s27 + $0xb8] sm:$0xf]  ;;  %8564 = vst [vmem:[#allocation15_spill] sm:$0xff] %v7593_v25 }
  0xd7   : > { %6110 = vmatprep.mubr.msk.bf16.mxu0 %vm2107_vm3, %v5481_v1  ;;  %6453 = vmatprep.subr.msk.bf16.mxu1 %vm2156_vm0, %v6553_v8  ;;  %v5343_v1 = vcombine.low %v7531_v50, %v754_v20  ;;  %v7585_v12 = vld [vmem:[%s6708_s27 + $0xc0] sm:$0xf]  ;;  %v7590_v50 = vsel %vm6969_vm7, %v766_v51, %v767_v15  ;;  %v5104_v40 = vrot.slane %v660_v28, 9  ;;  %v773_v49 = vrot.slane %v771_v47, 4  ;;  %v6554_v10 = vld [vmem:[%s6708_s27 + $0x5c] sm:$0x1] }
  0xd8   : > { %8562 = vst [vmem:[#allocation13_spill] sm:$0xff] %v7556_v4  ;;  %8563 = vst [vmem:[#allocation14_spill] sm:$0xff] %v7585_v12  ;;  %v661_v8 = vld [vmem:[%s6708_s27 + $0x60] sm:$0xe]  ;;  %v774_v20 = vrot.slane %v6554_v10, 5  ;;  %v7599_v3 = vrot.slane %v1506_v54, 5  ;;  %v1503_v10 = vor.u32 %v7341_v57, %v7339_v56  ;;  %v5484_v54 = vcombine.low %v7561_v38, %v7578_v6 }
  0xd9   : > { %v7597_v63 = vld [vmem:[%s6708_s27 + $0x20] sm:$0x1]  ;;  %v8566_v43 = vshrl.u32 %v7278_v31, 16  ;;  %v7603_v22 = vrot.slane %v1530_v59, 5  ;;  %v8567_v51 = vshrl.u32 %v7291_v18, 16  ;;  %v5105_v23 = vrot.slane %v661_v8, 9 }
  0xda   : > { %8565 = vst [vmem:[#allocation16_spill] sm:$0xff] %v7597_v63  ;;  %v780_v28 = vrot.slane %v778_v46, 4  ;;  %v781_v44 = vrot.slane %v6555_v17, 5  ;;  %v5344_v31 = vcombine.low %v7571_v21, %v7575_v24  ;;  %v5485_v18 = vcombine.low %v7585_v12, %v7593_v25  ;;  %v7620_v59 = vld [vmem:[%s6708_s27 + $0xcc] sm:$0xf] }
  0xdb   : > { %v1512_v4 = vrot.slane %v8566_v43, 4  ;;  %v1536_v15 = vrot.slane %v8567_v51, 4  ;;  %v6556_v8 = vld [vmem:[%s6708_s27 + $0x70] sm:$0xf]  ;;  %v8569_v56 = vcombine.low %v7485_v42, %v7500_v27  ;;  %v5345_v57 = vcombine.low %v7582_v30, %v7590_v50  ;;  %v662_v51 = vld [vmem:[%s6708_s27 + $0x6c] sm:$0xe] }
  0xdc   : > { %v785_v43 = vrot.slane %v6556_v8, 5  ;;  %v7632_v17 = vsel %vm6969_vm7, %v5104_v40, %v771_v47  ;;  %v7635_v21 = vld [vmem:[%s6708_s27 + $0xd0] sm:$0xf]  ;;  %v1516_v24 = vshll.u32 %v7597_v63, 16  ;;  %v7645_v42 = vsel %vm6969_vm7, %v773_v49, %v774_v20  ;;  %v6557_v20 = vld [vmem:[%s6708_s27 + $0x74] sm:$0x1] }
  0xdd   : > { %5959 = vmatmul.mubr.msk.bf16.gmra.mrb[4].mxu1 %vm2107_vm3, %v5342_v9  ;;  %6111 = vmatmul.mubr.msk.bf16.gmra.mrb[20].mxu0 %vm2107_vm3, %v8569_v56  ;;  %v1527_v9 = vor.u32 %v7350_v58, %v7348_v55  ;;  %v1513_v47 = vor.u32 %v1512_v4, %v7599_v3  ;;  %v1537_v30 = vor.u32 %v1536_v15, %v7603_v22  ;;  %v1540_v50 = vshll.u32 %v7611_v48, 16 }
  0xde   : > { %5962 = vmatprep.mubr.msk.bf16.mxu1 %vm2107_vm3, %v5343_v1  ;;  %6114 = vmatprep.mubr.msk.bf16.mxu0 %vm2107_vm3, %v5483_v16  ;;  %v7652_v40 = vsel %vm6969_vm7, %v5105_v23, %v778_v46  ;;  %v7656_v55 = vsel %vm6969_vm7, %v780_v28, %v781_v44  ;;  %v1504_v58 = vrot.slane %v1503_v10, 4  ;;  %v1554_v16 = vshll.u32 %v7295_v33, 16  ;;  %v663_v44 = vld [vmem:[%s6708_s27 + $0x78] sm:$0xe]  ;;  %v6558_v28 = vld [vmem:[%s6708_s27 + $0x7c] sm:$0xf] }
  0xdf   : > { %v5106_v1 = vrot.slane %v662_v51, 9  ;;  %v787_v49 = vrot.slane %v785_v43, 4  ;;  %v788_v15 = vrot.slane %v6557_v20, 5  ;;  %v1518_v46 = vrot.slane %v1516_v24, 5  ;;  %v7669_v51 = vld [vmem:[%s6708_s27 + $0x38] sm:$0x1] }
  0xe0   : > { %v1528_v8 = vrot.slane %v1527_v9, 4  ;;  %v792_v10 = vrot.slane %v6558_v28, 5  ;;  %v1514_v48 = vrot.slane %v1513_v47, 4  ;;  %v1538_v63 = vrot.slane %v1537_v30, 4  ;;  %v664_v23 = vld [vmem:[%s6708_s27 + $0x84] sm:$0xe] }
  0xe1   : > { %v1542_v4 = vrot.slane %v1540_v50, 5  ;;  %v1509_v20 = vsel %vm6730_vm4, %v1504_v58, %v7599_v3  ;;  %v7674_v25 = vrot.slane %v1554_v16, 5  ;;  %v8570_v24 = vshrl.u32 %v7295_v33, 16  ;;  %v6559_v28 = vld [vmem:[%s6708_s27 + $0x88] sm:$0xf] }
  0xe2   : > { %v799_v12 = vrot.slane %v6559_v28, 5  ;;  %v7682_v47 = vsel %vm6969_vm7, %v5106_v1, %v785_v43  ;;  %v7686_v30 = vsel %vm6969_vm7, %v787_v49, %v788_v15  ;;  %v5107_v50 = vrot.slane %v663_v44, 9  ;;  %v6560_v58 = vld [vmem:[%s6708_s27 + $0x80] sm:$0x1] }
  0xe3   : > { %v1560_v9 = vrot.slane %v8570_v24, 4  ;;  %v1578_v56 = vshll.u32 %v7315_v35, 16  ;;  %v1533_v33 = vsel %vm6730_vm4, %v1528_v8, %v7603_v22  ;;  %v794_v3 = vrot.slane %v792_v10, 4  ;;  %v6561_v8 = vld [vmem:[%s6708_s27 + $0x8c] sm:$0x1] }
  0xe4   : > { %v795_v43 = vrot.slane %v6560_v58, 5  ;;  %v1551_v16 = vor.u32 %v7358_v41, %v7356_v34  ;;  %v1519_v1 = vsel %vm6730_vm4, %v1514_v48, %v1518_v46  ;;  %v5108_v22 = vrot.slane %v664_v23, 9 }
  0xe5   : > { %5963 = vmatmul.mubr.msk.bf16.gmra.mrb[8].mxu1 %vm2107_vm3, %v5344_v31  ;;  %6115 = vmatmul.mubr.msk.bf16.gmra.mrb[24].mxu0 %vm2107_vm3, %v5484_v54  ;;  %v1543_v31 = vsel %vm6730_vm4, %v1538_v63, %v1542_v4  ;;  %v1564_v54 = vshll.u32 %v7669_v51, 16  ;;  %v1561_v49 = vor.u32 %v1560_v9, %v7674_v25  ;;  %v801_v15 = vrot.slane %v799_v12, 4  ;;  %v7726_v9 = vld [vmem:[%s6708_s27 + $0x44] sm:$0x1] }
  0xe6   : > { %5966 = vmatprep.mubr.msk.bf16.mxu1 %vm2107_vm3, %v5345_v57  ;;  %6118 = vmatprep.mubr.msk.bf16.mxu0 %vm2107_vm3, %v5485_v18  ;;  %v802_v34 = vrot.slane %v6561_v8, 5  ;;  %v1602_v41 = vshll.u32 %v7320_v19, 16  ;;  %v5348_v18 = vcombine.low %v7682_v47, %v7686_v30  ;;  %v7711_v48 = vsel %vm2156_vm0, %v7308_v14, 0  ;;  %v6566_v30 = vld [vmem:[%s6708_s27 + $0xac] sm:$0xf] }
  0xe7   : > { %v7713_v63 = vrot.slane %v1578_v56, 5  ;;  %v8571_v57 = vshrl.u32 %v7315_v35, 16  ;;  %v5504_v23 = vcombine.low %v1509_v20, %v1519_v1  ;;  %v7719_v46 = vsel %vm6969_vm7, %v5107_v50, %v792_v10  ;;  %v665_v35 = vld [vmem:[%s6708_s27 + $0x90] sm:$0xe]  ;;  %v6562_v20 = vld [vmem:[%s6708_s27 + $0x94] sm:$0xf] }
  0xe8   : > { %v7723_v44 = vsel %vm6969_vm7, %v794_v3, %v795_v43  ;;  %v1552_v24 = vrot.slane %v1551_v16, 4  ;;  %v5505_v14 = vcombine.low %v1533_v33, %v1543_v31  ;;  %v1566_v28 = vrot.slane %v1564_v54, 5  ;;  %v7749_v54 = vld [vmem:[%s6708_s27 + $0x50] sm:$0x1] }
  0xe9   : > { %v1584_v4 = vrot.slane %v8571_v57, 4  ;;  %v7730_v56 = vsel %vm6969_vm7, %v5108_v22, %v799_v12  ;;  %v806_v10 = vrot.slane %v6562_v20, 5  ;;  %v1562_v50 = vrot.slane %v1561_v49, 4  ;;  %v666_v49 = vld [vmem:[%s6708_s27 + $0x9c] sm:$0xe] }
  0xea   : > { %v7736_v3 = vsel %vm6969_vm7, %v801_v15, %v802_v34  ;;  %v7738_v58 = vrot.slane %v1602_v41, 5  ;;  %v8572_v43 = vshrl.u32 %v7320_v19, 16  ;;  %v5349_v16 = vcombine.low %v7719_v46, %v7723_v44  ;;  %v6563_v15 = vld [vmem:[%s6708_s27 + $0xa0] sm:$0xf]  ;;  %v6564_v57 = vld [vmem:[%s6708_s27 + $0x98] sm:$0x1] }
  0xeb   : > { %v1575_v12 = vor.u32 %v7369_v13, %v7367_v29  ;;  %v1585_v1 = vor.u32 %v1584_v4, %v7713_v63  ;;  %v1588_v31 = vshll.u32 %v7726_v9, 16  ;;  %v8573_v22 = vcombine.low %v7632_v17, %v7645_v42 }
  0xec   : > { %v1608_v33 = vrot.slane %v8572_v43, 4  ;;  %v8574_v19 = vcombine.low %v7620_v59, %v7635_v21  ;;  %v1557_v29 = vsel %vm6730_vm4, %v1552_v24, %v7674_v25  ;;  %v5109_v13 = vrot.slane %v665_v35, 9 }
  0xed   : > { %5967 = vmatmul.mubr.msk.bf16.gmra.mrb[12].mxu1 %vm2107_vm3, %v8573_v22  ;;  %v813_v8 = vrot.slane %v6563_v15, 5  ;;  %v1626_v34 = vshll.u32 %v7346_v60, 16  ;;  %v8575_v17 = vcombine.low %v7652_v40, %v7656_v55  ;;  %v5350_v42 = vcombine.low %v7730_v56, %v7736_v3  ;;  %v6565_v22 = vld [vmem:[%s6708_s27 + $0xa4] sm:$0x1]  ;;  %v8580_v3 = vld [vmem:[#allocation3_spill] sm:$0xff] }
  0xee   : > { %6119 = vmatmul.mubr.msk.bf16.gmra.mrb[28].mxu0 %vm2107_vm3, %v8574_v19  ;;  %v808_v41 = vrot.slane %v806_v10, 4  ;;  %v809_v25 = vrot.slane %v6564_v57, 5  ;;  %v1599_v4 = vor.u32 %v7381_v7, %v7375_v37  ;;  %v1567_v46 = vsel %vm6730_vm4, %v1562_v50, %v1566_v28  ;;  %v7812_v57 = vld [vmem:[%s6708_s27 + $0x68] sm:$0x1] }
  0xef   : > { %5970 = vmatprep.mubr.msk.bf16.mxu1 %vm2107_vm3, %v8575_v17  ;;  %6124 = vmatprep.mubr.msk.bf16.mxu0 %vm2107_vm3, %v5504_v23  ;;  %v1609_v44 = vor.u32 %v1608_v33, %v7738_v58  ;;  %v1612_v40 = vshll.u32 %v7749_v54, 16  ;;  %v1650_v55 = vshll.u32 %v7365_v0, 16  ;;  %v1576_v23 = vrot.slane %v1575_v12, 4 }
  0xf0   : > { %v1586_v24 = vrot.slane %v1585_v1, 4  ;;  %v1590_v35 = vrot.slane %v1588_v31, 5  ;;  %v5110_v20 = vrot.slane %v666_v49, 9  ;;  %v815_v43 = vrot.slane %v813_v8, 4  ;;  %v7794_v1 = vld [vmem:[%s6708_s27 + $0x5c] sm:$0x1] }
  0xf1   : > { %v816_v19 = vrot.slane %v6565_v22, 5  ;;  %v7781_v15 = vrot.slane %v1626_v34, 5  ;;  %v8576_v37 = vshrl.u32 %v7346_v60, 16  ;;  %v5506_v28 = vcombine.low %v1557_v29, %v1567_v46  ;;  %v6567_v22 = vld [vmem:[%s6708_s27 + $0xb0] sm:$0x1] }
  0xf2   : > { %v7787_v50 = vsel %vm6969_vm7, %v5109_v13, %v806_v10  ;;  %v7791_v33 = vsel %vm6969_vm7, %v808_v41, %v809_v25  ;;  %v1600_v12 = vrot.slane %v1599_v4, 4  ;;  %v1610_v31 = vrot.slane %v1609_v44, 4  ;;  %v667_v25 = vld [vmem:[%s6708_s27 + $0xa8] sm:$0xe] }
  0xf3   : > { %v1632_v7 = vrot.slane %v8576_v37, 4  ;;  %v1614_v49 = vrot.slane %v1612_v40, 5  ;;  %v7796_v34 = vrot.slane %v1650_v55, 5  ;;  %v8577_v60 = vshrl.u32 %v7365_v0, 16 }
  0xf4   : > { %v1581_v10 = vsel %vm6730_vm4, %v1576_v23, %v7713_v63  ;;  %v1591_v29 = vsel %vm6730_vm4, %v1586_v24, %v1590_v35  ;;  %v7807_v13 = vsel %vm6969_vm7, %v5110_v20, %v813_v8  ;;  %v1623_v41 = vor.u32 %v7396_v53, %v7390_v36 }
  0xf5   : > { %v1656_v17 = vrot.slane %v8577_v60, 4  ;;  %5971 = vmatmul.mubr.msk.bf16.gmra.mrb[16].mxu1 %vm2107_vm3, %v5348_v18  ;;  %v7821_v0 = vsel %vm6969_vm7, %v815_v43, %v816_v19  ;;  %v1633_v63 = vor.u32 %v1632_v7, %v7781_v15  ;;  %v1636_v8 = vshll.u32 %v7794_v1, 16  ;;  %v7851_v7 = vld [vmem:[%s6708_s27 + $0x74] sm:$0x1] }
  0xf6   : > { %6125 = vmatmul.mubr.msk.bf16.vlgmr.msra.gmra.mrb[0].mxu0 %vm2107_vm3, %v5505_v14  ;;  %v1674_v36 = vshll.u32 %v7393_v39, 16  ;;  %5974 = vmatprep.mubr.msk.bf16.mxu1 %vm2107_vm3, %v5349_v16  ;;  %v5351_v53 = vcombine.low %v7787_v50, %v7791_v33  ;;  %v1605_v47 = vsel %vm6730_vm4, %v1600_v12, %v7738_v58  ;;  %v820_v18 = vrot.slane %v6566_v30, 5  ;;  %v668_v33 = vld [vmem:[%s6708_s27 + $0xb4] sm:$0xe] }
  0xf7   : > { %6157 = vmatpush3.bf16.msra.mxu0 %v7711_v48  ;;  %v1647_v14 = vor.u32 %v7409_v61, %v7404_v52  ;;  %6128 = vmatprep.mubr.msk.bf16.mxu0 %vm2107_vm3, %v5506_v28  ;;  %v1615_v48 = vsel %vm6730_vm4, %v1610_v31, %v1614_v49  ;;  %v1657_v16 = vor.u32 %v1656_v17, %v7796_v34  ;;  %v1660_v4 = vshll.u32 %v7812_v57, 16  ;;  %v6568_v17 = vld [vmem:[%s6708_s27 + $0xb8] sm:$0xf] }
  0xf8   : > { %v1698_v46 = vshll.u32 %v7418_v45, 16  ;;  %v5507_v44 = vcombine.low %v1581_v10, %v1591_v29  ;;  %v5352_v58 = vcombine.low %v7807_v13, %v7821_v0  ;;  %v1624_v40 = vrot.slane %v1623_v41, 4  ;;  %v7867_v41 = vld [vmem:[%s6708_s27 + $0x80] sm:$0x1]  ;;  %v8586_v0 = vld [vmem:[#allocation7_spill] sm:$0xff] }
  0xf9   : > { %v5111_v52 = vrot.slane %v667_v25, 9  ;;  %v1634_v61 = vrot.slane %v1633_v63, 4  ;;  %v1638_v55 = vrot.slane %v1636_v8, 5  ;;  %v7845_v23 = vrot.slane %v1674_v36, 5 }
  0xfa   : > { %v8578_v24 = vshrl.u32 %v7393_v39, 16  ;;  %v5508_v20 = vcombine.low %v1605_v47, %v1615_v48  ;;  %v822_v43 = vrot.slane %v820_v18, 4  ;;  %v823_v19 = vrot.slane %v6567_v22, 5  ;;  %v8581_v47 = vld [vmem:[#allocation4_spill] sm:$0xff]  ;;  %v6569_v48 = vld [vmem:[%s6708_s27 + $0xbc] sm:$0x1] }
  0xfb   : > { %v1648_v37 = vrot.slane %v1647_v14, 4  ;;  %v1658_v28 = vrot.slane %v1657_v16, 4  ;;  %v1662_v50 = vrot.slane %v1660_v4, 5  ;;  %v7854_v12 = vrot.slane %v1698_v46, 5 }
  0xfc   : > { %v1680_v35 = vrot.slane %v8578_v24, 4  ;;  %v8579_v31 = vshrl.u32 %v7418_v45, 16  ;;  %v1629_v39 = vsel %vm6730_vm4, %v1624_v40, %v7781_v15  ;;  %v821_v60 = vsel %vm6969_vm7, %v5111_v52, %v820_v18 }
  0xfd   : > { %v827_v10 = vrot.slane %v6568_v17, 5  ;;  %v1671_v29 = vor.u32 %v7420_v2, %v7412_v5  ;;  %5975 = vmatmul.mubr.msk.bf16.gmra.mrb[20].mxu1 %vm2107_vm3, %v5350_v42  ;;  %v1639_v45 = vsel %vm6730_vm4, %v1634_v61, %v1638_v55  ;;  %v1684_v63 = vshll.u32 %v7851_v7, 16 }
  0xfe   : > { %v1704_v49 = vrot.slane %v8579_v31, 4  ;;  %6129 = vmatmul.mubr.msk.bf16.gmra.mrb[4].mxu0 %vm2107_vm3, %v5507_v44  ;;  %v1681_v15 = vor.u32 %v1680_v35, %v7845_v23  ;;  %v1722_v8 = vshll.u32 %v7447_v62, 16  ;;  %5978 = vmatprep.mubr.msk.bf16.mxu1 %vm2107_vm3, %v5351_v53  ;;  %v824_v5 = vsel %vm6969_vm7, %v822_v43, %v823_v19  ;;  %v7900_v35 = vld [vmem:[%s6708_s27 + $0x8c] sm:$0x1]  ;;  %v8585_v31 = vld [vmem:[#allocation6_spill] sm:$0xff] }
  0xff   : > { %6132 = vmatprep.mubr.msk.bf16.mxu0 %vm2107_vm3, %v5508_v20  ;;  %v1653_v2 = vsel %vm6730_vm4, %v1648_v37, %v7796_v34  ;;  %v5112_v56 = vrot.slane %v668_v33, 9  ;;  %v1695_v42 = vor.u32 %v8580_v3, %v7450_v26  ;;  %v1663_v25 = vsel %vm6730_vm4, %v1658_v28, %v1662_v50  ;;  %v8584_v33 = vld [vmem:[#allocation5_spill] sm:$0xff] }
 0x100   : > { %v1705_v36 = vor.u32 %v1704_v49, %v7854_v12  ;;  %v1708_v53 = vshll.u32 %v7867_v41, 16  ;;  %v1746_v30 = vshll.u32 %v8581_v47, 16  ;;  %v5509_v18 = vcombine.low %v1629_v39, %v1639_v45  ;;  %v7916_v39 = vld [vmem:[%s6708_s27 + $0x98] sm:$0x1] }
 0x101   : > { %v829_v14 = vrot.slane %v827_v10, 4  ;;  %v830_v16 = vrot.slane %v6569_v48, 5  ;;  %v1672_v4 = vrot.slane %v1671_v29, 4  ;;  %v1682_v34 = vrot.slane %v1681_v15, 4  ;;  %v6570_v48 = vld [vmem:[%s6708_s27 + $0xc] sm:$0xf] }
 0x102   : > { %v1686_v46 = vrot.slane %v1684_v63, 5  ;;  %v7894_v44 = vrot.slane %v1722_v8, 5  ;;  %v8582_v26 = vshrl.u32 %v7447_v62, 16  ;;  %v1809_v52 = vshrl.u32 %v7561_v38, 16 }
 0x103   : > { %v5353_v61 = vcombine.low %v821_v60, %v824_v5  ;;  %v5510_v55 = vcombine.low %v1653_v2, %v1663_v25  ;;  %v1696_v24 = vrot.slane %v1695_v42, 4  ;;  %v1706_v20 = vrot.slane %v1705_v36, 4  ;;  %v8588_v5 = vld [vmem:[#allocation11_spill] sm:$0xff] }
 0x104   : > { %v1728_v40 = vrot.slane %v8582_v26, 4  ;;  %v1710_v43 = vrot.slane %v1708_v53, 5  ;;  %v7902_v22 = vrot.slane %v1746_v30, 5  ;;  %v8583_v19 = vshrl.u32 %v8581_v47, 16  ;;  %v7952_v26 = vld [vmem:[%s6708_s27 + $0xa4] sm:$0x1] }
 0x105   : > { %v828_v28 = vsel %vm6969_vm7, %v5112_v56, %v827_v10  ;;  %v831_v62 = vsel %vm6969_vm7, %v829_v14, %v830_v16  ;;  %v1677_v50 = vsel %vm6730_vm4, %v1672_v4, %v7845_v23  ;;  %v1719_v49 = vor.u32 %v8585_v31, %v8584_v33  ;;  %5979 = vmatmul.mubr.msk.bf16.gmra.mrb[24].mxu1 %vm2107_vm3, %v5352_v58  ;;  %v8587_v58 = vld [vmem:[#allocation8_spill] sm:$0xff] }
 0x106   : > { %v1752_v37 = vrot.slane %v8583_v19, 4  ;;  %6133 = vmatmul.mubr.msk.bf16.gmra.mrb[8].mxu0 %vm2107_vm3, %v5509_v18  ;;  %v1687_v60 = vsel %vm6730_vm4, %v1682_v34, %v1686_v46  ;;  %v1729_v17 = vor.u32 %v1728_v40, %v7894_v44  ;;  %v1732_v10 = vshll.u32 %v7900_v35, 16  ;;  %5982 = vmatprep.mubr.msk.bf16.mxu1 %vm2107_vm3, %v5353_v61  ;;  %v8590_v18 = vld [vmem:[#allocation14_spill] sm:$0xff]  ;;  %v6571_v16 = vld [vmem:[%s6708_s27 + $0x10] sm:$0xf]  ;;  %v8592_v19 = vld [vmem:[#allocation9_spill] sm:$0xff] }
 0x107   : > { %v1770_v23 = vshll.u32 %v7500_v27, 16  ;;  %v1812_v29 = vshll.u32 %v7561_v38, 16  ;;  %v1822_v45 = vshrl.u32 %v7578_v6, 16  ;;  %6136 = vmatprep.mubr.msk.bf16.mxu0 %vm2107_vm3, %v5510_v55  ;;  %v1701_v13 = vsel %vm6730_vm4, %v1696_v24, %v7854_v12 }
 0x108   : > { %v1743_v15 = vor.u32 %v8587_v58, %v8586_v0  ;;  %v1711_v63 = vsel %vm6730_vm4, %v1706_v20, %v1710_v43  ;;  %v1753_v38 = vor.u32 %v1752_v37, %v7902_v22  ;;  %v1756_v8 = vshll.u32 %v7916_v39, 16  ;;  %v8593_v37 = vld [vmem:[#allocation10_spill] sm:$0xff] }
 0x109   : > { %v1794_v2 = vshll.u32 %v8588_v5, 16  ;;  %v7942_v56 = vrot.slane %v1809_v52, 4  ;;  %v5354_v3 = vcombine.low %v828_v28, %v831_v62  ;;  %v5511_v42 = vcombine.low %v1677_v50, %v1687_v60  ;;  %v7967_v62 = vld [vmem:[%s6708_s27 + $0xb0] sm:$0x1]  ;;  %v8594_v60 = vld [vmem:[#allocation15_spill] sm:$0xff] }
 0x10a   : > { %v1720_v25 = vrot.slane %v1719_v49, 4  ;;  %v1730_v12 = vrot.slane %v1729_v17, 4  ;;  %v1734_v36 = vrot.slane %v1732_v10, 5  ;;  %v7944_v53 = vrot.slane %v1770_v23, 5  ;;  %v8595_v23 = vld [vmem:[#allocation12_spill] sm:$0xff] }
 0x10b   : > { %v8589_v47 = vshrl.u32 %v7500_v27, 16  ;;  %v1833_v14 = vshrl.u32 %v8590_v18, 16  ;;  %v5372_v4 = vcombine.low %v6570_v48, %v6571_v16  ;;  %v5512_v34 = vcombine.low %v1701_v13, %v1711_v63  ;;  %v7999_v16 = vld [vmem:[%s6708_s27 + $0xbc] sm:$0x1] }
 0x10c   : > { %v1744_v46 = vrot.slane %v1743_v15, 4  ;;  %v1754_v40 = vrot.slane %v1753_v38, 4  ;;  %v1758_v52 = vrot.slane %v1756_v8, 5  ;;  %v7954_v61 = vrot.slane %v1794_v2, 5  ;;  %v6572_v38 = vld [vmem:[%s6708_s27 + $0x18] sm:$0xf] }
 0x10d   : > { %v1776_v30 = vrot.slane %v8589_v47, 4  ;;  %v8591_v55 = vshrl.u32 %v8588_v5, 16  ;;  %v7958_v20 = vrot.slane %v1812_v29, 5  ;;  %v1836_v27 = vshll.u32 %v8590_v18, 16  ;;  %5983 = vmatmul.mubr.msk.bf16.gmra.mrb[28].mxu1 %vm2107_vm3, %v5354_v3  ;;  %v8596_v29 = vld [vmem:[#allocation13_spill] sm:$0xff] }
 0x10e   : > { %v1725_v43 = vsel %vm6730_vm4, %v1720_v25, %v7894_v44  ;;  %v1767_v28 = vor.u32 %v8593_v37, %v8592_v19  ;;  %6137 = vmatmul.mubr.msk.bf16.gmra.mrb[12].mxu0 %vm2107_vm3, %v5511_v42  ;;  %v1735_v50 = vsel %vm6730_vm4, %v1730_v12, %v1734_v36  ;;  %v1780_v31 = vshll.u32 %v7952_v26, 16  ;;  %5988 = vmatprep.mubr.msk.bf16.mxu1 %vm2107_vm3, %v5372_v4  ;;  %v6573_v8 = vld [vmem:[%s6708_s27 + $0x1c] sm:$0xf]  ;;  %v6574_v47 = vld [vmem:[%s6708_s27 + $0x24] sm:$0xf] }
 0x10f   : > { %v1800_v24 = vrot.slane %v8591_v55, 4  ;;  %v1777_v33 = vor.u32 %v1776_v30, %v7944_v53  ;;  %v1818_v44 = vshll.u32 %v7578_v6, 16  ;;  %v7976_v49 = vrot.slane %v1833_v14, 4  ;;  %6140 = vmatprep.mubr.msk.bf16.mxu0 %vm2107_vm3, %v5512_v34  ;;  %v6575_v30 = vld [vmem:[%s6708_s27 + $0x28] sm:$0xf] }
 0x110   : > { %v1846_v17 = vshrl.u32 %v8594_v60, 16  ;;  %v1749_v10 = vsel %vm6730_vm4, %v1744_v46, %v7902_v22  ;;  %v1791_v13 = vor.u32 %v8596_v29, %v8595_v23  ;;  %v1759_v0 = vsel %vm6730_vm4, %v1754_v40, %v1758_v52 }
 0x111   : > { %v1801_v6 = vor.u32 %v1800_v24, %v7954_v61  ;;  %v1804_v58 = vshll.u32 %v7967_v62, 16  ;;  %v1842_v15 = vshll.u32 %v8594_v60, 16  ;;  %v1838_v63 = vrot.slane %v1836_v27, 5  ;;  %v8011_v27 = vld [vmem:[%s6708_s27 + $0xc8] sm:$0x1] }
 0x112   : > { %v5373_v5 = vcombine.low %v6572_v38, %v6573_v8  ;;  %v5513_v22 = vcombine.low %v1725_v43, %v1735_v50  ;;  %v1768_v2 = vrot.slane %v1767_v28, 4  ;;  %v1778_v3 = vrot.slane %v1777_v33, 4  ;;  %v8597_v28 = vld [vmem:[#allocation2_spill] sm:$0xff]  ;;  %v6577_v60 = vld [vmem:[%s6708_s27 + $0x34] sm:$0xf] }
 0x113   : > { %v1782_v42 = vrot.slane %v1780_v31, 5  ;;  %v7993_v25 = vrot.slane %v1818_v44, 5  ;;  %v1824_v12 = vrot.slane %v1822_v45, 4  ;;  %v1857_v36 = vshrl.u32 %v7620_v59, 16  ;;  %v6576_v44 = vld [vmem:[%s6708_s27 + $0x30] sm:$0xf] }
 0x114   : > { %v5374_v18 = vcombine.low %v6574_v47, %v6575_v30  ;;  %v5514_v14 = vcombine.low %v1749_v10, %v1759_v0  ;;  %v1792_v48 = vrot.slane %v1791_v13, 4  ;;  %v1802_v4 = vrot.slane %v1801_v6, 4  ;;  %v6578_v6 = vld [vmem:[%s6708_s27 + $0x3c] sm:$0xf] }
 0x115   : > { %v1806_v34 = vrot.slane %v1804_v58, 5  ;;  %v8001_v46 = vrot.slane %v1842_v15, 5  ;;  %v1848_v40 = vrot.slane %v1846_v17, 4  ;;  %v1860_v52 = vshll.u32 %v7620_v59, 16  ;;  %5989 = vmatmul.mubr.msk.bf16.vlgmr.msra.gmra.mrb[0].mxu1 %vm2107_vm3, %v5373_v5  ;;  %v6579_v58 = vld [vmem:[%s6708_s27 + $0x40] sm:$0xf] }
 0x116   : > { %v1870_v55 = vshrl.u32 %v7635_v21, 16  ;;  %v1773_v45 = vsel %vm6730_vm4, %v1768_v2, %v7944_v53  ;;  %v1815_v24 = vor.u32 %v7958_v20, %v7942_v56  ;;  %6141 = vmatmul.mubr.msk.bf16.gmra.mrb[16].mxu0 %vm2107_vm3, %v5513_v22  ;;  %v1783_v59 = vsel %vm6730_vm4, %v1778_v3, %v1782_v42  ;;  %6191 = vmatpush3.bf16.msra.mxu1 %v8597_v28  ;;  %v6580_v47 = vld [vmem:[%s6708_s27 + $0x1c] sm:$0xf] }
 0x117   : > { %v1825_v43 = vor.u32 %v1824_v12, %v7993_v25  ;;  %v1828_v19 = vshll.u32 %v7999_v16, 16  ;;  %v1866_v53 = vshll.u32 %v7635_v21, 16  ;;  %v1859_v37 = vrot.slane %v1857_v36, 4  ;;  %5992 = vmatprep.mubr.msk.bf16.mxu1 %vm2107_vm3, %v5374_v18  ;;  %6144 = vmatprep.mubr.msk.bf16.mxu0 %vm2107_vm3, %v5514_v14  ;;  %v5241_v36 = vld [vmem:[%s6708_s27 + $0x18] sm:$0xe] }
 0x118   : > { %v1797_v56 = vsel %vm6730_vm4, %v1792_v48, %v7954_v61  ;;  %v1807_v20 = vsel %vm6730_vm4, %v1802_v4, %v1806_v34  ;;  %v1839_v50 = vor.u32 %v1838_v63, %v7976_v49  ;;  %v1849_v21 = vor.u32 %v1848_v40, %v8001_v46  ;;  %v8038_v63 = vld [vmem:[%s6708_s27 + $0xd4] sm:$0x1]  ;;  %v6581_v18 = vld [vmem:[%s6708_s27 + $0x48] sm:$0xf]  ;;  %v6582_v14 = vld [vmem:[%s6708_s27 + $0x4c] sm:$0xf] }
 0x119   : > { %v1852_v33 = vshll.u32 %v8011_v27, 16  ;;  %v1862_v31 = vrot.slane %v1860_v52, 5  ;;  %v5375_v17 = vcombine.low %v6576_v44, %v6577_v60  ;;  %v5515_v10 = vcombine.low %v1773_v45, %v1783_v59  ;;  %v6583_v40 = vld [vmem:[%s6708_s27 + $0x54] sm:$0xf]  ;;  %v6584_v52 = vld [vmem:[%s6708_s27 + $0x58] sm:$0xf] }
 0x11a   : > { %v1816_v61 = vrot.slane %v1815_v24, 4  ;;  %v1826_v23 = vrot.slane %v1825_v43, 4  ;;  %v1830_v29 = vrot.slane %v1828_v19, 5  ;;  %v8033_v13 = vrot.slane %v1866_v53, 5  ;;  %v8063_v59 = vld [vmem:[%s6708_s27 + $0x78] sm:$0xf] }
 0x11b   : > { %v1872_v0 = vrot.slane %v1870_v55, 4  ;;  %v5376_v49 = vcombine.low %v6578_v6, %v6579_v58  ;;  %v5516_v15 = vcombine.low %v1797_v56, %v1807_v20  ;;  %v1840_v38 = vrot.slane %v1839_v50, 4  ;;  %v8598_v56 = vld [vmem:[#allocation16_spill] sm:$0xff]  ;;  %v5242_v50 = vld [vmem:[%s6708_s27 + $0x24] sm:$0xe] }
 0x11c   : > { %v1850_v8 = vrot.slane %v1849_v21, 4  ;;  %v1854_v5 = vrot.slane %v1852_v33, 5  ;;  %v1863_v22 = vor.u32 %v1862_v31, %v1859_v37  ;;  %v1821_v2 = vsel %vm6730_vm4, %v1816_v61, %v7993_v25  ;;  %v6585_v21 = vld [vmem:[%s6708_s27 + $0x28] sm:$0xf]  ;;  %v8071_v31 = vld [vmem:[%s6708_s27 + $0x7c] sm:$0xf] }
 0x11d   : > { %5993 = vmatmul.mubr.msk.bf16.gmra.mrb[4].mxu1 %vm2107_vm3, %v5375_v17  ;;  %v1831_v3 = vsel %vm6730_vm4, %v1826_v23, %v1830_v29  ;;  %v1873_v42 = vor.u32 %v1872_v0, %v8033_v13  ;;  %v1876_v12 = vshll.u32 %v8038_v63, 16  ;;  %v1946_v30 = vrot.slane %v6580_v47, 5  ;;  %v6587_v17 = vld [vmem:[%s6708_s27 + $0x80] sm:$0x1]  ;;  %v5129_v61 = vld [vmem:[%s6708_s27 + $0x6c] sm:$0xf] }
 0x11e   : > { %6145 = vmatmul.mubr.msk.bf16.gmra.mrb[20].mxu0 %vm2107_vm3, %v5515_v10  ;;  %5996 = vmatprep.mubr.msk.bf16.mxu1 %vm2107_vm3, %v5376_v49  ;;  %v5377_v48 = vcombine.low %v6581_v18, %v6582_v14  ;;  %v1845_v25 = vsel %vm6730_vm4, %v1840_v38, %v8001_v46  ;;  %v1855_v4 = vsel %vm6730_vm4, %v1850_v8, %v1854_v5  ;;  %v1864_v45 = vrot.slane %v1863_v22, 4  ;;  %v8599_v8 = vld [vmem:[#allocation17_spill] sm:$0xff]  ;;  %v6588_v22 = vld [vmem:[%s6708_s27 + $0x34] sm:$0xf]  ;;  %v5243_v47 = vld [vmem:[%s6708_s27 + $0x30] sm:$0xe] }
 0x11f   : > { %6148 = vmatprep.mubr.msk.bf16.mxu0 %vm2107_vm3, %v5516_v15  ;;  %v5517_v34 = vcombine.low %v1821_v2, %v1831_v3  ;;  %v5378_v55 = vcombine.low %v6583_v40, %v6584_v52  ;;  %v5257_v24 = vrot.slane %v5241_v36, 9  ;;  %v1874_v43 = vrot.slane %v1873_v42, 4  ;;  %v6590_v18 = vld [vmem:[%s6708_s27 + $0x64] sm:$0xf] }
 0x120   : > { %v1878_v19 = vrot.slane %v1876_v12, 5  ;;  %v1101_v46 = vshrl.u32 %v8063_v59, 16  ;;  %v1104_v53 = vshll.u32 %v8063_v59, 16  ;;  %v5518_v37 = vcombine.low %v1845_v25, %v1855_v4  ;;  %v8104_v25 = vld [vmem:[%s6708_s27 + $0x70] sm:$0xf] }
 0x121   : > { %v1948_v28 = vrot.slane %v1946_v30, 4  ;;  %v1949_v20 = vrot.slane %v8598_v56, 5  ;;  %v1953_v33 = vrot.slane %v6585_v21, 5  ;;  %v1110_v44 = vshll.u32 %v8071_v31, 16 }
 0x122   : > { %v1114_v60 = vshrl.u32 %v8071_v31, 16  ;;  %v1120_v10 = vshll.u32 %v6587_v17, 16  ;;  %v1869_v23 = vsel %vm6730_vm4, %v1864_v45, %v8033_v13  ;;  %v1077_v29 = vshrl.u32 %v5129_v61, 16 }
 0x123   : > { %v1947_v0 = vsel %vm6969_vm7, %v5257_v24, %v1946_v30  ;;  %v1879_v6 = vsel %vm6730_vm4, %v1874_v43, %v1878_v19  ;;  %v1103_v58 = vrot.slane %v1101_v46, 4  ;;  %v1106_v49 = vrot.slane %v1104_v53, 5  ;;  %v6589_v30 = vld [vmem:[%s6708_s27 + $0x60] sm:$0xf]  ;;  %v5244_v43 = vld [vmem:[%s6708_s27 + $0x3c] sm:$0xe] }
 0x124   : > { %v5258_v15 = vrot.slane %v5242_v50, 9  ;;  %v1950_v13 = vsel %vm6969_vm7, %v1948_v28, %v1949_v20  ;;  %v1955_v38 = vrot.slane %v1953_v33, 4  ;;  %v1956_v5 = vrot.slane %v8599_v8, 5  ;;  %v8118_v46 = vld [vmem:[%s6708_s27 + $0x84] sm:$0xf] }
 0x125   : > { %5997 = vmatmul.mubr.msk.bf16.gmra.mrb[8].mxu1 %vm2107_vm3, %v5377_v48  ;;  %v1960_v2 = vrot.slane %v6588_v22, 5  ;;  %v8092_v3 = vrot.slane %v1110_v44, 5  ;;  %v8094_v42 = vrot.slane %v1114_v60, 4  ;;  %v8096_v12 = vrot.slane %v1120_v10, 5  ;;  %v5245_v10 = vld [vmem:[%s6708_s27 + $0x48] sm:$0xe] }
 0x126   : > { %6149 = vmatmul.mubr.msk.bf16.gmra.mrb[24].mxu0 %vm2107_vm3, %v5517_v34  ;;  %6000 = vmatprep.mubr.msk.bf16.mxu1 %vm2107_vm3, %v5378_v55  ;;  %v1080_v36 = vshll.u32 %v5129_v61, 16  ;;  %v5379_v14 = vcombine.low %v6589_v30, %v6590_v18  ;;  %v8101_v48 = vrot.slane %v1077_v29, 4  ;;  %v5380_v4 = vcombine.low %v5129_v61, %v8104_v25  ;;  %v6592_v34 = vld [vmem:[%s6708_s27 + $0x40] sm:$0xf]  ;;  %v6593_v61 = vld [vmem:[%s6708_s27 + $0x4c] sm:$0xf] }
 0x127   : > { %6152 = vmatprep.mubr.msk.bf16.mxu0 %vm2107_vm3, %v5518_v37  ;;  %v1967_v40 = vrot.slane %v6592_v34, 5  ;;  %v5519_v52 = vcombine.low %v1869_v23, %v1879_v6  ;;  %v5537_v55 = vcombine.low %v1947_v0, %v1950_v13  ;;  %v1107_v45 = vor.u32 %v1106_v49, %v1103_v58  ;;  %v8140_v23 = vld [vmem:[%s6708_s27 + $0x88] sm:$0xf]  ;;  %v8146_v0 = vld [vmem:[%s6708_s27 + $0x9c] sm:$0xf] }
 0x128   : > { %v8110_v24 = vsel %vm6969_vm7, %v5258_v15, %v1953_v33  ;;  %v8115_v19 = vsel %vm6969_vm7, %v1955_v38, %v1956_v5  ;;  %v5259_v53 = vrot.slane %v5243_v47, 9  ;;  %v1962_v37 = vrot.slane %v1960_v2, 4  ;;  %v8128_v33 = vld [vmem:[%s6708_s27 + $0x90] sm:$0xf]  ;;  %v8161_v8 = vld [vmem:[%s6708_s27 + $0x94] sm:$0xf] }
 0x129   : > { %v1963_v28 = vrot.slane %v7669_v51, 5  ;;  %v8121_v56 = vrot.slane %v1080_v36, 5  ;;  %v5381_v20 = vcombine.low %v8063_v59, %v8071_v31  ;;  %v1125_v50 = vshrl.u32 %v8118_v46, 16  ;;  %v5246_v18 = vld [vmem:[%s6708_s27 + $0x54] sm:$0xe] }
 0x12a   : > { %v1128_v21 = vshll.u32 %v8118_v46, 16  ;;  %v5260_v44 = vrot.slane %v5244_v43, 9  ;;  %v1969_v60 = vrot.slane %v1967_v40, 4  ;;  %v1970_v17 = vrot.slane %v7726_v9, 5 }
 0x12b   : > { %v1974_v51 = vrot.slane %v6593_v61, 5  ;;  %v8135_v59 = vrot.slane %v1107_v45, 4  ;;  %v5538_v31 = vcombine.low %v8110_v24, %v8115_v19  ;;  %v5382_v29 = vcombine.low %v8118_v46, %v8140_v23  ;;  %v8191_v46 = vld [vmem:[%s6708_s27 + $0xa0] sm:$0xf] }
 0x12c   : > { %v1149_v9 = vshrl.u32 %v8128_v33, 16  ;;  %v1961_v6 = vsel %vm6969_vm7, %v5259_v53, %v1960_v2  ;;  %v1964_v58 = vsel %vm6969_vm7, %v1962_v37, %v1963_v28  ;;  %v1152_v49 = vshll.u32 %v8128_v33, 16 }
 0x12d   : > { %6001 = vmatmul.mubr.msk.bf16.gmra.mrb[12].mxu1 %vm2107_vm3, %v5379_v14  ;;  %v1173_v15 = vshrl.u32 %v8146_v0, 16  ;;  %v8156_v13 = vrot.slane %v1125_v50, 4  ;;  %v8158_v38 = vrot.slane %v1128_v21, 5  ;;  %v5383_v5 = vcombine.low %v8128_v33, %v8161_v8  ;;  %v8200_v50 = vld [vmem:[%s6708_s27 + $0xb4] sm:$0xf] }
 0x12e   : > { %6153 = vmatmul.mubr.msk.bf16.gmra.mrb[28].mxu0 %vm2107_vm3, %v5519_v52  ;;  %6004 = vmatprep.mubr.msk.bf16.mxu1 %vm2107_vm3, %v5380_v4  ;;  %v5261_v22 = vrot.slane %v5245_v10, 9  ;;  %v8167_v2 = vsel %vm6969_vm7, %v5260_v44, %v1967_v40  ;;  %v8171_v36 = vsel %vm6969_vm7, %v1969_v60, %v1970_v17  ;;  %v1976_v47 = vrot.slane %v1974_v51, 4  ;;  %v8179_v52 = vld [vmem:[%s6708_s27 + $0xa8] sm:$0xf]  ;;  %v6596_v40 = vld [vmem:[%s6708_s27 + $0x58] sm:$0xf] }
 0x12f   : > { %6158 = vmatprep.mubr.msk.bf16.mxu0 %vm2107_vm3, %v5537_v55  ;;  %v1977_v30 = vrot.slane %v7749_v54, 5  ;;  %v5539_v14 = vcombine.low %v1961_v6, %v1964_v58  ;;  %v8175_v4 = vrot.slane %v1149_v9, 4  ;;  %v1176_v34 = vshll.u32 %v8146_v0, 16  ;;  %v5247_v60 = vld [vmem:[%s6708_s27 + $0x60] sm:$0xe] }
 0x130   : > { %v1981_v55 = vrot.slane %v6596_v40, 5  ;;  %v8182_v45 = vrot.slane %v1152_v49, 5  ;;  %v8184_v24 = vrot.slane %v1173_v15, 4  ;;  %v1197_v43 = vshrl.u32 %v8179_v52, 16  ;;  %v6598_v6 = vld [vmem:[%s6708_s27 + $0x64] sm:$0xf] }
 0x131   : > { %v1200_v54 = vshll.u32 %v8179_v52, 16  ;;  %v5540_v19 = vcombine.low %v8167_v2, %v8171_v36  ;;  %v5384_v53 = vcombine.low %v8146_v0, %v8191_v46  ;;  %v8197_v37 = vsel %vm6969_vm7, %v5261_v22, %v1974_v51  ;;  %v5248_v15 = vld [vmem:[%s6708_s27 + $0x6c] sm:$0xe]  ;;  %v6600_v22 = vld [vmem:[%s6708_s27 + $0x70] sm:$0xf] }
 0x132   : > { %v5262_v28 = vrot.slane %v5246_v18, 9  ;;  %v1978_v21 = vsel %vm6969_vm7, %v1976_v47, %v1977_v30  ;;  %v1221_v44 = vshrl.u32 %v8200_v50, 16  ;;  %v1086_v17 = vshll.u32 %v8104_v25, 16  ;;  %v5250_v47 = vld [vmem:[%s6708_s27 + $0x84] sm:$0xe] }
 0x133   : > { %v1090_v10 = vshrl.u32 %v8104_v25, 16  ;;  %v8210_v61 = vrot.slane %v1176_v34, 5  ;;  %v1983_v51 = vrot.slane %v1981_v55, 4  ;;  %v1984_v9 = vrot.slane %v7794_v1, 5  ;;  %v8241_v34 = vld [vmem:[%s6708_s27 + $0xc0] sm:$0xf] }
 0x134   : > { %v1988_v58 = vrot.slane %v6598_v6, 5  ;;  %v8216_v49 = vrot.slane %v1197_v43, 4  ;;  %v8218_v25 = vrot.slane %v1200_v54, 5  ;;  %v1995_v2 = vrot.slane %v6600_v22, 5 }
 0x135   : > { %6005 = vmatmul.mubr.msk.bf16.gmra.mrb[16].mxu1 %vm2107_vm3, %v5381_v20  ;;  %v8221_v20 = vld [vmem:[%s6708_s27 + $0xac] sm:$0xf]  ;;  %v5541_v1 = vcombine.low %v8197_v37, %v1978_v21  ;;  %v1224_v36 = vshll.u32 %v8200_v50, 16  ;;  %v5263_v30 = vrot.slane %v5247_v60, 9  ;;  %v8236_v18 = vsel %vm6969_vm7, %v5262_v28, %v1981_v55 }
 0x136   : > { %6159 = vmatmul.mubr.msk.bf16.vlgmr.msra.gmra.mrb[0].mxu0 %vm2107_vm3, %v5538_v31  ;;  %6008 = vmatprep.mubr.msk.bf16.mxu1 %vm2107_vm3, %v5382_v29  ;;  %v5385_v31 = vcombine.low %v8179_v52, %v8221_v20  ;;  %v8230_v29 = vld [vmem:[%s6708_s27 + $0xb8] sm:$0xf]  ;;  %v8243_v40 = vrot.slane %v1086_v17, 5  ;;  %v1092_v43 = vrot.slane %v1090_v10, 4  ;;  %v1985_v54 = vsel %vm6969_vm7, %v1983_v51, %v1984_v9  ;;  %v8257_v9 = vld [vmem:[%s6708_s27 + $0xc4] sm:$0xf] }
 0x137   : > { %6162 = vmatprep.mubr.msk.bf16.mxu0 %vm2107_vm3, %v5539_v14  ;;  %v8238_v14 = vrot.slane %v1221_v44, 4  ;;  %v1990_v37 = vrot.slane %v1988_v58, 4  ;;  %v1991_v21 = vrot.slane %v7812_v57, 5  ;;  %v5264_v60 = vrot.slane %v5248_v15, 9  ;;  %v6602_v44 = vld [vmem:[%s6708_s27 + $0x74] sm:$0x1] }
 0x138   : > { %v1997_v6 = vrot.slane %v1995_v2, 4  ;;  %v1998_v55 = vrot.slane %v7851_v7, 5  ;;  %v1083_v28 = vor.u32 %v8121_v56, %v8101_v48  ;;  %v1096_v17 = vshll.u32 %v6602_v44, 16  ;;  %v5249_v15 = vld [vmem:[%s6708_s27 + $0x78] sm:$0xe] }
 0x139   : > { %v8252_v22 = vrot.slane %v1224_v36, 5  ;;  %v1245_v10 = vshrl.u32 %v8241_v34, 16  ;;  %v5387_v57 = vcombine.low %v8241_v34, %v8257_v9  ;;  %v5542_v7 = vcombine.low %v8236_v18, %v1985_v54  ;;  %v6604_v36 = vld [vmem:[%s6708_s27 + $0x7c] sm:$0xf] }
 0x13a   : > { %v1989_v48 = vsel %vm6969_vm7, %v5263_v30, %v1988_v58  ;;  %v1093_v56 = vor.u32 %v1092_v43, %v8243_v40  ;;  %v2002_v44 = vrot.slane %v6604_v36, 5  ;;  %v1992_v51 = vsel %vm6969_vm7, %v1990_v37, %v1991_v21  ;;  %v6605_v30 = vld [vmem:[%s6708_s27 + $0x88] sm:$0xf] }
 0x13b   : > { %v8277_v18 = vsel %vm6969_vm7, %v5264_v60, %v1995_v2  ;;  %v1117_v58 = vor.u32 %v8094_v42, %v8092_v3  ;;  %v2009_v43 = vrot.slane %v6605_v30, 5  ;;  %v8289_v33 = vsel %vm6969_vm7, %v1997_v6, %v1998_v55 }
 0x13c   : > { %v5265_v2 = vrot.slane %v5249_v15, 9  ;;  %v2005_v54 = vrot.slane %v7867_v41, 5  ;;  %v5266_v37 = vrot.slane %v5250_v47, 9  ;;  %v1134_v42 = vshll.u32 %v8140_v23, 16 }
 0x13d   : > { %6009 = vmatmul.mubr.msk.bf16.gmra.mrb[20].mxu1 %vm2107_vm3, %v5383_v5  ;;  %v1084_v5 = vrot.slane %v1083_v28, 4  ;;  %v1138_v21 = vshrl.u32 %v8140_v23, 16  ;;  %v1094_v60 = vrot.slane %v1093_v56, 4  ;;  %v2004_v0 = vrot.slane %v2002_v44, 4 }
 0x13e   : > { %6163 = vmatmul.mubr.msk.bf16.gmra.mrb[4].mxu0 %vm2107_vm3, %v5540_v19  ;;  %6012 = vmatprep.mubr.msk.bf16.mxu1 %vm2107_vm3, %v5384_v53  ;;  %v1098_v19 = vrot.slane %v1096_v17, 5  ;;  %v1158_v53 = vshll.u32 %v8161_v8, 16  ;;  %v1118_v36 = vrot.slane %v1117_v58, 4  ;;  %v2011_v30 = vrot.slane %v2009_v43, 4 }
 0x13f   : > { %6166 = vmatprep.mubr.msk.bf16.mxu0 %vm2107_vm3, %v5541_v1  ;;  %v1162_v1 = vshrl.u32 %v8161_v8, 16  ;;  %v2012_v6 = vrot.slane %v7900_v35, 5  ;;  %v1131_v55 = vor.u32 %v8158_v38, %v8156_v13  ;;  %v5543_v28 = vcombine.low %v1989_v48, %v1992_v51 }
 0x140   : > { %v8299_v41 = vrot.slane %v1245_v10, 4  ;;  %v5544_v47 = vcombine.low %v8277_v18, %v8289_v33  ;;  %v1113_v23 = vsel %vm6730_vm4, %v8135_v59, %v8092_v3  ;;  %v1089_v8 = vsel %vm6730_vm4, %v1084_v5, %v8243_v40  ;;  %v6608_v5 = vld [vmem:[%s6708_s27 + $0x98] sm:$0x1] }
 0x141   : > { %v2003_v35 = vsel %vm6969_vm7, %v5265_v2, %v2002_v44  ;;  %v8312_v13 = vrot.slane %v1134_v42, 5  ;;  %v1140_v38 = vrot.slane %v1138_v21, 4  ;;  %v2006_v17 = vsel %vm6969_vm7, %v2004_v0, %v2005_v54  ;;  %v5252_v42 = vld [vmem:[%s6708_s27 + $0x9c] sm:$0xe]  ;;  %v6609_v21 = vld [vmem:[%s6708_s27 + $0xa0] sm:$0xf] }
 0x142   : > { %v8318_v10 = vsel %vm6969_vm7, %v5266_v37, %v2009_v43  ;;  %v8320_v3 = vrot.slane %v1158_v53, 5  ;;  %v1164_v59 = vrot.slane %v1162_v1, 4  ;;  %v1099_v40 = vsel %vm6730_vm4, %v1094_v60, %v1098_v19 }
 0x143   : > { %v1123_v51 = vsel %vm6730_vm4, %v1118_v36, %v8096_v12  ;;  %v8334_v15 = vsel %vm6969_vm7, %v2011_v30, %v2012_v6  ;;  %v8336_v48 = vrot.slane %v1131_v55, 4  ;;  %v8600_v52 = vcombine.low %v8200_v50, %v8230_v29  ;;  %v6607_v50 = vld [vmem:[%s6708_s27 + $0x8c] sm:$0x1] }
 0x144   : > { %v1155_v12 = vor.u32 %v8182_v45, %v8175_v4  ;;  %v1182_v44 = vshll.u32 %v8191_v46, 16  ;;  %v1186_v18 = vshrl.u32 %v8191_v46, 16  ;;  %v5545_v58 = vcombine.low %v2003_v35, %v2006_v17  ;;  %v5253_v17 = vld [vmem:[%s6708_s27 + $0xa8] sm:$0xe] }
 0x145   : > { %6013 = vmatmul.mubr.msk.bf16.gmra.mrb[24].mxu1 %vm2107_vm3, %v5385_v31  ;;  %v5251_v31 = vld [vmem:[%s6708_s27 + $0x90] sm:$0xe]  ;;  %v1141_v43 = vor.u32 %v1140_v38, %v8312_v13  ;;  %v1144_v33 = vshll.u32 %v6607_v50, 16  ;;  %v1168_v19 = vshll.u32 %v6608_v5, 16  ;;  %v5413_v2 = vcombine.low %v1089_v8, %v1099_v40 }
 0x146   : > { %6167 = vmatmul.mubr.msk.bf16.gmra.mrb[8].mxu0 %vm2107_vm3, %v5542_v7  ;;  %6016 = vmatprep.mubr.msk.bf16.mxu1 %vm2107_vm3, %v8600_v52  ;;  %v6606_v7 = vld [vmem:[%s6708_s27 + $0x94] sm:$0xf]  ;;  %v5414_v54 = vcombine.low %v1113_v23, %v1123_v51  ;;  %v1165_v37 = vor.u32 %v1164_v59, %v8320_v3  ;;  %v2023_v60 = vrot.slane %v6609_v21, 5  ;;  %v5546_v4 = vcombine.low %v8318_v10, %v8334_v15  ;;  %v6610_v10 = vld [vmem:[%s6708_s27 + $0xac] sm:$0xf] }
 0x147   : > { %6170 = vmatprep.mubr.msk.bf16.mxu0 %vm2107_vm3, %v5543_v28  ;;  %v2016_v56 = vrot.slane %v6606_v7, 5  ;;  %v1137_v45 = vsel %vm6730_vm4, %v8336_v48, %v8312_v13  ;;  %v5267_v46 = vrot.slane %v5251_v31, 9  ;;  %v2019_v0 = vrot.slane %v7916_v39, 5 }
 0x148   : > { %v1156_v1 = vrot.slane %v1155_v12, 4  ;;  %v8362_v36 = vrot.slane %v1182_v44, 5  ;;  %v1188_v30 = vrot.slane %v1186_v18, 4  ;;  %v1142_v6 = vrot.slane %v1141_v43, 4 }
 0x149   : > { %v2018_v53 = vrot.slane %v2016_v56, 4  ;;  %v1146_v55 = vrot.slane %v1144_v33, 5  ;;  %v1170_v28 = vrot.slane %v1168_v19, 5  ;;  %v5268_v23 = vrot.slane %v5252_v42, 9 }
 0x14a   : > { %v1166_v8 = vrot.slane %v1165_v37, 4  ;;  %v2025_v35 = vrot.slane %v2023_v60, 4  ;;  %v2026_v38 = vrot.slane %v7952_v26, 5  ;;  %v1179_v13 = vor.u32 %v8210_v61, %v8184_v24 }
 0x14b   : > { %v2017_v39 = vsel %vm6969_vm7, %v5267_v46, %v2016_v56  ;;  %v2030_v59 = vrot.slane %v6610_v10, 5  ;;  %v1206_v40 = vshll.u32 %v8221_v20, 16  ;;  %v1210_v26 = vshrl.u32 %v8221_v20, 16 }
 0x14c   : > { %v2020_v24 = vsel %vm6969_vm7, %v2018_v53, %v2019_v0  ;;  %v1161_v61 = vsel %vm6730_vm4, %v1156_v1, %v8320_v3  ;;  %v1147_v15 = vsel %vm6730_vm4, %v1142_v6, %v1146_v55  ;;  %v8391_v20 = vsel %vm6969_vm7, %v5268_v23, %v2023_v60  ;;  %v5254_v0 = vld [vmem:[%s6708_s27 + $0xb4] sm:$0xe]  ;;  %v6613_v53 = vld [vmem:[%s6708_s27 + $0xb8] sm:$0xf] }
 0x14d   : > { %6017 = vmatmul.mubr.msk.bf16.gmra.mrb[28].mxu1 %vm2107_vm3, %v5387_v57  ;;  %v1189_v57 = vor.u32 %v1188_v30, %v8362_v36  ;;  %v1230_v48 = vshll.u32 %v8230_v29, 16  ;;  %v1234_v52 = vshrl.u32 %v8230_v29, 16  ;;  %v1171_v31 = vsel %vm6730_vm4, %v1166_v8, %v1170_v28 }
 0x14e   : > { %6171 = vmatmul.mubr.msk.bf16.gmra.mrb[12].mxu0 %vm2107_vm3, %v5544_v47  ;;  %6038 = vmatprep.mubr.msk.bf16.mxu1 %vm2107_vm3, %v5413_v2  ;;  %v6611_v47 = vld [vmem:[%s6708_s27 + $0xa4] sm:$0x1]  ;;  %v2027_v3 = vsel %vm6969_vm7, %v2025_v35, %v2026_v38  ;;  %v1180_v7 = vrot.slane %v1179_v13, 4  ;;  %v5269_v56 = vrot.slane %v5253_v17, 9  ;;  %v2032_v12 = vrot.slane %v2030_v59, 4 }
 0x14f   : > { %6174 = vmatprep.mubr.msk.bf16.mxu0 %vm2107_vm3, %v5545_v58  ;;  %v1192_v51 = vshll.u32 %v6611_v47, 16  ;;  %v2033_v44 = vrot.slane %v7967_v62, 5  ;;  %v8400_v18 = vrot.slane %v1206_v40, 5  ;;  %v1212_v58 = vrot.slane %v1210_v26, 4  ;;  %v6615_v35 = vld [vmem:[%s6708_s27 + $0xbc] sm:$0x1] }
 0x150   : > { %v5415_v43 = vcombine.low %v1137_v45, %v1147_v15  ;;  %v5547_v50 = vcombine.low %v2017_v39, %v2020_v24  ;;  %v1190_v33 = vrot.slane %v1189_v57, 4  ;;  %v8601_v5 = vshll.u32 %v8241_v34, 16  ;;  %v6612_v45 = vld [vmem:[%s6708_s27 + $0xb0] sm:$0x1] }
 0x151   : > { %v1194_v29 = vrot.slane %v1192_v51, 5  ;;  %v1203_v2 = vor.u32 %v8218_v25, %v8216_v49  ;;  %v8408_v37 = vrot.slane %v1230_v48, 5  ;;  %v1236_v42 = vrot.slane %v1234_v52, 4  ;;  %v6616_v52 = vld [vmem:[%s6708_s27 + $0xc8] sm:$0x1] }
 0x152   : > { %v8404_v19 = vrot.slane %v8601_v5, 5  ;;  %v5416_v62 = vcombine.low %v1161_v61, %v1171_v31  ;;  %v5548_v21 = vcombine.low %v8391_v20, %v2027_v3  ;;  %v1185_v60 = vsel %vm6730_vm4, %v1180_v7, %v8362_v36  ;;  %v6614_v36 = vld [vmem:[%s6708_s27 + $0xc4] sm:$0xf] }
 0x153   : > { %v1216_v34 = vshll.u32 %v6612_v45, 16  ;;  %v2031_v49 = vsel %vm6969_vm7, %v5269_v56, %v2030_v59  ;;  %v2034_v25 = vsel %vm6969_vm7, %v2032_v12, %v2033_v44  ;;  %v1213_v46 = vor.u32 %v1212_v58, %v8400_v18  ;;  %v5256_v12 = vld [vmem:[%s6708_s27 + $0xcc] sm:$0xe]  ;;  %v6617_v44 = vld [vmem:[%s6708_s27 + $0xd0] sm:$0xf] }
 0x154   : > { %v2037_v1 = vrot.slane %v6613_v53, 5  ;;  %v2044_v30 = vrot.slane %v6614_v36, 5  ;;  %v1254_v6 = vshll.u32 %v8257_v9, 16  ;;  %v1258_v55 = vshrl.u32 %v8257_v9, 16 }
 0x155   : > { %6039 = vmatmul.mubr.msk.bf16.vlgmr.msra.gmra.mrb[16].mxu1 %vm2107_vm3, %v5414_v54  ;;  %v1195_v54 = vsel %vm6730_vm4, %v1190_v33, %v1194_v29  ;;  %v1204_v28 = vrot.slane %v1203_v2, 4  ;;  %v1227_v23 = vor.u32 %v8252_v22, %v8238_v14  ;;  %v1237_v8 = vor.u32 %v1236_v42, %v8408_v37 }
 0x156   : > { %6175 = vmatmul.mubr.msk.bf16.gmra.mrb[16].mxu0 %vm2107_vm3, %v5546_v4  ;;  %6042 = vmatprep.mubr.msk.bf16.mxu1 %vm2107_vm3, %v5415_v43  ;;  %v5255_v4 = vld [vmem:[%s6708_s27 + $0xc0] sm:$0xe]  ;;  %v1240_v38 = vshll.u32 %v6615_v35, 16  ;;  %v5549_v13 = vcombine.low %v2031_v49, %v2034_v25  ;;  %v1218_v39 = vrot.slane %v1216_v34, 5  ;;  %v5270_v17 = vrot.slane %v5254_v0, 9 }
 0x157   : > { %6178 = vmatprep.mubr.msk.bf16.mxu0 %vm2107_vm3, %v5547_v50  ;;  %v2040_v10 = vrot.slane %v7999_v16, 5  ;;  %v5417_v59 = vcombine.low %v1185_v60, %v1195_v54  ;;  %v1214_v40 = vrot.slane %v1213_v46, 4  ;;  %v2039_v26 = vrot.slane %v2037_v1, 4 }
 0x158   : > { %v5271_v24 = vrot.slane %v5255_v4, 9  ;;  %v2046_v61 = vrot.slane %v2044_v30, 4  ;;  %v2047_v9 = vrot.slane %v8011_v27, 5  ;;  %v1256_v57 = vrot.slane %v1254_v6, 5 }
 0x159   : > { %v1260_v47 = vrot.slane %v1258_v55, 4  ;;  %v1228_v14 = vrot.slane %v1227_v23, 4  ;;  %v1238_v22 = vrot.slane %v1237_v8, 4  ;;  %v1242_v51 = vrot.slane %v1240_v38, 5 }
 0x15a   : > { %v1209_v15 = vsel %vm6730_vm4, %v1204_v28, %v8400_v18  ;;  %v2038_v16 = vsel %vm6969_vm7, %v5270_v17, %v2037_v1  ;;  %v1219_v27 = vsel %vm6730_vm4, %v1214_v40, %v1218_v39  ;;  %v2041_v20 = vsel %vm6969_vm7, %v2039_v26, %v2040_v10 }
 0x15b   : > { %v1251_v48 = vor.u32 %v8404_v19, %v8299_v41  ;;  %v1264_v31 = vshll.u32 %v6616_v52, 16  ;;  %v2045_v3 = vsel %vm6969_vm7, %v5271_v24, %v2044_v30  ;;  %v2048_v7 = vsel %vm6969_vm7, %v2046_v61, %v2047_v9 }
 0x15c   : > { %v1261_v56 = vor.u32 %v1260_v47, %v1256_v57  ;;  %v2051_v18 = vrot.slane %v6617_v44, 5  ;;  %v1233_v41 = vsel %vm6730_vm4, %v1228_v14, %v8408_v37  ;;  %v1243_v58 = vsel %vm6730_vm4, %v1238_v22, %v1242_v51 }
 0x15d   : > { %6043 = vmatmul.mubr.msk.bf16.gmra.mrb[20].mxu1 %vm2107_vm3, %v5416_v62  ;;  %v5418_v43 = vcombine.low %v1209_v15, %v1219_v27  ;;  %v5550_v50 = vcombine.low %v2038_v16, %v2041_v20  ;;  %v5551_v33 = vcombine.low %v2045_v3, %v2048_v7  ;;  %v1252_v29 = vrot.slane %v1251_v48, 4 }
 0x15e   : > { %6179 = vmatmul.mubr.msk.bf16.gmra.mrb[20].mxu0 %vm2107_vm3, %v5548_v21  ;;  %6046 = vmatprep.mubr.msk.bf16.mxu1 %vm2107_vm3, %v5417_v59  ;;  %v1266_v5 = vrot.slane %v1264_v31, 5  ;;  %v5272_v19 = vrot.slane %v5256_v12, 9  ;;  %v5419_v2 = vcombine.low %v1233_v41, %v1243_v58  ;;  %v1262_v42 = vrot.slane %v1261_v56, 4 }
 0x15f   : > { %6182 = vmatprep.mubr.msk.bf16.mxu0 %vm2107_vm3, %v5549_v13  ;;  %v2053_v62 = vrot.slane %v2051_v18, 4  ;;  %v2054_v21 = vrot.slane %v8038_v63, 5  ;;  %v1257_v60 = vsel %vm6730_vm4, %v1252_v29, %v1256_v57  ;;  %v6642_v25 = vmov 0.0  }
 0x160   : > { %v2052_v37 = vsel %vm6969_vm7, %v5272_v19, %v2051_v18  ;;  %v1267_v45 = vsel %vm6730_vm4, %v1262_v42, %v1266_v5  ;;  %4847 = vst [vmem:[%s8484_s22] sm:$0xff] %v6642_v25 }
 0x161   : > { %v2055_v63 = vsel %vm6969_vm7, %v2053_v62, %v2054_v21  ;;  %v5420_v34 = vcombine.low %v1257_v60, %v1267_v45 }
 0x162   : > { %v5552_v49 = vcombine.low %v2052_v37, %v2055_v63 }
 0x165   : > { %6047 = vmatmul.mubr.msk.bf16.gmra.mrb[24].mxu1 %vm2107_vm3, %v5418_v43 }
 0x166   : > { %6183 = vmatmul.mubr.msk.bf16.gmra.mrb[24].mxu0 %vm2107_vm3, %v5550_v50  ;;  %6050 = vmatprep.mubr.msk.bf16.mxu1 %vm2107_vm3, %v5419_v2 }
 0x167   : > { %6186 = vmatprep.mubr.msk.bf16.mxu0 %vm2107_vm3, %v5551_v33 }
 0x16d   : > { %6051 = vmatmul.mubr.msk.bf16.gmra.mrb[28].mxu1 %vm2107_vm3, %v5420_v34 }
 0x16e   : > { %6187 = vmatmul.mubr.msk.bf16.gmra.mrb[28].mxu0 %vm2107_vm3, %v5552_v49 }
 0x1e8   : > { %v5990_v32 = vpop.f32.mrb[0].mxu1 }
 0x1e9   : > { %v3042_v46 = vpop.f32.mrb[1].mxu1 }
 0x1ea   : > { %v5991_v0 = vpop.f32.mrb[2].mxu1 }
 0x1eb   : > { %v3045_v11 = vpop.f32.mrb[3].mxu1 }
 0x1f0   : > { %v5994_v53 = vpop.f32.mrb[4].mxu1 }
 0x1f1   : > { %v3058_v1 = vpop.f32.mrb[5].mxu1 }
 0x1f2   : > { %v5995_v54 = vpop.f32.mrb[6].mxu1 }
 0x1f3   : > { %v3061_v4 = vpop.f32.mrb[7].mxu1 }
 0x1f8   : > { %v5998_v36 = vpop.f32.mrb[8].mxu1 }
 0x1f9   : > { %v3074_v30 = vpop.f32.mrb[9].mxu1 }
 0x1fa   : > { %v5999_v6 = vpop.f32.mrb[10].mxu1 }
 0x1fb   : > { %v3077_v55 = vpop.f32.mrb[11].mxu1 }
 0x200   : > { %v8487_v28 = vpop.f32.mrb[12].mxu1 }
 0x201   : > { %v8489_v23 = vpop.f32.mrb[13].mxu1 }
 0x202   : > { %v8491_v8 = vpop.f32.mrb[14].mxu1 }
 0x203   : > { %v8493_v35 = vpop.f32.mrb[15].mxu1 }
 0x209   : > { %v6160_v38 = vpop.f32.mrb[0].mxu0 }
 0x20a   : > { %v6192_v13 = vadd.f32 %v6160_v38, %v5990_v32  ;;  %v4528_v39 = vpop.f32.mrb[1].mxu0 }
 0x20b   : > { %v6193_v17 = vadd.f32 %v4528_v39, %v3042_v46  ;;  %v6161_v10 = vpop.f32.mrb[2].mxu0 }
 0x20c   : > { %v6194_v59 = vadd.f32 %v6161_v10, %v5991_v0  ;;  %v4531_v40 = vpop.f32.mrb[3].mxu0  ;;  %v4888_v14 = vmul.f32 %v6192_v13, %v6192_v13 }
 0x20d   : > { %v6195_v26 = vadd.f32 %v4531_v40, %v3045_v11  ;;  %v4886_v61 = vmul.f32 %v6193_v17, %v6193_v17 }
 0x20e   : > { %v5644_v24 = vpack.c.bf16 %v6194_v59, %v6192_v13  ;;  %v4889_v20 = vmul.f32 %v6194_v59, %v6194_v59 }
 0x20f   : > { %v5639_v9 = vpack.c.bf16 %v6195_v26, %v6193_v17  ;;  %v4848_v57 = vadd.f32 %v6195_v26, %v6193_v17  ;;  %v4887_v47 = vmul.f32 %v6195_v26, %v6195_v26 }
 0x210   : > { %5716 = vst [vmem:[%s8499_s26 + $0x8] sm:$0xff] %v5644_v24  }
 0x211   : > { %5640 = vst [vmem:[%s8499_s26] sm:$0xff] %v5639_v9   ;;  %v4849_v22 = vadd.f32 %v6192_v13, %v4848_v57  ;;  %v4918_v51 = vadd.f32 %v4887_v47, %v4886_v61  ;;  %v6164_v15 = vpop.f32.mrb[4].mxu0 }
 0x212   : > { %v6196_v16 = vadd.f32 %v6164_v15, %v5994_v53  ;;  %v4544_v27 = vpop.f32.mrb[5].mxu0 }
 0x213   : > { %v4919_v48 = vadd.f32 %v4918_v51, %v4888_v14  ;;  %v6197_v52 = vadd.f32 %v4544_v27, %v3058_v1  ;;  %v4850_v31 = vadd.f32 %v6194_v59, %v4849_v22  ;;  %v6165_v3 = vpop.f32.mrb[6].mxu0 }
 0x214   : > { %v6198_v7 = vadd.f32 %v6165_v3, %v5995_v54  ;;  %v4547_v56 = vpop.f32.mrb[7].mxu0  ;;  %v4892_v5 = vmul.f32 %v6196_v16, %v6196_v16 }
 0x215   : > { %v4851_v12 = vadd.f32 %v6197_v52, %v4850_v31  ;;  %v4890_v44 = vmul.f32 %v6197_v52, %v6197_v52  ;;  %v4920_v18 = vadd.f32 %v4919_v48, %v4889_v20  ;;  %v6199_v41 = vadd.f32 %v4547_v56, %v3061_v4 }
 0x216   : > { %v5654_v58 = vpack.c.bf16 %v6198_v7, %v6196_v16  ;;  %v4893_v37 = vmul.f32 %v6198_v7, %v6198_v7 }
 0x217   : > { %v4921_v43 = vadd.f32 %v4920_v18, %v4890_v44  ;;  %v5649_v50 = vpack.c.bf16 %v6199_v41, %v6197_v52  ;;  %v4852_v33 = vadd.f32 %v6199_v41, %v4851_v12  ;;  %v4891_v29 = vmul.f32 %v6199_v41, %v6199_v41 }
 0x218   : > { %5718 = vst [vmem:[%s8499_s26 + $0x18] sm:$0xff] %v5654_v58  }
 0x219   : > { %5717 = vst [vmem:[%s8499_s26 + $0x10] sm:$0xff] %v5649_v50   ;;  %v4853_v19 = vadd.f32 %v6196_v16, %v4852_v33  ;;  %v4922_v2 = vadd.f32 %v4921_v43, %v4891_v29  ;;  %v6168_v42 = vpop.f32.mrb[8].mxu0 }
 0x21a   : > { %v6200_v62 = vadd.f32 %v6168_v42, %v5998_v36  ;;  %v4560_v21 = vpop.f32.mrb[9].mxu0 }
 0x21b   : > { %v4923_v60 = vadd.f32 %v4922_v2, %v4892_v5  ;;  %v6201_v45 = vadd.f32 %v4560_v21, %v3074_v30  ;;  %v4854_v63 = vadd.f32 %v6198_v7, %v4853_v19  ;;  %v6169_v34 = vpop.f32.mrb[10].mxu0 }
 0x21c   : > { %v6202_v49 = vadd.f32 %v6169_v34, %v5999_v6  ;;  %v4563_v25 = vpop.f32.mrb[11].mxu0  ;;  %v4896_v36 = vmul.f32 %v6200_v62, %v6200_v62 }
 0x21d   : > { %v4855_v32 = vadd.f32 %v6201_v45, %v4854_v63  ;;  %v4894_v46 = vmul.f32 %v6201_v45, %v6201_v45  ;;  %v4924_v0 = vadd.f32 %v4923_v60, %v4893_v37  ;;  %v6203_v11 = vadd.f32 %v4563_v25, %v3077_v55 }
 0x21e   : > { %v5664_v53 = vpack.c.bf16 %v6202_v49, %v6200_v62  ;;  %v4897_v6 = vmul.f32 %v6202_v49, %v6202_v49 }
 0x21f   : > { %v4925_v1 = vadd.f32 %v4924_v0, %v4894_v46  ;;  %v5659_v54 = vpack.c.bf16 %v6203_v11, %v6201_v45  ;;  %v4856_v4 = vadd.f32 %v6203_v11, %v4855_v32  ;;  %v4895_v38 = vmul.f32 %v6203_v11, %v6203_v11 }
 0x220   : > { %5720 = vst [vmem:[%s8499_s26 + $0x28] sm:$0xff] %v5664_v53  }
 0x221   : > { %5719 = vst [vmem:[%s8499_s26 + $0x20] sm:$0xff] %v5659_v54   ;;  %v4857_v13 = vadd.f32 %v6200_v62, %v4856_v4  ;;  %v4926_v39 = vadd.f32 %v4925_v1, %v4895_v38  ;;  %v6172_v30 = vpop.f32.mrb[12].mxu0 }
 0x222   : > { %v6204_v17 = vadd.f32 %v6172_v30, %v8487_v28  ;;  %v4576_v10 = vpop.f32.mrb[13].mxu0 }
 0x223   : > { %v4927_v59 = vadd.f32 %v4926_v39, %v4896_v36  ;;  %v6205_v40 = vadd.f32 %v4576_v10, %v8489_v23  ;;  %v4858_v55 = vadd.f32 %v6202_v49, %v4857_v13  ;;  %v6173_v26 = vpop.f32.mrb[14].mxu0 }
 0x224   : > { %v6206_v24 = vadd.f32 %v6173_v26, %v8491_v8  ;;  %v4579_v61 = vpop.f32.mrb[15].mxu0  ;;  %v4900_v27 = vmul.f32 %v6204_v17, %v6204_v17 }
 0x225   : > { %v4859_v9 = vadd.f32 %v6205_v40, %v4858_v55  ;;  %v4898_v57 = vmul.f32 %v6205_v40, %v6205_v40  ;;  %v4928_v47 = vadd.f32 %v4927_v59, %v4897_v6  ;;  %v6207_v14 = vadd.f32 %v4579_v61, %v8493_v35 }
 0x226   : > { %v5674_v22 = vpack.c.bf16 %v6206_v24, %v6204_v17  ;;  %v4901_v7 = vmul.f32 %v6206_v24, %v6206_v24 }
 0x227   : > { %v4929_v51 = vadd.f32 %v4928_v47, %v4898_v57  ;;  %v5669_v28 = vpack.c.bf16 %v6207_v14, %v6205_v40  ;;  %v4860_v15 = vadd.f32 %v6207_v14, %v4859_v9  ;;  %v4899_v16 = vmul.f32 %v6207_v14, %v6207_v14 }
 0x228   : > { %5722 = vst [vmem:[%s8499_s26 + $0x38] sm:$0xff] %v5674_v22   ;;  %v6040_v48 = vpop.f32.mrb[16].mxu1 }
 0x229   : > { %5721 = vst [vmem:[%s8499_s26 + $0x30] sm:$0xff] %v5669_v28   ;;  %v4861_v23 = vadd.f32 %v6204_v17, %v4860_v15  ;;  %v4930_v20 = vadd.f32 %v4929_v51, %v4899_v16  ;;  %v6176_v52 = vpop.f32.mrb[16].mxu0  ;;  %v3400_v8 = vpop.f32.mrb[17].mxu1 }
 0x22a   : > { %v6208_v31 = vadd.f32 %v6176_v52, %v6040_v48  ;;  %v4592_v3 = vpop.f32.mrb[17].mxu0  ;;  %v6041_v44 = vpop.f32.mrb[18].mxu1 }
 0x22b   : > { %v4931_v56 = vadd.f32 %v4930_v20, %v4900_v27  ;;  %v6209_v12 = vadd.f32 %v4592_v3, %v3400_v8  ;;  %v4862_v35 = vadd.f32 %v6206_v24, %v4861_v23  ;;  %v6177_v18 = vpop.f32.mrb[18].mxu0  ;;  %v3403_v58 = vpop.f32.mrb[19].mxu1 }
 0x22c   : > { %v6210_v41 = vadd.f32 %v6177_v18, %v6041_v44  ;;  %v4595_v43 = vpop.f32.mrb[19].mxu0  ;;  %v4904_v37 = vmul.f32 %v6208_v31, %v6208_v31 }
 0x22d   : > { %v4863_v50 = vadd.f32 %v6209_v12, %v4862_v35  ;;  %v4902_v33 = vmul.f32 %v6209_v12, %v6209_v12  ;;  %v4932_v29 = vadd.f32 %v4931_v56, %v4901_v7  ;;  %v6211_v5 = vadd.f32 %v4595_v43, %v3403_v58 }
 0x22e   : > { %v5684_v19 = vpack.c.bf16 %v6210_v41, %v6208_v31  ;;  %v4905_v46 = vmul.f32 %v6210_v41, %v6210_v41 }
 0x22f   : > { %v4933_v2 = vadd.f32 %v4932_v29, %v4902_v33  ;;  %v5679_v42 = vpack.c.bf16 %v6211_v5, %v6209_v12  ;;  %v4864_v62 = vadd.f32 %v6211_v5, %v4863_v50  ;;  %v4903_v21 = vmul.f32 %v6211_v5, %v6211_v5 }
 0x230   : > { %5724 = vst [vmem:[%s8499_s26 + $0x48] sm:$0xff] %v5684_v19   ;;  %v6044_v63 = vpop.f32.mrb[20].mxu1 }
 0x231   : > { %5723 = vst [vmem:[%s8499_s26 + $0x40] sm:$0xff] %v5679_v42   ;;  %v4865_v60 = vadd.f32 %v6208_v31, %v4864_v62  ;;  %v4934_v45 = vadd.f32 %v4933_v2, %v4903_v21  ;;  %v6180_v34 = vpop.f32.mrb[20].mxu0  ;;  %v3416_v25 = vpop.f32.mrb[21].mxu1 }
 0x232   : > { %v6212_v49 = vadd.f32 %v6180_v34, %v6044_v63  ;;  %v4608_v32 = vpop.f32.mrb[21].mxu0  ;;  %v6045_v1 = vpop.f32.mrb[22].mxu1 }
 0x233   : > { %v4935_v0 = vadd.f32 %v4934_v45, %v4904_v37  ;;  %v6213_v11 = vadd.f32 %v4608_v32, %v3416_v25  ;;  %v4866_v53 = vadd.f32 %v6210_v41, %v4865_v60  ;;  %v6181_v54 = vpop.f32.mrb[22].mxu0  ;;  %v3419_v38 = vpop.f32.mrb[23].mxu1 }
 0x234   : > { %v6214_v4 = vadd.f32 %v6181_v54, %v6045_v1  ;;  %v4611_v36 = vpop.f32.mrb[23].mxu0  ;;  %v4908_v26 = vmul.f32 %v6212_v49, %v6212_v49 }
 0x235   : > { %v4867_v13 = vadd.f32 %v6213_v11, %v4866_v53  ;;  %v4906_v39 = vmul.f32 %v6213_v11, %v6213_v11  ;;  %v4936_v30 = vadd.f32 %v4935_v0, %v4905_v46  ;;  %v6215_v17 = vadd.f32 %v4611_v36, %v3419_v38 }
 0x236   : > { %v5694_v10 = vpack.c.bf16 %v6214_v4, %v6212_v49  ;;  %v4909_v51 = vmul.f32 %v6214_v4, %v6214_v4 }
 0x237   : > { %v4937_v6 = vadd.f32 %v4936_v30, %v4906_v39  ;;  %v5689_v59 = vpack.c.bf16 %v6215_v17, %v6213_v11  ;;  %v4868_v40 = vadd.f32 %v6215_v17, %v4867_v13  ;;  %v4907_v55 = vmul.f32 %v6215_v17, %v6215_v17 }
 0x238   : > { %5726 = vst [vmem:[%s8499_s26 + $0x58] sm:$0xff] %v5694_v10   ;;  %v6048_v9 = vpop.f32.mrb[24].mxu1 }
 0x239   : > { %5725 = vst [vmem:[%s8499_s26 + $0x50] sm:$0xff] %v5689_v59   ;;  %v4869_v24 = vadd.f32 %v6212_v49, %v4868_v40  ;;  %v4938_v61 = vadd.f32 %v4937_v6, %v4907_v55  ;;  %v6184_v57 = vpop.f32.mrb[24].mxu0  ;;  %v3432_v14 = vpop.f32.mrb[25].mxu1 }
 0x23a   : > { %v6216_v47 = vadd.f32 %v6184_v57, %v6048_v9  ;;  %v4624_v22 = vpop.f32.mrb[25].mxu0  ;;  %v6049_v27 = vpop.f32.mrb[26].mxu1 }
 0x23b   : > { %v4939_v28 = vadd.f32 %v4938_v61, %v4908_v26  ;;  %v6217_v15 = vadd.f32 %v4624_v22, %v3432_v14  ;;  %v4870_v16 = vadd.f32 %v6214_v4, %v4869_v24  ;;  %v6185_v23 = vpop.f32.mrb[26].mxu0  ;;  %v3435_v48 = vpop.f32.mrb[27].mxu1 }
 0x23c   : > { %v6218_v20 = vadd.f32 %v6185_v23, %v6049_v27  ;;  %v4627_v52 = vpop.f32.mrb[27].mxu0  ;;  %v4912_v41 = vmul.f32 %v6216_v47, %v6216_v47 }
 0x23d   : > { %v4871_v31 = vadd.f32 %v6217_v15, %v4870_v16  ;;  %v4910_v8 = vmul.f32 %v6217_v15, %v6217_v15  ;;  %v4940_v3 = vadd.f32 %v4939_v28, %v4909_v51  ;;  %v6219_v7 = vadd.f32 %v4627_v52, %v3435_v48 }
 0x23e   : > { %v5704_v56 = vpack.c.bf16 %v6218_v20, %v6216_v47  ;;  %v4913_v2 = vmul.f32 %v6218_v20, %v6218_v20 }
 0x23f   : > { %v4941_v12 = vadd.f32 %v4940_v3, %v4910_v8  ;;  %v5699_v35 = vpack.c.bf16 %v6219_v7, %v6217_v15  ;;  %v4872_v44 = vadd.f32 %v6219_v7, %v4871_v31  ;;  %v4911_v18 = vmul.f32 %v6219_v7, %v6219_v7 }
 0x240   : > { %5728 = vst [vmem:[%s8499_s26 + $0x68] sm:$0xff] %v5704_v56   ;;  %v6052_v50 = vpop.f32.mrb[28].mxu1 }
 0x241   : > { %5727 = vst [vmem:[%s8499_s26 + $0x60] sm:$0xff] %v5699_v35   ;;  %v4873_v58 = vadd.f32 %v6216_v47, %v4872_v44  ;;  %v4942_v43 = vadd.f32 %v4941_v12, %v4911_v18  ;;  %v6188_v33 = vpop.f32.mrb[28].mxu0  ;;  %v3448_v5 = vpop.f32.mrb[29].mxu1 }
 0x242   : > { %v6220_v29 = vadd.f32 %v6188_v33, %v6052_v50  ;;  %v4640_v19 = vpop.f32.mrb[29].mxu0  ;;  %v6053_v37 = vpop.f32.mrb[30].mxu1 }
 0x243   : > { %v4943_v42 = vadd.f32 %v4942_v43, %v4912_v41  ;;  %v6221_v62 = vadd.f32 %v4640_v19, %v3448_v5  ;;  %v4874_v21 = vadd.f32 %v6218_v20, %v4873_v58  ;;  %v6189_v60 = vpop.f32.mrb[30].mxu0  ;;  %v3451_v63 = vpop.f32.mrb[31].mxu1 }
 0x244   : > { %v6222_v45 = vadd.f32 %v6189_v60, %v6053_v37  ;;  %v4643_v34 = vpop.f32.mrb[31].mxu0  ;;  %v4916_v4 = vmul.f32 %v6220_v29, %v6220_v29 }
 0x245   : > { %v4875_v49 = vadd.f32 %v6221_v62, %v4874_v21  ;;  %v4914_v25 = vmul.f32 %v6221_v62, %v6221_v62  ;;  %v4944_v32 = vadd.f32 %v4943_v42, %v4913_v2  ;;  %v6223_v46 = vadd.f32 %v4643_v34, %v3451_v63 }
 0x246   : > { %v5714_v0 = vpack.c.bf16 %v6222_v45, %v6220_v29  ;;  %v4917_v13 = vmul.f32 %v6222_v45, %v6222_v45 }
 0x247   : > { %v4945_v11 = vadd.f32 %v4944_v32, %v4914_v25  ;;  %v5709_v53 = vpack.c.bf16 %v6223_v46, %v6221_v62  ;;  %v4876_v1 = vadd.f32 %v6223_v46, %v4875_v49  ;;  %v4915_v54 = vmul.f32 %v6223_v46, %v6223_v46 }
 0x248   : > { %5730 = vst [vmem:[%s8499_s26 + $0x78] sm:$0xff] %v5714_v0  }
 0x249   : > { %5729 = vst [vmem:[%s8499_s26 + $0x70] sm:$0xff] %v5709_v53   ;;  %v4877_v38 = vadd.f32 %v6220_v29, %v4876_v1  ;;  %v4946_v36 = vadd.f32 %v4945_v11, %v4915_v54 }
 0x24b   : > { %v4878_v39 = vadd.f32 %v6222_v45, %v4877_v38  ;;  %v4947_v30 = vadd.f32 %v4946_v36, %v4916_v4 }
 0x24d   : > { %v4879_v17 = vrot.slane %v4878_v39, 4  ;;  %v4948_v10 = vadd.f32 %v4947_v30, %v4917_v13 }
 0x24f   : > { %v4880_v6 = vadd.f32 %v4879_v17, %v4878_v39  ;;  %v4949_v59 = vrot.slane %v4948_v10, 4 }
 0x251   : > { %v4881_v40 = vrot.slane %v4880_v6, 2  ;;  %v4950_v55 = vadd.f32 %v4949_v59, %v4948_v10 }
 0x253   : > { %v4882_v26 = vadd.f32 %v4881_v40, %v4880_v6  ;;  %v4951_v24 = vrot.slane %v4950_v55, 2 }
 0x255   : > { %v4883_v61 = vrot.slane %v4882_v26, 1  ;;  %v4952_v9 = vadd.f32 %v4951_v24, %v4950_v55 }
 0x257   : > { %v4884_v57 = vadd.f32 %v4883_v61, %v4882_v26  ;;  %v4953_v47 = vrot.slane %v4952_v9, 1 }
 0x259   : > { %4885 = vst [vmem:[%s8484_s22] sm:$0x1] %v4884_v57  ;;  %v4954_v14 = vadd.f32 %v4953_v47, %v4952_v9 }
 0x25b   : > { %4955 = vst [vmem:[%s8484_s22 + $0x1] sm:$0x1] %v4954_v14 }
 0x25c PF: > { %s14_s14 = sadd.s32 1, %s6640_s14   ;;  %s8602_s12 = smov %s6636_s13 }
 0x25d   : > { %p11_p5 = scmp.ge.s32.totalorder %s14_s14, 4   ;;  %s8603_s13 = smov %s8605_s15 }
 0x25f   :  { %13 = sbr.rel (!%p11_p5) target bundleno = 2 (0x2), region = 81 }

// kernel: double_conv.6
= control target key start
LH: loop header
LB: loop body
LE: loop exit
PB: predicated region body
PF: predicated region fallthrough
CT: control target
= control target key end

     0   :  { %s5759_s12 = smov 0   ;;  %s5761_s13 = smov 0   ;;  %s7800_s0 = inlined_call_operand.vmem [shape: bf16[2,18,18,128], index: 0, kind: input, shape index: {}]   ;;  %s7801_s1 = inlined_call_operand.vmem [shape: bf16[9,128,128], index: 1, kind: input, shape index: {}]   ;;  %s7802_s2 = inlined_call_operand.vmem [shape: bf16[2,256,128], index: 2, kind: output, shape index: {0}]   ;;  %s7803_s3 = inlined_call_operand.vmem [shape: f32[2,1,8,128], index: 3, kind: output, shape index: {1}]  }
   0x1   :  { %s5763_s14 = smov 0  }
   0x2 LB: > { %s26_s15 = sadd.s32 1, %s5732_s13  ;;  %p4466_p0 = scmp.ge.s32.totalorder %s5736_s14, 1  ;;  %s5736_s14 = sphi %s5763_s14, %s14_s14   ;;  %s5732_s13 = sphi %s5761_s13, %s7818_s13   ;;  %s5728_s12 = sphi %s5759_s12, %s7817_s12  }
   0x3   : > { %p28_p1 = scmp.ge.s32.totalorder %s26_s15, 2  ;;  %p156_p2 = scmp.lt.s32.totalorder %s5736_s14, 3 }
   0x5   : > { %s7820_s15 = smov (%p28_p1, %s26_s15), 0  ;;  %p157_p3 = pnand %p4466_p0, %p156_p2 }
   0x6   : > { %v5587_v0 = vld [vmem:[%s7801_s1 + $0x40] sm:$0xff] (!%p157_p3)   ;;  %p191_p4 = scmp.lt.s32.totalorder (!%p157_p3), %s5728_s12, 1  ;;  %v5589_v2 = vld [vmem:[%s7801_s1 + $0x48] sm:$0xff] (!%p157_p3)   ;;  %v5591_v4 = vld [vmem:[%s7801_s1 + $0x50] sm:$0xff] (!%p157_p3)   ;;  %vm266_vm0 = vsmask.f32 (!%p157_p3), 3328 }
   0x7   : > { %160 = sbr.rel (%p157_p3) target bundleno = 577 (0x241), region = 28  ;;  %v5588_v1 = vld [vmem:[%s7801_s1] sm:$0xff] (!%p157_p3)   ;;  %5025 = vmatprep.subr.bf16.mxu0 (!%p157_p3), %v5587_v0  ;;  %5545 = vmatprep.subr.bf16.mxu1 (!%p157_p3), %v5587_v0  ;;  %v5590_v3 = vld [vmem:[%s7801_s1 + $0x8] sm:$0xff] (!%p157_p3)   ;;  %v5592_v5 = vld [vmem:[%s7801_s1 + $0x10] sm:$0xff] (!%p157_p3)   ;;  %vm267_vm1 = vsmask.f32 (!%p157_p3), 7440 }
   0x8   : > { %5026 = vmatpush3.bf16.msra.mxu0 (!%p157_p3), %v5588_v1  ;;  %5553 = vmatpush3.bf16.msra.mxu1 (!%p157_p3), %v5588_v1  ;;  %v5593_v6 = vld [vmem:[%s7801_s1 + $0x58] sm:$0xff] (!%p157_p3)   ;;  %v5595_v8 = vld [vmem:[%s7801_s1 + $0x60] sm:$0xff] (!%p157_p3)   ;;  %v5597_v10 = vld [vmem:[%s7801_s1 + $0x68] sm:$0xff] (!%p157_p3)   ;;  %vm717_vm3 = vcmask (!%p157_p3), 1042432   ;;  %vm718_vm4 = vcmask (!%p157_p3), 1046532  }
   0x9   : > { %5027 = vmatprep.subr.bf16.mxu0 (!%p157_p3), %v5589_v2  ;;  %5546 = vmatprep.subr.bf16.mxu1 (!%p157_p3), %v5589_v2  ;;  %v5594_v7 = vld [vmem:[%s7801_s1 + $0x18] sm:$0xff] (!%p157_p3)   ;;  %v5596_v9 = vld [vmem:[%s7801_s1 + $0x20] sm:$0xff] (!%p157_p3)   ;;  %v5598_v16 = vld [vmem:[%s7801_s1 + $0x28] sm:$0xff] (!%p157_p3)  }
   0xa   : > { %v5599_v21 = vld [vmem:[%s7801_s1 + $0x70] sm:$0xff] (!%p157_p3)   ;;  %vm5853_vm2 = vmor (!%p157_p3), %vm266_vm0, %vm267_vm1  ;;  %v5601_v43 = vld [vmem:[%s7801_s1 + $0x78] sm:$0xff] (!%p157_p3)  }
   0xb   : > { %v5600_v39 = vld [vmem:[%s7801_s1 + $0x30] sm:$0xff] (!%p157_p3)   ;;  %v5602_v46 = vld [vmem:[%s7801_s1 + $0x38] sm:$0xff] (!%p157_p3)   ;;  %v5605_v56 = vld [vmem:[%s7801_s1 + $0xc0] sm:$0xff] (!%p157_p3)  }
   0xc   : > { %5028 = vmatpush3.bf16.msra.mxu0 (!%p157_p3), %v5590_v3  ;;  %5554 = vmatpush3.bf16.msra.mxu1 (!%p157_p3), %v5590_v3  ;;  %v5606_v59 = vld [vmem:[%s7801_s1 + $0x140] sm:$0xff] (!%p157_p3)   ;;  %vm6051_vm5 = vmor (!%p157_p3), %vm717_vm3, %vm718_vm4 }
   0xd   : > { %5029 = vmatprep.subr.bf16.mxu0 (!%p157_p3), %v5591_v4  ;;  %5547 = vmatprep.subr.bf16.mxu1 (!%p157_p3), %v5591_v4  ;;  %v5607_v63 = vld [vmem:[%s7801_s1 + $0x80] sm:$0xff] (!%p157_p3)  }
   0xe   : > { %s7822_s12 = smov (!%p191_p4, %s5728_s12), 1  ;;  %v5608_v0 = vld [vmem:[%s7801_s1 + $0x100] sm:$0xff]  }
   0xf   : > { %s5561_s30 = smul.u32 216, %s7822_s12  ;;  %s4897_s7 = sshll.u32 %s7822_s12, 7 }
  0x10   : > { %5030 = vmatpush3.bf16.msra.mxu0 %v5592_v5  ;;  %5555 = vmatpush3.bf16.msra.mxu1 %v5592_v5  ;;  %s7727_s11 = scalar_lea.vmem %s7802_s2, %s4897_s7 }
  0x11   : > { %5031 = vmatprep.subr.bf16.mxu0 %v5593_v6  ;;  %5548 = vmatprep.subr.bf16.mxu1 %v5593_v6  ;;  %s5810_s10 = scalar_lea.vmem %s7800_s0, %s5561_s30  ;;  %v5609_v6 = vld [vmem:[%s7801_s1 + $0xc8] sm:$0xff]  }
  0x12   : > { %v5819_v11 = vld [vmem:[%s5810_s10] sm:$0xf]  ;;  %v5822_v12 = vld [vmem:[%s5810_s10 + $0x4] sm:$0xf]  ;;  %v5825_v13 = vld [vmem:[%s5810_s10 + $0x8] sm:$0x1] }
  0x13   : > { %v270_v14 = vshrl.u32 %v5819_v11, 16  ;;  %v273_v15 = vshll.u32 %v5819_v11, 16  ;;  %v279_v17 = vshll.u32 %v5822_v12, 16  ;;  %v283_v18 = vshrl.u32 %v5822_v12, 16  ;;  %v5836_v20 = vld [vmem:[%s5810_s10 + $0x90] sm:$0xf] }
  0x14   : > { %5032 = vmatpush3.bf16.msra.mxu0 %v5594_v7  ;;  %5556 = vmatpush3.bf16.msra.mxu1 %v5594_v7  ;;  %v289_v19 = vshll.u32 %v5825_v13, 16  ;;  %v5842_v24 = vld [vmem:[%s5810_s10 + $0x94] sm:$0xf]  ;;  %v558_v25 = vshrl.u32 %v5836_v20, 16  ;;  %v722_v29 = vrot.slane %v5822_v12, 5  ;;  %v561_v33 = vshll.u32 %v5836_v20, 16 }
  0x15   : > { %5033 = vmatprep.subr.bf16.mxu0 %v5595_v8  ;;  %5549 = vmatprep.subr.bf16.mxu1 %v5595_v8  ;;  %v272_v22 = vrot.slane %v270_v14, 4  ;;  %v275_v23 = vrot.slane %v273_v15, 5  ;;  %v281_v26 = vrot.slane %v279_v17, 5  ;;  %v285_v27 = vrot.slane %v283_v18, 4  ;;  %v5847_v30 = vld [vmem:[%s5810_s10 + $0x98] sm:$0x1] }
  0x16   : > { %v291_v28 = vrot.slane %v289_v19, 5  ;;  %v560_v32 = vrot.slane %v558_v25, 4  ;;  %v567_v34 = vshll.u32 %v5842_v24, 16  ;;  %v571_v37 = vshrl.u32 %v5842_v24, 16  ;;  %v5886_v60 = vld [vmem:[%s5810_s10 + $0xc] sm:$0xf] }
  0x17   : > { %v276_v31 = vor.u32 %v275_v23, %v272_v22  ;;  %v286_v36 = vor.u32 %v285_v27, %v281_v26  ;;  %v577_v38 = vshll.u32 %v5847_v30, 16  ;;  %v563_v41 = vrot.slane %v561_v33, 5  ;;  %v5899_v1 = vld [vmem:[%s5810_s10 + $0x10] sm:$0xf]  ;;  %v5902_v2 = vld [vmem:[%s5810_s10 + $0x14] sm:$0x1] }
  0x18   : > { %5034 = vmatpush3.bf16.msra.mxu0 %v5596_v9  ;;  %5557 = vmatpush3.bf16.msra.mxu1 %v5596_v9  ;;  %v569_v42 = vrot.slane %v567_v34, 5  ;;  %v573_v45 = vrot.slane %v571_v37, 4  ;;  %v725_v48 = vrot.slane %v5825_v13, 5  ;;  %v5875_v51 = vrot.slane %v722_v29, 4  ;;  %v263_v17 = vld [vmem:[%s5810_s10 + $0xa4] sm:$0x1] }
  0x19   : > { %5035 = vmatprep.subr.bf16.mxu0 %v5597_v10  ;;  %5550 = vmatprep.subr.bf16.mxu1 %v5597_v10  ;;  %v277_v40 = vrot.slane %v276_v31, 4  ;;  %v287_v44 = vrot.slane %v286_v36, 4  ;;  %v564_v49 = vor.u32 %v563_v41, %v560_v32  ;;  %v579_v53 = vrot.slane %v577_v38, 5  ;;  %v5915_v10 = vld [vmem:[%s5810_s10 + $0x9c] sm:$0xf]  ;;  %v5610_v22 = vld [vmem:[%s7801_s1 + $0x88] sm:$0xff]  }
  0x1a   : > { %v574_v52 = vor.u32 %v573_v45, %v569_v42  ;;  %v4647_v58 = vcombine.low %v5819_v11, %v5822_v12  ;;  %v4659_v62 = vcombine.low %v5836_v20, %v5842_v24  ;;  %v294_v3 = vshrl.u32 %v5886_v60, 16 }
  0x1b   : > { %v282_v47 = vsel %vm5853_vm2, %v277_v40, %v281_v26  ;;  %v292_v50 = vsel %vm5853_vm2, %v287_v44, %v291_v28  ;;  %v565_v55 = vrot.slane %v564_v49, 4  ;;  %v297_v4 = vshll.u32 %v5886_v60, 16  ;;  %v5616_v40 = vld [vmem:[%s7801_s1 + $0x148] sm:$0xff]  }
  0x1c   : > { %5036 = vmatpush3.bf16.msra.mxu0 %v5598_v16  ;;  %5558 = vmatpush3.bf16.msra.mxu1 %v5598_v16  ;;  %v4663_v54 = vcombine.low %v282_v47, %v292_v50  ;;  %v575_v57 = vrot.slane %v574_v52, 4  ;;  %v303_v7 = vshll.u32 %v5899_v1, 16  ;;  %v307_v8 = vshrl.u32 %v5899_v1, 16  ;;  %v5918_v16 = vld [vmem:[%s5810_s10 + $0xa0] sm:$0xf]  ;;  %v5614_v47 = vld [vmem:[%s7801_s1 + $0x90] sm:$0xff]  }
  0x1d   : > { %5037 = vmatprep.subr.bf16.mxu0 %v5599_v21  ;;  %5551 = vmatprep.subr.bf16.mxu1 %v5599_v21  ;;  %v570_v61 = vsel %vm5853_vm2, %v565_v55, %v569_v42  ;;  %v313_v9 = vshll.u32 %v5902_v2, 16  ;;  %v296_v14 = vrot.slane %v294_v3, 4  ;;  %v299_v15 = vrot.slane %v297_v4, 5  ;;  %v5974_v3 = vld [vmem:[%s5810_s10 + $0xac] sm:$0xf] }
  0x1e   : > { %3288 = vmatprep.mubr.bf16.mxu0 %v4663_v54  ;;  %v580_v5 = vsel %vm5853_vm2, %v575_v57, %v579_v53  ;;  %v305_v18 = vrot.slane %v303_v7, 5  ;;  %v309_v19 = vrot.slane %v307_v8, 4  ;;  %v582_v21 = vshrl.u32 %v5915_v10, 16  ;;  %v5615_v53 = vld [vmem:[%s7801_s1 + $0xd8] sm:$0xff]   ;;  %v5618_v54 = vld [vmem:[%s7801_s1 + $0x108] sm:$0xff]  }
  0x1f   : > { %v4675_v11 = vcombine.low %v570_v61, %v580_v5  ;;  %v315_v20 = vrot.slane %v313_v9, 5  ;;  %v300_v23 = vor.u32 %v299_v15, %v296_v14  ;;  %v585_v24 = vshll.u32 %v5915_v10, 16  ;;  %v5956_v57 = vld [vmem:[%s5810_s10 + $0x1c] sm:$0xf]  ;;  %v264_v8 = vld [vmem:[%s5810_s10 + $0xb0] sm:$0x1] }
  0x20   : > { %5038 = vmatpush3.bf16.msra.mxu0 %v5600_v39  ;;  %5559 = vmatpush3.bf16.msra.mxu1 %v5600_v39  ;;  %v591_v25 = vshll.u32 %v5918_v16, 16  ;;  %v595_v26 = vshrl.u32 %v5918_v16, 16  ;;  %v310_v27 = vor.u32 %v309_v19, %v305_v18  ;;  %v584_v28 = vrot.slane %v582_v21, 4  ;;  %v5613_v39 = vld [vmem:[%s7801_s1 + $0xd0] sm:$0xff]   ;;  %v5617_v61 = vld [vmem:[%s7801_s1 + $0x98] sm:$0xff]   ;;  %v5621_v9 = vld [vmem:[%s7801_s1 + $0xe0] sm:$0xff]  }
  0x21   : > { %5039 = vmatprep.subr.bf16.mxu0 %v5601_v43  ;;  %5552 = vmatprep.subr.bf16.mxu1 %v5601_v43  ;;  %v601_v31 = vshll.u32 %v263_v17, 16  ;;  %v301_v32 = vrot.slane %v300_v23, 4  ;;  %v587_v33 = vrot.slane %v585_v24, 5  ;;  %v4660_v55 = vcombine.low %v5915_v10, %v5918_v16  ;;  %v5622_v24 = vld [vmem:[%s7801_s1 + $0xa0] sm:$0xff]  }
  0x22   : > { %3384 = vmatprep.mubr.bf16.mxu1 %v4675_v11  ;;  %v593_v34 = vrot.slane %v591_v25, 5  ;;  %v597_v36 = vrot.slane %v595_v26, 4  ;;  %v311_v37 = vrot.slane %v310_v27, 4  ;;  %v327_v5 = vshll.u32 %v5956_v57, 16 }
  0x23   : > { %v603_v38 = vrot.slane %v601_v31, 5  ;;  %v306_v41 = vsel %vm5853_vm2, %v301_v32, %v305_v18  ;;  %v588_v42 = vor.u32 %v587_v33, %v584_v28  ;;  %v615_v19 = vshll.u32 %v5974_v3, 16 }
  0x24   : > { %5040 = vmatpush3.bf16.msra.mxu0 %v5602_v46  ;;  %5560 = vmatpush3.bf16.msra.mxu1 %v5602_v46  ;;  %v598_v43 = vor.u32 %v597_v36, %v593_v34  ;;  %v316_v45 = vsel %vm5853_vm2, %v311_v37, %v315_v20  ;;  %v4648_v46 = vcombine.low %v5886_v60, %v5899_v1  ;;  %v329_v16 = vrot.slane %v327_v5, 5  ;;  %v5623_v37 = vld [vmem:[%s7801_s1 + $0xe8] sm:$0xff]  }
  0x25   : > { %5137 = vmatprep.subr.bf16.mxu1 %v5605_v56  ;;  %5249 = vmatprep.subr.bf16.mxu0 %v5606_v59  ;;  %v4664_v49 = vcombine.low %v306_v41, %v316_v45  ;;  %v589_v50 = vrot.slane %v588_v42, 4  ;;  %v5953_v56 = vld [vmem:[%s5810_s10 + $0x18] sm:$0xf]  ;;  %v619_v23 = vshrl.u32 %v5974_v3, 16  ;;  %v617_v26 = vrot.slane %v615_v19, 5 }
  0x26   : > { %v599_v52 = vrot.slane %v598_v43, 4  ;;  %v625_v27 = vshll.u32 %v264_v8, 16  ;;  %v4649_v36 = vcombine.low %v5953_v56, %v5956_v57  ;;  %v5624_v43 = vld [vmem:[%s7801_s1 + $0xa8] sm:$0xff]   ;;  %v6004_v45 = vld [vmem:[%s5810_s10 + $0x24] sm:$0xf] }
  0x27   : > { %3289 = vmatmul.mubr.bf16.vlgmr.msra.gmra.mrb[0].mxu0 %v4647_v58  ;;  %3385 = vmatmul.mubr.bf16.vlgmr.msra.gmra.mrb[0].mxu1 %v4659_v62  ;;  %v5959_v58 = vld [vmem:[%s5810_s10 + $0x20] sm:$0x1]  ;;  %v594_v59 = vsel %vm5853_vm2, %v589_v50, %v593_v34  ;;  %v318_v62 = vshrl.u32 %v5953_v56, 16  ;;  %v621_v32 = vrot.slane %v619_v23, 4  ;;  %v6015_v50 = vld [vmem:[%s5810_s10 + $0x2c] sm:$0x1] }
  0x28   : > { %5138 = vmatpush3.bf16.msra.mxu1 %v5607_v63  ;;  %5250 = vmatpush3.bf16.msra.mxu0 %v5608_v0  ;;  %v604_v60 = vsel %vm5853_vm2, %v599_v52, %v603_v38  ;;  %v321_v63 = vshll.u32 %v5953_v56, 16  ;;  %v5971_v0 = vld [vmem:[%s5810_s10 + $0xa8] sm:$0xf]  ;;  %v337_v7 = vshll.u32 %v5959_v58, 16  ;;  %v627_v34 = vrot.slane %v625_v27, 5 }
  0x29   : > { %5139 = vmatprep.subr.bf16.mxu1 %v5609_v6  ;;  %5251 = vmatprep.subr.bf16.mxu0 %v5616_v40  ;;  %v4676_v4 = vcombine.low %v594_v59, %v604_v60  ;;  %v331_v6 = vshrl.u32 %v5956_v57, 16  ;;  %v320_v10 = vrot.slane %v318_v62, 4  ;;  %v606_v14 = vshrl.u32 %v5971_v0, 16  ;;  %v6027_v62 = vld [vmem:[%s5810_s10 + $0xb4] sm:$0xf] }
  0x2a   : > { %3296 = vmatprep.mubr.bf16.mxu0 %v4664_v49  ;;  %v323_v11 = vrot.slane %v321_v63, 5  ;;  %v609_v15 = vshll.u32 %v5971_v0, 16  ;;  %v339_v18 = vrot.slane %v337_v7, 5  ;;  %v729_v38 = vrot.slane %v5899_v1, 5  ;;  %v6030_v63 = vld [vmem:[%s5810_s10 + $0xb8] sm:$0xf] }
  0x2b   : > { %3392 = vmatprep.mubr.bf16.mxu1 %v4676_v4  ;;  %v333_v17 = vrot.slane %v331_v6, 4  ;;  %v608_v21 = vrot.slane %v606_v14, 4  ;;  %v622_v41 = vor.u32 %v621_v32, %v617_v26  ;;  %v4661_v42 = vcombine.low %v5971_v0, %v5974_v3  ;;  %v265_v6 = vld [vmem:[%s5810_s10 + $0xbc] sm:$0x1] }
  0x2c   : > { %5140 = vmatpush3.bf16.msra.mxu1 %v5610_v22  ;;  %5252 = vmatpush3.bf16.msra.mxu0 %v5618_v54  ;;  %v324_v20 = vor.u32 %v323_v11, %v320_v10  ;;  %v611_v22 = vrot.slane %v609_v15, 5  ;;  %v342_v52 = vshrl.u32 %v6004_v45, 16  ;;  %v361_v5 = vshll.u32 %v6015_v50, 16  ;;  %v5630_v11 = vld [vmem:[%s7801_s1 + $0x110] sm:$0xff]  }
  0x2d   : > { %5141 = vmatprep.subr.bf16.mxu1 %v5613_v39  ;;  %v334_v25 = vor.u32 %v333_v17, %v329_v16  ;;  %v623_v60 = vrot.slane %v622_v41, 4  ;;  %v633_v10 = vshll.u32 %v6027_v62, 16  ;;  %v639_v17 = vshll.u32 %v6030_v63, 16 }
  0x2e   : > { %v325_v28 = vrot.slane %v324_v20, 4  ;;  %v612_v31 = vor.u32 %v611_v22, %v608_v21  ;;  %v344_v0 = vrot.slane %v342_v52, 4  ;;  %v643_v21 = vshrl.u32 %v6030_v63, 16  ;;  %v5629_v22 = vld [vmem:[%s7801_s1 + $0xb0] sm:$0xff]  }
  0x2f   : > { %3297 = vmatmul.mubr.bf16.gmra.mrb[4].mxu0 %v4648_v46  ;;  %3393 = vmatmul.mubr.bf16.gmra.mrb[4].mxu1 %v4660_v55  ;;  %v335_v33 = vrot.slane %v334_v25, 4  ;;  %v6007_v46 = vld [vmem:[%s5810_s10 + $0x28] sm:$0xf]  ;;  %v5627_v55 = vld [vmem:[%s7801_s1 + $0xf0] sm:$0xff]   ;;  %v628_v7 = vsel %vm5853_vm2, %v623_v60, %v627_v34  ;;  %v635_v20 = vrot.slane %v633_v10, 5  ;;  %v649_v25 = vshll.u32 %v265_v6, 16 }
  0x30   : > { %5142 = vmatpush3.bf16.msra.mxu1 %v5614_v47  ;;  %v330_v39 = vsel %vm5853_vm2, %v325_v28, %v329_v16  ;;  %v613_v40 = vrot.slane %v612_v31, 4  ;;  %v5628_v47 = vld [vmem:[%s7801_s1 + $0x150] sm:$0xff]   ;;  %v351_v54 = vshll.u32 %v6007_v46, 16  ;;  %v363_v16 = vrot.slane %v361_v5, 5  ;;  %v5643_v6 = vld [vmem:[%s7801_s1 + $0x160] sm:$0xff]  }
  0x31   : > { %5143 = vmatprep.subr.bf16.mxu1 %v5615_v53  ;;  %v340_v49 = vsel %vm5853_vm2, %v335_v33, %v339_v18  ;;  %v345_v53 = vshll.u32 %v6004_v45, 16  ;;  %5253 = vmatprep.subr.bf16.mxu0 %v5628_v47  ;;  %v645_v32 = vrot.slane %v643_v21, 4  ;;  %v651_v34 = vrot.slane %v649_v25, 5  ;;  %v6078_v52 = vld [vmem:[%s5810_s10 + $0x34] sm:$0xf] }
  0x32   : > { %v4665_v56 = vcombine.low %v330_v39, %v340_v49  ;;  %v618_v59 = vsel %vm5853_vm2, %v613_v40, %v617_v26  ;;  %v353_v4 = vrot.slane %v351_v54, 5  ;;  %5254 = vmatpush3.bf16.msra.mxu0 %v5630_v11  ;;  %v5631_v26 = vld [vmem:[%s7801_s1 + $0xf8] sm:$0xff]   ;;  %v4650_v41 = vcombine.low %v6004_v45, %v6007_v46  ;;  %v6075_v49 = vld [vmem:[%s5810_s10 + $0x30] sm:$0xf]  ;;  %v653_v11 = vld [vmem:[%s5810_s10] sm:$0xe] }
  0x33   : > { %v347_v3 = vrot.slane %v345_v53, 5  ;;  %v4677_v14 = vcombine.low %v618_v59, %v628_v7  ;;  %v6083_v54 = vld [vmem:[%s5810_s10 + $0x38] sm:$0x1]  ;;  %v366_v13 = vshrl.u32 %v6075_v49, 16  ;;  %v379_v59 = vshrl.u32 %v6078_v52, 16 }
  0x34   : > { %5144 = vmatpush3.bf16.msra.mxu1 %v5617_v61  ;;  %v355_v61 = vshrl.u32 %v6007_v46, 16  ;;  %3304 = vmatprep.mubr.bf16.mxu0 %v4665_v56  ;;  %v375_v56 = vshll.u32 %v6078_v52, 16  ;;  %v385_v60 = vshll.u32 %v6083_v54, 16 }
  0x35   : > { %5145 = vmatprep.subr.bf16.mxu1 %v5621_v9  ;;  %v630_v9 = vshrl.u32 %v6027_v62, 16  ;;  %v348_v15 = vor.u32 %v347_v3, %v344_v0  ;;  %3400 = vmatprep.mubr.bf16.mxu1 %v4677_v14  ;;  %v5638_v0 = vld [vmem:[%s7801_s1 + $0x118] sm:$0xff]  }
  0x36   : > { %v357_v8 = vrot.slane %v355_v61, 4  ;;  %v4487_v61 = vld [vmem:[%s5810_s10 + $0xc] sm:$0xf]  ;;  %v387_v10 = vrot.slane %v385_v60, 5 }
  0x37   : > { %3305 = vmatmul.mubr.bf16.gmra.mrb[8].mxu0 %v4649_v36  ;;  %v632_v19 = vrot.slane %v630_v9, 4  ;;  %v349_v23 = vrot.slane %v348_v15, 4  ;;  %3401 = vmatmul.mubr.bf16.gmra.mrb[8].mxu1 %v4661_v42  ;;  %v5632_v36 = vld [vmem:[%s7801_s1 + $0xb8] sm:$0xff]   ;;  %v5635_v42 = vld [vmem:[%s7801_s1 + $0x1c0] sm:$0xff]   ;;  %v381_v9 = vrot.slane %v379_v59, 4 }
  0x38   : > { %5146 = vmatpush3.bf16.msra.mxu1 %v5622_v24  ;;  %v358_v18 = vor.u32 %v357_v8, %v353_v4  ;;  %v641_v24 = vrot.slane %v639_v17, 5  ;;  %v377_v8 = vrot.slane %v375_v56, 5 }
  0x39   : > { %5147 = vmatprep.subr.bf16.mxu1 %v5623_v37  ;;  %v636_v31 = vor.u32 %v635_v20, %v632_v19  ;;  %v354_v33 = vsel %vm5853_vm2, %v349_v23, %v353_v4  ;;  %v368_v4 = vrot.slane %v366_v13, 4 }
  0x3a   : > { %v359_v28 = vrot.slane %v358_v18, 4  ;;  %v646_v40 = vor.u32 %v645_v32, %v641_v24  ;;  %v5645_v18 = vld [vmem:[%s7801_s1 + $0x120] sm:$0xff]   ;;  %v382_v19 = vor.u32 %v381_v9, %v377_v8 }
  0x3b   : > { %v637_v39 = vrot.slane %v636_v31, 4 }
  0x3c   : > { %5148 = vmatpush3.bf16.msra.mxu1 %v5624_v43  ;;  %v364_v37 = vsel %vm5853_vm2, %v359_v28, %v363_v16  ;;  %v6072_v43 = vsel %vm6051_vm5, %v5875_v51, %v725_v48  ;;  %v647_v53 = vrot.slane %v646_v40, 4  ;;  %v5637_v48 = vld [vmem:[%s7801_s1 + $0x158] sm:$0xff]   ;;  %v4662_v51 = vcombine.low %v6027_v62, %v6030_v63  ;;  %v6102_v62 = vld [vmem:[%s5810_s10 + $0x10] sm:$0xf] }
  0x3d   : > { %5149 = vmatprep.subr.bf16.mxu1 %v5627_v55  ;;  %v4666_v47 = vcombine.low %v354_v33, %v364_v37  ;;  %v642_v45 = vsel %vm5853_vm2, %v637_v39, %v641_v24  ;;  %v369_v55 = vshll.u32 %v6075_v49, 16  ;;  %v885_v63 = vshrl.u32 %v4487_v61, 16  ;;  %5255 = vmatprep.subr.bf16.mxu0 %v5637_v48  ;;  %v6130_v39 = vld [vmem:[%s5810_s10 + $0x3c] sm:$0xf]  ;;  %v5644_v48 = vld [vmem:[%s7801_s1 + $0x1c8] sm:$0xff]  }
  0x3e   : > { %v652_v3 = vsel %vm5853_vm2, %v647_v53, %v651_v34  ;;  %v888_v16 = vshll.u32 %v4487_v61, 16  ;;  %v894_v17 = vshll.u32 %v6102_v62, 16  ;;  %5256 = vmatpush3.bf16.msra.mxu0 %v5638_v0  ;;  %v898_v20 = vshrl.u32 %v6102_v62, 16 }
  0x3f   : > { %3312 = vmatprep.mubr.bf16.mxu0 %v4666_v47  ;;  %v371_v5 = vrot.slane %v369_v55, 5  ;;  %v4678_v7 = vcombine.low %v642_v45, %v652_v3  ;;  %v887_v15 = vrot.slane %v885_v63, 4  ;;  %v4695_v21 = vcombine.low %v4487_v61, %v6102_v62  ;;  %5257 = vmatprep.subr.bf16.mxu0 %v5643_v6  ;;  %v4489_v55 = vld [vmem:[%s5810_s10 + $0x18] sm:$0xf]  ;;  %v6158_v61 = vld [vmem:[%s5810_s10 + $0x1c] sm:$0xf] }
  0x40   : > { %5150 = vmatpush3.bf16.msra.mxu1 %v5629_v22  ;;  %3313 = vmatmul.mubr.bf16.gmra.mrb[12].mxu0 %v4650_v41  ;;  %v4471_v22 = vrot.slane %v653_v11, 9  ;;  %v890_v24 = vrot.slane %v888_v16, 5  ;;  %v6114_v25 = vrot.slane %v894_v17, 5  ;;  %v383_v28 = vrot.slane %v382_v19, 4  ;;  %v6139_v41 = vld [vmem:[%s5810_s10 + $0x40] sm:$0xf] }
  0x41   : > { %5151 = vmatprep.subr.bf16.mxu1 %v5631_v26  ;;  %v372_v14 = vor.u32 %v371_v5, %v368_v4  ;;  %3408 = vmatprep.mubr.bf16.mxu1 %v4678_v7  ;;  %v6118_v26 = vrot.slane %v729_v38, 4  ;;  %v900_v31 = vrot.slane %v898_v20, 4  ;;  %v390_v47 = vshrl.u32 %v6130_v39, 16  ;;  %v654_v63 = vld [vmem:[%s5810_s10 + $0xc] sm:$0xe] }
  0x42   : > { %3409 = vmatmul.mubr.bf16.gmra.mrb[12].mxu1 %v4662_v51  ;;  %v723_v32 = vsel %vm6051_vm5, %v4471_v22, %v722_v29  ;;  %v891_v34 = vor.u32 %v890_v24, %v887_v15  ;;  %5258 = vmatpush3.bf16.msra.mxu0 %v5645_v18  ;;  %v388_v40 = vsel %vm5853_vm2, %v383_v28, %v387_v10  ;;  %v5636_v29 = vld [vmem:[%s7801_s1 + $0x180] sm:$0xff]   ;;  %v399_v53 = vshll.u32 %v6139_v41, 16  ;;  %v6164_v10 = vld [vmem:[%s5810_s10 + $0x48] sm:$0xf]  ;;  %v6167_v11 = vld [vmem:[%s5810_s10 + $0x4c] sm:$0xf] }
  0x43   : > { %v373_v23 = vrot.slane %v372_v14, 4  ;;  %3449 = vmatprep.mubr.bf16.mxu1 %v4695_v21  ;;  %v4679_v37 = vcombine.low %v723_v32, %v6072_v43  ;;  %v901_v12 = vor.u32 %v900_v31, %v6114_v25  ;;  %v393_v43 = vshll.u32 %v6130_v39, 16  ;;  %v6176_v18 = vld [vmem:[%s5810_s10 + $0x50] sm:$0x1]  ;;  %v5646_v19 = vld [vmem:[%s7801_s1 + $0x188] sm:$0xff]  }
  0x44   : > { %5152 = vmatpush3.bf16.msra.mxu1 %v5632_v36  ;;  %v4651_v36 = vcombine.low %v6075_v49, %v6078_v52  ;;  %v6146_v45 = vrot.slane %v891_v34, 4  ;;  %v403_v13 = vshrl.u32 %v6139_v41, 16  ;;  %v392_v56 = vrot.slane %v390_v47, 4  ;;  %v4491_v24 = vld [vmem:[%s5810_s10 + $0x24] sm:$0xf] }
  0x45   : > { %5361 = vmatprep.subr.bf16.mxu1 %v5635_v42  ;;  %v378_v33 = vsel %vm5853_vm2, %v373_v23, %v377_v8  ;;  %v6142_v42 = vld [vmem:[%s5810_s10 + $0x44] sm:$0x1]  ;;  %v6154_v51 = vrot.slane %v901_v12, 4  ;;  %v395_v59 = vrot.slane %v393_v43, 5  ;;  %v401_v0 = vrot.slane %v399_v53, 5  ;;  %v5649_v12 = vld [vmem:[%s7801_s1 + $0x168] sm:$0xff]  }
  0x46   : > { %v4667_v49 = vcombine.low %v378_v33, %v388_v40  ;;  %v409_v60 = vshll.u32 %v6142_v42, 16  ;;  %v405_v3 = vrot.slane %v403_v13, 4  ;;  %v909_v4 = vshrl.u32 %v4489_v55, 16  ;;  %v6188_v34 = vld [vmem:[%s5810_s10 + $0x28] sm:$0xf]  ;;  %5259 = vmatprep.subr.bf16.mxu0 %v5649_v12 }
  0x47   : > { %v912_v5 = vshll.u32 %v4489_v55, 16  ;;  %v396_v6 = vor.u32 %v395_v59, %v392_v56  ;;  %v4696_v9 = vcombine.low %v4489_v55, %v6158_v61  ;;  %v4652_v17 = vcombine.low %v6130_v39, %v6139_v41  ;;  %v655_v40 = vld [vmem:[%s5810_s10 + $0x18] sm:$0xe]  ;;  %v4519_v8 = vld [vmem:[%s5810_s10 + $0x14] sm:$0x1] }
  0x48   : > { %3320 = vmatprep.mubr.bf16.mxu0 %v4667_v49  ;;  %v411_v7 = vrot.slane %v409_v60, 5  ;;  %v406_v14 = vor.u32 %v405_v3, %v401_v0  ;;  %v6169_v15 = vrot.slane %v909_v4, 4  ;;  %v4472_v21 = vrot.slane %v654_v63, 9 }
  0x49   : > { %3321 = vmatmul.mubr.bf16.gmra.mrb[16].mxu0 %v4651_v36  ;;  %v6171_v16 = vrot.slane %v912_v5, 5  ;;  %v397_v20 = vrot.slane %v396_v6, 4  ;;  %v732_v22 = vrot.slane %v5902_v2, 5  ;;  %v414_v23 = vshrl.u32 %v6164_v10, 16  ;;  %v6216_v5 = vld [vmem:[%s5810_s10 + $0x54] sm:$0xf] }
  0x4a   : > { %3450 = vmatmul.mubr.bf16.vlgmr.msra.gmra.mrb[16].mxu1 %v4679_v37  ;;  %v407_v28 = vrot.slane %v406_v14, 4  ;;  %v417_v31 = vshll.u32 %v6164_v10, 16  ;;  %v423_v32 = vshll.u32 %v6167_v11, 16  ;;  %v427_v33 = vshrl.u32 %v6167_v11, 16  ;;  %v6222_v14 = vld [vmem:[%s5810_s10 + $0x58] sm:$0xf] }
  0x4b   : > { %5362 = vmatpush3.bf16.msra.mxu1 %v5636_v29  ;;  %3457 = vmatprep.mubr.bf16.mxu1 %v4696_v9  ;;  %v402_v36 = vsel %vm5853_vm2, %v397_v20, %v401_v0  ;;  %v730_v2 = vsel %vm6051_vm5, %v4472_v21, %v729_v38  ;;  %v733_v37 = vsel %vm6051_vm5, %v6118_v26, %v732_v22  ;;  %v416_v39 = vrot.slane %v414_v23, 4  ;;  %v5650_v26 = vld [vmem:[%s7801_s1 + $0x128] sm:$0xff]   ;;  %v6226_v20 = vld [vmem:[%s5810_s10 + $0x5c] sm:$0x1] }
  0x4c   : > { %5363 = vmatprep.subr.bf16.mxu1 %v5644_v48  ;;  %v412_v29 = vsel %vm5853_vm2, %v407_v28, %v411_v7  ;;  %v4680_v47 = vcombine.low %v730_v2, %v733_v37  ;;  %v419_v43 = vrot.slane %v417_v31, 5  ;;  %v425_v49 = vrot.slane %v423_v32, 5  ;;  %5260 = vmatpush3.bf16.msra.mxu0 %v5650_v26  ;;  %v4493_v28 = vld [vmem:[%s5810_s10 + $0x30] sm:$0xf]  ;;  %v6237_v31 = vld [vmem:[%s5810_s10 + $0x34] sm:$0xf] }
  0x4d   : > { %v4668_v1 = vcombine.low %v402_v36, %v412_v29  ;;  %v429_v53 = vrot.slane %v427_v33, 4  ;;  %v433_v38 = vshll.u32 %v6176_v18, 16  ;;  %v933_v13 = vshrl.u32 %v4491_v24, 16  ;;  %v656_v2 = vld [vmem:[%s5810_s10 + $0x24] sm:$0xe]  ;;  %v5653_v37 = vld [vmem:[%s7801_s1 + $0x1d0] sm:$0xff]  }
  0x4e   : > { %v420_v55 = vor.u32 %v419_v43, %v416_v39  ;;  %v936_v48 = vshll.u32 %v4491_v24, 16  ;;  %v4697_v59 = vcombine.low %v4491_v24, %v6188_v34  ;;  %v4653_v4 = vcombine.low %v6164_v10, %v6167_v11 }
  0x4f   : > { %5364 = vmatpush3.bf16.msra.mxu1 %v5646_v19  ;;  %3328 = vmatprep.mubr.bf16.mxu0 %v4668_v1  ;;  %v430_v60 = vor.u32 %v429_v53, %v425_v49  ;;  %v435_v0 = vrot.slane %v433_v38, 5  ;;  %v6211_v3 = vrot.slane %v933_v13, 4  ;;  %v4473_v7 = vrot.slane %v655_v40, 9  ;;  %v6449_v13 = vld [vmem:[%s5810_s10 + $0x6c] sm:$0xf] }
  0x50   : > { %v421_v63 = vrot.slane %v420_v55, 4  ;;  %v6218_v6 = vrot.slane %v936_v48, 5  ;;  %v736_v9 = vrot.slane %v5956_v57, 5  ;;  %v739_v10 = vrot.slane %v5959_v58, 5  ;;  %5365 = vmatprep.subr.bf16.mxu1 %v5653_v37  ;;  %v6252_v55 = vld [vmem:[%s5810_s10 + $0x60] sm:$0xf] }
  0x51   : > { %3329 = vmatmul.mubr.bf16.gmra.mrb[20].mxu0 %v4652_v17  ;;  %v431_v19 = vrot.slane %v430_v60, 4  ;;  %v438_v17 = vshrl.u32 %v6216_v5, 16  ;;  %v441_v21 = vshll.u32 %v6216_v5, 16  ;;  %v447_v24 = vshll.u32 %v6222_v14, 16  ;;  %v5654_v48 = vld [vmem:[%s7801_s1 + $0x190] sm:$0xff]  }
  0x52   : > { %3458 = vmatmul.mubr.bf16.gmra.mrb[20].mxu1 %v4680_v47  ;;  %v426_v22 = vsel %vm5853_vm2, %v421_v63, %v425_v49  ;;  %v737_v23 = vsel %vm6051_vm5, %v4473_v7, %v736_v9  ;;  %v738_v57 = vrot.slane %v736_v9, 4  ;;  %v451_v36 = vshrl.u32 %v6222_v14, 16  ;;  %v6262_v7 = vld [vmem:[%s5810_s10 + $0x64] sm:$0xf] }
  0x53   : > { %3465 = vmatprep.mubr.bf16.mxu1 %v4697_v59  ;;  %v436_v58 = vsel %vm5853_vm2, %v431_v19, %v435_v0  ;;  %v440_v32 = vrot.slane %v438_v17, 4  ;;  %v443_v33 = vrot.slane %v441_v21, 5  ;;  %v449_v12 = vrot.slane %v447_v24, 5  ;;  %v6269_v21 = vld [vmem:[%s5810_s10 + $0x68] sm:$0x1]  ;;  %5366 = vmatpush3.bf16.msra.mxu1 %v5654_v48 }
  0x54   : > { %v4669_v39 = vcombine.low %v426_v22, %v436_v58  ;;  %v740_v40 = vsel %vm6051_vm5, %v738_v57, %v739_v10  ;;  %v457_v29 = vshll.u32 %v6226_v20, 16  ;;  %v453_v49 = vrot.slane %v451_v36, 4  ;;  %v4495_v57 = vld [vmem:[%s5810_s10 + $0x3c] sm:$0xf]  ;;  %v6277_v24 = vld [vmem:[%s5810_s10 + $0x40] sm:$0xf] }
  0x55   : > { %v4681_v47 = vcombine.low %v737_v23, %v740_v40  ;;  %v444_v43 = vor.u32 %v443_v33, %v440_v32  ;;  %v957_v1 = vshrl.u32 %v4493_v28, 16  ;;  %v960_v38 = vshll.u32 %v4493_v28, 16  ;;  %v657_v33 = vld [vmem:[%s5810_s10 + $0x30] sm:$0xe] }
  0x56   : > { %3336 = vmatprep.mubr.bf16.mxu0 %v4669_v39  ;;  %v459_v53 = vrot.slane %v457_v29, 5  ;;  %v4698_v26 = vcombine.low %v4493_v28, %v6237_v31  ;;  %v454_v60 = vor.u32 %v453_v49, %v449_v12  ;;  %v4654_v63 = vcombine.low %v6216_v5, %v6222_v14  ;;  %v5658_v36 = vld [vmem:[%s7801_s1 + $0x130] sm:$0xff]  }
  0x57   : > { %v445_v59 = vrot.slane %v444_v43, 4  ;;  %v6257_v0 = vrot.slane %v957_v1, 4  ;;  %v6264_v9 = vrot.slane %v960_v38, 5  ;;  %v4474_v19 = vrot.slane %v656_v2, 9 }
  0x58   : > { %v743_v10 = vrot.slane %v6007_v46, 5  ;;  %v746_v17 = vrot.slane %v6015_v50, 5  ;;  %v455_v23 = vrot.slane %v454_v60, 4  ;;  %v462_v5 = vshrl.u32 %v6252_v55, 16  ;;  %v5657_v46 = vld [vmem:[%s7801_s1 + $0x170] sm:$0xff]  }
  0x59   : > { %3337 = vmatmul.mubr.bf16.gmra.mrb[24].mxu0 %v4653_v4  ;;  %v450_v22 = vsel %vm5853_vm2, %v445_v59, %v449_v12  ;;  %v465_v4 = vshll.u32 %v6252_v55, 16  ;;  %v471_v58 = vshll.u32 %v6262_v7, 16  ;;  %v475_v32 = vshrl.u32 %v6262_v7, 16  ;;  %5261 = vmatprep.subr.bf16.mxu0 %v5657_v46  ;;  %v5661_v12 = vld [vmem:[%s7801_s1 + $0x1d8] sm:$0xff]  }
  0x5a   : > { %3466 = vmatmul.mubr.bf16.gmra.mrb[24].mxu1 %v4681_v47  ;;  %v744_v50 = vsel %vm6051_vm5, %v4474_v19, %v743_v10  ;;  %v745_v28 = vrot.slane %v743_v10, 4  ;;  %v460_v2 = vsel %vm5853_vm2, %v455_v23, %v459_v53  ;;  %v464_v37 = vrot.slane %v462_v5, 4  ;;  %5262 = vmatpush3.bf16.msra.mxu0 %v5658_v36  ;;  %v6301_v10 = vld [vmem:[%s5810_s10 + $0x6c] sm:$0xf]  ;;  %v5662_v46 = vld [vmem:[%s7801_s1 + $0x198] sm:$0xff]  }
  0x5b   : > { %3473 = vmatprep.mubr.bf16.mxu1 %v4698_v26  ;;  %v467_v39 = vrot.slane %v465_v4, 5  ;;  %v481_v40 = vshll.u32 %v6269_v21, 16  ;;  %v4670_v29 = vcombine.low %v450_v22, %v460_v2  ;;  %v473_v43 = vrot.slane %v471_v58, 5  ;;  %5367 = vmatprep.subr.bf16.mxu1 %v5661_v12  ;;  %v6304_v22 = vld [vmem:[%s5810_s10 + $0x70] sm:$0xf] }
  0x5c   : > { %v747_v47 = vsel %vm6051_vm5, %v745_v28, %v746_v17  ;;  %v477_v49 = vrot.slane %v475_v32, 4  ;;  %v981_v26 = vshrl.u32 %v4495_v57, 16  ;;  %v984_v59 = vshll.u32 %v4495_v57, 16  ;;  %v6318_v32 = vld [vmem:[%s5810_s10 + $0x74] sm:$0x1]  ;;  %5368 = vmatpush3.bf16.msra.mxu1 %v5662_v46 }
  0x5d   : > { %v4682_v1 = vcombine.low %v744_v50, %v747_v47  ;;  %v468_v53 = vor.u32 %v467_v39, %v464_v37  ;;  %v483_v38 = vrot.slane %v481_v40, 5  ;;  %3344 = vmatprep.mubr.bf16.mxu0 %v4670_v29  ;;  %v4699_v19 = vcombine.low %v4495_v57, %v6277_v24  ;;  %v4497_v2 = vld [vmem:[%s5810_s10 + $0x48] sm:$0xf]  ;;  %v6327_v37 = vld [vmem:[%s5810_s10 + $0x4c] sm:$0xf] }
  0x5e   : > { %v478_v48 = vor.u32 %v477_v49, %v473_v43  ;;  %v6306_v23 = vrot.slane %v981_v26, 4  ;;  %v4655_v5 = vcombine.low %v6252_v55, %v6262_v7  ;;  %v4475_v4 = vrot.slane %v657_v33, 9  ;;  %v658_v29 = vld [vmem:[%s5810_s10 + $0x3c] sm:$0xe] }
  0x5f   : > { %v469_v17 = vrot.slane %v468_v53, 4  ;;  %v6313_v50 = vrot.slane %v984_v59, 5  ;;  %v750_v28 = vrot.slane %v6078_v52, 5  ;;  %v753_v58 = vrot.slane %v6083_v54, 5  ;;  %v5663_v52 = vld [vmem:[%s7801_s1 + $0x178] sm:$0xff]  }
  0x60   : > { %v479_v57 = vrot.slane %v478_v48, 4  ;;  %v486_v33 = vshrl.u32 %v6301_v10, 16  ;;  %v489_v36 = vshll.u32 %v6301_v10, 16  ;;  %v499_v12 = vshrl.u32 %v6304_v22, 16  ;;  %5263 = vmatprep.subr.bf16.mxu0 %v5663_v52  ;;  %v5664_v53 = vld [vmem:[%s7801_s1 + $0x138] sm:$0xff]  }
  0x61   : > { %3345 = vmatmul.mubr.bf16.gmra.mrb[28].mxu0 %v4654_v63  ;;  %v474_v55 = vsel %vm5853_vm2, %v469_v17, %v473_v43  ;;  %v495_v63 = vshll.u32 %v6304_v22, 16  ;;  %v751_v39 = vsel %vm6051_vm5, %v4475_v4, %v750_v28  ;;  %v752_v40 = vrot.slane %v750_v28, 4  ;;  %v6349_v28 = vld [vmem:[%s5810_s10 + $0x78] sm:$0xf] }
  0x62   : > { %3474 = vmatmul.mubr.bf16.gmra.mrb[28].mxu1 %v4682_v1  ;;  %v484_v54 = vsel %vm5853_vm2, %v479_v57, %v483_v38  ;;  %v488_v43 = vrot.slane %v486_v33, 4  ;;  %v491_v49 = vrot.slane %v489_v36, 5  ;;  %v501_v26 = vrot.slane %v499_v12, 4  ;;  %5264 = vmatpush3.bf16.msra.mxu0 %v5664_v53  ;;  %v6364_v12 = vld [vmem:[%s7801_s1 + $0x200] sm:$0xff]  }
  0x63   : > { %3481 = vmatprep.mubr.bf16.mxu1 %v4699_v19  ;;  %v4671_v47 = vcombine.low %v474_v55, %v484_v54  ;;  %v497_v1 = vrot.slane %v495_v63, 5  ;;  %v754_v38 = vsel %vm6051_vm5, %v752_v40, %v753_v58  ;;  %v505_v48 = vshll.u32 %v6318_v32, 16  ;;  %v5668_v19 = vld [vmem:[%s7801_s1 + $0x1e0] sm:$0xff]   ;;  %v6355_v63 = vld [vmem:[%s5810_s10 + $0x7c] sm:$0xf]  ;;  %5497 = vmatprep.subr.bf16.mxu0 %v6364_v12 }
  0x64   : > { %v1005_v59 = vshrl.u32 %v4497_v2, 16  ;;  %v4683_v17 = vcombine.low %v751_v39, %v754_v38  ;;  %v492_v4 = vor.u32 %v491_v49, %v488_v43  ;;  %v1008_v46 = vshll.u32 %v4497_v2, 16  ;;  %5369 = vmatprep.subr.bf16.mxu1 %v5668_v19  ;;  %v6369_v49 = vld [vmem:[%s5810_s10 + $0x80] sm:$0x1] }
  0x65   : > { %3352 = vmatprep.mubr.bf16.mxu0 %v4671_v47  ;;  %v502_v55 = vor.u32 %v501_v26, %v497_v1  ;;  %v507_v58 = vrot.slane %v505_v48, 5  ;;  %v4700_v36 = vcombine.low %v4497_v2, %v6327_v37  ;;  %v4656_v39 = vcombine.low %v6301_v10, %v6304_v22  ;;  %v4499_v26 = vld [vmem:[%s5810_s10 + $0x54] sm:$0xf]  ;;  %v6379_v48 = vld [vmem:[%s5810_s10 + $0x58] sm:$0xf] }
  0x66   : > { %v6351_v33 = vrot.slane %v1005_v59, 4  ;;  %v493_v52 = vrot.slane %v492_v4, 4  ;;  %v6357_v54 = vrot.slane %v1008_v46, 5  ;;  %v4476_v40 = vrot.slane %v658_v29, 9 }
  0x67   : > { %v503_v2 = vrot.slane %v502_v55, 4  ;;  %v757_v47 = vrot.slane %v6139_v41, 5  ;;  %v760_v43 = vrot.slane %v6142_v42, 5  ;;  %v510_v53 = vshrl.u32 %v6349_v28, 16  ;;  %v5670_v41 = vld [vmem:[%s7801_s1 + $0x1a0] sm:$0xff]  }
  0x68   : > { %v498_v10 = vsel %vm5853_vm2, %v493_v52, %v497_v1  ;;  %v513_v29 = vshll.u32 %v6349_v28, 16  ;;  %v519_v38 = vshll.u32 %v6355_v63, 16  ;;  %5370 = vmatpush3.bf16.msra.mxu1 %v5670_v41  ;;  %v5673_v52 = vld [vmem:[%s7801_s1 + $0x1e8] sm:$0xff]   ;;  %v1032_v44 = vshll.u32 %v4499_v26, 16 }
  0x69   : > { %3353 = vmatmul.mubr.bf16.gmra.mrb[32].mxu0 %v4655_v5  ;;  %v523_v5 = vshrl.u32 %v6355_v63, 16  ;;  %v508_v42 = vsel %vm5853_vm2, %v503_v2, %v507_v58  ;;  %v758_v1 = vsel %vm6051_vm5, %v4476_v40, %v757_v47  ;;  %v759_v59 = vrot.slane %v757_v47, 4  ;;  %5371 = vmatprep.subr.bf16.mxu1 %v5673_v52 }
  0x6a   : > { %3482 = vmatmul.mubr.bf16.gmra.mrb[32].mxu1 %v4683_v17  ;;  %v512_v19 = vrot.slane %v510_v53, 4  ;;  %v659_v17 = vld [vmem:[%s5810_s10 + $0x48] sm:$0xe]  ;;  %v4672_v4 = vcombine.low %v498_v10, %v508_v42  ;;  %v515_v46 = vrot.slane %v513_v29, 5  ;;  %v521_v55 = vrot.slane %v519_v38, 5 }
  0x6b   : > { %3489 = vmatprep.mubr.bf16.mxu1 %v4700_v36  ;;  %v525_v36 = vrot.slane %v523_v5, 4  ;;  %v761_v57 = vsel %vm6051_vm5, %v759_v59, %v760_v43  ;;  %v529_v58 = vshll.u32 %v6369_v49, 16  ;;  %v1029_v2 = vshrl.u32 %v4499_v26, 16  ;;  %v5675_v29 = vld [vmem:[%s7801_s1 + $0x1a8] sm:$0xff]  }
  0x6c   : > { %3360 = vmatprep.mubr.bf16.mxu0 %v4672_v4  ;;  %v4684_v40 = vcombine.low %v758_v1, %v761_v57  ;;  %v516_v47 = vor.u32 %v515_v46, %v512_v19  ;;  %v6402_v5 = vrot.slane %v1032_v44, 5  ;;  %v4701_v41 = vcombine.low %v4499_v26, %v6379_v48  ;;  %v5678_v57 = vld [vmem:[%s7801_s1 + $0x1f0] sm:$0xff]   ;;  %v6411_v4 = vld [vmem:[%s5810_s10 + $0x84] sm:$0xf]  ;;  %5372 = vmatpush3.bf16.msra.mxu1 %v5675_v29  ;;  %v6416_v46 = vld [vmem:[%s5810_s10 + $0x88] sm:$0xf] }
  0x6d   : > { %v526_v53 = vor.u32 %v525_v36, %v521_v55  ;;  %v531_v38 = vrot.slane %v529_v58, 5  ;;  %v6400_v43 = vrot.slane %v1029_v2, 4  ;;  %v4657_v59 = vcombine.low %v6349_v28, %v6355_v63  ;;  %v6419_v36 = vld [vmem:[%s5810_s10 + $0x8c] sm:$0x1]  ;;  %5373 = vmatprep.subr.bf16.mxu1 %v5678_v57 }
  0x6e   : > { %v517_v42 = vrot.slane %v516_v47, 4  ;;  %v4477_v19 = vrot.slane %v659_v17, 9  ;;  %v764_v44 = vrot.slane %v6167_v11, 5  ;;  %v767_v26 = vrot.slane %v6176_v18, 5  ;;  %v4535_v17 = vld [vmem:[%s5810_s10 + $0xc] sm:$0xe] }
  0x6f   : > { %v527_v1 = vrot.slane %v526_v53, 4  ;;  %v897_v28 = vsel %vm5853_vm2, %v6146_v45, %v6114_v25  ;;  %v534_v18 = vshrl.u32 %v6411_v4, 16  ;;  %v537_v52 = vshll.u32 %v6411_v4, 16  ;;  %v4501_v53 = vld [vmem:[%s5810_s10 + $0x60] sm:$0xf] }
  0x70   : > { %v765_v2 = vsel %vm6051_vm5, %v4477_v19, %v764_v44  ;;  %v543_v47 = vshll.u32 %v6416_v46, 16  ;;  %v1053_v19 = vshrl.u32 %v4501_v53, 16  ;;  %v6530_v25 = vld [vmem:[%s5810_s10 + $0x84] sm:$0xf] }
  0x71   : > { %3361 = vmatmul.mubr.bf16.gmra.mrb[36].mxu0 %v4656_v39  ;;  %v522_v39 = vsel %vm5853_vm2, %v517_v42, %v521_v55  ;;  %v532_v11 = vsel %vm5853_vm2, %v527_v1, %v531_v38  ;;  %v536_v29 = vrot.slane %v534_v18, 4  ;;  %v539_v55 = vrot.slane %v537_v52, 5  ;;  %v6440_v42 = vld [vmem:[%s5810_s10 + $0x64] sm:$0xf] }
  0x72   : > { %3490 = vmatmul.mubr.bf16.gmra.mrb[36].mxu1 %v4684_v40  ;;  %v4673_v58 = vcombine.low %v522_v39, %v532_v11  ;;  %v766_v40 = vrot.slane %v764_v44, 4  ;;  %v547_v38 = vshrl.u32 %v6416_v46, 16  ;;  %v545_v1 = vrot.slane %v543_v47, 5  ;;  %v660_v39 = vld [vmem:[%s5810_s10 + $0x54] sm:$0xe] }
  0x73   : > { %3497 = vmatprep.mubr.bf16.mxu1 %v4701_v41  ;;  %v553_v41 = vshll.u32 %v6419_v36, 16  ;;  %v1056_v44 = vshll.u32 %v4501_v53, 16  ;;  %v5680_v11 = vld [vmem:[%s7801_s1 + $0x1b0] sm:$0xff]   ;;  %v540_v52 = vor.u32 %v539_v55, %v536_v29  ;;  %v4702_v56 = vcombine.low %v4501_v53, %v6440_v42 }
  0x74   : > { %3368 = vmatprep.mubr.bf16.mxu0 %v4673_v58  ;;  %v768_v57 = vsel %vm6051_vm5, %v766_v40, %v767_v26  ;;  %v549_v10 = vrot.slane %v547_v38, 4  ;;  %v6452_v58 = vld [vmem:[%s5810_s10 + $0x70] sm:$0xf]  ;;  %v6454_v26 = vrot.slane %v1053_v19, 4  ;;  %5374 = vmatpush3.bf16.msra.mxu1 %v5680_v11  ;;  %v4658_v38 = vcombine.low %v6411_v4, %v6416_v46 }
  0x75   : > { %v4685_v18 = vcombine.low %v765_v2, %v768_v57  ;;  %v555_v60 = vrot.slane %v553_v41, 5  ;;  %v6456_v40 = vrot.slane %v1056_v44, 5  ;;  %v5683_v2 = vld [vmem:[%s7801_s1 + $0x1f8] sm:$0xff]   ;;  %v541_v29 = vrot.slane %v540_v52, 4  ;;  %v661_v57 = vld [vmem:[%s5810_s10 + $0x60] sm:$0xe] }
  0x76   : > { %v550_v55 = vor.u32 %v549_v10, %v545_v1  ;;  %v4478_v41 = vrot.slane %v660_v39, 9  ;;  %v771_v19 = vrot.slane %v6222_v14, 5  ;;  %v774_v53 = vrot.slane %v6226_v20, 5  ;;  %5375 = vmatprep.subr.bf16.mxu1 %v5683_v2 }
  0x77   : > { %v1077_v44 = vshrl.u32 %v6449_v13, 16  ;;  %v1080_v11 = vshll.u32 %v6449_v13, 16  ;;  %v546_v47 = vsel %vm5853_vm2, %v541_v29, %v545_v1  ;;  %v1090_v10 = vshrl.u32 %v6452_v58, 16 }
  0x78   : > { %v551_v52 = vrot.slane %v550_v55, 4  ;;  %v772_v14 = vsel %vm6051_vm5, %v4478_v41, %v771_v19  ;;  %v773_v20 = vrot.slane %v771_v19, 4  ;;  %v1334_v29 = vrot.slane %v6102_v62, 5 }
  0x79   : > { %3369 = vmatmul.mubr.bf16.gmra.mrb[40].mxu0 %v4657_v59  ;;  %v4703_v59 = vcombine.low %v6449_v13, %v6452_v58  ;;  %v6479_v4 = vrot.slane %v1077_v44, 4  ;;  %v6481_v39 = vrot.slane %v1080_v11, 5  ;;  %v5685_v13 = vld [vmem:[%s7801_s1 + $0x1b8] sm:$0xff]   ;;  %v1337_v41 = vrot.slane %v4519_v8, 5 }
  0x7a   : > { %3498 = vmatmul.mubr.bf16.gmra.mrb[40].mxu1 %v4685_v18  ;;  %v556_v1 = vsel %vm5853_vm2, %v551_v52, %v555_v60  ;;  %v4551_v18 = vrot.slane %v4535_v17, 9  ;;  %v775_v55 = vsel %vm6051_vm5, %v773_v20, %v774_v53  ;;  %v4479_v19 = vrot.slane %v661_v57, 9  ;;  %v6492_v44 = vld [vmem:[%s5810_s10 + $0x78] sm:$0xf]  ;;  %v6495_v11 = vld [vmem:[%s5810_s10 + $0x7c] sm:$0xf] }
  0x7b   : > { %3505 = vmatprep.mubr.bf16.mxu1 %v4702_v56  ;;  %v904_v56 = vshll.u32 %v4519_v8, 16  ;;  %v4674_v2 = vcombine.low %v546_v47, %v556_v1  ;;  %v4686_v60 = vcombine.low %v772_v14, %v775_v55  ;;  %v1336_v52 = vrot.slane %v1334_v29, 4  ;;  %5376 = vmatpush3.bf16.msra.mxu1 %v5685_v13  ;;  %v4536_v20 = vld [vmem:[%s5810_s10 + $0x18] sm:$0xe] }
  0x7c   : > { %v1335_v62 = vsel %vm6051_vm5, %v4551_v18, %v1334_v29  ;;  %v778_v47 = vrot.slane %v6262_v7, 5  ;;  %v781_v53 = vrot.slane %v6269_v21, 5  ;;  %v1101_v8 = vshrl.u32 %v6492_v44, 16  ;;  %v4520_v7 = vld [vmem:[%s5810_s10 + $0x20] sm:$0x1] }
  0x7d   : > { %v906_v17 = vrot.slane %v904_v56, 5  ;;  %3376 = vmatprep.mubr.bf16.mxu0 %v4674_v2  ;;  %v1104_v57 = vshll.u32 %v6492_v44, 16  ;;  %v1338_v14 = vsel %vm6051_vm5, %v1336_v52, %v1337_v41  ;;  %v1114_v56 = vshrl.u32 %v6495_v11, 16  ;;  %v662_v29 = vld [vmem:[%s5810_s10 + $0x6c] sm:$0xe] }
  0x7e   : > { %v4704_v18 = vcombine.low %v6492_v44, %v6495_v11  ;;  %v4727_v21 = vcombine.low %v1335_v62, %v1338_v14  ;;  %v779_v13 = vsel %vm6051_vm5, %v4479_v19, %v778_v47  ;;  %v780_v2 = vrot.slane %v778_v47, 4  ;;  %v6536_v47 = vld [vmem:[%s5810_s10 + $0x88] sm:$0xf] }
  0x7f   : > { %v907_v1 = vsel %vm5853_vm2, %v6154_v51, %v906_v17  ;;  %v6521_v55 = vrot.slane %v1101_v8, 4  ;;  %v6523_v41 = vrot.slane %v1104_v57, 5  ;;  %v1341_v44 = vrot.slane %v6158_v61, 5 }
  0x80   : > { %v4711_v51 = vcombine.low %v897_v28, %v907_v1  ;;  %v782_v19 = vsel %vm6051_vm5, %v780_v2, %v781_v53  ;;  %v4480_v17 = vrot.slane %v662_v29, 9  ;;  %v785_v62 = vrot.slane %v6304_v22, 5  ;;  %v5674_v2 = vld [vmem:[%s7801_s1 + $0x208] sm:$0xff]  }
  0x81   : > { %3377 = vmatmul.mubr.bf16.gmra.mrb[44].mxu0 %v4658_v38  ;;  %v4552_v38 = vrot.slane %v4536_v20, 9  ;;  %v4687_v45 = vcombine.low %v779_v13, %v782_v19  ;;  %v788_v52 = vrot.slane %v6318_v32, 5  ;;  %v7808_v22 = vor.u32 %v6171_v16, %v6169_v15  ;;  %v4521_v13 = vld [vmem:[%s5810_s10 + $0x2c] sm:$0x1]  ;;  %v4537_v19 = vld [vmem:[%s5810_s10 + $0x24] sm:$0xe] }
  0x82   : > { %3506 = vmatmul.mubr.bf16.gmra.mrb[44].mxu1 %v4686_v60  ;;  %3610 = vmatprep.mubr.bf16.mxu0 %v4727_v21  ;;  %v1344_v60 = vrot.slane %v4520_v7, 5  ;;  %v6540_v53 = vsel %vm6051_vm5, %v4480_v17, %v785_v62  ;;  %v787_v8 = vrot.slane %v785_v62, 4  ;;  %v918_v20 = vshll.u32 %v6158_v61, 16 }
  0x83   : > { %3513 = vmatprep.mubr.bf16.mxu1 %v4703_v59  ;;  %v1342_v28 = vsel %vm6051_vm5, %v4552_v38, %v1341_v44  ;;  %v1343_v59 = vrot.slane %v1341_v44, 4  ;;  %v916_v57 = vrot.slane %v7808_v22, 4  ;;  %v7809_v32 = vshrl.u32 %v6158_v61, 16 }
  0x84   : > { %v928_v29 = vshll.u32 %v4520_v7, 16  ;;  %v1125_v21 = vshrl.u32 %v6530_v25, 16  ;;  %v789_v15 = vsel %vm6051_vm5, %v787_v8, %v788_v52  ;;  %v920_v16 = vrot.slane %v918_v20, 5 }
  0x85   : > { %v1345_v14 = vsel %vm6051_vm5, %v1343_v59, %v1344_v60  ;;  %v924_v1 = vrot.slane %v7809_v32, 4  ;;  %v1128_v44 = vshll.u32 %v6530_v25, 16  ;;  %v663_v60 = vld [vmem:[%s5810_s10 + $0x78] sm:$0xe]  ;;  %v4688_v61 = vcombine.low %v6540_v53, %v789_v15 }
  0x86   : > { %v4728_v38 = vcombine.low %v1342_v28, %v1345_v14  ;;  %v930_v17 = vrot.slane %v928_v29, 5  ;;  %v6561_v7 = vrot.slane %v1125_v21, 4  ;;  %v1138_v62 = vshrl.u32 %v6536_v47, 16  ;;  %v6585_v21 = vld [vmem:[%s5810_s10 + $0x90] sm:$0xf] }
  0x87   : > { %v921_v28 = vsel %vm5853_vm2, %v916_v57, %v920_v16  ;;  %v925_v59 = vor.u32 %v924_v1, %v920_v16  ;;  %v6566_v22 = vrot.slane %v1128_v44, 5  ;;  %v4705_v52 = vcombine.low %v6530_v25, %v6536_v47  ;;  %v4522_v16 = vld [vmem:[%s5810_s10 + $0x38] sm:$0x1]  ;;  %v4538_v44 = vld [vmem:[%s5810_s10 + $0x30] sm:$0xe] }
  0x88   : > { %v4553_v53 = vrot.slane %v4537_v19, 9  ;;  %v1348_v8 = vrot.slane %v6188_v34, 5  ;;  %v1351_v20 = vrot.slane %v4521_v13, 5  ;;  %v792_v57 = vrot.slane %v6355_v63, 5 }
  0x89   : > { %3611 = vmatmul.mubr.bf16.vlgmr.msra.gmra.mrb[48].mxu0 %v4711_v51  ;;  %v926_v51 = vrot.slane %v925_v59, 4  ;;  %v795_v14 = vrot.slane %v6369_v49, 5  ;;  %v939_v25 = vor.u32 %v6218_v6, %v6211_v3  ;;  %v942_v1 = vshll.u32 %v6188_v34, 16  ;;  %v6588_v49 = vld [vmem:[%s5810_s10 + $0x94] sm:$0xf] }
  0x8a   : > { %3514 = vmatmul.mubr.bf16.gmra.mrb[48].mxu1 %v4687_v45  ;;  %5498 = vmatpush3.bf16.msra.mxu0 %v6364_v12  ;;  %v4481_v45 = vrot.slane %v663_v60, 9  ;;  %v5679_v12 = vld [vmem:[%s7801_s1 + $0x210] sm:$0xff]   ;;  %v1350_v32 = vrot.slane %v1348_v8, 4  ;;  %v7810_v29 = vshrl.u32 %v6188_v34, 16  ;;  %v952_v59 = vshll.u32 %v4521_v13, 16  ;;  %v5684_v13 = vld [vmem:[%s7801_s1 + $0x218] sm:$0xff]  }
  0x8b   : > { %3521 = vmatprep.mubr.bf16.mxu1 %v4704_v18  ;;  %3618 = vmatprep.mubr.bf16.mxu0 %v4728_v38  ;;  %v1349_v18 = vsel %vm6051_vm5, %v4553_v53, %v1348_v8  ;;  %v931_v3 = vsel %vm5853_vm2, %v926_v51, %v930_v17  ;;  %v794_v38 = vrot.slane %v792_v57, 4  ;;  %v940_v15 = vrot.slane %v939_v25, 4 }
  0x8c   : > { %5499 = vmatprep.subr.bf16.mxu0 %v5674_v2  ;;  %v948_v63 = vrot.slane %v7810_v29, 4  ;;  %v6594_v6 = vsel %vm6051_vm5, %v4481_v45, %v792_v57  ;;  %v4712_v19 = vcombine.low %v921_v28, %v931_v3  ;;  %v1352_v34 = vsel %vm6051_vm5, %v1350_v32, %v1351_v20  ;;  %v664_v20 = vld [vmem:[%s5810_s10 + $0x84] sm:$0xe] }
  0x8d   : > { %v944_v60 = vrot.slane %v942_v1, 5  ;;  %v4729_v53 = vcombine.low %v1349_v18, %v1352_v34  ;;  %v796_v17 = vsel %vm6051_vm5, %v794_v38, %v795_v14  ;;  %v1149_v8 = vshrl.u32 %v6585_v21, 16  ;;  %v6629_v34 = vld [vmem:[%s5810_s10 + $0x9c] sm:$0xf] }
  0x8e   : > { %5500 = vmatpush3.bf16.msra.mxu0 %v5674_v2  ;;  %v1152_v45 = vshll.u32 %v6585_v21, 16  ;;  %v4689_v51 = vcombine.low %v6594_v6, %v796_v17  ;;  %v954_v25 = vrot.slane %v952_v59, 5  ;;  %v1162_v18 = vshrl.u32 %v6588_v49, 16  ;;  %v6642_v59 = vld [vmem:[%s5810_s10 + $0x44] sm:$0x1] }
  0x8f   : > { %5501 = vmatprep.subr.bf16.mxu0 %v5679_v12  ;;  %v945_v28 = vsel %vm5853_vm2, %v940_v15, %v944_v60  ;;  %v949_v57 = vor.u32 %v948_v63, %v944_v60  ;;  %v6611_v2 = vrot.slane %v1149_v8, 4  ;;  %v4706_v32 = vcombine.low %v6585_v21, %v6588_v49  ;;  %v6639_v60 = vld [vmem:[%s5810_s10 + $0xa0] sm:$0xf] }
  0x90   : > { %v6613_v14 = vrot.slane %v1152_v45, 5  ;;  %v4554_v29 = vrot.slane %v4538_v44, 9  ;;  %v1355_v63 = vrot.slane %v6237_v31, 5  ;;  %v1358_v3 = vrot.slane %v4522_v16, 5 }
  0x91   : > { %3619 = vmatmul.mubr.bf16.gmra.mrb[52].mxu0 %v4712_v19  ;;  %v950_v1 = vrot.slane %v949_v57, 4  ;;  %v4482_v6 = vrot.slane %v664_v20, 9  ;;  %v802_v38 = vrot.slane %v6419_v36, 5  ;;  %v963_v15 = vor.u32 %v6264_v9, %v6257_v0 }
  0x92   : > { %3522 = vmatmul.mubr.bf16.gmra.mrb[52].mxu1 %v4688_v61  ;;  %3626 = vmatprep.mubr.bf16.mxu0 %v4729_v53  ;;  %v799_v61 = vrot.slane %v6416_v46, 5  ;;  %v1356_v21 = vsel %vm6051_vm5, %v4554_v29, %v1355_v63  ;;  %v1357_v44 = vrot.slane %v1355_v63, 4  ;;  %v966_v19 = vshll.u32 %v6237_v31, 16  ;;  %v5688_v46 = vld [vmem:[%s7801_s1 + $0x220] sm:$0xff]   ;;  %v665_v63 = vld [vmem:[%s5810_s10 + $0x90] sm:$0xe] }
  0x93   : > { %3529 = vmatprep.mubr.bf16.mxu1 %v4705_v52  ;;  %5502 = vmatpush3.bf16.msra.mxu0 %v5679_v12  ;;  %v955_v52 = vsel %vm5853_vm2, %v950_v1, %v954_v25  ;;  %v964_v12 = vrot.slane %v963_v15, 4  ;;  %v7811_v8 = vshrl.u32 %v6237_v31, 16  ;;  %v976_v57 = vshll.u32 %v4522_v16, 16  ;;  %v4539_v25 = vld [vmem:[%s5810_s10 + $0x3c] sm:$0xe]  ;;  %v5691_v16 = vld [vmem:[%s7801_s1 + $0x228] sm:$0xff]  }
  0x94   : > { %5503 = vmatprep.subr.bf16.mxu0 %v5684_v13  ;;  %v4713_v0 = vcombine.low %v945_v28, %v955_v52  ;;  %v6636_v9 = vsel %vm6051_vm5, %v4482_v6, %v799_v61  ;;  %v801_v36 = vrot.slane %v799_v61, 4  ;;  %v1359_v53 = vsel %vm6051_vm5, %v1357_v44, %v1358_v3 }
  0x95   : > { %v968_v17 = vrot.slane %v966_v19, 5  ;;  %v972_v45 = vrot.slane %v7811_v8, 4  ;;  %v4730_v28 = vcombine.low %v1356_v21, %v1359_v53  ;;  %v1173_v1 = vshrl.u32 %v6629_v34, 16 }
  0x96   : > { %v803_v20 = vsel %vm6051_vm5, %v801_v36, %v802_v38  ;;  %v1176_v29 = vshll.u32 %v6629_v34, 16  ;;  %v978_v31 = vrot.slane %v976_v57, 5  ;;  %v4707_v52 = vcombine.low %v6629_v34, %v6639_v60  ;;  %v5694_v57 = vld [vmem:[%s7801_s1 + $0x230] sm:$0xff]  }
  0x97   : > { %5504 = vmatpush3.bf16.msra.mxu0 %v5684_v13  ;;  %v4690_v6 = vcombine.low %v6636_v9, %v803_v20  ;;  %v969_v3 = vsel %vm5853_vm2, %v964_v12, %v968_v17  ;;  %v973_v61 = vor.u32 %v972_v45, %v968_v17  ;;  %v6660_v38 = vrot.slane %v1173_v1, 4  ;;  %v6690_v20 = vld [vmem:[%s5810_s10 + $0xac] sm:$0xf] }
  0x98   : > { %5505 = vmatprep.subr.bf16.mxu0 %v5688_v46  ;;  %v6662_v15 = vrot.slane %v1176_v29, 5  ;;  %v1186_v13 = vshrl.u32 %v6639_v60, 16  ;;  %v4555_v44 = vrot.slane %v4539_v25, 9  ;;  %v1362_v19 = vrot.slane %v6277_v24, 5 }
  0x99   : > { %3627 = vmatmul.mubr.bf16.gmra.mrb[56].mxu0 %v4713_v0  ;;  %v974_v21 = vrot.slane %v973_v61, 4  ;;  %v1365_v9 = vrot.slane %v6642_v59, 5  ;;  %v4483_v36 = vrot.slane %v665_v63, 9  ;;  %v987_v12 = vor.u32 %v6313_v50, %v6306_v23 }
  0x9a   : > { %3530 = vmatmul.mubr.bf16.gmra.mrb[56].mxu1 %v4689_v51  ;;  %3634 = vmatprep.mubr.bf16.mxu0 %v4730_v28  ;;  %v5707_v51 = vld [vmem:[%s5810_s10 + $0x94] sm:$0xf]  ;;  %v990_v53 = vshll.u32 %v6277_v24, 16  ;;  %v1363_v34 = vsel %vm6051_vm5, %v4555_v44, %v1362_v19  ;;  %v1364_v17 = vrot.slane %v1362_v19, 4  ;;  %v7812_v8 = vshrl.u32 %v6277_v24, 16 }
  0x9b   : > { %3537 = vmatprep.mubr.bf16.mxu1 %v4706_v32  ;;  %v806_v0 = vrot.slane %v5707_v51, 5  ;;  %5506 = vmatpush3.bf16.msra.mxu0 %v5688_v46  ;;  %v979_v32 = vsel %vm5853_vm2, %v974_v21, %v978_v31  ;;  %v988_v25 = vrot.slane %v987_v12, 4  ;;  %v6687_v28 = vld [vmem:[%s5810_s10 + $0xa8] sm:$0xf]  ;;  %v1000_v29 = vshll.u32 %v6642_v59, 16 }
  0x9c   : > { %v996_v45 = vrot.slane %v7812_v8, 4  ;;  %5507 = vmatprep.subr.bf16.mxu0 %v5691_v16  ;;  %v4714_v23 = vcombine.low %v969_v3, %v979_v32  ;;  %v1366_v24 = vsel %vm6051_vm5, %v1364_v17, %v1365_v9  ;;  %v992_v1 = vrot.slane %v990_v53, 5  ;;  %v4540_v3 = vld [vmem:[%s5810_s10 + $0x48] sm:$0xe]  ;;  %v666_v51 = vld [vmem:[%s5810_s10 + $0x9c] sm:$0xe] }
  0x9d   : > { %v6684_v50 = vsel %vm6051_vm5, %v4483_v36, %v806_v0  ;;  %v808_v46 = vrot.slane %v806_v0, 4  ;;  %v1197_v63 = vshrl.u32 %v6687_v28, 16  ;;  %v4731_v61 = vcombine.low %v1363_v34, %v1366_v24  ;;  %v4524_v36 = vld [vmem:[%s5810_s10 + $0x50] sm:$0x1] }
  0x9e   : > { %v7813_v31 = vrot.slane %v5847_v30, 5  ;;  %v1200_v44 = vshll.u32 %v6687_v28, 16  ;;  %v1210_v19 = vshrl.u32 %v6690_v20, 16  ;;  %v993_v59 = vsel %vm5853_vm2, %v988_v25, %v992_v1  ;;  %v5697_v30 = vld [vmem:[%s7801_s1 + $0x238] sm:$0xff]  }
  0x9f   : > { %5508 = vmatpush3.bf16.msra.mxu0 %v5691_v16  ;;  %v997_v0 = vor.u32 %v996_v45, %v992_v1  ;;  %v1002_v12 = vrot.slane %v1000_v29, 5  ;;  %v6711_v53 = vrot.slane %v1197_v63, 4  ;;  %v4708_v16 = vcombine.low %v6687_v28, %v6690_v20 }
  0xa0   : > { %v810_v21 = vsel %vm6051_vm5, %v808_v46, %v7813_v31  ;;  %5509 = vmatprep.subr.bf16.mxu0 %v5694_v57  ;;  %v6713_v32 = vrot.slane %v1200_v44, 5  ;;  %v4556_v34 = vrot.slane %v4540_v3, 9  ;;  %v1369_v8 = vrot.slane %v6327_v37, 5  ;;  %v5708_v46 = vld [vmem:[%s5810_s10 + $0xa0] sm:$0xf] }
  0xa1   : > { %v4691_v9 = vcombine.low %v6684_v50, %v810_v21  ;;  %3635 = vmatmul.mubr.bf16.gmra.mrb[60].mxu0 %v4714_v23  ;;  %v998_v17 = vrot.slane %v997_v0, 4  ;;  %v1372_v45 = vrot.slane %v4524_v36, 5  ;;  %v4484_v50 = vrot.slane %v666_v51, 9  ;;  %v6734_v31 = vld [vmem:[%s5810_s10 + $0xb4] sm:$0xf] }
  0xa2   : > { %3538 = vmatmul.mubr.bf16.gmra.mrb[60].mxu1 %v4690_v6  ;;  %3642 = vmatprep.mubr.bf16.mxu0 %v4731_v61  ;;  %v813_v25 = vrot.slane %v5708_v46, 5  ;;  %v5709_v6 = vld [vmem:[%s5810_s10 + $0xa4] sm:$0x1]  ;;  %v1011_v24 = vor.u32 %v6357_v54, %v6351_v33  ;;  %v1014_v1 = vshll.u32 %v6327_v37, 16  ;;  %v1370_v28 = vsel %vm6051_vm5, %v4556_v34, %v1369_v8  ;;  %v6737_v21 = vld [vmem:[%s5810_s10 + $0xb8] sm:$0xf] }
  0xa3   : > { %3545 = vmatprep.mubr.bf16.mxu1 %v4707_v52  ;;  %v816_v23 = vrot.slane %v5709_v6, 5  ;;  %5510 = vmatpush3.bf16.msra.mxu0 %v5694_v57  ;;  %v1003_v52 = vsel %vm5853_vm2, %v998_v17, %v1002_v12  ;;  %v1371_v29 = vrot.slane %v1369_v8, 4  ;;  %v7814_v63 = vshrl.u32 %v6327_v37, 16  ;;  %v4541_v12 = vld [vmem:[%s5810_s10 + $0x54] sm:$0xe] }
  0xa4   : > { %5511 = vmatprep.subr.bf16.mxu0 %v5697_v30  ;;  %v4715_v61 = vcombine.low %v993_v59, %v1003_v52  ;;  %v6731_v33 = vsel %vm6051_vm5, %v4484_v50, %v813_v25  ;;  %v815_v54 = vrot.slane %v813_v25, 4  ;;  %v1012_v57 = vrot.slane %v1011_v24, 4  ;;  %v4525_v50 = vld [vmem:[%s5810_s10 + $0x5c] sm:$0x1]  ;;  %v667_v46 = vld [vmem:[%s5810_s10 + $0xa8] sm:$0xe] }
  0xa5   : > { %v1020_v3 = vrot.slane %v7814_v63, 4  ;;  %v1373_v44 = vsel %vm6051_vm5, %v1371_v29, %v1372_v45  ;;  %v1016_v51 = vrot.slane %v1014_v1, 5  ;;  %v1024_v37 = vshll.u32 %v4524_v36, 16 }
  0xa6   : > { %v1221_v0 = vshrl.u32 %v6734_v31, 16  ;;  %v4732_v59 = vcombine.low %v1370_v28, %v1373_v44  ;;  %v817_v34 = vsel %vm6051_vm5, %v815_v54, %v816_v23  ;;  %v1224_v17 = vshll.u32 %v6734_v31, 16 }
  0xa7   : > { %v1234_v8 = vshrl.u32 %v6737_v21, 16  ;;  %5512 = vmatpush3.bf16.msra.mxu0 %v5697_v30  ;;  %v4692_v25 = vcombine.low %v6731_v33, %v817_v34  ;;  %v1017_v36 = vsel %vm5853_vm2, %v1012_v57, %v1016_v51  ;;  %v1021_v45 = vor.u32 %v1020_v3, %v1016_v51  ;;  %v5710_v3 = vld [vmem:[%s5810_s10 + $0xac] sm:$0xf]  ;;  %v6778_v34 = vld [vmem:[%s5810_s10 + $0xc4] sm:$0xf] }
  0xa8   : > { %v1026_v6 = vrot.slane %v1024_v37, 5  ;;  %v6752_v24 = vrot.slane %v1221_v0, 4  ;;  %v6754_v23 = vrot.slane %v1224_v17, 5  ;;  %v4709_v1 = vcombine.low %v6734_v31, %v6737_v21 }
  0xa9   : > { %3643 = vmatmul.mubr.bf16.gmra.mrb[64].mxu0 %v4715_v61  ;;  %v4557_v52 = vrot.slane %v4541_v12, 9  ;;  %v1022_v30 = vrot.slane %v1021_v45, 4  ;;  %v1376_v28 = vrot.slane %v6379_v48, 5  ;;  %v1379_v29 = vrot.slane %v4525_v50, 5  ;;  %v5711_v61 = vld [vmem:[%s5810_s10 + $0xb0] sm:$0x1] }
  0xaa   : > { %3546 = vmatmul.mubr.bf16.gmra.mrb[64].mxu1 %v4691_v9  ;;  %3650 = vmatprep.mubr.bf16.mxu0 %v4732_v59  ;;  %v4485_v63 = vrot.slane %v667_v46, 9  ;;  %v820_v9 = vrot.slane %v5710_v3, 5  ;;  %v823_v33 = vrot.slane %v5711_v61, 5  ;;  %v1035_v54 = vor.u32 %v6402_v5, %v6400_v43  ;;  %v6775_v59 = vld [vmem:[%s5810_s10 + $0xc0] sm:$0xf] }
  0xab   : > { %3553 = vmatprep.mubr.bf16.mxu1 %v4708_v16  ;;  %v1038_v57 = vshll.u32 %v6379_v48, 16  ;;  %v1027_v16 = vsel %vm5853_vm2, %v1022_v30, %v1026_v6  ;;  %v1377_v31 = vsel %vm6051_vm5, %v4557_v52, %v1376_v28  ;;  %v1378_v44 = vrot.slane %v1376_v28, 4  ;;  %v4542_v6 = vld [vmem:[%s5810_s10 + $0x60] sm:$0xe]  ;;  %v668_v3 = vld [vmem:[%s5810_s10 + $0xb4] sm:$0xe] }
  0xac   : > { %v7815_v51 = vshrl.u32 %v6379_v48, 16  ;;  %v4716_v0 = vcombine.low %v1017_v36, %v1027_v16  ;;  %v6772_v12 = vsel %vm6051_vm5, %v4485_v63, %v820_v9  ;;  %v822_v43 = vrot.slane %v820_v9, 4  ;;  %v4526_v63 = vld [vmem:[%s5810_s10 + $0x68] sm:$0x1] }
  0xad   : > { %v1036_v5 = vrot.slane %v1035_v54, 4  ;;  %v1380_v17 = vsel %vm6051_vm5, %v1378_v44, %v1379_v29  ;;  %v1040_v46 = vrot.slane %v1038_v57, 5  ;;  %v1048_v45 = vshll.u32 %v4525_v50, 16 }
  0xae   : > { %v1044_v37 = vrot.slane %v7815_v51, 4  ;;  %v1245_v48 = vshrl.u32 %v6775_v59, 16  ;;  %v4733_v36 = vcombine.low %v1377_v31, %v1380_v17  ;;  %v824_v52 = vsel %vm6051_vm5, %v822_v43, %v823_v33  ;;  %v4543_v31 = vld [vmem:[%s5810_s10 + $0x6c] sm:$0xe]  ;;  %v5712_v43 = vld [vmem:[%s5810_s10 + $0xb8] sm:$0xf] }
  0xaf   : > { %v1248_v30 = vshll.u32 %v6775_v59, 16  ;;  %v1258_v28 = vshrl.u32 %v6778_v34, 16  ;;  %v4693_v9 = vcombine.low %v6772_v12, %v824_v52  ;;  %v1041_v29 = vsel %vm5853_vm2, %v1036_v5, %v1040_v46 }
  0xb0   : > { %v1045_v50 = vor.u32 %v1044_v37, %v1040_v46  ;;  %v1050_v61 = vrot.slane %v1048_v45, 5  ;;  %v6793_v54 = vrot.slane %v1245_v48, 4  ;;  %v4710_v57 = vcombine.low %v6775_v59, %v6778_v34 }
  0xb1   : > { %3651 = vmatmul.mubr.bf16.gmra.mrb[68].mxu0 %v4716_v0  ;;  %v6795_v33 = vrot.slane %v1248_v30, 5  ;;  %v4558_v16 = vrot.slane %v4542_v6, 9  ;;  %v1383_v51 = vrot.slane %v6440_v42, 5  ;;  %v1386_v37 = vrot.slane %v4526_v63, 5  ;;  %v5713_v0 = vld [vmem:[%s5810_s10 + $0xbc] sm:$0x1] }
  0xb2   : > { %3554 = vmatmul.mubr.bf16.gmra.mrb[68].mxu1 %v4692_v25  ;;  %3658 = vmatprep.mubr.bf16.mxu0 %v4733_v36  ;;  %v1046_v44 = vrot.slane %v1045_v50, 4  ;;  %v4486_v12 = vrot.slane %v668_v3, 9  ;;  %v827_v25 = vrot.slane %v5712_v43, 5  ;;  %v830_v5 = vrot.slane %v5713_v0, 5  ;;  %v4527_v36 = vld [vmem:[%s5810_s10 + $0x74] sm:$0x1] }
  0xb3   : > { %3561 = vmatprep.mubr.bf16.mxu1 %v4709_v1  ;;  %v1059_v17 = vor.u32 %v6456_v40, %v6454_v26  ;;  %v1062_v59 = vshll.u32 %v6440_v42, 16  ;;  %v1384_v46 = vsel %vm6051_vm5, %v4558_v16, %v1383_v51  ;;  %v1385_v45 = vrot.slane %v1383_v51, 4  ;;  %v6818_v16 = vld [vmem:[%s5810_s10 + $0x18] sm:$0xf]  ;;  %v6824_v0 = vld [vmem:[%s5810_s10 + $0x1c] sm:$0xf] }
  0xb4   : > { %v1051_v1 = vsel %vm5853_vm2, %v1046_v44, %v1050_v61  ;;  %v7816_v48 = vshrl.u32 %v6440_v42, 16  ;;  %v828_v30 = vsel %vm6051_vm5, %v4486_v12, %v827_v25  ;;  %v829_v26 = vrot.slane %v827_v25, 4  ;;  %v6827_v12 = vld [vmem:[%s5810_s10 + $0x20] sm:$0x1] }
  0xb5   : > { %v4717_v52 = vcombine.low %v1041_v29, %v1051_v1  ;;  %v1060_v40 = vrot.slane %v1059_v17, 4  ;;  %v1387_v3 = vsel %vm6051_vm5, %v1385_v45, %v1386_v37  ;;  %v1064_v50 = vrot.slane %v1062_v59, 5 }
  0xb6   : > { %v1068_v6 = vrot.slane %v7816_v48, 4  ;;  %v1072_v61 = vshll.u32 %v4526_v63, 16  ;;  %v4559_v44 = vrot.slane %v4543_v31, 9  ;;  %v4734_v51 = vcombine.low %v1384_v46, %v1387_v3 }
  0xb7   : > { %v831_v42 = vsel %vm6051_vm5, %v829_v26, %v830_v5  ;;  %v1390_v43 = vrot.slane %v6452_v58, 5  ;;  %v1393_v29 = vrot.slane %v4527_v36, 5  ;;  %v1065_v37 = vsel %vm5853_vm2, %v1060_v40, %v1064_v50 }
  0xb8   : > { %v4694_v25 = vcombine.low %v828_v30, %v831_v42  ;;  %v1069_v17 = vor.u32 %v1068_v6, %v1064_v50  ;;  %v1074_v63 = vrot.slane %v1072_v61, 5  ;;  %v1497_v5 = vshrl.u32 %v6818_v16, 16  ;;  %v4544_v61 = vld [vmem:[%s5810_s10 + $0x78] sm:$0xe] }
  0xb9   : > { %3659 = vmatmul.mubr.bf16.gmra.mrb[72].mxu0 %v4717_v52  ;;  %v1391_v31 = vsel %vm6051_vm5, %v4559_v44, %v1390_v43  ;;  %v1392_v59 = vrot.slane %v1390_v43, 4  ;;  %v1500_v1 = vshll.u32 %v6818_v16, 16  ;;  %v1506_v45 = vshll.u32 %v6824_v0, 16 }
  0xba   : > { %3562 = vmatmul.mubr.bf16.gmra.mrb[72].mxu1 %v4693_v9  ;;  %3666 = vmatprep.mubr.bf16.mxu0 %v4734_v51  ;;  %v1070_v46 = vrot.slane %v1069_v17, 4  ;;  %v1510_v48 = vshrl.u32 %v6824_v0, 16  ;;  %v1516_v9 = vshll.u32 %v6827_v12, 16  ;;  %v1499_v52 = vrot.slane %v1497_v5, 4  ;;  %v6846_v17 = vld [vmem:[%s5810_s10 + $0x80] sm:$0x1] }
  0xbb   : > { %3569 = vmatprep.mubr.bf16.mxu1 %v4710_v57  ;;  %v1394_v6 = vsel %vm6051_vm5, %v1392_v59, %v1393_v29  ;;  %v1502_v30 = vrot.slane %v1500_v1, 5  ;;  %v1083_v26 = vor.u32 %v6481_v39, %v6479_v4  ;;  %v1508_v3 = vrot.slane %v1506_v45, 5  ;;  %v6852_v5 = vld [vmem:[%s5810_s10 + $0x24] sm:$0xf] }
  0xbc   : > { %v1075_v57 = vsel %vm5853_vm2, %v1070_v46, %v1074_v63  ;;  %v4735_v40 = vcombine.low %v1391_v31, %v1394_v6  ;;  %v1512_v50 = vrot.slane %v1510_v48, 4  ;;  %v1518_v42 = vrot.slane %v1516_v9, 5  ;;  %v6859_v6 = vld [vmem:[%s5810_s10 + $0x28] sm:$0xf] }
  0xbd   : > { %v4718_v44 = vcombine.low %v1065_v37, %v1075_v57  ;;  %v1503_v51 = vor.u32 %v1502_v30, %v1499_v52  ;;  %v1084_v43 = vrot.slane %v1083_v26, 4  ;;  %v1086_v59 = vshll.u32 %v6452_v58, 16  ;;  %v6871_v57 = vld [vmem:[%s5810_s10 + $0x2c] sm:$0x1] }
  0xbe   : > { %v1513_v29 = vor.u32 %v1512_v50, %v1508_v3  ;;  %v1092_v4 = vrot.slane %v1090_v10, 4  ;;  %v1096_v39 = vshll.u32 %v4527_v36, 16  ;;  %v4743_v31 = vcombine.low %v6818_v16, %v6824_v0 }
  0xbf   : > { %v1504_v63 = vrot.slane %v1503_v51, 4  ;;  %v4560_v37 = vrot.slane %v4544_v61, 9  ;;  %v1397_v1 = vrot.slane %v6495_v11, 5  ;;  %v1088_v45 = vrot.slane %v1086_v59, 5 }
  0xc0   : > { %v1514_v46 = vrot.slane %v1513_v29, 4  ;;  %v1098_v48 = vrot.slane %v1096_v39, 5  ;;  %v1400_v9 = vrot.slane %v6846_v17, 5  ;;  %v1521_v16 = vshrl.u32 %v6852_v5, 16 }
  0xc1   : > { %3667 = vmatmul.mubr.bf16.gmra.mrb[76].mxu0 %v4718_v44  ;;  %v1509_v58 = vsel %vm5853_vm2, %v1504_v63, %v1508_v3  ;;  %v1398_v10 = vsel %vm6051_vm5, %v4560_v37, %v1397_v1  ;;  %v1399_v36 = vrot.slane %v1397_v1, 4  ;;  %v1089_v30 = vsel %vm5853_vm2, %v1084_v43, %v1088_v45 }
  0xc2   : > { %3570 = vmatmul.mubr.bf16.gmra.mrb[76].mxu1 %v4694_v25  ;;  %3674 = vmatprep.mubr.bf16.mxu0 %v4735_v40  ;;  %v1519_v52 = vsel %vm5853_vm2, %v1514_v46, %v1518_v42  ;;  %v1093_v26 = vor.u32 %v1092_v4, %v1088_v45  ;;  %v1524_v25 = vshll.u32 %v6852_v5, 16  ;;  %v1523_v61 = vrot.slane %v1521_v16, 4  ;;  %v4529_v45 = vld [vmem:[%s5810_s10 + $0x8c] sm:$0x1] }
  0xc3   : > { %v4759_v50 = vcombine.low %v1509_v58, %v1519_v52  ;;  %v1401_v3 = vsel %vm6051_vm5, %v1399_v36, %v1400_v9  ;;  %v1530_v40 = vshll.u32 %v6859_v6, 16  ;;  %v1534_v29 = vshrl.u32 %v6859_v6, 16  ;;  %v4545_v9 = vld [vmem:[%s5810_s10 + $0x84] sm:$0xe] }
  0xc4   : > { %v1094_v44 = vrot.slane %v1093_v26, 4  ;;  %v4736_v51 = vcombine.low %v1398_v10, %v1401_v3  ;;  %v1526_v42 = vrot.slane %v1524_v25, 5  ;;  %v1540_v59 = vshll.u32 %v6871_v57, 16 }
  0xc5   : > { %3771 = vmatprep.mubr.bf16.mxu1 %v4759_v50  ;;  %v1532_v43 = vrot.slane %v1530_v40, 5  ;;  %v1956_v4 = vrot.slane %v6871_v57, 5  ;;  %v1107_v39 = vor.u32 %v6523_v41, %v6521_v55  ;;  %v1536_v1 = vrot.slane %v1534_v29, 4  ;;  %v6891_v41 = vld [vmem:[%s5810_s10 + $0x30] sm:$0xf] }
  0xc6   : > { %v1099_v63 = vsel %vm5853_vm2, %v1094_v44, %v1098_v48  ;;  %v1527_v37 = vor.u32 %v1526_v42, %v1523_v61  ;;  %v1110_v46 = vshll.u32 %v6495_v11, 16  ;;  %v1542_v10 = vrot.slane %v1540_v59, 5  ;;  %v6897_v61 = vld [vmem:[%s5810_s10 + $0x34] sm:$0xf] }
  0xc7   : > { %v4719_v58 = vcombine.low %v1089_v30, %v1099_v63  ;;  %v1108_v36 = vrot.slane %v1107_v39, 4  ;;  %v1116_v16 = vrot.slane %v1114_v56, 4  ;;  %v1537_v26 = vor.u32 %v1536_v1, %v1532_v43 }
  0xc8   : > { %v1528_v52 = vrot.slane %v1527_v37, 4  ;;  %v1112_v25 = vrot.slane %v1110_v46, 5  ;;  %v1120_v55 = vshll.u32 %v6846_v17, 16  ;;  %v4744_v48 = vcombine.low %v6852_v5, %v6859_v6 }
  0xc9   : > { %3675 = vmatmul.mubr.bf16.gmra.mrb[80].mxu0 %v4719_v58  ;;  %v4561_v50 = vrot.slane %v4545_v9, 9  ;;  %v1404_v30 = vrot.slane %v6536_v47, 5  ;;  %v1407_v3 = vrot.slane %v4529_v45, 5  ;;  %v1538_v56 = vrot.slane %v1537_v26, 4 }
  0xca   : > { %3772 = vmatmul.mubr.bf16.vlgmr.msra.gmra.mrb[80].mxu1 %v4743_v31  ;;  %3682 = vmatprep.mubr.bf16.mxu0 %v4736_v51  ;;  %v1533_v11 = vsel %vm5853_vm2, %v1528_v52, %v1532_v43  ;;  %v1113_v17 = vsel %vm5853_vm2, %v1108_v36, %v1112_v25  ;;  %v1117_v40 = vor.u32 %v1116_v16, %v1112_v25  ;;  %v1122_v31 = vrot.slane %v1120_v55, 5  ;;  %v6909_v51 = vld [vmem:[%s5810_s10 + $0x38] sm:$0x1] }
  0xcb   : > { %v1405_v5 = vsel %vm6051_vm5, %v4561_v50, %v1404_v30  ;;  %v1406_v44 = vrot.slane %v1404_v30, 4  ;;  %v1545_v42 = vshrl.u32 %v6891_v41, 16  ;;  %v1543_v29 = vsel %vm5853_vm2, %v1538_v56, %v1542_v10  ;;  %v6922_v55 = vld [vmem:[%s5810_s10 + $0x98] sm:$0x1]  ;;  %v4546_v50 = vld [vmem:[%s5810_s10 + $0x90] sm:$0xe] }
  0xcc   : > { %v1118_v59 = vrot.slane %v1117_v40, 4  ;;  %v1548_v43 = vshll.u32 %v6891_v41, 16  ;;  %v1554_v39 = vshll.u32 %v6897_v61, 16  ;;  %v4760_v63 = vcombine.low %v1533_v11, %v1543_v29  ;;  %v6929_v40 = vld [vmem:[%s5810_s10 + $0x3c] sm:$0xf] }
  0xcd   : > { %v1408_v37 = vsel %vm6051_vm5, %v1406_v44, %v1407_v3  ;;  %v1547_v1 = vrot.slane %v1545_v42, 4  ;;  %v1558_v46 = vshrl.u32 %v6897_v61, 16  ;;  %v1564_v26 = vshll.u32 %v6909_v51, 16 }
  0xce   : > { %v1123_v9 = vsel %vm5853_vm2, %v1118_v59, %v1122_v31  ;;  %v4737_v58 = vcombine.low %v1405_v5, %v1408_v37  ;;  %v1550_v10 = vrot.slane %v1548_v43, 5  ;;  %v1556_v36 = vrot.slane %v1554_v39, 5  ;;  %3779 = vmatprep.mubr.bf16.mxu1 %v4760_v63  ;;  %v6936_v59 = vld [vmem:[%s5810_s10 + $0x40] sm:$0xf]  ;;  %v6944_v63 = vld [vmem:[%s5810_s10 + $0x44] sm:$0x1] }
  0xcf   : > { %v4720_v16 = vcombine.low %v1113_v17, %v1123_v9  ;;  %v1560_v52 = vrot.slane %v1558_v46, 4  ;;  %v1131_v25 = vor.u32 %v6566_v22, %v6561_v7  ;;  %v1134_v3 = vshll.u32 %v6536_v47, 16 }
  0xd0   : > { %v1551_v30 = vor.u32 %v1550_v10, %v1547_v1  ;;  %v1140_v11 = vrot.slane %v1138_v62, 4  ;;  %v1144_v56 = vshll.u32 %v4529_v45, 16  ;;  %v1566_v31 = vrot.slane %v1564_v26, 5 }
  0xd1   : > { %3683 = vmatmul.mubr.bf16.gmra.mrb[84].mxu0 %v4720_v16  ;;  %v1561_v17 = vor.u32 %v1560_v52, %v1556_v36  ;;  %v1132_v5 = vrot.slane %v1131_v25, 4  ;;  %v4745_v7 = vcombine.low %v6891_v41, %v6897_v61  ;;  %v1136_v44 = vrot.slane %v1134_v3, 5 }
  0xd2   : > { %3780 = vmatmul.mubr.bf16.gmra.mrb[84].mxu1 %v4744_v48  ;;  %3690 = vmatprep.mubr.bf16.mxu0 %v4737_v58  ;;  %v1552_v22 = vrot.slane %v1551_v30, 4  ;;  %v1146_v42 = vrot.slane %v1144_v56, 5  ;;  %v4562_v29 = vrot.slane %v4546_v50, 9  ;;  %v1411_v62 = vrot.slane %v6588_v49, 5 }
  0xd3   : > { %v1562_v47 = vrot.slane %v1561_v17, 4  ;;  %v1414_v45 = vrot.slane %v6922_v55, 5  ;;  %v1569_v48 = vshrl.u32 %v6929_v40, 16  ;;  %v1137_v41 = vsel %vm5853_vm2, %v1132_v5, %v1136_v44 }
  0xd4   : > { %v1557_v43 = vsel %vm5853_vm2, %v1552_v22, %v1556_v36  ;;  %v1141_v39 = vor.u32 %v1140_v11, %v1136_v44  ;;  %v1572_v37 = vshll.u32 %v6929_v40, 16  ;;  %v1412_v46 = vsel %vm6051_vm5, %v4562_v29, %v1411_v62 }
  0xd5   : > { %v1567_v1 = vsel %vm5853_vm2, %v1562_v47, %v1566_v31  ;;  %v1413_v9 = vrot.slane %v1411_v62, 4  ;;  %v1571_v58 = vrot.slane %v1569_v48, 4  ;;  %v1578_v52 = vshll.u32 %v6936_v59, 16  ;;  %v4547_v31 = vld [vmem:[%s5810_s10 + $0x9c] sm:$0xe] }
  0xd6   : > { %v4761_v10 = vcombine.low %v1557_v43, %v1567_v1  ;;  %v1142_v16 = vrot.slane %v1141_v39, 4  ;;  %v1574_v36 = vrot.slane %v1572_v37, 5  ;;  %v1582_v25 = vshrl.u32 %v6936_v59, 16  ;;  %v6962_v47 = vld [vmem:[%s5810_s10 + $0xa4] sm:$0x1] }
  0xd7   : > { %v1415_v26 = vsel %vm6051_vm5, %v1413_v9, %v1414_v45  ;;  %v1588_v50 = vshll.u32 %v6944_v63, 16  ;;  %v1155_v30 = vor.u32 %v6613_v14, %v6611_v2  ;;  %v1580_v17 = vrot.slane %v1578_v52, 5  ;;  %v6969_v45 = vld [vmem:[%s5810_s10 + $0x48] sm:$0xf]  ;;  %v6975_v39 = vld [vmem:[%s5810_s10 + $0x4c] sm:$0xf] }
  0xd8   : > { %3787 = vmatprep.mubr.bf16.mxu1 %v4761_v10  ;;  %v1147_v3 = vsel %vm5853_vm2, %v1142_v16, %v1146_v42  ;;  %v4738_v11 = vcombine.low %v1412_v46, %v1415_v26  ;;  %v1575_v56 = vor.u32 %v1574_v36, %v1571_v58  ;;  %v1584_v22 = vrot.slane %v1582_v25, 4  ;;  %v6986_v16 = vld [vmem:[%s5810_s10 + $0x50] sm:$0x1] }
  0xd9   : > { %v4721_v5 = vcombine.low %v1137_v41, %v1147_v3  ;;  %v1590_v44 = vrot.slane %v1588_v50, 5  ;;  %v1156_v29 = vrot.slane %v1155_v30, 4  ;;  %v1158_v2 = vshll.u32 %v6588_v49, 16 }
  0xda   : > { %3788 = vmatmul.mubr.bf16.gmra.mrb[88].mxu1 %v4745_v7  ;;  %v1576_v62 = vrot.slane %v1575_v56, 4  ;;  %v1164_v14 = vrot.slane %v1162_v18, 4  ;;  %v1168_v42 = vshll.u32 %v6922_v55, 16  ;;  %v1585_v48 = vor.u32 %v1584_v22, %v1580_v17 }
  0xdb   : > { %3691 = vmatmul.mubr.bf16.gmra.mrb[88].mxu0 %v4721_v5  ;;  %v4746_v7 = vcombine.low %v6929_v40, %v6936_v59  ;;  %v4563_v43 = vrot.slane %v4547_v31, 9  ;;  %v1418_v41 = vrot.slane %v6639_v60, 5  ;;  %v1160_v18 = vrot.slane %v1158_v2, 5 }
  0xdc   : > { %3698 = vmatprep.mubr.bf16.mxu0 %v4738_v11  ;;  %v1581_v49 = vsel %vm5853_vm2, %v1576_v62, %v1580_v17  ;;  %v1170_v37 = vrot.slane %v1168_v42, 5  ;;  %v1421_v55 = vrot.slane %v6962_v47, 5  ;;  %v1586_v1 = vrot.slane %v1585_v48, 4  ;;  %v4532_v42 = vld [vmem:[%s5810_s10 + $0xb0] sm:$0x1] }
  0xdd   : > { %v1419_v46 = vsel %vm6051_vm5, %v4563_v43, %v1418_v41  ;;  %v1420_v9 = vrot.slane %v1418_v41, 4  ;;  %v1593_v40 = vshrl.u32 %v6969_v45, 16  ;;  %v1161_v58 = vsel %vm5853_vm2, %v1156_v29, %v1160_v18  ;;  %v4548_v48 = vld [vmem:[%s5810_s10 + $0xa8] sm:$0xe] }
  0xde   : > { %v1165_v10 = vor.u32 %v1164_v14, %v1160_v18  ;;  %v1596_v36 = vshll.u32 %v6969_v45, 16  ;;  %v1602_v52 = vshll.u32 %v6975_v39, 16  ;;  %v1591_v26 = vsel %vm5853_vm2, %v1586_v1, %v1590_v44  ;;  %v7009_v1 = vld [vmem:[%s5810_s10 + $0x54] sm:$0xf] }
  0xdf   : > { %v1422_v25 = vsel %vm6051_vm5, %v1420_v9, %v1421_v55  ;;  %v1595_v50 = vrot.slane %v1593_v40, 4  ;;  %v1606_v30 = vshrl.u32 %v6975_v39, 16  ;;  %v4762_v3 = vcombine.low %v1581_v49, %v1591_v26 }
  0xe0   : > { %v1166_v11 = vrot.slane %v1165_v10, 4  ;;  %v4739_v56 = vcombine.low %v1419_v46, %v1422_v25  ;;  %v1598_v17 = vrot.slane %v1596_v36, 5  ;;  %v1604_v31 = vrot.slane %v1602_v52, 5 }
  0xe1   : > { %v1608_v5 = vrot.slane %v1606_v30, 4  ;;  %v1612_v22 = vshll.u32 %v6986_v16, 16  ;;  %v1179_v29 = vor.u32 %v6662_v15, %v6660_v38  ;;  %3795 = vmatprep.mubr.bf16.mxu1 %v4762_v3  ;;  %v1182_v2 = vshll.u32 %v6639_v60, 16 }
  0xe2   : > { %v1171_v44 = vsel %vm5853_vm2, %v1166_v11, %v1170_v37  ;;  %v1599_v62 = vor.u32 %v1598_v17, %v1595_v50  ;;  %v1188_v14 = vrot.slane %v1186_v13, 4  ;;  %3796 = vmatmul.mubr.bf16.gmra.mrb[92].mxu1 %v4746_v7  ;;  %v1192_v55 = vshll.u32 %v6962_v47, 16  ;;  %v7013_v7 = vld [vmem:[%s5810_s10 + $0x58] sm:$0xf] }
  0xe3   : > { %v4722_v43 = vcombine.low %v1161_v58, %v1171_v44  ;;  %v1609_v41 = vor.u32 %v1608_v5, %v1604_v31  ;;  %v1614_v49 = vrot.slane %v1612_v22, 5  ;;  %v1180_v18 = vrot.slane %v1179_v29, 4 }
  0xe4   : > { %v1600_v38 = vrot.slane %v1599_v62, 4  ;;  %v1184_v15 = vrot.slane %v1182_v2, 5  ;;  %v4747_v37 = vcombine.low %v6969_v45, %v6975_v39  ;;  %v4564_v13 = vrot.slane %v4548_v48, 9  ;;  %v7020_v45 = vld [vmem:[%s5810_s10 + $0x5c] sm:$0x1] }
  0xe5   : > { %3699 = vmatmul.mubr.bf16.gmra.mrb[92].mxu0 %v4722_v43  ;;  %v1610_v60 = vrot.slane %v1609_v41, 4  ;;  %v1425_v46 = vrot.slane %v6690_v20, 5  ;;  %v1428_v9 = vrot.slane %v4532_v42, 5  ;;  %v1194_v10 = vrot.slane %v1192_v55, 5  ;;  %v4549_v2 = vld [vmem:[%s5810_s10 + $0xb4] sm:$0xe] }
  0xe6   : > { %3706 = vmatprep.mubr.bf16.mxu0 %v4739_v56  ;;  %v1605_v40 = vsel %vm5853_vm2, %v1600_v38, %v1604_v31  ;;  %v1185_v47 = vsel %vm5853_vm2, %v1180_v18, %v1184_v15  ;;  %v1189_v58 = vor.u32 %v1188_v14, %v1184_v15  ;;  %v1617_v25 = vshrl.u32 %v7009_v1, 16 }
  0xe7   : > { %v1615_v36 = vsel %vm5853_vm2, %v1610_v60, %v1614_v49  ;;  %v1426_v52 = vsel %vm6051_vm5, %v4564_v13, %v1425_v46  ;;  %v1427_v26 = vrot.slane %v1425_v46, 4  ;;  %v1620_v3 = vshll.u32 %v7009_v1, 16  ;;  %v7039_v49 = vld [vmem:[%s5810_s10 + $0xbc] sm:$0x1]  ;;  %v7045_v60 = vld [vmem:[%s5810_s10 + $0x60] sm:$0xf] }
  0xe8   : > { %v4763_v50 = vcombine.low %v1605_v40, %v1615_v36  ;;  %v1190_v30 = vrot.slane %v1189_v58, 4  ;;  %v1626_v11 = vshll.u32 %v7013_v7, 16  ;;  %v1619_v17 = vrot.slane %v1617_v25, 4  ;;  %v7063_v25 = vld [vmem:[%s5810_s10 + $0x68] sm:$0x1] }
  0xe9   : > { %v1429_v56 = vsel %vm6051_vm5, %v1427_v26, %v1428_v9  ;;  %v1630_v31 = vshrl.u32 %v7013_v7, 16  ;;  %v1636_v5 = vshll.u32 %v7020_v45, 16  ;;  %v1622_v44 = vrot.slane %v1620_v3, 5 }
  0xea   : > { %3803 = vmatprep.mubr.bf16.mxu1 %v4763_v50  ;;  %v1195_v22 = vsel %vm5853_vm2, %v1190_v30, %v1194_v10  ;;  %v4740_v29 = vcombine.low %v1426_v52, %v1429_v56  ;;  %v1628_v62 = vrot.slane %v1626_v11, 5  ;;  %v1203_v41 = vor.u32 %v6713_v32, %v6711_v53 }
  0xeb   : > { %v4723_v14 = vcombine.low %v1185_v47, %v1195_v22  ;;  %3804 = vmatmul.mubr.bf16.gmra.mrb[96].mxu1 %v4747_v37  ;;  %v1632_v48 = vrot.slane %v1630_v31, 4  ;;  %v1638_v43 = vrot.slane %v1636_v5, 5  ;;  %v1623_v18 = vor.u32 %v1622_v44, %v1619_v17 }
  0xec   : > { %v1206_v38 = vshll.u32 %v6690_v20, 16  ;;  %v1212_v15 = vrot.slane %v1210_v19, 4  ;;  %v1216_v55 = vshll.u32 %v4532_v42, 16  ;;  %v1204_v37 = vrot.slane %v1203_v41, 4  ;;  %v7052_v42 = vld [vmem:[%s5810_s10 + $0x64] sm:$0xf] }
  0xed   : > { %3707 = vmatmul.mubr.bf16.gmra.mrb[96].mxu0 %v4723_v14  ;;  %v1633_v13 = vor.u32 %v1632_v48, %v1628_v62  ;;  %v4748_v46 = vcombine.low %v7009_v1, %v7013_v7  ;;  %v4565_v53 = vrot.slane %v4549_v2, 9  ;;  %v1624_v32 = vrot.slane %v1623_v18, 4 }
  0xee   : > { %3714 = vmatprep.mubr.bf16.mxu0 %v4740_v29  ;;  %v1208_v9 = vrot.slane %v1206_v38, 5  ;;  %v1218_v40 = vrot.slane %v1216_v55, 5  ;;  %v1432_v47 = vrot.slane %v6737_v21, 5  ;;  %v1435_v19 = vrot.slane %v7039_v49, 5  ;;  %v7077_v55 = vld [vmem:[%s5810_s10 + $0xc8] sm:$0x1] }
  0xef   : > { %v1634_v20 = vrot.slane %v1633_v13, 4  ;;  %v1641_v58 = vshrl.u32 %v7045_v60, 16  ;;  %v1644_v10 = vshll.u32 %v7045_v60, 16  ;;  %v1629_v1 = vsel %vm5853_vm2, %v1624_v32, %v1628_v62  ;;  %v4550_v13 = vld [vmem:[%s5810_s10 + $0xc0] sm:$0xe] }
  0xf0   : > { %v1209_v36 = vsel %vm5853_vm2, %v1204_v37, %v1208_v9  ;;  %v1213_v52 = vor.u32 %v1212_v15, %v1208_v9  ;;  %v1433_v26 = vsel %vm6051_vm5, %v4565_v53, %v1432_v47  ;;  %v1434_v30 = vrot.slane %v1432_v47, 4 }
  0xf1   : > { %v1639_v50 = vsel %vm5853_vm2, %v1634_v20, %v1638_v43  ;;  %v1643_v3 = vrot.slane %v1641_v58, 4  ;;  %v1646_v11 = vrot.slane %v1644_v10, 5  ;;  %v1650_v31 = vshll.u32 %v7052_v42, 16 }
  0xf2   : > { %v4764_v56 = vcombine.low %v1629_v1, %v1639_v50  ;;  %v1214_v17 = vrot.slane %v1213_v52, 4  ;;  %v1654_v5 = vshrl.u32 %v7052_v42, 16  ;;  %v1436_v22 = vsel %vm6051_vm5, %v1434_v30, %v1435_v19 }
  0xf3   : > { %v1647_v29 = vor.u32 %v1646_v11, %v1643_v3  ;;  %v1660_v44 = vshll.u32 %v7063_v25, 16  ;;  %v1227_v62 = vor.u32 %v6754_v23, %v6752_v24  ;;  %v4741_v43 = vcombine.low %v1433_v26, %v1436_v22  ;;  %v7093_v26 = vld [vmem:[%s5810_s10 + $0x6c] sm:$0xf]  ;;  %v7109_v22 = vld [vmem:[%s5810_s10 + $0x74] sm:$0x1] }
  0xf4   : > { %3811 = vmatprep.mubr.bf16.mxu1 %v4764_v56  ;;  %v1219_v48 = vsel %vm5853_vm2, %v1214_v17, %v1218_v40  ;;  %v1652_v41 = vrot.slane %v1650_v31, 5  ;;  %v1656_v18 = vrot.slane %v1654_v5, 4  ;;  %v1230_v20 = vshll.u32 %v6737_v21, 16  ;;  %v7102_v56 = vld [vmem:[%s5810_s10 + $0x70] sm:$0xf] }
  0xf5   : > { %v4724_v37 = vcombine.low %v1209_v36, %v1219_v48  ;;  %3812 = vmatmul.mubr.bf16.gmra.mrb[100].mxu1 %v4748_v46  ;;  %v1648_v53 = vrot.slane %v1647_v29, 4  ;;  %v1662_v32 = vrot.slane %v1660_v44, 5  ;;  %v1228_v24 = vrot.slane %v1227_v62, 4 }
  0xf6   : > { %v1657_v47 = vor.u32 %v1656_v18, %v1652_v41  ;;  %v1236_v40 = vrot.slane %v1234_v8, 4  ;;  %v1240_v19 = vshll.u32 %v7039_v49, 16  ;;  %v4749_v1 = vcombine.low %v7045_v60, %v7052_v42 }
  0xf7   : > { %3715 = vmatmul.mubr.bf16.gmra.mrb[100].mxu0 %v4724_v37  ;;  %v1653_v46 = vsel %vm5853_vm2, %v1648_v53, %v1652_v41  ;;  %v1232_v8 = vrot.slane %v1230_v20, 5  ;;  %v4566_v3 = vrot.slane %v4550_v13, 9  ;;  %v1439_v11 = vrot.slane %v6778_v34, 5 }
  0xf8   : > { %3722 = vmatprep.mubr.bf16.mxu0 %v4741_v43  ;;  %v1658_v21 = vrot.slane %v1657_v47, 4  ;;  %v1242_v49 = vrot.slane %v1240_v19, 5  ;;  %v1442_v60 = vrot.slane %v7077_v55, 5  ;;  %v1665_v29 = vshrl.u32 %v7093_v26, 16 }
  0xf9   : > { %v1233_v31 = vsel %vm5853_vm2, %v1228_v24, %v1232_v8  ;;  %v1237_v5 = vor.u32 %v1236_v40, %v1232_v8  ;;  %v1440_v62 = vsel %vm6051_vm5, %v4566_v3, %v1439_v11  ;;  %v1674_v18 = vshll.u32 %v7102_v56, 16 }
  0xfa   : > { %v5041_v2 = vpop.f32.mrb[0].mxu0  ;;  %v5113_v14 = vpop.f32.mrb[0].mxu1  ;;  %v1663_v17 = vsel %vm5853_vm2, %v1658_v21, %v1662_v32  ;;  %v1667_v41 = vrot.slane %v1665_v29, 4  ;;  %v1684_v53 = vshll.u32 %v7109_v22, 16  ;;  %v1251_v32 = vor.u32 %v6795_v33, %v6793_v54 }
  0xfb   : > { %v5042_v38 = vpop.f32.mrb[1].mxu0  ;;  %v5114_v15 = vpop.f32.mrb[1].mxu1  ;;  %v4765_v44 = vcombine.low %v1653_v46, %v1663_v17  ;;  %v1238_v43 = vrot.slane %v1237_v5, 4  ;;  %v1676_v47 = vrot.slane %v1674_v18, 5  ;;  %v1254_v54 = vshll.u32 %v6778_v34, 16 }
  0xfc   : > { %v5044_v23 = vpop.f32.mrb[2].mxu0  ;;  %v5116_v9 = vpop.f32.mrb[2].mxu1  ;;  %v7088_v36 = vadd.f32 %v5042_v38, %v5041_v2  ;;  %v7090_v52 = vadd.f32 %v5114_v15, %v5113_v14  ;;  %v1441_v2 = vrot.slane %v1439_v11, 4  ;;  %v1668_v14 = vshll.u32 %v7093_v26, 16  ;;  %v7129_v11 = vld [vmem:[%s5810_s10 + $0x78] sm:$0xf] }
  0xfd   : > { %v5045_v58 = vpop.f32.mrb[3].mxu0  ;;  %v5117_v10 = vpop.f32.mrb[3].mxu1  ;;  %v1678_v38 = vshrl.u32 %v7102_v56, 16  ;;  %3819 = vmatprep.mubr.bf16.mxu1 %v4765_v44  ;;  %v1686_v46 = vrot.slane %v1684_v53, 5  ;;  %v1252_v21 = vrot.slane %v1251_v32, 4  ;;  %v1260_v33 = vrot.slane %v1258_v28, 4 }
  0xfe   : > { %v7095_v50 = vadd.f32 %v5045_v58, %v5044_v23  ;;  %v7097_v30 = vadd.f32 %v5117_v10, %v5116_v9  ;;  %v1443_v13 = vsel %vm6051_vm5, %v1441_v2, %v1442_v60  ;;  %v1670_v37 = vrot.slane %v1668_v14, 5  ;;  %3820 = vmatmul.mubr.bf16.gmra.mrb[104].mxu1 %v4749_v1  ;;  %v7138_v44 = vld [vmem:[%s5810_s10 + $0x7c] sm:$0xf] }
  0xff   : > { %v1243_v23 = vsel %vm5853_vm2, %v1238_v43, %v1242_v49  ;;  %v4742_v9 = vcombine.low %v1440_v62, %v1443_v13  ;;  %v1680_v20 = vrot.slane %v1678_v38, 4  ;;  %v1264_v1 = vshll.u32 %v7077_v55, 16 }
 0x100   : > { %v4725_v58 = vcombine.low %v1233_v31, %v1243_v23  ;;  %v1671_v10 = vor.u32 %v1670_v37, %v1667_v41  ;;  %v4750_v17 = vcombine.low %v7093_v26, %v7102_v56  ;;  %v1256_v28 = vrot.slane %v1254_v54, 5  ;;  %v7147_v26 = vld [vmem:[%s5810_s10 + $0x80] sm:$0x1]  ;;  %v4615_v41 = vld [vmem:[%s5810_s10 + $0x18] sm:$0xe] }
 0x101   : > { %v1681_v3 = vor.u32 %v1680_v20, %v1676_v47  ;;  %v1266_v55 = vrot.slane %v1264_v1, 5  ;;  %v1692_v43 = vshll.u32 %v7129_v11, 16  ;;  %v1698_v13 = vshll.u32 %v7138_v44, 16  ;;  %v4616_v23 = vld [vmem:[%s5810_s10 + $0x24] sm:$0xe] }
 0x102   : > { %v5047_v48 = vpop.f32.mrb[4].mxu0  ;;  %v5119_v40 = vpop.f32.mrb[4].mxu1  ;;  %3723 = vmatmul.mubr.bf16.gmra.mrb[104].mxu0 %v4725_v58  ;;  %v1672_v60 = vrot.slane %v1671_v10, 4  ;;  %v1257_v38 = vsel %vm5853_vm2, %v1252_v21, %v1256_v28  ;;  %v1708_v20 = vshll.u32 %v7147_v26, 16  ;;  %v1946_v10 = vrot.slane %v6824_v0, 5 }
 0x103   : > { %v5048_v15 = vpop.f32.mrb[5].mxu0  ;;  %v5120_v8 = vpop.f32.mrb[5].mxu1  ;;  %3730 = vmatprep.mubr.bf16.mxu0 %v4742_v9  ;;  %v1682_v34 = vrot.slane %v1681_v3, 4  ;;  %v1694_v32 = vrot.slane %v1692_v43, 5  ;;  %v4632_v1 = vrot.slane %v4616_v23, 9  ;;  %v1960_v57 = vrot.slane %v6897_v61, 5 }
 0x104   : > { %v5050_v24 = vpop.f32.mrb[6].mxu0  ;;  %v5122_v49 = vpop.f32.mrb[6].mxu1  ;;  %v7133_v31 = vadd.f32 %v5048_v15, %v5047_v48  ;;  %v7135_v5 = vadd.f32 %v5120_v8, %v5119_v40  ;;  %v1677_v2 = vsel %vm5853_vm2, %v1672_v60, %v1676_v47  ;;  %v1689_v48 = vshrl.u32 %v7129_v11, 16  ;;  %v7163_v8 = vld [vmem:[%s5810_s10 + $0x84] sm:$0xf] }
 0x105   : > { %v5051_v19 = vpop.f32.mrb[7].mxu0  ;;  %v5123_v29 = vpop.f32.mrb[7].mxu1  ;;  %v1687_v18 = vsel %vm5853_vm2, %v1682_v34, %v1686_v46  ;;  %v1261_v15 = vor.u32 %v1260_v33, %v1256_v28  ;;  %v1700_v47 = vrot.slane %v1698_v13, 5  ;;  %v4631_v40 = vrot.slane %v4615_v41, 9  ;;  %v7190_v23 = vld [vmem:[%s5810_s10 + $0x8c] sm:$0x1] }
 0x106   : > { %v7140_v62 = vadd.f32 %v5051_v19, %v5050_v24  ;;  %v7144_v14 = vadd.f32 %v5123_v29, %v5122_v49  ;;  %v4766_v37 = vcombine.low %v1677_v2, %v1687_v18  ;;  %v1691_v53 = vrot.slane %v1689_v48, 4 }
 0x107   : > { %v1702_v24 = vshrl.u32 %v7138_v44, 16  ;;  %v1262_v9 = vrot.slane %v1261_v15, 4  ;;  %v1949_v46 = vrot.slane %v6827_v12, 5  ;;  %v1710_v54 = vrot.slane %v1708_v20, 5  ;;  %v7180_v15 = vld [vmem:[%s5810_s10 + $0x88] sm:$0xf] }
 0x108   : > { %3827 = vmatprep.mubr.bf16.mxu1 %v4766_v37  ;;  %v1695_v19 = vor.u32 %v1694_v32, %v1691_v53  ;;  %v4751_v33 = vcombine.low %v7129_v11, %v7138_v44  ;;  %v1947_v0 = vsel %vm6051_vm5, %v4631_v40, %v1946_v10  ;;  %v1948_v28 = vrot.slane %v1946_v10, 4 }
 0x109   : > { %v1704_v58 = vrot.slane %v1702_v24, 4  ;;  %v1267_v3 = vsel %vm5853_vm2, %v1262_v9, %v1266_v55  ;;  %3828 = vmatmul.mubr.bf16.gmra.mrb[108].mxu1 %v4750_v17  ;;  %v1953_v2 = vrot.slane %v6859_v6, 5  ;;  %v1713_v11 = vshrl.u32 %v7163_v8, 16 }
 0x10a   : > { %v5053_v21 = vpop.f32.mrb[8].mxu0  ;;  %v4726_v60 = vcombine.low %v1257_v38, %v1267_v3  ;;  %v1696_v29 = vrot.slane %v1695_v19, 4  ;;  %v5125_v48 = vpop.f32.mrb[8].mxu1  ;;  %v1716_v6 = vshll.u32 %v7163_v8, 16  ;;  %v1950_v13 = vsel %vm6051_vm5, %v1948_v28, %v1949_v46 }
 0x10b   : > { %v5054_v49 = vpop.f32.mrb[9].mxu0  ;;  %v1705_v34 = vor.u32 %v1704_v58, %v1700_v47  ;;  %v5126_v18 = vpop.f32.mrb[9].mxu1  ;;  %v1954_v37 = vsel %vm6051_vm5, %v4632_v1, %v1953_v2  ;;  %v1955_v53 = vrot.slane %v1953_v2, 4  ;;  %v1715_v40 = vrot.slane %v1713_v11, 4  ;;  %v4617_v58 = vld [vmem:[%s5810_s10 + $0x30] sm:$0xe] }
 0x10c   : > { %v5056_v12 = vpop.f32.mrb[10].mxu0  ;;  %v7172_v17 = vadd.f32 %v5054_v49, %v5053_v21  ;;  %3731 = vmatmul.mubr.bf16.gmra.mrb[108].mxu0 %v4726_v60  ;;  %v1701_v43 = vsel %vm5853_vm2, %v1696_v29, %v1700_v47  ;;  %v7187_v32 = vadd.f32 %v5126_v18, %v5125_v48  ;;  %v5128_v24 = vpop.f32.mrb[10].mxu1  ;;  %v4775_v47 = vcombine.low %v1947_v0, %v1950_v13  ;;  %v4618_v29 = vld [vmem:[%s5810_s10 + $0x3c] sm:$0xe]  ;;  %v7213_v13 = vld [vmem:[%s5810_s10 + $0x90] sm:$0xf] }
 0x10d   : > { %v5057_v55 = vpop.f32.mrb[11].mxu0  ;;  %v1706_v41 = vrot.slane %v1705_v34, 4  ;;  %v5129_v20 = vpop.f32.mrb[11].mxu1  ;;  %v1718_v19 = vrot.slane %v1716_v6, 5  ;;  %v1957_v46 = vsel %vm6051_vm5, %v1955_v53, %v1956_v4  ;;  %v1722_v3 = vshll.u32 %v7180_v15, 16 }
 0x10e   : > { %v7177_v38 = vadd.f32 %v5057_v55, %v5056_v12  ;;  %v7199_v21 = vadd.f32 %v5129_v20, %v5128_v24  ;;  %5513 = vmatprep.mubr.bf16.mxu0 %v4775_v47  ;;  %v4776_v1 = vcombine.low %v1954_v37, %v1957_v46  ;;  %v1732_v60 = vshll.u32 %v7190_v23, 16  ;;  %v7221_v24 = vld [vmem:[%s5810_s10 + $0x94] sm:$0xf] }
 0x10f   : > { %v1711_v9 = vsel %vm5853_vm2, %v1706_v41, %v1710_v54  ;;  %v1719_v49 = vor.u32 %v1718_v19, %v1715_v40  ;;  %v1726_v54 = vshrl.u32 %v7180_v15, 16  ;;  %v1724_v34 = vrot.slane %v1722_v3, 5 }
 0x110   : > { %v4767_v10 = vcombine.low %v1701_v43, %v1711_v9  ;;  %v4633_v0 = vrot.slane %v4617_v58, 9  ;;  %v1963_v4 = vrot.slane %v6909_v51, 5  ;;  %v1734_v48 = vrot.slane %v1732_v60, 5 }
 0x111   : > { %v1720_v28 = vrot.slane %v1719_v49, 4  ;;  %v1728_v2 = vrot.slane %v1726_v54, 4  ;;  %v4752_v55 = vcombine.low %v7163_v8, %v7180_v15  ;;  %v1962_v41 = vrot.slane %v1960_v57, 4 }
 0x112   : > { %3835 = vmatprep.mubr.bf16.mxu1 %v4767_v10  ;;  %v1961_v43 = vsel %vm6051_vm5, %v4633_v0, %v1960_v57  ;;  %v4634_v18 = vrot.slane %v4618_v29, 9  ;;  %v1967_v6 = vrot.slane %v6936_v59, 5  ;;  %v1970_v37 = vrot.slane %v6944_v63, 5  ;;  %v7230_v63 = vld [vmem:[%s5810_s10 + $0x98] sm:$0x1] }
 0x113   : > { %v5059_v12 = vpop.f32.mrb[12].mxu0  ;;  %3836 = vmatmul.mubr.bf16.gmra.mrb[112].mxu1 %v4751_v33  ;;  %v1725_v51 = vsel %vm5853_vm2, %v1720_v28, %v1724_v34  ;;  %v1729_v33 = vor.u32 %v1728_v2, %v1724_v34  ;;  %v1964_v9 = vsel %vm6051_vm5, %v1962_v41, %v1963_v4  ;;  %v1737_v46 = vshrl.u32 %v7213_v13, 16  ;;  %v4619_v34 = vld [vmem:[%s5810_s10 + $0x48] sm:$0xe]  ;;  %v4620_v2 = vld [vmem:[%s5810_s10 + $0x54] sm:$0xe] }
 0x114   : > { %v5060_v11 = vpop.f32.mrb[13].mxu0  ;;  %5514 = vmatmul.mubr.bf16.vlgmr.msra.gmra.mrb[112].mxu0 %v4776_v1  ;;  %v1968_v59 = vsel %vm6051_vm5, %v4634_v18, %v1967_v6  ;;  %v1969_v47 = vrot.slane %v1967_v6, 4  ;;  %v4777_v58 = vcombine.low %v1961_v43, %v1964_v9  ;;  %v1740_v3 = vshll.u32 %v7213_v13, 16 }
 0x115   : > { %v5062_v61 = vpop.f32.mrb[14].mxu0  ;;  %v7218_v8 = vadd.f32 %v5060_v11, %v5059_v12  ;;  %v5131_v20 = vpop.f32.mrb[12].mxu1  ;;  %v1730_v19 = vrot.slane %v1729_v33, 4  ;;  %v1746_v60 = vshll.u32 %v7221_v24, 16  ;;  %v1750_v29 = vshrl.u32 %v7221_v24, 16 }
 0x116   : > { %v5063_v53 = vpop.f32.mrb[15].mxu0  ;;  %v5132_v10 = vpop.f32.mrb[13].mxu1  ;;  %v1971_v1 = vsel %vm6051_vm5, %v1969_v47, %v1970_v37  ;;  %5517 = vmatprep.mubr.bf16.mxu0 %v4777_v58  ;;  %v1739_v12 = vrot.slane %v1737_v46, 4  ;;  %v1742_v28 = vrot.slane %v1740_v3, 5  ;;  %v4635_v33 = vrot.slane %v4619_v34, 9 }
 0x117   : > { %v7227_v40 = vadd.f32 %v5063_v53, %v5062_v61  ;;  %v7236_v49 = vadd.f32 %v5132_v10, %v5131_v20  ;;  %v5134_v54 = vpop.f32.mrb[14].mxu1  ;;  %v1735_v0 = vsel %vm5853_vm2, %v1730_v19, %v1734_v48  ;;  %v4778_v57 = vcombine.low %v1968_v59, %v1971_v1  ;;  %v7249_v53 = vld [vmem:[%s5810_s10 + $0x9c] sm:$0xf] }
 0x118   : > { %v5135_v4 = vpop.f32.mrb[15].mxu1  ;;  %v4768_v11 = vcombine.low %v1725_v51, %v1735_v0  ;;  %v1748_v41 = vrot.slane %v1746_v60, 5  ;;  %v1752_v18 = vrot.slane %v1750_v29, 4  ;;  %v1743_v6 = vor.u32 %v1742_v28, %v1739_v12  ;;  %v7266_v0 = vld [vmem:[%s5810_s10 + $0xa0] sm:$0xf] }
 0x119   : > { %v7244_v43 = vadd.f32 %v5135_v4, %v5134_v54  ;;  %v1756_v61 = vshll.u32 %v7230_v63, 16  ;;  %v1974_v37 = vrot.slane %v6975_v39, 5  ;;  %v1977_v9 = vrot.slane %v6986_v16, 5 }
 0x11a   : > { %3843 = vmatprep.mubr.bf16.mxu1 %v4768_v11  ;;  %v1753_v48 = vor.u32 %v1752_v18, %v1748_v41  ;;  %v4753_v59 = vcombine.low %v7213_v13, %v7221_v24  ;;  %v4636_v51 = vrot.slane %v4620_v2, 9  ;;  %v1744_v47 = vrot.slane %v1743_v6, 4  ;;  %v7274_v11 = vld [vmem:[%s5810_s10 + $0xa4] sm:$0x1] }
 0x11b   : > { %3844 = vmatmul.mubr.bf16.gmra.mrb[116].mxu1 %v4752_v55  ;;  %v1758_v20 = vrot.slane %v1756_v61, 5  ;;  %v1975_v19 = vsel %vm6051_vm5, %v4635_v33, %v1974_v37  ;;  %v1976_v58 = vrot.slane %v1974_v37, 4  ;;  %v1981_v46 = vrot.slane %v7013_v7, 5  ;;  %v4621_v37 = vld [vmem:[%s5810_s10 + $0x60] sm:$0xe] }
 0x11c   : > { %5518 = vmatmul.mubr.bf16.gmra.mrb[116].mxu0 %v4778_v57  ;;  %v5065_v39 = vpop.f32.mrb[16].mxu0  ;;  %v1754_v10 = vrot.slane %v1753_v48, 4  ;;  %v1984_v3 = vrot.slane %v7020_v45, 5  ;;  %v1761_v13 = vshrl.u32 %v7249_v53, 16  ;;  %v1749_v55 = vsel %vm5853_vm2, %v1744_v47, %v1748_v41 }
 0x11d   : > { %v5153_v16 = vpop.f32.mrb[16].mxu1  ;;  %v5066_v1 = vpop.f32.mrb[17].mxu0  ;;  %v1978_v54 = vsel %vm6051_vm5, %v1976_v58, %v1977_v9  ;;  %v1764_v7 = vshll.u32 %v7249_v53, 16  ;;  %v1982_v4 = vsel %vm6051_vm5, %v4636_v51, %v1981_v46  ;;  %v1983_v12 = vrot.slane %v1981_v46, 4 }
 0x11e   : > { %v7263_v60 = vadd.f32 %v5066_v1, %v5065_v39  ;;  %v5154_v29 = vpop.f32.mrb[17].mxu1  ;;  %v5068_v34 = vpop.f32.mrb[18].mxu0  ;;  %v1759_v45 = vsel %vm5853_vm2, %v1754_v10, %v1758_v20  ;;  %v4779_v57 = vcombine.low %v1975_v19, %v1978_v54  ;;  %v1763_v33 = vrot.slane %v1761_v13, 4  ;;  %v4622_v10 = vld [vmem:[%s5810_s10 + $0x6c] sm:$0xe] }
 0x11f   : > { %v5156_v28 = vpop.f32.mrb[18].mxu1  ;;  %v5069_v2 = vpop.f32.mrb[19].mxu0  ;;  %v4769_v41 = vcombine.low %v1749_v55, %v1759_v45  ;;  %v5155_v18 = vadd.f32 %v5154_v29, %v5153_v16  ;;  %v1985_v48 = vsel %vm6051_vm5, %v1983_v12, %v1984_v3  ;;  %v1766_v47 = vrot.slane %v1764_v7, 5  ;;  %v7294_v29 = vld [vmem:[%s5810_s10 + $0xa8] sm:$0xf] }
 0x120   : > { %v7276_v6 = vadd.f32 %v5069_v2, %v5068_v34  ;;  %v5157_v61 = vpop.f32.mrb[19].mxu1  ;;  %5521 = vmatprep.mubr.bf16.mxu0 %v4779_v57  ;;  %v1770_v51 = vshll.u32 %v7266_v0, 16  ;;  %v4780_v20 = vcombine.low %v1982_v4, %v1985_v48  ;;  %v1774_v58 = vshrl.u32 %v7266_v0, 16 }
 0x121   : > { %v5158_v9 = vadd.f32 %v5157_v61, %v5156_v28  ;;  %3851 = vmatprep.mubr.bf16.mxu1 %v4769_v41  ;;  %v7283_v19 = vadd.f32 %v5155_v18, %v7088_v36  ;;  %v1780_v39 = vshll.u32 %v7274_v11, 16  ;;  %v1767_v16 = vor.u32 %v1766_v47, %v1763_v33 }
 0x122   : > { %v1772_v3 = vrot.slane %v1770_v51, 5  ;;  %v4637_v1 = vrot.slane %v4621_v37, 9  ;;  %v1776_v13 = vrot.slane %v1774_v58, 4  ;;  %v1988_v54 = vrot.slane %v7052_v42, 5  ;;  %v7311_v51 = vld [vmem:[%s5810_s10 + $0xac] sm:$0xf] }
 0x123   : > { %v7289_v46 = vadd.f32 %v5158_v9, %v7095_v50  ;;  %3852 = vmatmul.mubr.bf16.gmra.mrb[120].mxu1 %v4753_v59  ;;  %v1782_v55 = vrot.slane %v1780_v39, 5  ;;  %v1991_v36 = vrot.slane %v7063_v25, 5  ;;  %v1768_v34 = vrot.slane %v1767_v16, 4 }
 0x124   : > { %5522 = vmatmul.mubr.bf16.gmra.mrb[120].mxu0 %v4780_v20  ;;  %v4754_v7 = vcombine.low %v7249_v53, %v7266_v0  ;;  %v4638_v45 = vrot.slane %v4622_v10, 9  ;;  %v1995_v50 = vrot.slane %v7102_v56, 5  ;;  %v5071_v57 = vpop.f32.mrb[20].mxu0  ;;  %v1777_v12 = vor.u32 %v1776_v13, %v1772_v3 }
 0x125   : > { %v5159_v4 = vpop.f32.mrb[20].mxu1  ;;  %v1989_v59 = vsel %vm6051_vm5, %v4637_v1, %v1988_v54  ;;  %v1990_v28 = vrot.slane %v1988_v54, 4  ;;  %v1998_v42 = vrot.slane %v7109_v22, 5  ;;  %v5072_v25 = vpop.f32.mrb[21].mxu0  ;;  %v1773_v41 = vsel %vm5853_vm2, %v1768_v34, %v1772_v3  ;;  %v7319_v3 = vld [vmem:[%s5810_s10 + $0xb0] sm:$0x1] }
 0x126   : > { %v5160_v2 = vpop.f32.mrb[21].mxu1  ;;  %v1996_v53 = vsel %vm6051_vm5, %v4638_v45, %v1995_v50  ;;  %v1997_v56 = vrot.slane %v1995_v50, 4  ;;  %v7306_v18 = vadd.f32 %v5072_v25, %v5071_v57  ;;  %v5074_v61 = vpop.f32.mrb[22].mxu0  ;;  %v1778_v37 = vrot.slane %v1777_v12, 4  ;;  %v4623_v1 = vld [vmem:[%s5810_s10 + $0x78] sm:$0xe] }
 0x127   : > { %v5162_v33 = vpop.f32.mrb[22].mxu1  ;;  %v1992_v48 = vsel %vm6051_vm5, %v1990_v28, %v1991_v36  ;;  %v5161_v22 = vadd.f32 %v5160_v2, %v5159_v4  ;;  %v5075_v9 = vpop.f32.mrb[23].mxu0  ;;  %v1785_v20 = vshrl.u32 %v7294_v29, 16  ;;  %v1788_v57 = vshll.u32 %v7294_v29, 16 }
 0x128   : > { %v5163_v47 = vpop.f32.mrb[23].mxu1  ;;  %v4781_v58 = vcombine.low %v1989_v59, %v1992_v48  ;;  %v1999_v39 = vsel %vm6051_vm5, %v1997_v56, %v1998_v42  ;;  %v7316_v10 = vadd.f32 %v5075_v9, %v5074_v61  ;;  %v1783_v13 = vsel %vm5853_vm2, %v1778_v37, %v1782_v55 }
 0x129   : > { %v5164_v16 = vadd.f32 %v5163_v47, %v5162_v33  ;;  %v4782_v54 = vcombine.low %v1996_v53, %v1999_v39  ;;  %v7325_v36 = vadd.f32 %v5161_v22, %v7133_v31  ;;  %v1787_v34 = vrot.slane %v1785_v20, 4  ;;  %v4624_v31 = vld [vmem:[%s5810_s10 + $0x84] sm:$0xe] }
 0x12a   : > { %v4770_v45 = vcombine.low %v1773_v41, %v1783_v13  ;;  %5525 = vmatprep.mubr.bf16.mxu0 %v4781_v58  ;;  %v1794_v4 = vshll.u32 %v7311_v51, 16  ;;  %v1798_v12 = vshrl.u32 %v7311_v51, 16  ;;  %v1804_v59 = vshll.u32 %v7319_v3, 16 }
 0x12b   : > { %v7328_v50 = vadd.f32 %v5164_v16, %v7140_v62  ;;  %v4639_v55 = vrot.slane %v4623_v1, 9  ;;  %v2002_v28 = vrot.slane %v7138_v44, 5  ;;  %v1790_v42 = vrot.slane %v1788_v57, 5 }
 0x12c   : > { %5526 = vmatmul.mubr.bf16.gmra.mrb[124].mxu0 %v4782_v54  ;;  %3859 = vmatprep.mubr.bf16.mxu1 %v4770_v45  ;;  %v1796_v25 = vrot.slane %v1794_v4, 5  ;;  %v2005_v2 = vrot.slane %v7147_v26, 5  ;;  %v4755_v62 = vcombine.low %v7294_v29, %v7311_v51  ;;  %v5077_v41 = vpop.f32.mrb[24].mxu0  ;;  %v1800_v56 = vrot.slane %v1798_v12, 4  ;;  %v7348_v45 = vld [vmem:[%s5810_s10 + $0xb4] sm:$0xf] }
 0x12d   : > { %v5165_v53 = vpop.f32.mrb[24].mxu1  ;;  %3860 = vmatmul.mubr.bf16.gmra.mrb[124].mxu1 %v4754_v7  ;;  %v1806_v61 = vrot.slane %v1804_v59, 5  ;;  %v2003_v33 = vsel %vm6051_vm5, %v4639_v55, %v2002_v28  ;;  %v2004_v37 = vrot.slane %v2002_v28, 4  ;;  %v5078_v44 = vpop.f32.mrb[25].mxu0  ;;  %v1791_v22 = vor.u32 %v1790_v42, %v1787_v34  ;;  %v7353_v4 = vld [vmem:[%s5810_s10 + $0xb8] sm:$0xf] }
 0x12e   : > { %v5166_v48 = vpop.f32.mrb[25].mxu1  ;;  %v4640_v9 = vrot.slane %v4624_v31, 9  ;;  %v2009_v26 = vrot.slane %v7180_v15, 5  ;;  %v2012_v47 = vrot.slane %v7190_v23, 5  ;;  %v5080_v20 = vpop.f32.mrb[26].mxu0  ;;  %v1801_v39 = vor.u32 %v1800_v56, %v1796_v25 }
 0x12f   : > { %v5168_v58 = vpop.f32.mrb[26].mxu1  ;;  %v2006_v7 = vsel %vm6051_vm5, %v2004_v37, %v2005_v2  ;;  %v7345_v16 = vadd.f32 %v5078_v44, %v5077_v41  ;;  %v5167_v1 = vadd.f32 %v5166_v48, %v5165_v53  ;;  %v5081_v13 = vpop.f32.mrb[27].mxu0  ;;  %v1792_v34 = vrot.slane %v1791_v22, 4  ;;  %v7365_v2 = vld [vmem:[%s5810_s10 + $0xbc] sm:$0x1] }
 0x130   : > { %v5169_v54 = vpop.f32.mrb[27].mxu1  ;;  %v4783_v57 = vcombine.low %v2003_v33, %v2006_v7  ;;  %v2010_v15 = vsel %vm6051_vm5, %v4640_v9, %v2009_v26  ;;  %v2011_v23 = vrot.slane %v2009_v26, 4  ;;  %v1802_v12 = vrot.slane %v1801_v39, 4  ;;  %v4625_v56 = vld [vmem:[%s5810_s10 + $0x90] sm:$0xe] }
 0x131   : > { %v7356_v59 = vadd.f32 %v5167_v1, %v7172_v17  ;;  %v7358_v55 = vadd.f32 %v5081_v13, %v5080_v20  ;;  %v5170_v28 = vadd.f32 %v5169_v54, %v5168_v58  ;;  %v1797_v31 = vsel %vm5853_vm2, %v1792_v34, %v1796_v25  ;;  %v4626_v44 = vld [vmem:[%s5810_s10 + $0x9c] sm:$0xe] }
 0x132   : > { %5529 = vmatprep.mubr.bf16.mxu0 %v4783_v57  ;;  %v2013_v42 = vsel %vm6051_vm5, %v2011_v23, %v2012_v47  ;;  %v1809_v41 = vshrl.u32 %v7348_v45, 16  ;;  %v1812_v53 = vshll.u32 %v7348_v45, 16  ;;  %v1807_v17 = vsel %vm5853_vm2, %v1802_v12, %v1806_v61 }
 0x133   : > { %v4784_v33 = vcombine.low %v2010_v15, %v2013_v42  ;;  %v7373_v37 = vadd.f32 %v5170_v28, %v7177_v38  ;;  %v1818_v25 = vshll.u32 %v7353_v4, 16  ;;  %v4771_v48 = vcombine.low %v1797_v31, %v1807_v17  ;;  %v7391_v17 = vld [vmem:[%s5810_s10 + $0xc0] sm:$0xf] }
 0x134   : > { %v1811_v22 = vrot.slane %v1809_v41, 4  ;;  %v1814_v9 = vrot.slane %v1812_v53, 5  ;;  %v1822_v26 = vshrl.u32 %v7353_v4, 16  ;;  %v5083_v47 = vpop.f32.mrb[28].mxu0  ;;  %v1828_v39 = vshll.u32 %v7365_v2, 16 }
 0x135   : > { %v5171_v20 = vpop.f32.mrb[28].mxu1  ;;  %5530 = vmatmul.mubr.bf16.gmra.mrb[128].mxu0 %v4784_v33  ;;  %v1820_v58 = vrot.slane %v1818_v25, 5  ;;  %v4641_v7 = vrot.slane %v4625_v56, 9  ;;  %v2016_v61 = vrot.slane %v7221_v24, 5  ;;  %v5084_v1 = vpop.f32.mrb[29].mxu0  ;;  %3867 = vmatprep.mubr.bf16.mxu1 %v4771_v48  ;;  %v2019_v34 = vrot.slane %v7230_v63, 5 }
 0x136   : > { %v5172_v38 = vpop.f32.mrb[29].mxu1  ;;  %v1815_v13 = vor.u32 %v1814_v9, %v1811_v22  ;;  %v1824_v54 = vrot.slane %v1822_v26, 4  ;;  %v4756_v57 = vcombine.low %v7348_v45, %v7353_v4  ;;  %v5086_v15 = vpop.f32.mrb[30].mxu0  ;;  %3868 = vmatmul.mubr.bf16.gmra.mrb[128].mxu1 %v4755_v62  ;;  %v1830_v12 = vrot.slane %v1828_v39, 5  ;;  %v7410_v39 = vld [vmem:[%s5810_s10 + $0xc8] sm:$0x1] }
 0x137   : > { %v5174_v23 = vpop.f32.mrb[30].mxu1  ;;  %v2017_v24 = vsel %vm6051_vm5, %v4641_v7, %v2016_v61  ;;  %v2018_v28 = vrot.slane %v2016_v61, 4  ;;  %v4642_v31 = vrot.slane %v4626_v44, 9  ;;  %v5087_v42 = vpop.f32.mrb[31].mxu0  ;;  %v2023_v45 = vrot.slane %v7266_v0, 5 }
 0x138   : > { %v5175_v41 = vpop.f32.mrb[31].mxu1  ;;  %v1816_v53 = vrot.slane %v1815_v13, 4  ;;  %v1825_v63 = vor.u32 %v1824_v54, %v1820_v58  ;;  %v2026_v56 = vrot.slane %v7274_v11, 5  ;;  %v7395_v62 = vadd.f32 %v5084_v1, %v5083_v47  ;;  %v7400_v44 = vld [vmem:[%s5810_s10 + $0xc4] sm:$0xf] }
 0x139   : > { %v2020_v29 = vsel %vm6051_vm5, %v2018_v28, %v2019_v34  ;;  %v5173_v33 = vadd.f32 %v5172_v38, %v5171_v20  ;;  %v7397_v25 = vadd.f32 %v5087_v42, %v5086_v15  ;;  %v2024_v11 = vsel %vm6051_vm5, %v4642_v31, %v2023_v45  ;;  %v4627_v7 = vld [vmem:[%s5810_s10 + $0xa8] sm:$0xe] }
 0x13a   : > { %v1821_v48 = vsel %vm5853_vm2, %v1816_v53, %v1820_v58  ;;  %v1826_v22 = vrot.slane %v1825_v63, 4  ;;  %v4785_v0 = vcombine.low %v2017_v24, %v2020_v29  ;;  %v2025_v9 = vrot.slane %v2023_v45, 4  ;;  %v4628_v24 = vld [vmem:[%s5810_s10 + $0xb4] sm:$0xe] }
 0x13b   : > { %v7407_v26 = vadd.f32 %v5173_v33, %v7218_v8  ;;  %v5176_v47 = vadd.f32 %v5175_v41, %v5174_v23  ;;  %v1833_v20 = vshrl.u32 %v7391_v17, 16  ;;  %v1836_v58 = vshll.u32 %v7391_v17, 16 }
 0x13c   : > { %v1831_v61 = vsel %vm5853_vm2, %v1826_v22, %v1830_v12  ;;  %5533 = vmatprep.mubr.bf16.mxu0 %v4785_v0  ;;  %v1842_v1 = vshll.u32 %v7400_v44, 16  ;;  %v1846_v38 = vshrl.u32 %v7400_v44, 16  ;;  %v5089_v13 = vpop.f32.mrb[32].mxu0  ;;  %v2027_v34 = vsel %vm6051_vm5, %v2025_v9, %v2026_v56 }
 0x13d   : > { %v5177_v8 = vpop.f32.mrb[32].mxu1  ;;  %v4772_v54 = vcombine.low %v1821_v48, %v1831_v61  ;;  %v7422_v15 = vadd.f32 %v5176_v47, %v7227_v40  ;;  %v1835_v23 = vrot.slane %v1833_v20, 4  ;;  %v5090_v28 = vpop.f32.mrb[33].mxu0  ;;  %v4786_v31 = vcombine.low %v2024_v11, %v2027_v34 }
 0x13e   : > { %v5178_v12 = vpop.f32.mrb[33].mxu1  ;;  %v1838_v42 = vrot.slane %v1836_v58, 5  ;;  %v1844_v41 = vrot.slane %v1842_v1, 5  ;;  %v1848_v53 = vrot.slane %v1846_v38, 4  ;;  %v5092_v63 = vpop.f32.mrb[34].mxu0  ;;  %v1852_v29 = vshll.u32 %v7410_v39, 16 }
 0x13f   : > { %v5180_v45 = vpop.f32.mrb[34].mxu1  ;;  %3875 = vmatprep.mubr.bf16.mxu1 %v4772_v54  ;;  %v4643_v33 = vrot.slane %v4627_v7, 9  ;;  %v2030_v48 = vrot.slane %v7311_v51, 5  ;;  %v2033_v56 = vrot.slane %v7319_v3, 5  ;;  %v5093_v40 = vpop.f32.mrb[35].mxu0  ;;  %5534 = vmatmul.mubr.bf16.gmra.mrb[132].mxu0 %v4786_v31  ;;  %v4757_v9 = vcombine.low %v7391_v17, %v7400_v44 }
 0x140   : > { %v5181_v22 = vpop.f32.mrb[35].mxu1  ;;  %3876 = vmatmul.mubr.bf16.gmra.mrb[132].mxu1 %v4756_v57  ;;  %v1839_v0 = vor.u32 %v1838_v42, %v1835_v23  ;;  %v1849_v11 = vor.u32 %v1848_v53, %v1844_v41  ;;  %v4644_v47 = vrot.slane %v4628_v24, 9  ;;  %v1854_v20 = vrot.slane %v1852_v29, 5  ;;  %v7441_v23 = vld [vmem:[%s5810_s10 + $0xcc] sm:$0xf] }
 0x141   : > { %v2031_v7 = vsel %vm6051_vm5, %v4643_v33, %v2030_v48  ;;  %v2032_v61 = vrot.slane %v2030_v48, 4  ;;  %v2037_v51 = vrot.slane %v7353_v4, 5  ;;  %v2040_v58 = vrot.slane %v7365_v2, 5  ;;  %v7444_v24 = vld [vmem:[%s5810_s10 + $0xd0] sm:$0xf] }
 0x142   : > { %v1840_v3 = vrot.slane %v1839_v0, 4  ;;  %v1850_v57 = vrot.slane %v1849_v11, 4  ;;  %v7434_v1 = vadd.f32 %v5090_v28, %v5089_v13  ;;  %v5179_v34 = vadd.f32 %v5178_v12, %v5177_v8  ;;  %v7453_v31 = vld [vmem:[%s5810_s10 + $0xd4] sm:$0x1]  ;;  %v4629_v42 = vld [vmem:[%s5810_s10 + $0xc0] sm:$0xe] }
 0x143   : > { %v2034_v38 = vsel %vm6051_vm5, %v2032_v61, %v2033_v56  ;;  %v2038_v17 = vsel %vm6051_vm5, %v4644_v47, %v2037_v51  ;;  %v2039_v54 = vrot.slane %v2037_v51, 4  ;;  %v7450_v28 = vadd.f32 %v5093_v40, %v5092_v63 }
 0x144   : > { %v1845_v4 = vsel %vm5853_vm2, %v1840_v3, %v1844_v41  ;;  %v1855_v2 = vsel %vm5853_vm2, %v1850_v57, %v1854_v20  ;;  %v4787_v13 = vcombine.low %v2031_v7, %v2034_v38  ;;  %v5095_v53 = vpop.f32.mrb[36].mxu0  ;;  %v7459_v12 = vadd.f32 %v5179_v34, %v7263_v60  ;;  %v4630_v41 = vld [vmem:[%s5810_s10 + $0xcc] sm:$0xe]  ;;  %s4470_s10 = sshll.u32 %s7822_s12, 3 }
 0x145   : > { %v5183_v29 = vpop.f32.mrb[36].mxu1  ;;  %v4773_v33 = vcombine.low %v1845_v4, %v1855_v2  ;;  %v2041_v8 = vsel %vm6051_vm5, %v2039_v54, %v2040_v58  ;;  %v5182_v48 = vadd.f32 %v5181_v22, %v5180_v45  ;;  %v5096_v56 = vpop.f32.mrb[37].mxu0  ;;  %v1857_v63 = vshrl.u32 %v7441_v23, 16  ;;  %s7651_s6 = scalar_lea.vmem %s7803_s3, %s4470_s10 }
 0x146   : > { %v5184_v0 = vpop.f32.mrb[37].mxu1  ;;  %5537 = vmatprep.mubr.bf16.mxu0 %v4787_v13  ;;  %v4788_v11 = vcombine.low %v2038_v17, %v2041_v8  ;;  %v1860_v40 = vshll.u32 %v7441_v23, 16  ;;  %v1866_v47 = vshll.u32 %v7444_v24, 16  ;;  %v5098_v20 = vpop.f32.mrb[38].mxu0  ;;  %v1870_v60 = vshrl.u32 %v7444_v24, 16 }
 0x147   : > { %v5186_v7 = vpop.f32.mrb[38].mxu1  ;;  %3883 = vmatprep.mubr.bf16.mxu1 %v4773_v33  ;;  %v7466_v61 = vadd.f32 %v5182_v48, %v7276_v6  ;;  %v1876_v45 = vshll.u32 %v7453_v31, 16  ;;  %v4645_v22 = vrot.slane %v4629_v42, 9  ;;  %v5099_v51 = vpop.f32.mrb[39].mxu0  ;;  %v1859_v57 = vrot.slane %v1857_v63, 4 }
 0x148   : > { %v5187_v3 = vpop.f32.mrb[39].mxu1  ;;  %3884 = vmatmul.mubr.bf16.gmra.mrb[136].mxu1 %v4757_v9  ;;  %5538 = vmatmul.mubr.bf16.gmra.mrb[136].mxu0 %v4788_v11  ;;  %v1862_v58 = vrot.slane %v1860_v40, 5  ;;  %v1868_v38 = vrot.slane %v1866_v47, 5  ;;  %v2044_v17 = vrot.slane %v7400_v44, 5  ;;  %v1872_v54 = vrot.slane %v1870_v60, 4 }
 0x149   : > { %v1878_v34 = vrot.slane %v1876_v45, 5  ;;  %v2047_v4 = vrot.slane %v7410_v39, 5  ;;  %v4646_v33 = vrot.slane %v4630_v41, 9  ;;  %v2051_v8 = vrot.slane %v7444_v24, 5 }
 0x14a   : > { %v1863_v6 = vor.u32 %v1862_v58, %v1859_v57  ;;  %v2045_v2 = vsel %vm6051_vm5, %v4645_v22, %v2044_v17  ;;  %v2046_v13 = vrot.slane %v2044_v17, 4  ;;  %v1873_v42 = vor.u32 %v1872_v54, %v1868_v38 }
 0x14b   : > { %v2054_v9 = vrot.slane %v7453_v31, 5  ;;  %v7476_v48 = vadd.f32 %v5096_v56, %v5095_v53  ;;  %v5185_v63 = vadd.f32 %v5184_v0, %v5183_v29  ;;  %v7480_v40 = vadd.f32 %v5099_v51, %v5098_v20 }
 0x14c   : > { %v1864_v11 = vrot.slane %v1863_v6, 4  ;;  %v2048_v44 = vsel %vm6051_vm5, %v2046_v13, %v2047_v4  ;;  %v5101_v39 = vpop.f32.mrb[40].mxu0  ;;  %v1874_v60 = vrot.slane %v1873_v42, 4  ;;  %v2052_v41 = vsel %vm6051_vm5, %v4646_v33, %v2051_v8 }
 0x14d   : > { %v5189_v47 = vpop.f32.mrb[40].mxu1  ;;  %v4789_v45 = vcombine.low %v2045_v2, %v2048_v44  ;;  %v2053_v22 = vrot.slane %v2051_v8, 4  ;;  %v5102_v57 = vpop.f32.mrb[41].mxu0  ;;  %v7487_v53 = vadd.f32 %v5185_v63, %v7306_v18  ;;  %v5188_v56 = vadd.f32 %v5187_v3, %v5186_v7 }
 0x14e   : > { %v5190_v58 = vpop.f32.mrb[41].mxu1  ;;  %v1869_v31 = vsel %vm5853_vm2, %v1864_v11, %v1868_v38  ;;  %v7489_v29 = vadd.f32 %v5102_v57, %v5101_v39  ;;  %v5104_v0 = vpop.f32.mrb[42].mxu0  ;;  %v1879_v51 = vsel %vm5853_vm2, %v1874_v60, %v1878_v34  ;;  %v4758_v17 = vcombine.low %v7441_v23, %v7444_v24 }
 0x14f   : > { %v5192_v20 = vpop.f32.mrb[42].mxu1  ;;  %5541 = vmatprep.mubr.bf16.mxu0 %v4789_v45  ;;  %v2055_v54 = vsel %vm6051_vm5, %v2053_v22, %v2054_v9  ;;  %v5191_v4 = vadd.f32 %v5190_v58, %v5189_v47  ;;  %v5105_v38 = vpop.f32.mrb[43].mxu0  ;;  %v4774_v18 = vcombine.low %v1869_v31, %v1879_v51  ;;  %v7498_v7 = vadd.f32 %v5188_v56, %v7316_v10 }
 0x150   : > { %v5193_v6 = vpop.f32.mrb[43].mxu1  ;;  %v4790_v2 = vcombine.low %v2052_v41, %v2055_v54  ;;  %v7500_v3 = vadd.f32 %v5105_v38, %v5104_v0 }
 0x151   : > { %v7503_v35 = vadd.f32 %v5191_v4, %v7345_v16  ;;  %v5194_v34 = vadd.f32 %v5193_v6, %v5192_v20  ;;  %3891 = vmatprep.mubr.bf16.mxu1 %v4774_v18 }
 0x152   : > { %5542 = vmatmul.mubr.bf16.gmra.mrb[140].mxu0 %v4790_v2  ;;  %3892 = vmatmul.mubr.bf16.gmra.mrb[140].mxu1 %v4758_v17 }
 0x153   : > { %v7506_v27 = vadd.f32 %v5194_v34, %v7358_v55 }
 0x154   : > { %v5107_v23 = vpop.f32.mrb[44].mxu0 }
 0x155   : > { %v5195_v24 = vpop.f32.mrb[44].mxu1  ;;  %v5108_v13 = vpop.f32.mrb[45].mxu0 }
 0x156   : > { %v5196_v33 = vpop.f32.mrb[45].mxu1  ;;  %v7508_v42 = vadd.f32 %v5108_v13, %v5107_v23  ;;  %v5110_v8 = vpop.f32.mrb[46].mxu0 }
 0x157   : > { %v5197_v10 = vadd.f32 %v5196_v33, %v5195_v24  ;;  %v5198_v9 = vpop.f32.mrb[46].mxu1  ;;  %v5111_v11 = vpop.f32.mrb[47].mxu0 }
 0x158   : > { %v5199_v44 = vpop.f32.mrb[47].mxu1  ;;  %v7513_v63 = vadd.f32 %v5111_v11, %v5110_v8 }
 0x159   : > { %v7511_v16 = vadd.f32 %v5197_v10, %v7395_v62  ;;  %v5200_v39 = vadd.f32 %v5199_v44, %v5198_v9 }
 0x15b   : > { %v7516_v55 = vadd.f32 %v5200_v39, %v7397_v25 }
 0x15c   : > { %v5265_v60 = vpop.f32.mrb[48].mxu0 }
 0x15d   : > { %v5201_v47 = vpop.f32.mrb[48].mxu1  ;;  %v5266_v41 = vpop.f32.mrb[49].mxu0 }
 0x15e   : > { %v5202_v45 = vpop.f32.mrb[49].mxu1  ;;  %v5267_v57 = vadd.f32 %v5266_v41, %v5265_v60  ;;  %v5268_v31 = vpop.f32.mrb[50].mxu0 }
 0x15f   : > { %v5203_v22 = vadd.f32 %v5202_v45, %v5201_v47  ;;  %v5204_v58 = vpop.f32.mrb[50].mxu1  ;;  %v5269_v0 = vpop.f32.mrb[51].mxu0 }
 0x160   : > { %v5205_v56 = vpop.f32.mrb[51].mxu1  ;;  %v7522_v62 = vadd.f32 %v5267_v57, %v7283_v19  ;;  %v5270_v17 = vadd.f32 %v5269_v0, %v5268_v31 }
 0x161   : > { %v7519_v20 = vadd.f32 %v5203_v22, %v7434_v1  ;;  %v5206_v51 = vadd.f32 %v5205_v56, %v5204_v58 }
 0x162   : > { %v7528_v54 = vadd.f32 %v5270_v17, %v7289_v46 }
 0x163   : > { %v7525_v25 = vadd.f32 %v5206_v51, %v7450_v28 }
 0x164   : > { %v5271_v38 = vpop.f32.mrb[52].mxu0 }
 0x165   : > { %v5207_v4 = vpop.f32.mrb[52].mxu1  ;;  %v5272_v18 = vpop.f32.mrb[53].mxu0 }
 0x166   : > { %v5208_v6 = vpop.f32.mrb[53].mxu1  ;;  %v5273_v34 = vadd.f32 %v5272_v18, %v5271_v38  ;;  %v5274_v1 = vpop.f32.mrb[54].mxu0 }
 0x167   : > { %v5209_v2 = vadd.f32 %v5208_v6, %v5207_v4  ;;  %v5210_v23 = vpop.f32.mrb[54].mxu1  ;;  %v5275_v13 = vpop.f32.mrb[55].mxu0 }
 0x168   : > { %v5211_v24 = vpop.f32.mrb[55].mxu1  ;;  %v7534_v33 = vadd.f32 %v5273_v34, %v7325_v36  ;;  %v5276_v10 = vadd.f32 %v5275_v13, %v5274_v1 }
 0x169   : > { %v7531_v19 = vadd.f32 %v5209_v2, %v7476_v48  ;;  %v5212_v28 = vadd.f32 %v5211_v24, %v5210_v23 }
 0x16a   : > { %v7540_v8 = vadd.f32 %v5276_v10, %v7328_v50 }
 0x16b   : > { %v7537_v46 = vadd.f32 %v5212_v28, %v7480_v40 }
 0x16c   : > { %v5277_v11 = vpop.f32.mrb[56].mxu0 }
 0x16d   : > { %v5213_v9 = vpop.f32.mrb[56].mxu1  ;;  %v5278_v39 = vpop.f32.mrb[57].mxu0 }
 0x16e   : > { %v5214_v44 = vpop.f32.mrb[57].mxu1  ;;  %v5279_v60 = vadd.f32 %v5278_v39, %v5277_v11  ;;  %v5280_v48 = vpop.f32.mrb[58].mxu0 }
 0x16f   : > { %v5215_v47 = vadd.f32 %v5214_v44, %v5213_v9  ;;  %v5216_v45 = vpop.f32.mrb[58].mxu1  ;;  %v5281_v22 = vpop.f32.mrb[59].mxu0 }
 0x170   : > { %v5217_v41 = vpop.f32.mrb[59].mxu1  ;;  %v7546_v57 = vadd.f32 %v5279_v60, %v7356_v59  ;;  %v5282_v58 = vadd.f32 %v5281_v22, %v5280_v48 }
 0x171   : > { %v7543_v36 = vadd.f32 %v5215_v47, %v7489_v29  ;;  %v5218_v40 = vadd.f32 %v5217_v41, %v5216_v45 }
 0x172   : > { %v7552_v31 = vadd.f32 %v5282_v58, %v7373_v37 }
 0x173   : > { %v7549_v50 = vadd.f32 %v5218_v40, %v7500_v3 }
 0x174   : > { %v5283_v0 = vpop.f32.mrb[60].mxu0 }
 0x175   : > { %v5219_v56 = vpop.f32.mrb[60].mxu1  ;;  %v5284_v17 = vpop.f32.mrb[61].mxu0 }
 0x176   : > { %v5220_v51 = vpop.f32.mrb[61].mxu1  ;;  %v5285_v38 = vadd.f32 %v5284_v17, %v5283_v0  ;;  %v5286_v29 = vpop.f32.mrb[62].mxu0 }
 0x177   : > { %v5221_v4 = vadd.f32 %v5220_v51, %v5219_v56  ;;  %v5222_v6 = vpop.f32.mrb[62].mxu1  ;;  %v5287_v2 = vpop.f32.mrb[63].mxu0 }
 0x178   : > { %v5223_v18 = vpop.f32.mrb[63].mxu1  ;;  %v7558_v34 = vadd.f32 %v5285_v38, %v7407_v26  ;;  %v5288_v23 = vadd.f32 %v5287_v2, %v5286_v29 }
 0x179   : > { %v7555_v59 = vadd.f32 %v5221_v4, %v7508_v42  ;;  %v5224_v3 = vadd.f32 %v5223_v18, %v5222_v6 }
 0x17a   : > { %v7564_v1 = vadd.f32 %v5288_v23, %v7422_v15 }
 0x17b   : > { %v7561_v37 = vadd.f32 %v5224_v3, %v7513_v63 }
 0x17c   : > { %v5289_v13 = vpop.f32.mrb[64].mxu0 }
 0x17d   : > { %v5225_v24 = vpop.f32.mrb[64].mxu1  ;;  %v5290_v10 = vpop.f32.mrb[65].mxu0 }
 0x17e   : > { %v5226_v28 = vpop.f32.mrb[65].mxu1  ;;  %v5291_v11 = vadd.f32 %v5290_v10, %v5289_v13  ;;  %v5292_v42 = vpop.f32.mrb[66].mxu0 }
 0x17f   : > { %v5227_v9 = vadd.f32 %v5226_v28, %v5225_v24  ;;  %v5228_v44 = vpop.f32.mrb[66].mxu1  ;;  %v5293_v47 = vpop.f32.mrb[67].mxu0 }
 0x180   : > { %v5229_v39 = vpop.f32.mrb[67].mxu1  ;;  %v7570_v60 = vadd.f32 %v5291_v11, %v7459_v12  ;;  %v5294_v45 = vadd.f32 %v5293_v47, %v5292_v42 }
 0x181   : > { %v7567_v26 = vadd.f32 %v5227_v9, %v7090_v52  ;;  %v5230_v63 = vadd.f32 %v5229_v39, %v5228_v44 }
 0x182   : > { %v7576_v48 = vadd.f32 %v5294_v45, %v7466_v61 }
 0x183   : > { %v7573_v15 = vadd.f32 %v5230_v63, %v7097_v30 }
 0x184   : > { %v5295_v22 = vpop.f32.mrb[68].mxu0 }
 0x185   : > { %v5231_v41 = vpop.f32.mrb[68].mxu1  ;;  %v5296_v58 = vpop.f32.mrb[69].mxu0 }
 0x186   : > { %v5232_v40 = vpop.f32.mrb[69].mxu1  ;;  %v5297_v0 = vadd.f32 %v5296_v58, %v5295_v22  ;;  %v5298_v52 = vpop.f32.mrb[70].mxu0 }
 0x187   : > { %v5233_v56 = vadd.f32 %v5232_v40, %v5231_v41  ;;  %v5234_v51 = vpop.f32.mrb[70].mxu1  ;;  %v5299_v4 = vpop.f32.mrb[71].mxu0 }
 0x188   : > { %v5235_v17 = vpop.f32.mrb[71].mxu1  ;;  %v7582_v38 = vadd.f32 %v5297_v0, %v7487_v53  ;;  %v5300_v6 = vadd.f32 %v5299_v4, %v5298_v52 }
 0x189   : > { %v7579_v12 = vadd.f32 %v5233_v56, %v7135_v5  ;;  %v5236_v30 = vadd.f32 %v5235_v17, %v5234_v51 }
 0x18a   : > { %v7588_v29 = vadd.f32 %v5300_v6, %v7498_v7 }
 0x18b   : > { %v7585_v61 = vadd.f32 %v5236_v30, %v7144_v14 }
 0x18c   : > { %v5301_v2 = vpop.f32.mrb[72].mxu0 }
 0x18d   : > { %v5237_v18 = vpop.f32.mrb[72].mxu1  ;;  %v5302_v23 = vpop.f32.mrb[73].mxu0 }
 0x18e   : > { %v5238_v3 = vpop.f32.mrb[73].mxu1  ;;  %v5303_v13 = vadd.f32 %v5302_v23, %v5301_v2  ;;  %v5304_v5 = vpop.f32.mrb[74].mxu0 }
 0x18f   : > { %v5239_v24 = vadd.f32 %v5238_v3, %v5237_v18  ;;  %v5240_v28 = vpop.f32.mrb[74].mxu1  ;;  %v5305_v9 = vpop.f32.mrb[75].mxu0 }
 0x190   : > { %v5241_v10 = vpop.f32.mrb[75].mxu1  ;;  %v7594_v11 = vadd.f32 %v5303_v13, %v7503_v35  ;;  %v5306_v44 = vadd.f32 %v5305_v9, %v5304_v5 }
 0x191   : > { %v7591_v53 = vadd.f32 %v5239_v24, %v7187_v32  ;;  %v5242_v14 = vadd.f32 %v5241_v10, %v5240_v28 }
 0x192   : > { %v7600_v42 = vadd.f32 %v5306_v44, %v7506_v27 }
 0x193   : > { %v7597_v7 = vadd.f32 %v5242_v14, %v7199_v21 }
 0x194   : > { %v5307_v47 = vpop.f32.mrb[76].mxu0 }
 0x195   : > { %v5243_v39 = vpop.f32.mrb[76].mxu1  ;;  %v5308_v45 = vpop.f32.mrb[77].mxu0 }
 0x196   : > { %v5244_v63 = vpop.f32.mrb[77].mxu1  ;;  %v5309_v22 = vadd.f32 %v5308_v45, %v5307_v47  ;;  %v5310_v32 = vpop.f32.mrb[78].mxu0 }
 0x197   : > { %v5245_v41 = vadd.f32 %v5244_v63, %v5243_v39  ;;  %v5246_v40 = vpop.f32.mrb[78].mxu1  ;;  %v5311_v56 = vpop.f32.mrb[79].mxu0 }
 0x198   : > { %v5247_v58 = vpop.f32.mrb[79].mxu1  ;;  %v7606_v0 = vadd.f32 %v5309_v22, %v7511_v16  ;;  %v5312_v51 = vadd.f32 %v5311_v56, %v5310_v32 }
 0x199   : > { %v7603_v35 = vadd.f32 %v5245_v41, %v7236_v49  ;;  %v5248_v21 = vadd.f32 %v5247_v58, %v5246_v40 }
 0x19a   : > { %v7612_v52 = vadd.f32 %v5312_v51, %v7516_v55 }
 0x19b   : > { %v7609_v27 = vadd.f32 %v5248_v21, %v7244_v43 }
 0x19c   : > { %v5313_v17 = vpop.f32.mrb[80].mxu0 }
 0x19d   : > { %v5377_v4 = vpop.f32.mrb[80].mxu1  ;;  %v5314_v30 = vpop.f32.mrb[81].mxu0 }
 0x19e   : > { %v5378_v6 = vpop.f32.mrb[81].mxu1  ;;  %v5315_v18 = vadd.f32 %v5314_v30, %v5313_v17  ;;  %v5316_v3 = vpop.f32.mrb[82].mxu0 }
 0x19f   : > { %v5379_v2 = vadd.f32 %v5378_v6, %v5377_v4  ;;  %v5380_v49 = vpop.f32.mrb[82].mxu1  ;;  %v5317_v23 = vpop.f32.mrb[83].mxu0 }
 0x1a0   : > { %v5381_v24 = vpop.f32.mrb[83].mxu1  ;;  %v7615_v16 = vadd.f32 %v5315_v18, %v7519_v20  ;;  %v5318_v13 = vadd.f32 %v5317_v23, %v5316_v3 }
 0x1a1   : > { %v5382_v28 = vadd.f32 %v5381_v24, %v5380_v49  ;;  %v7618_v43 = vadd.f32 %v5379_v2, %v7522_v62 }
 0x1a2   : > { %v7621_v55 = vadd.f32 %v5318_v13, %v7525_v25 }
 0x1a3   : > { %v7624_v5 = vadd.f32 %v5382_v28, %v7528_v54 }
 0x1a4   : > { %v5319_v10 = vpop.f32.mrb[84].mxu0 }
 0x1a5   : > { %v5383_v9 = vpop.f32.mrb[84].mxu1  ;;  %v5320_v14 = vpop.f32.mrb[85].mxu0 }
 0x1a6   : > { %v5384_v44 = vpop.f32.mrb[85].mxu1  ;;  %v5321_v39 = vadd.f32 %v5320_v14, %v5319_v10  ;;  %v5322_v63 = vpop.f32.mrb[86].mxu0 }
 0x1a7   : > { %v5385_v47 = vadd.f32 %v5384_v44, %v5383_v9  ;;  %v5386_v20 = vpop.f32.mrb[86].mxu1  ;;  %v5323_v45 = vpop.f32.mrb[87].mxu0 }
 0x1a8   : > { %v5387_v41 = vpop.f32.mrb[87].mxu1  ;;  %v7627_v22 = vadd.f32 %v5321_v39, %v7531_v19  ;;  %v5324_v62 = vadd.f32 %v5323_v45, %v5322_v63 }
 0x1a9   : > { %v5388_v40 = vadd.f32 %v5387_v41, %v5386_v20  ;;  %v7630_v25 = vadd.f32 %v5385_v47, %v7534_v33 }
 0x1aa   : > { %v7633_v54 = vadd.f32 %v5324_v62, %v7537_v46 }
 0x1ab   : > { %v7636_v32 = vadd.f32 %v5388_v40, %v7540_v8 }
 0x1ad   : > { %v5389_v58 = vpop.f32.mrb[88].mxu1 }
 0x1ae   : > { %v5390_v56 = vpop.f32.mrb[89].mxu1  ;;  %v5325_v21 = vpop.f32.mrb[88].mxu0 }
 0x1af   : > { %v5391_v51 = vadd.f32 %v5390_v56, %v5389_v58  ;;  %v5392_v17 = vpop.f32.mrb[90].mxu1  ;;  %v5326_v4 = vpop.f32.mrb[89].mxu0 }
 0x1b0   : > { %v5393_v19 = vpop.f32.mrb[91].mxu1  ;;  %v5327_v30 = vadd.f32 %v5326_v4, %v5325_v21  ;;  %v5328_v6 = vpop.f32.mrb[90].mxu0 }
 0x1b1   : > { %v5394_v18 = vadd.f32 %v5393_v19, %v5392_v17  ;;  %v7639_v33 = vadd.f32 %v5391_v51, %v7546_v57  ;;  %v5329_v2 = vpop.f32.mrb[91].mxu0  ;;  %v5738_v57 = vmov 0.0  }
 0x1b2   : > { %v7642_v46 = vadd.f32 %v5327_v30, %v7543_v36  ;;  %v5330_v8 = vadd.f32 %v5329_v2, %v5328_v6  ;;  %4221 = vst [vmem:[%s7651_s6] sm:$0xff] %v5738_v57 }
 0x1b3   : > { %v7645_v3 = vadd.f32 %v5394_v18, %v7552_v31 }
 0x1b4   : > { %v7654_v49 = vadd.f32 %v5330_v8, %v7549_v50 }
 0x1b5   : > { %v5395_v23 = vpop.f32.mrb[92].mxu1 }
 0x1b6   : > { %v5396_v24 = vpop.f32.mrb[93].mxu1 }
 0x1b7   : > { %v5397_v13 = vadd.f32 %v5396_v24, %v5395_v23  ;;  %v5398_v28 = vpop.f32.mrb[94].mxu1 }
 0x1b8   : > { %v5331_v36 = vpop.f32.mrb[92].mxu0  ;;  %v5399_v31 = vpop.f32.mrb[95].mxu1 }
 0x1b9   : > { %v5332_v10 = vpop.f32.mrb[93].mxu0  ;;  %v5400_v44 = vadd.f32 %v5399_v31, %v5398_v28  ;;  %v7658_v39 = vadd.f32 %v5397_v13, %v7558_v34 }
 0x1ba   : > { %v5333_v9 = vadd.f32 %v5332_v10, %v5331_v36  ;;  %v5334_v14 = vpop.f32.mrb[94].mxu0 }
 0x1bb   : > { %v5335_v47 = vpop.f32.mrb[95].mxu0  ;;  %v7664_v20 = vadd.f32 %v5400_v44, %v7564_v1 }
 0x1bc   : > { %v7661_v63 = vadd.f32 %v5333_v9, %v7555_v59  ;;  %v5336_v50 = vadd.f32 %v5335_v47, %v5334_v14 }
 0x1be   : > { %v7667_v45 = vadd.f32 %v5336_v50, %v7561_v37  ;;  %v5401_v41 = vpop.f32.mrb[96].mxu1 }
 0x1bf   : > { %v5402_v62 = vpop.f32.mrb[97].mxu1 }
 0x1c0   : > { %v5337_v40 = vpop.f32.mrb[96].mxu0  ;;  %v5403_v58 = vadd.f32 %v5402_v62, %v5401_v41  ;;  %v5404_v56 = vpop.f32.mrb[98].mxu1 }
 0x1c1   : > { %v5338_v21 = vpop.f32.mrb[97].mxu0  ;;  %v5405_v51 = vpop.f32.mrb[99].mxu1 }
 0x1c2   : > { %v5339_v34 = vadd.f32 %v5338_v21, %v5337_v40  ;;  %v5340_v17 = vpop.f32.mrb[98].mxu0  ;;  %v5406_v4 = vadd.f32 %v5405_v51, %v5404_v56  ;;  %v7670_v59 = vadd.f32 %v5403_v58, %v7570_v60 }
 0x1c3   : > { %v5341_v19 = vpop.f32.mrb[99].mxu0 }
 0x1c4   : > { %v7673_v1 = vadd.f32 %v5339_v34, %v7567_v26  ;;  %v5342_v30 = vadd.f32 %v5341_v19, %v5340_v17  ;;  %v7676_v37 = vadd.f32 %v5406_v4, %v7576_v48 }
 0x1c6   : > { %v7679_v6 = vadd.f32 %v5342_v30, %v7573_v15 }
 0x1c8   : > { %v5407_v18 = vpop.f32.mrb[100].mxu1 }
 0x1c9   : > { %v5408_v2 = vpop.f32.mrb[101].mxu1 }
 0x1ca   : > { %v5343_v8 = vpop.f32.mrb[100].mxu0  ;;  %v5409_v57 = vadd.f32 %v5408_v2, %v5407_v18  ;;  %v5410_v23 = vpop.f32.mrb[102].mxu1 }
 0x1cb   : > { %v5344_v24 = vpop.f32.mrb[101].mxu0  ;;  %v5411_v36 = vpop.f32.mrb[103].mxu1 }
 0x1cc   : > { %v5345_v60 = vadd.f32 %v5344_v24, %v5343_v8  ;;  %v5346_v13 = vpop.f32.mrb[102].mxu0  ;;  %v5412_v28 = vadd.f32 %v5411_v36, %v5410_v23  ;;  %v7682_v26 = vadd.f32 %v5409_v57, %v7582_v38 }
 0x1cd   : > { %v5347_v10 = vpop.f32.mrb[103].mxu0 }
 0x1ce   : > { %v7685_v48 = vadd.f32 %v5345_v60, %v7579_v12  ;;  %v5348_v31 = vadd.f32 %v5347_v10, %v5346_v13  ;;  %v7688_v15 = vadd.f32 %v5412_v28, %v7588_v29 }
 0x1d0   : > { %v7691_v9 = vadd.f32 %v5348_v31, %v7585_v61 }
 0x1d1   : > { %v5413_v14 = vpop.f32.mrb[104].mxu1 }
 0x1d2   : > { %v5414_v44 = vpop.f32.mrb[105].mxu1 }
 0x1d3   : > { %v5415_v47 = vadd.f32 %v5414_v44, %v5413_v14  ;;  %v5416_v50 = vpop.f32.mrb[106].mxu1 }
 0x1d4   : > { %v5417_v62 = vpop.f32.mrb[107].mxu1 }
 0x1d5   : > { %v5349_v41 = vpop.f32.mrb[104].mxu0  ;;  %v5418_v38 = vadd.f32 %v5417_v62, %v5416_v50  ;;  %v7694_v58 = vadd.f32 %v5415_v47, %v7594_v11 }
 0x1d6   : > { %v5350_v40 = vpop.f32.mrb[105].mxu0 }
 0x1d7   : > { %v5351_v12 = vadd.f32 %v5350_v40, %v5349_v41  ;;  %v5352_v56 = vpop.f32.mrb[106].mxu0  ;;  %v7697_v29 = vadd.f32 %v5418_v38, %v7600_v42 }
 0x1d8   : > { %v5353_v21 = vpop.f32.mrb[107].mxu0 }
 0x1d9   : > { %v7700_v61 = vadd.f32 %v5351_v12, %v7591_v53  ;;  %v5354_v51 = vadd.f32 %v5353_v21, %v5352_v56 }
 0x1db   : > { %v7703_v34 = vadd.f32 %v5354_v51, %v7597_v7 }
 0x1dc   : > { %v5419_v17 = vpop.f32.mrb[108].mxu1 }
 0x1dd   : > { %v5420_v4 = vpop.f32.mrb[109].mxu1 }
 0x1de   : > { %v5421_v19 = vadd.f32 %v5420_v4, %v5419_v17  ;;  %v5422_v30 = vpop.f32.mrb[110].mxu1 }
 0x1df   : > { %v5355_v18 = vpop.f32.mrb[108].mxu0  ;;  %v5423_v11 = vpop.f32.mrb[111].mxu1 }
 0x1e0   : > { %v5356_v2 = vpop.f32.mrb[109].mxu0  ;;  %v5424_v8 = vadd.f32 %v5423_v11, %v5422_v30  ;;  %v7706_v57 = vadd.f32 %v5421_v19, %v7606_v0 }
 0x1e1   : > { %v5357_v42 = vadd.f32 %v5356_v2, %v5355_v18  ;;  %v5358_v23 = vpop.f32.mrb[110].mxu0 }
 0x1e2   : > { %v5359_v53 = vpop.f32.mrb[111].mxu0  ;;  %v7709_v24 = vadd.f32 %v5424_v8, %v7612_v52 }
 0x1e3   : > { %v7712_v7 = vadd.f32 %v5357_v42, %v7603_v35  ;;  %v5360_v36 = vadd.f32 %v5359_v53, %v5358_v23 }
 0x1e5   : > { %v7715_v60 = vadd.f32 %v5360_v36, %v7609_v27 }
 0x1e6   : > { %v5425_v13 = vpop.f32.mrb[112].mxu1 }
 0x1e7   : > { %v5426_v28 = vpop.f32.mrb[113].mxu1  ;;  %v5515_v10 = vpop.f32.mrb[112].mxu0 }
 0x1e8   : > { %v5427_v31 = vadd.f32 %v5426_v28, %v5425_v13  ;;  %v5428_v14 = vpop.f32.mrb[114].mxu1  ;;  %v3943_v0 = vadd.f32 %v5515_v10, %v7630_v25  ;;  %v3934_v44 = vpop.f32.mrb[113].mxu0 }
 0x1e9   : > { %v5429_v47 = vpop.f32.mrb[115].mxu1  ;;  %v3935_v52 = vadd.f32 %v3934_v44, %v7618_v43  ;;  %v5516_v50 = vpop.f32.mrb[114].mxu0 }
 0x1ea   : > { %v5430_v41 = vadd.f32 %v5429_v47, %v5428_v14  ;;  %v7721_v35 = vadd.f32 %v5427_v31, %v7615_v16  ;;  %v3946_v27 = vadd.f32 %v5516_v50, %v7636_v32  ;;  %v3937_v62 = vpop.f32.mrb[115].mxu0  ;;  %v4262_v32 = vmul.f32 %v3943_v0, %v3943_v0 }
 0x1eb   : > { %v3938_v25 = vadd.f32 %v3937_v62, %v7624_v5  ;;  %v4260_v38 = vmul.f32 %v3935_v52, %v3935_v52 }
 0x1ec   : > { %v7731_v40 = vadd.f32 %v5430_v41, %v7621_v55  ;;  %v4938_v43 = vpack.c.bf16 %v3946_v27, %v3943_v0  ;;  %v4263_v19 = vmul.f32 %v3946_v27, %v3946_v27 }
 0x1ed   : > { %v4933_v12 = vpack.c.bf16 %v3938_v25, %v3935_v52  ;;  %v4222_v16 = vadd.f32 %v3938_v25, %v3935_v52  ;;  %v4261_v56 = vmul.f32 %v3938_v25, %v3938_v25 }
 0x1ee   : > { %5010 = vst [vmem:[%s7727_s11 + $0x8] sm:$0xff] %v4938_v43   ;;  %v5431_v17 = vpop.f32.mrb[116].mxu1 }
 0x1ef   : > { %4934 = vst [vmem:[%s7727_s11] sm:$0xff] %v4933_v12   ;;  %v4223_v21 = vadd.f32 %v4222_v16, %v3943_v0  ;;  %v4292_v51 = vadd.f32 %v4261_v56, %v4260_v38  ;;  %v5519_v4 = vpop.f32.mrb[116].mxu0  ;;  %v5432_v18 = vpop.f32.mrb[117].mxu1 }
 0x1f0   : > { %v3959_v30 = vadd.f32 %v5519_v4, %v7658_v39  ;;  %v3950_v5 = vpop.f32.mrb[117].mxu0  ;;  %v5433_v55 = vadd.f32 %v5432_v18, %v5431_v17  ;;  %v5434_v42 = vpop.f32.mrb[118].mxu1 }
 0x1f1   : > { %v4293_v11 = vadd.f32 %v4292_v51, %v4262_v32  ;;  %v3951_v2 = vadd.f32 %v3950_v5, %v7639_v33  ;;  %v4224_v8 = vadd.f32 %v4223_v21, %v3946_v27  ;;  %v5520_v23 = vpop.f32.mrb[118].mxu0  ;;  %v5435_v36 = vpop.f32.mrb[119].mxu1 }
 0x1f2   : > { %v3962_v53 = vadd.f32 %v5520_v23, %v7664_v20  ;;  %v3953_v13 = vpop.f32.mrb[119].mxu0  ;;  %v5436_v14 = vadd.f32 %v5435_v36, %v5434_v42  ;;  %v7740_v44 = vadd.f32 %v5433_v55, %v7627_v22  ;;  %v4266_v62 = vmul.f32 %v3959_v30, %v3959_v30 }
 0x1f3   : > { %v4225_v28 = vadd.f32 %v4224_v8, %v3951_v2  ;;  %v4264_v10 = vmul.f32 %v3951_v2, %v3951_v2  ;;  %v4294_v31 = vadd.f32 %v4293_v11, %v4263_v19  ;;  %v3954_v0 = vadd.f32 %v3953_v13, %v7645_v3 }
 0x1f4   : > { %v4948_v39 = vpack.c.bf16 %v3962_v53, %v3959_v30  ;;  %v7743_v47 = vadd.f32 %v5436_v14, %v7633_v54  ;;  %v4267_v32 = vmul.f32 %v3962_v53, %v3962_v53 }
 0x1f5   : > { %v4295_v33 = vadd.f32 %v4294_v31, %v4264_v10  ;;  %v4943_v52 = vpack.c.bf16 %v3954_v0, %v3951_v2  ;;  %v4226_v20 = vadd.f32 %v4225_v28, %v3954_v0  ;;  %v4265_v50 = vmul.f32 %v3954_v0, %v3954_v0 }
 0x1f6   : > { %5012 = vst [vmem:[%s7727_s11 + $0x18] sm:$0xff] %v4948_v39   ;;  %v5437_v41 = vpop.f32.mrb[120].mxu1 }
 0x1f7   : > { %v5523_v27 = vpop.f32.mrb[120].mxu0  ;;  %5011 = vst [vmem:[%s7727_s11 + $0x10] sm:$0xff] %v4943_v52   ;;  %v4227_v25 = vadd.f32 %v4226_v20, %v3959_v30  ;;  %v4296_v43 = vadd.f32 %v4295_v33, %v4265_v50  ;;  %v5438_v3 = vpop.f32.mrb[121].mxu1 }
 0x1f8   : > { %v3975_v38 = vadd.f32 %v5523_v27, %v7682_v26  ;;  %v3966_v12 = vpop.f32.mrb[121].mxu0  ;;  %v5439_v22 = vadd.f32 %v5438_v3, %v5437_v41  ;;  %v5440_v56 = vpop.f32.mrb[122].mxu1 }
 0x1f9   : > { %v3967_v16 = vadd.f32 %v3966_v12, %v7670_v59  ;;  %v5524_v54 = vpop.f32.mrb[122].mxu0  ;;  %v4297_v21 = vadd.f32 %v4296_v43, %v4266_v62  ;;  %v4228_v51 = vadd.f32 %v4227_v25, %v3962_v53  ;;  %v5441_v4 = vpop.f32.mrb[123].mxu1 }
 0x1fa   : > { %v3978_v17 = vadd.f32 %v5524_v54, %v7688_v15  ;;  %v3969_v19 = vpop.f32.mrb[123].mxu0  ;;  %v5442_v18 = vadd.f32 %v5441_v4, %v5440_v56  ;;  %v7752_v5 = vadd.f32 %v5439_v22, %v7642_v46  ;;  %v4270_v36 = vmul.f32 %v3975_v38, %v3975_v38 }
 0x1fb   : > { %v4268_v30 = vmul.f32 %v3967_v16, %v3967_v16  ;;  %v3970_v26 = vadd.f32 %v3969_v19, %v7676_v37  ;;  %v4229_v11 = vadd.f32 %v4228_v51, %v3967_v16  ;;  %v4298_v59 = vadd.f32 %v4297_v21, %v4267_v32 }
 0x1fc   : > { %v4958_v55 = vpack.c.bf16 %v3978_v17, %v3975_v38  ;;  %v7755_v42 = vadd.f32 %v5442_v18, %v7654_v49  ;;  %v4271_v39 = vmul.f32 %v3978_v17, %v3978_v17 }
 0x1fd   : > { %v4953_v2 = vpack.c.bf16 %v3970_v26, %v3967_v16  ;;  %v4269_v8 = vmul.f32 %v3970_v26, %v3970_v26  ;;  %v4299_v23 = vadd.f32 %v4298_v59, %v4268_v30  ;;  %v4230_v15 = vadd.f32 %v4229_v11, %v3970_v26 }
 0x1fe   : > { %5014 = vst [vmem:[%s7727_s11 + $0x28] sm:$0xff] %v4958_v55  }
 0x1ff   : > { %5013 = vst [vmem:[%s7727_s11 + $0x20] sm:$0xff] %v4953_v2   ;;  %v5527_v53 = vpop.f32.mrb[124].mxu0  ;;  %v4231_v13 = vadd.f32 %v4230_v15, %v3975_v38  ;;  %v4300_v28 = vadd.f32 %v4299_v23, %v4269_v8 }
 0x200   : > { %v3991_v37 = vadd.f32 %v5527_v53, %v7706_v57  ;;  %v3982_v46 = vpop.f32.mrb[125].mxu0  ;;  %v5443_v10 = vpop.f32.mrb[124].mxu1 }
 0x201   : > { %v3983_v31 = vadd.f32 %v3982_v46, %v7694_v58  ;;  %v5528_v14 = vpop.f32.mrb[126].mxu0  ;;  %v4301_v0 = vadd.f32 %v4300_v28, %v4270_v36  ;;  %v5444_v33 = vpop.f32.mrb[125].mxu1  ;;  %v4232_v49 = vadd.f32 %v4231_v13, %v3978_v17 }
 0x202   : > { %v3994_v52 = vadd.f32 %v5528_v14, %v7709_v24  ;;  %v3985_v20 = vpop.f32.mrb[127].mxu0  ;;  %v5445_v50 = vadd.f32 %v5444_v33, %v5443_v10  ;;  %v5446_v27 = vpop.f32.mrb[126].mxu1  ;;  %v4274_v54 = vmul.f32 %v3991_v37, %v3991_v37 }
 0x203   : > { %v4272_v41 = vmul.f32 %v3983_v31, %v3983_v31  ;;  %v3986_v62 = vadd.f32 %v3985_v20, %v7697_v29  ;;  %v4233_v57 = vadd.f32 %v4232_v49, %v3983_v31  ;;  %v4302_v25 = vadd.f32 %v4301_v0, %v4271_v39  ;;  %v5447_v38 = vpop.f32.mrb[127].mxu1 }
 0x204   : > { %v4968_v43 = vpack.c.bf16 %v3994_v52, %v3991_v37  ;;  %v5448_v58 = vadd.f32 %v5447_v38, %v5446_v27  ;;  %v3862_v22 = vadd.f32 %v5445_v50, %v7661_v63  ;;  %v4275_v29 = vmul.f32 %v3994_v52, %v3994_v52 }
 0x205   : > { %v4963_v3 = vpack.c.bf16 %v3986_v62, %v3983_v31  ;;  %v4273_v12 = vmul.f32 %v3986_v62, %v3986_v62  ;;  %v4303_v16 = vadd.f32 %v4302_v25, %v4272_v41  ;;  %v4234_v56 = vadd.f32 %v4233_v57, %v3986_v62 }
 0x206   : > { %5016 = vst [vmem:[%s7727_s11 + $0x38] sm:$0xff] %v4968_v43   ;;  %v3865_v24 = vadd.f32 %v5448_v58, %v7667_v45 }
 0x207   : > { %5015 = vst [vmem:[%s7727_s11 + $0x30] sm:$0xff] %v4963_v3   ;;  %v4235_v32 = vadd.f32 %v4234_v56, %v3991_v37  ;;  %v4304_v21 = vadd.f32 %v4303_v16, %v4273_v12 }
 0x208   : > { %v5531_v51 = vpop.f32.mrb[128].mxu0 }
 0x209   : > { %v4305_v17 = vadd.f32 %v4304_v21, %v4274_v54  ;;  %v4007_v4 = vadd.f32 %v5531_v51, %v7740_v44  ;;  %v3998_v19 = vpop.f32.mrb[129].mxu0  ;;  %v4236_v30 = vadd.f32 %v4235_v32, %v3994_v52  ;;  %v5449_v18 = vpop.f32.mrb[128].mxu1 }
 0x20a   : > { %v3999_v26 = vadd.f32 %v3998_v19, %v7721_v35  ;;  %v5532_v63 = vpop.f32.mrb[130].mxu0  ;;  %v5450_v11 = vpop.f32.mrb[129].mxu1 }
 0x20b   : > { %v4306_v59 = vadd.f32 %v4305_v17, %v4275_v29  ;;  %v4010_v55 = vadd.f32 %v5532_v63, %v7743_v47  ;;  %v4001_v45 = vpop.f32.mrb[131].mxu0  ;;  %v5451_v2 = vadd.f32 %v5450_v11, %v5449_v18  ;;  %v5452_v15 = vpop.f32.mrb[130].mxu1  ;;  %v4278_v14 = vmul.f32 %v4007_v4, %v4007_v4 }
 0x20c   : > { %v4237_v8 = vadd.f32 %v4236_v30, %v3999_v26  ;;  %v4276_v23 = vmul.f32 %v3999_v26, %v3999_v26  ;;  %v4002_v53 = vadd.f32 %v4001_v45, %v7731_v40  ;;  %v5453_v36 = vpop.f32.mrb[131].mxu1 }
 0x20d   : > { %v4978_v44 = vpack.c.bf16 %v4010_v55, %v4007_v4  ;;  %v5454_v28 = vadd.f32 %v5453_v36, %v5452_v15  ;;  %v3870_v10 = vadd.f32 %v5451_v2, %v7673_v1  ;;  %v4279_v33 = vmul.f32 %v4010_v55, %v4010_v55 }
 0x20e   : > { %v4307_v13 = vadd.f32 %v4306_v59, %v4276_v23  ;;  %v4973_v37 = vpack.c.bf16 %v4002_v53, %v3999_v26  ;;  %v4238_v35 = vadd.f32 %v4237_v8, %v4002_v53  ;;  %v4277_v46 = vmul.f32 %v4002_v53, %v4002_v53 }
 0x20f   : > { %5018 = vst [vmem:[%s7727_s11 + $0x48] sm:$0xff] %v4978_v44   ;;  %v3873_v31 = vadd.f32 %v5454_v28, %v7679_v6 }
 0x210   : > { %5017 = vst [vmem:[%s7727_s11 + $0x40] sm:$0xff] %v4973_v37   ;;  %v4239_v47 = vadd.f32 %v4238_v35, %v4007_v4  ;;  %v4308_v39 = vadd.f32 %v4307_v13, %v4277_v46 }
 0x212   : > { %v4240_v0 = vadd.f32 %v4239_v47, %v4010_v55  ;;  %v4309_v49 = vadd.f32 %v4308_v39, %v4278_v14  ;;  %v5535_v52 = vpop.f32.mrb[132].mxu0 }
 0x213   : > { %v5455_v40 = vpop.f32.mrb[132].mxu1  ;;  %v4023_v20 = vadd.f32 %v5535_v52, %v3862_v22  ;;  %v4014_v41 = vpop.f32.mrb[133].mxu0 }
 0x214   : > { %v5456_v50 = vpop.f32.mrb[133].mxu1  ;;  %v4015_v62 = vadd.f32 %v4014_v41, %v7752_v5  ;;  %v4310_v57 = vadd.f32 %v4309_v49, %v4279_v33  ;;  %v5536_v25 = vpop.f32.mrb[134].mxu0 }
 0x215   : > { %v5457_v27 = vadd.f32 %v5456_v50, %v5455_v40  ;;  %v5458_v1 = vpop.f32.mrb[134].mxu1  ;;  %v4026_v43 = vadd.f32 %v5536_v25, %v3865_v24  ;;  %v4017_v38 = vpop.f32.mrb[135].mxu0  ;;  %v4282_v29 = vmul.f32 %v4023_v20, %v4023_v20 }
 0x216   : > { %v5459_v6 = vpop.f32.mrb[135].mxu1  ;;  %v4241_v58 = vadd.f32 %v4240_v0, %v4015_v62  ;;  %v4280_v3 = vmul.f32 %v4015_v62, %v4015_v62  ;;  %v4018_v16 = vadd.f32 %v4017_v38, %v7755_v42 }
 0x217   : > { %v5460_v12 = vadd.f32 %v5459_v6, %v5458_v1  ;;  %v4988_v56 = vpack.c.bf16 %v4026_v43, %v4023_v20  ;;  %v3878_v22 = vadd.f32 %v5457_v27, %v7685_v48  ;;  %v4283_v30 = vmul.f32 %v4026_v43, %v4026_v43 }
 0x218   : > { %v4311_v54 = vadd.f32 %v4310_v57, %v4280_v3  ;;  %v4983_v32 = vpack.c.bf16 %v4018_v16, %v4015_v62  ;;  %v4242_v21 = vadd.f32 %v4241_v58, %v4018_v16  ;;  %v4281_v5 = vmul.f32 %v4018_v16, %v4018_v16 }
 0x219   : > { %5020 = vst [vmem:[%s7727_s11 + $0x58] sm:$0xff] %v4988_v56   ;;  %v3881_v51 = vadd.f32 %v5460_v12, %v7691_v9 }
 0x21a   : > { %5019 = vst [vmem:[%s7727_s11 + $0x50] sm:$0xff] %v4983_v32   ;;  %v4243_v24 = vadd.f32 %v4242_v21, %v4023_v20  ;;  %v4312_v17 = vadd.f32 %v4311_v54, %v4281_v5 }
 0x21b   : > { %v5461_v4 = vpop.f32.mrb[136].mxu1  ;;  %v5539_v19 = vpop.f32.mrb[136].mxu0 }
 0x21c   : > { %v4039_v18 = vadd.f32 %v5539_v19, %v3878_v22  ;;  %v5462_v26 = vpop.f32.mrb[137].mxu1  ;;  %v4030_v42 = vpop.f32.mrb[137].mxu0  ;;  %v4313_v63 = vadd.f32 %v4312_v17, %v4282_v29  ;;  %v4244_v59 = vadd.f32 %v4243_v24, %v4026_v43 }
 0x21d   : > { %v5463_v11 = vadd.f32 %v5462_v26, %v5461_v4  ;;  %v4031_v48 = vadd.f32 %v4030_v42, %v3870_v10  ;;  %v5464_v55 = vpop.f32.mrb[138].mxu1  ;;  %v5540_v45 = vpop.f32.mrb[138].mxu0 }
 0x21e   : > { %v4042_v2 = vadd.f32 %v5540_v45, %v3881_v51  ;;  %v5465_v8 = vpop.f32.mrb[139].mxu1  ;;  %v4033_v9 = vpop.f32.mrb[139].mxu0  ;;  %v4314_v53 = vadd.f32 %v4313_v63, %v4283_v30  ;;  %v4286_v14 = vmul.f32 %v4039_v18, %v4039_v18 }
 0x21f   : > { %v4245_v23 = vadd.f32 %v4244_v59, %v4031_v48  ;;  %v4284_v15 = vmul.f32 %v4031_v48, %v4031_v48  ;;  %v5466_v44 = vadd.f32 %v5465_v8, %v5464_v55  ;;  %v4034_v13 = vadd.f32 %v4033_v9, %v3873_v31 }
 0x220   : > { %v4998_v36 = vpack.c.bf16 %v4042_v2, %v4039_v18  ;;  %v3886_v28 = vadd.f32 %v5463_v11, %v7700_v61  ;;  %v4287_v49 = vmul.f32 %v4042_v2, %v4042_v2 }
 0x221   : > { %v4315_v37 = vadd.f32 %v4314_v53, %v4284_v15  ;;  %v3889_v35 = vadd.f32 %v5466_v44, %v7703_v34  ;;  %v4993_v46 = vpack.c.bf16 %v4034_v13, %v4031_v48  ;;  %v4246_v10 = vadd.f32 %v4245_v23, %v4034_v13 }
 0x222   : > { %5022 = vst [vmem:[%s7727_s11 + $0x68] sm:$0xff] %v4998_v36   ;;  %v4285_v47 = vmul.f32 %v4034_v13, %v4034_v13 }
 0x223   : > { %5021 = vst [vmem:[%s7727_s11 + $0x60] sm:$0xff] %v4993_v46   ;;  %v4247_v39 = vadd.f32 %v4246_v10, %v4039_v18 }
 0x224   : > { %v4316_v0 = vadd.f32 %v4315_v37, %v4285_v47 }
 0x225   : > { %v5543_v33 = vpop.f32.mrb[140].mxu0  ;;  %v5467_v52 = vpop.f32.mrb[140].mxu1  ;;  %v4248_v50 = vadd.f32 %v4247_v39, %v4042_v2 }
 0x226   : > { %v4317_v40 = vadd.f32 %v4316_v0, %v4286_v14  ;;  %v4046_v20 = vpop.f32.mrb[141].mxu0  ;;  %v5468_v31 = vpop.f32.mrb[141].mxu1 }
 0x227   : > { %v4047_v41 = vadd.f32 %v4046_v20, %v3886_v28  ;;  %v5544_v61 = vpop.f32.mrb[142].mxu0  ;;  %v5469_v27 = vadd.f32 %v5468_v31, %v5467_v52  ;;  %v5470_v62 = vpop.f32.mrb[142].mxu1 }
 0x228   : > { %v4318_v34 = vadd.f32 %v4317_v40, %v4287_v49  ;;  %v4049_v57 = vpop.f32.mrb[143].mxu0  ;;  %v5471_v43 = vpop.f32.mrb[143].mxu1 }
 0x229   : > { %v4249_v1 = vadd.f32 %v4248_v50, %v4047_v41  ;;  %v4288_v25 = vmul.f32 %v4047_v41, %v4047_v41  ;;  %v4050_v6 = vadd.f32 %v4049_v57, %v3889_v35  ;;  %v3894_v38 = vadd.f32 %v5469_v27, %v7712_v7 }
 0x22a   : > { %v5472_v58 = vadd.f32 %v5471_v43, %v5470_v62 }
 0x22b   : > { %v4319_v3 = vadd.f32 %v4318_v34, %v4288_v25  ;;  %v5003_v12 = vpack.c.bf16 %v4050_v6, %v4047_v41  ;;  %v4250_v16 = vadd.f32 %v4249_v1, %v4050_v6  ;;  %v4289_v56 = vmul.f32 %v4050_v6, %v4050_v6 }
 0x22c   : > { %v4055_v22 = vadd.f32 %v5543_v33, %v3894_v38  ;;  %v3897_v54 = vadd.f32 %v5472_v58, %v7715_v60 }
 0x22d   : > { %5023 = vst [vmem:[%s7727_s11 + $0x70] sm:$0xff] %v5003_v12   ;;  %v4320_v32 = vadd.f32 %v4319_v3, %v4289_v56 }
 0x22e   : > { %v4290_v21 = vmul.f32 %v4055_v22, %v4055_v22  ;;  %v4058_v5 = vadd.f32 %v5544_v61, %v3897_v54  ;;  %v4251_v51 = vadd.f32 %v4250_v16, %v4055_v22 }
 0x230   : > { %v5008_v29 = vpack.c.bf16 %v4058_v5, %v4055_v22  ;;  %v4291_v24 = vmul.f32 %v4058_v5, %v4058_v5  ;;  %v4252_v17 = vadd.f32 %v4251_v51, %v4058_v5  ;;  %v4321_v4 = vadd.f32 %v4320_v32, %v4290_v21 }
 0x232   : > { %5024 = vst [vmem:[%s7727_s11 + $0x78] sm:$0xff] %v5008_v29   ;;  %v4253_v7 = vrot.slane %v4252_v17, 4  ;;  %v4322_v19 = vadd.f32 %v4321_v4, %v4291_v24 }
 0x234   : > { %v4254_v30 = vadd.f32 %v4253_v7, %v4252_v17  ;;  %v4323_v18 = vrot.slane %v4322_v19, 4 }
 0x236   : > { %v4255_v26 = vrot.slane %v4254_v30, 2  ;;  %v4324_v42 = vadd.f32 %v4323_v18, %v4322_v19 }
 0x238   : > { %v4256_v63 = vadd.f32 %v4255_v26, %v4254_v30  ;;  %v4325_v60 = vrot.slane %v4324_v42, 2 }
 0x23a   : > { %v4257_v11 = vrot.slane %v4256_v63, 1  ;;  %v4326_v48 = vadd.f32 %v4325_v60, %v4324_v42 }
 0x23c   : > { %v4258_v59 = vadd.f32 %v4257_v11, %v4256_v63  ;;  %v4327_v55 = vrot.slane %v4326_v48, 1 }
 0x23e   : > { %4259 = vst [vmem:[%s7651_s6] sm:$0x1] %v4258_v59  ;;  %v4328_v45 = vadd.f32 %v4327_v55, %v4326_v48 }
 0x240   : > { %4329 = vst [vmem:[%s7651_s6 + $0x1] sm:$0x1] %v4328_v45 }
 0x241 PF: > { %s14_s14 = sadd.s32 1, %s5736_s14   ;;  %s7817_s12 = smov %s5732_s13 }
 0x242   : > { %p11_p5 = scmp.ge.s32.totalorder %s14_s14, 4   ;;  %s7818_s13 = smov %s7820_s15 }
 0x244   :  { %13 = sbr.rel (!%p11_p5) target bundleno = 2 (0x2), region = 73 }

</bundles_post_ra>
